<compile_context>
chip_gen: v7x
topology: tpu7x:2x2x1
jax: 0.10.0
libtpu: 0.0.40
codegen_flags: <defaults>
</compile_context>

<pallas_src>
import jax
import jax.numpy as jnp
from jax.experimental import pallas as pl
from jax.experimental.pallas import tpu as pltpu

LEAKY_SLOPE = 0.01
BN_EPS = 1e-5
COMPUTE_DTYPE = jnp.bfloat16   # matmul-operand / inter-layer activation dtype
SUBLANE = 16                   # bf16 sublane-tile granularity for block rows
LANE = 128
CONV_INPUT_BLOCK_BYTES = 4 * 1024 * 1024   # per-buffer input-block budget (v5e-safe)
VMEM_LIMIT_BYTES = 32 * 1024 * 1024        # explicit scoped-VMEM limit (all gens)


# ---------------------------------------------------------------------------
# Pallas kernels
# ---------------------------------------------------------------------------
def conv_bn_lrelu_pool_kernel(x_ref, w_ref, bias_ref, o_ref):
    """Fused 3x3 conv (im2col matmul) + 2x2 max-pool + folded BN + LeakyReLU.

    x_ref:    (4, TM, K) bf16 -- the 4 pool branches (no wrapper transpose);
              branch b's rows for this tile live at x_ref[b].
    w_ref:    (K, TN) bf16, BN scale already folded in (scale > 0).
    bias_ref: (1, TN) f32 folded conv-bias + BN shift.
    o_ref:    (TM, TN) bf16 pooled output rows.

    Bias + LeakyReLU are applied once, after the max: valid because the folded
    BN scale is strictly positive and LeakyReLU is monotone increasing.
    """
    y0 = jnp.dot(x_ref[0], w_ref[...], preferred_element_type=jnp.float32)
    y1 = jnp.dot(x_ref[1], w_ref[...], preferred_element_type=jnp.float32)
    y2 = jnp.dot(x_ref[2], w_ref[...], preferred_element_type=jnp.float32)
    y3 = jnp.dot(x_ref[3], w_ref[...], preferred_element_type=jnp.float32)
    pooled = jnp.maximum(jnp.maximum(y0, y1), jnp.maximum(y2, y3))
    pooled = pooled + bias_ref[...]
    pooled = jnp.where(pooled >= 0.0, pooled, LEAKY_SLOPE * pooled)
    o_ref[...] = pooled.astype(o_ref.dtype)


def fc_fused_kernel(x_ref, w1_ref, b1_ref, w2_ref, b2_ref, w3_ref, b3_ref,
                    o_ref):
    """Fused fc1 + LeakyReLU + (eval-mode dropout) + fc2 + LeakyReLU + fc3.

    Intermediates (TB,512)/(TB,128) stay on-chip; matmuls in bf16 with f32
    accumulation, elementwise in f32.
    """
    def leaky(v):
        return jnp.where(v >= 0.0, v, LEAKY_SLOPE * v)

    h1 = jnp.dot(x_ref[...], w1_ref[...],
                 preferred_element_type=jnp.float32) + b1_ref[...]
    h1 = leaky(h1)
    # Dropout(0.5) in eval mode is the identity.
    h2 = jnp.dot(h1.astype(w2_ref.dtype), w2_ref[...],
                 preferred_element_type=jnp.float32) + b2_ref[...]
    h2 = leaky(h2)
    y = jnp.dot(h2.astype(w3_ref.dtype), w3_ref[...],
                preferred_element_type=jnp.float32) + b3_ref[...]
    o_ref[...] = y.astype(o_ref.dtype)


# ---------------------------------------------------------------------------
# Wrapper glue (padding, patch extraction, pallas_call)
# ---------------------------------------------------------------------------
def _round_up(x, m):
    return (x + m - 1) // m * m


def _pick_tile(m_pad, cap):
    """Largest multiple-of-SUBLANE divisor of m_pad that is <= cap.

    Prefers >= 2 grid steps once the layer is big enough to split (v7x
    megacore).  m_pad must itself be a multiple of SUBLANE.
    """
    cap = max(SUBLANE, min(cap, m_pad if m_pad < 256 else m_pad // 2))
    best = SUBLANE
    t = SUBLANE
    while t <= min(m_pad, cap):
        if m_pad % t == 0:
            best = t
        t += SUBLANE
    return best


def conv_bn_lrelu_pool(x_nhwc, w_col, eff_bias):
    """x_nhwc: (B, H, W, Cin) bf16; w_col: (9*Cin, Cout) bf16 (BN-scaled).

    Returns (B, H/2, W/2, Cout) bf16.
    """
    B, H, W, Cin = x_nhwc.shape
    K, Cout = w_col.shape
    Ho, Wo = H // 2, W // 2
    P = Ho * Wo
    M = B * P                       # batch folded into the matmul M dimension

    # Patch extraction (XLA glue): pad=1; for each 2x2 pool branch (p, q)
    # gather the 9 taps directly from the padded input with stride-2 slices.
    # TODO(synk): move patch extraction in-kernel (haloed NHWC row block + 9
    # shifted (TM,Cin)@(Cin,Cout) accumulating dots) to kill the ~9x im2col
    # HBM read amplification at large batch.
    xp = jnp.pad(x_nhwc, ((0, 0), (1, 1), (1, 1), (0, 0)))
    branches = []
    for p in range(2):
        for q in range(2):
            taps = [xp[:, p + dy::2, q + dx::2, :][:, :Ho, :Wo, :]
                    for dy in range(3) for dx in range(3)]
            branches.append(jnp.concatenate(taps, axis=-1).reshape(M, K))
    x4 = jnp.stack(branches, axis=0)            # (4, M, K), row = b*P + i*Wo + j

    # Pad pooled-position rows so the M tile is a multiple of the sublane tile.
    M_pad = _round_up(M, SUBLANE)
    if M_pad != M:
        x4 = jnp.pad(x4, ((0, 0), (0, M_pad - M), (0, 0)))

    # Row tile bounded so the double-buffered (4, TM, K_lane_padded) bf16
    # input block stays within the per-buffer VMEM budget (v5e-safe).
    k_lane_pad = _round_up(K, LANE)
    tm_cap = max(SUBLANE,
                 (CONV_INPUT_BLOCK_BYTES // (4 * k_lane_pad * 2))
                 // SUBLANE * SUBLANE)
    TM = _pick_tile(M_pad, tm_cap)
    nm = M_pad // TM

    # Split Cout into 128-lane column tiles (conv4: 2) so both v7x cores get
    # work even when nm == 1.  Small-Cout layers keep the full (unpadded) Cout
    # -- no zero-padded matmul columns (they would only inflate FLOPs/bytes).
    TN = LANE if Cout > LANE else Cout
    nn = Cout // TN

    flops = 2 * 4 * M_pad * K * Cout
    bytes_accessed = (4 * M_pad * K + K * Cout + M_pad * Cout) * 2 + 4 * Cout

    out = pl.pallas_call(
        conv_bn_lrelu_pool_kernel,
        out_shape=jax.ShapeDtypeStruct((M_pad, Cout), COMPUTE_DTYPE),
        grid=(nm, nn),
        in_specs=[pl.BlockSpec((4, TM, K), lambda i, j: (0, i, 0)),
                  pl.BlockSpec((K, TN), lambda i, j: (0, j)),
                  pl.BlockSpec((1, TN), lambda i, j: (0, j))],
        out_specs=pl.BlockSpec((TM, TN), lambda i, j: (i, j)),
        compiler_params=pltpu.CompilerParams(
            dimension_semantics=("parallel", "parallel"),
            vmem_limit_bytes=VMEM_LIMIT_BYTES),
        cost_estimate=pl.CostEstimate(flops=flops, transcendentals=0,
                                      bytes_accessed=bytes_accessed),
    )(x4, w_col, eff_bias.reshape(1, Cout))

    return out[:M].reshape(B, Ho, Wo, Cout)


def fc_head(x, w1, b1, w2, b2, w3, b3):
    """x: (B, 2304) bf16 (NHWC flatten order).  Returns (B, 4) f32."""
    B, K1 = x.shape
    N1 = w1.shape[1]
    N2 = w2.shape[1]
    N3 = w3.shape[1]

    # Tile over batch: enables double-buffering of x, bounds VMEM at large B,
    # and lets v7x's second TensorCore participate.  Weights stay pinned.
    B_pad = _round_up(B, SUBLANE)
    if B_pad != B:
        x = jnp.pad(x, ((0, B_pad - B), (0, 0)))
    TB = _pick_tile(B_pad, 256)
    nb = B_pad // TB

    flops = 2 * B_pad * (K1 * N1 + N1 * N2 + N2 * N3)
    bytes_accessed = ((B_pad * K1 + K1 * N1 + N1 * N2 + N2 * N3) * 2
                      + (N1 + N2 + N3 + B_pad * N3) * 4)

    out = pl.pallas_call(
        fc_fused_kernel,
        out_shape=jax.ShapeDtypeStruct((B_pad, N3), jnp.float32),
        grid=(nb,),
        in_specs=[pl.BlockSpec((TB, K1), lambda i: (i, 0)),
                  pl.BlockSpec((K1, N1), lambda i: (0, 0)),
                  pl.BlockSpec((1, N1), lambda i: (0, 0)),
                  pl.BlockSpec((N1, N2), lambda i: (0, 0)),
                  pl.BlockSpec((1, N2), lambda i: (0, 0)),
                  pl.BlockSpec((N2, N3), lambda i: (0, 0)),
                  pl.BlockSpec((1, N3), lambda i: (0, 0))],
        out_specs=pl.BlockSpec((TB, N3), lambda i: (i, 0)),
        compiler_params=pltpu.CompilerParams(
            dimension_semantics=("parallel",),
            vmem_limit_bytes=VMEM_LIMIT_BYTES),
        cost_estimate=pl.CostEstimate(flops=flops, transcendentals=0,
                                      bytes_accessed=bytes_accessed),
    )(x, w1, b1.reshape(1, N1), w2, b2.reshape(1, N2), w3, b3.reshape(1, N3))
    return out[:B]


# ---------------------------------------------------------------------------
# Parameter construction (deterministic, matches nn.Module __init__ shapes)
# ---------------------------------------------------------------------------
def make_params(key):
    params = {}
    conv_shapes = [(32, 1), (64, 32), (128, 64), (256, 128)]   # (Cout, Cin)
    for idx, (cout, cin) in enumerate(conv_shapes, start=1):
        key, kw, kb = jax.random.split(key, 3)
        # PyTorch conv weight (Cout, Cin, 3, 3) -> (3, 3, Cin, Cout) -> (9*Cin, Cout)
        w_pt = jax.random.normal(kw, (cout, cin, 3, 3), jnp.float32) * 0.05
        w_col = jnp.transpose(w_pt, (2, 3, 1, 0)).reshape(9 * cin, cout)
        b_conv = jax.random.normal(kb, (cout,), jnp.float32) * 0.01
        # BatchNorm (eval mode, PyTorch defaults): gamma=1, beta=0, mean=0, var=1.
        gamma = jnp.ones((cout,), jnp.float32)
        beta = jnp.zeros((cout,), jnp.float32)
        run_mean = jnp.zeros((cout,), jnp.float32)
        run_var = jnp.ones((cout,), jnp.float32)
        scale = gamma / jnp.sqrt(run_var + BN_EPS)
        shift = beta - run_mean * scale
        # Fold the (strictly positive) BN scale into the conv weights; the
        # max/affine hoist in the kernel is only valid for scale > 0.  A
        # checkpoint with negative gamma would need per-branch affine instead.
        params[f"conv{idx}_w"] = (w_col * scale[None, :]).astype(COMPUTE_DTYPE)
        params[f"conv{idx}_bias"] = scale * b_conv + shift

    # fc1: build in PyTorch (C,H,W) flatten order, then permute rows ONCE to
    # NHWC (H,W,C) order so the conv4 activation can be flattened directly.
    key, kw, kb = jax.random.split(key, 3)
    w1_pt = jax.random.normal(kw, (256 * 3 * 3, 512), jnp.float32) * 0.02
    perm = (jnp.arange(256 * 3 * 3).reshape(256, 3, 3)   # value = c*9 + h*3 + w
            .transpose(1, 2, 0).reshape(-1))             # indexed by (h, w, c)
    params["fc1_w"] = w1_pt[perm].astype(COMPUTE_DTYPE)
    params["fc1_b"] = jax.random.normal(kb, (512,), jnp.float32) * 0.01

    for idx, (kin, kout) in ((2, (512, 128)), (3, (128, 4))):
        key, kw, kb = jax.random.split(key, 3)
        params[f"fc{idx}_w"] = (jax.random.normal(kw, (kin, kout), jnp.float32)
                                * 0.02).astype(COMPUTE_DTYPE)
        params[f"fc{idx}_b"] = jax.random.normal(kb, (kout,), jnp.float32) * 0.01
    return params


# ---------------------------------------------------------------------------
# Full forward pass
# ---------------------------------------------------------------------------
@jax.jit
def variant2_forward(x_nchw, params):
    B = x_nchw.shape[0]
    # NCHW -> NHWC, activations in bf16 (matmuls accumulate in f32).
    x = jnp.transpose(x_nchw, (0, 2, 3, 1)).astype(COMPUTE_DTYPE)

    for idx in range(1, 5):
        x = conv_bn_lrelu_pool(x,
                               params[f"conv{idx}_w"],
                               params[f"conv{idx}_bias"])

    # NHWC flatten; fc1 weight rows were permuted at build time to match,
    # so no runtime transpose is needed here.
    x = x.reshape(B, 3 * 3 * 256)
    return fc_head(x, params["fc1_w"], params["fc1_b"],
                   params["fc2_w"], params["fc2_b"],
                   params["fc3_w"], params["fc3_b"])


if __name__ == "__main__":
    key = jax.random.PRNGKey(0)
    k_x, k_p = jax.random.split(key)
    # Spatial size 48: 48 -> 24 -> 12 -> 6 -> 3, giving 256*3*3 flat features.
    x = jax.random.normal(k_x, (2, 1, 48, 48), jnp.float32)   # NCHW like PyTorch
    params = make_params(k_p)

    out = variant2_forward(x, params)
    out = jax.block_until_ready(out)
    assert out.shape == (2, 4), out.shape
    print("KERNEL_OK")
</pallas_src>

<mosaic_0001>
module attributes {stable_mosaic.version = 11 : i64} {
  func.func @conv_bn_lrelu_pool_kernel(%arg0: i32, %arg1: i32, %arg2: memref<4x576x9xbf16, #tpu.memory_space<vmem>>, %arg3: memref<9x32xbf16, #tpu.memory_space<vmem>>, %arg4: memref<1x32xf32, #tpu.memory_space<vmem>>, %arg5: memref<576x32xbf16, #tpu.memory_space<vmem>>) attributes {dimension_semantics = [#tpu.dimension_semantics<parallel>, #tpu.dimension_semantics<parallel>], iteration_bounds = array<i64: 2, 1>, scalar_prefetch = 0 : i64, scratch_operands = 0 : i64, tpu.core_type = #tpu.core_type<tc>, window_params = [{transform_indices = @transform_0, window_bounds = array<i64: 4, 576, 9>}, {transform_indices = @transform_1, window_bounds = array<i64: 9, 32>}, {transform_indices = @transform_2, window_bounds = array<i64: 1, 32>}, {transform_indices = @transform_3, window_bounds = array<i64: 576, 32>}]} {
    %c0 = arith.constant 0 : index
    %c0_0 = arith.constant 0 : index
    %c0_1 = arith.constant 0 : index
    %0 = vector.load %arg2[%c0, %c0_0, %c0_1] : memref<4x576x9xbf16, #tpu.memory_space<vmem>>, vector<1x576x9xbf16>
    %1 = vector.shape_cast %0 : vector<1x576x9xbf16> to vector<576x9xbf16>
    %c0_2 = arith.constant 0 : index
    %c0_3 = arith.constant 0 : index
    %2 = vector.load %arg3[%c0_2, %c0_3] : memref<9x32xbf16, #tpu.memory_space<vmem>>, vector<9x32xbf16>
    %cst = arith.constant dense<0.000000e+00> : vector<576x32xf32>
    %3 = tpu.matmul %1, %2, %cst {dimension_numbers = #tpu.dot_dimension_numbers<[1], [0], [0], [1], [0, 0, 1, 1], [], []>} : vector<576x9xbf16>, vector<9x32xbf16>, vector<576x32xf32> -> vector<576x32xf32>
    %c1 = arith.constant 1 : index
    %c0_4 = arith.constant 0 : index
    %c0_5 = arith.constant 0 : index
    %4 = vector.load %arg2[%c1, %c0_4, %c0_5] : memref<4x576x9xbf16, #tpu.memory_space<vmem>>, vector<1x576x9xbf16>
    %5 = vector.shape_cast %4 : vector<1x576x9xbf16> to vector<576x9xbf16>
    %c0_6 = arith.constant 0 : index
    %c0_7 = arith.constant 0 : index
    %6 = vector.load %arg3[%c0_6, %c0_7] : memref<9x32xbf16, #tpu.memory_space<vmem>>, vector<9x32xbf16>
    %cst_8 = arith.constant dense<0.000000e+00> : vector<576x32xf32>
    %7 = tpu.matmul %5, %6, %cst_8 {dimension_numbers = #tpu.dot_dimension_numbers<[1], [0], [0], [1], [0, 0, 1, 1], [], []>} : vector<576x9xbf16>, vector<9x32xbf16>, vector<576x32xf32> -> vector<576x32xf32>
    %c2 = arith.constant 2 : index
    %c0_9 = arith.constant 0 : index
    %c0_10 = arith.constant 0 : index
    %8 = vector.load %arg2[%c2, %c0_9, %c0_10] : memref<4x576x9xbf16, #tpu.memory_space<vmem>>, vector<1x576x9xbf16>
    %9 = vector.shape_cast %8 : vector<1x576x9xbf16> to vector<576x9xbf16>
    %c0_11 = arith.constant 0 : index
    %c0_12 = arith.constant 0 : index
    %10 = vector.load %arg3[%c0_11, %c0_12] : memref<9x32xbf16, #tpu.memory_space<vmem>>, vector<9x32xbf16>
    %cst_13 = arith.constant dense<0.000000e+00> : vector<576x32xf32>
    %11 = tpu.matmul %9, %10, %cst_13 {dimension_numbers = #tpu.dot_dimension_numbers<[1], [0], [0], [1], [0, 0, 1, 1], [], []>} : vector<576x9xbf16>, vector<9x32xbf16>, vector<576x32xf32> -> vector<576x32xf32>
    %c3 = arith.constant 3 : index
    %c0_14 = arith.constant 0 : index
    %c0_15 = arith.constant 0 : index
    %12 = vector.load %arg2[%c3, %c0_14, %c0_15] : memref<4x576x9xbf16, #tpu.memory_space<vmem>>, vector<1x576x9xbf16>
    %13 = vector.shape_cast %12 : vector<1x576x9xbf16> to vector<576x9xbf16>
    %c0_16 = arith.constant 0 : index
    %c0_17 = arith.constant 0 : index
    %14 = vector.load %arg3[%c0_16, %c0_17] : memref<9x32xbf16, #tpu.memory_space<vmem>>, vector<9x32xbf16>
    %cst_18 = arith.constant dense<0.000000e+00> : vector<576x32xf32>
    %15 = tpu.matmul %13, %14, %cst_18 {dimension_numbers = #tpu.dot_dimension_numbers<[1], [0], [0], [1], [0, 0, 1, 1], [], []>} : vector<576x9xbf16>, vector<9x32xbf16>, vector<576x32xf32> -> vector<576x32xf32>
    %16 = arith.maximumf %3, %7 : vector<576x32xf32>
    %17 = arith.maximumf %11, %15 : vector<576x32xf32>
    %18 = arith.maximumf %16, %17 : vector<576x32xf32>
    %c0_19 = arith.constant 0 : index
    %c0_20 = arith.constant 0 : index
    %19 = vector.load %arg4[%c0_19, %c0_20] : memref<1x32xf32, #tpu.memory_space<vmem>>, vector<1x32xf32>
    %20 = vector.broadcast %19 : vector<1x32xf32> to vector<576x32xf32>
    %21 = arith.addf %18, %20 : vector<576x32xf32>
    %cst_21 = arith.constant 0.000000e+00 : f32
    %22 = vector.broadcast %cst_21 : f32 to vector<576x32xf32>
    %23 = arith.cmpf oge, %21, %22 : vector<576x32xf32>
    %cst_22 = arith.constant 0.00999999977 : f32
    %24 = vector.broadcast %cst_22 : f32 to vector<576x32xf32>
    %25 = arith.mulf %24, %21 : vector<576x32xf32>
    %26 = arith.select %23, %21, %25 : vector<576x32xi1>, vector<576x32xf32>
    %27 = arith.truncf %26 : vector<576x32xf32> to vector<576x32xbf16>
    %c0_23 = arith.constant 0 : index
    %c0_24 = arith.constant 0 : index
    %28 = vector.load %arg5[%c0_23, %c0_24] : memref<576x32xbf16, #tpu.memory_space<vmem>>, vector<576x32xbf16>
    tpu.vector_store %arg5[%c0_23, %c0_24], %27 {strides = array<i32>} : memref<576x32xbf16, #tpu.memory_space<vmem>>, vector<576x32xbf16>,
    return
  }
  func.func @transform_0(%arg0: i32, %arg1: i32) -> (i32, i32, i32) {
    %c0_i32 = arith.constant 0 : i32
    %c0_i32_0 = arith.constant 0 : i32
    %c0_i32_1 = arith.constant 0 : i32
    return %c0_i32, %arg0, %c0_i32_0 : i32, i32, i32
  }
  func.func @transform_1(%arg0: i32, %arg1: i32) -> (i32, i32) {
    %c0_i32 = arith.constant 0 : i32
    %c0_i32_0 = arith.constant 0 : i32
    return %c0_i32, %arg1 : i32, i32
  }
  func.func @transform_2(%arg0: i32, %arg1: i32) -> (i32, i32) {
    %c0_i32 = arith.constant 0 : i32
    %c0_i32_0 = arith.constant 0 : i32
    return %c0_i32, %arg1 : i32, i32
  }
  func.func @transform_3(%arg0: i32, %arg1: i32) -> (i32, i32) {
    %c0_i32 = arith.constant 0 : i32
    return %arg0, %arg1 : i32, i32
  }
}

module attributes {stable_mosaic.version = 11 : i64} {
  func.func @conv_bn_lrelu_pool_kernel(%arg0: i32, %arg1: i32, %arg2: memref<4x144x288xbf16, #tpu.memory_space<vmem>>, %arg3: memref<288x64xbf16, #tpu.memory_space<vmem>>, %arg4: memref<1x64xf32, #tpu.memory_space<vmem>>, %arg5: memref<144x64xbf16, #tpu.memory_space<vmem>>) attributes {dimension_semantics = [#tpu.dimension_semantics<parallel>, #tpu.dimension_semantics<parallel>], iteration_bounds = array<i64: 2, 1>, scalar_prefetch = 0 : i64, scratch_operands = 0 : i64, tpu.core_type = #tpu.core_type<tc>, window_params = [{transform_indices = @transform_0, window_bounds = array<i64: 4, 144, 288>}, {transform_indices = @transform_1, window_bounds = array<i64: 288, 64>}, {transform_indices = @transform_2, window_bounds = array<i64: 1, 64>}, {transform_indices = @transform_3, window_bounds = array<i64: 144, 64>}]} {
    %c0 = arith.constant 0 : index
    %c0_0 = arith.constant 0 : index
    %c0_1 = arith.constant 0 : index
    %0 = vector.load %arg2[%c0, %c0_0, %c0_1] : memref<4x144x288xbf16, #tpu.memory_space<vmem>>, vector<1x144x288xbf16>
    %1 = vector.shape_cast %0 : vector<1x144x288xbf16> to vector<144x288xbf16>
    %c0_2 = arith.constant 0 : index
    %c0_3 = arith.constant 0 : index
    %2 = vector.load %arg3[%c0_2, %c0_3] : memref<288x64xbf16, #tpu.memory_space<vmem>>, vector<288x64xbf16>
    %cst = arith.constant dense<0.000000e+00> : vector<144x64xf32>
    %3 = tpu.matmul %1, %2, %cst {dimension_numbers = #tpu.dot_dimension_numbers<[1], [0], [0], [1], [0, 0, 1, 1], [], []>} : vector<144x288xbf16>, vector<288x64xbf16>, vector<144x64xf32> -> vector<144x64xf32>
    %c1 = arith.constant 1 : index
    %c0_4 = arith.constant 0 : index
    %c0_5 = arith.constant 0 : index
    %4 = vector.load %arg2[%c1, %c0_4, %c0_5] : memref<4x144x288xbf16, #tpu.memory_space<vmem>>, vector<1x144x288xbf16>
    %5 = vector.shape_cast %4 : vector<1x144x288xbf16> to vector<144x288xbf16>
    %c0_6 = arith.constant 0 : index
    %c0_7 = arith.constant 0 : index
    %6 = vector.load %arg3[%c0_6, %c0_7] : memref<288x64xbf16, #tpu.memory_space<vmem>>, vector<288x64xbf16>
    %cst_8 = arith.constant dense<0.000000e+00> : vector<144x64xf32>
    %7 = tpu.matmul %5, %6, %cst_8 {dimension_numbers = #tpu.dot_dimension_numbers<[1], [0], [0], [1], [0, 0, 1, 1], [], []>} : vector<144x288xbf16>, vector<288x64xbf16>, vector<144x64xf32> -> vector<144x64xf32>
    %c2 = arith.constant 2 : index
    %c0_9 = arith.constant 0 : index
    %c0_10 = arith.constant 0 : index
    %8 = vector.load %arg2[%c2, %c0_9, %c0_10] : memref<4x144x288xbf16, #tpu.memory_space<vmem>>, vector<1x144x288xbf16>
    %9 = vector.shape_cast %8 : vector<1x144x288xbf16> to vector<144x288xbf16>
    %c0_11 = arith.constant 0 : index
    %c0_12 = arith.constant 0 : index
    %10 = vector.load %arg3[%c0_11, %c0_12] : memref<288x64xbf16, #tpu.memory_space<vmem>>, vector<288x64xbf16>
    %cst_13 = arith.constant dense<0.000000e+00> : vector<144x64xf32>
    %11 = tpu.matmul %9, %10, %cst_13 {dimension_numbers = #tpu.dot_dimension_numbers<[1], [0], [0], [1], [0, 0, 1, 1], [], []>} : vector<144x288xbf16>, vector<288x64xbf16>, vector<144x64xf32> -> vector<144x64xf32>
    %c3 = arith.constant 3 : index
    %c0_14 = arith.constant 0 : index
    %c0_15 = arith.constant 0 : index
    %12 = vector.load %arg2[%c3, %c0_14, %c0_15] : memref<4x144x288xbf16, #tpu.memory_space<vmem>>, vector<1x144x288xbf16>
    %13 = vector.shape_cast %12 : vector<1x144x288xbf16> to vector<144x288xbf16>
    %c0_16 = arith.constant 0 : index
    %c0_17 = arith.constant 0 : index
    %14 = vector.load %arg3[%c0_16, %c0_17] : memref<288x64xbf16, #tpu.memory_space<vmem>>, vector<288x64xbf16>
    %cst_18 = arith.constant dense<0.000000e+00> : vector<144x64xf32>
    %15 = tpu.matmul %13, %14, %cst_18 {dimension_numbers = #tpu.dot_dimension_numbers<[1], [0], [0], [1], [0, 0, 1, 1], [], []>} : vector<144x288xbf16>, vector<288x64xbf16>, vector<144x64xf32> -> vector<144x64xf32>
    %16 = arith.maximumf %3, %7 : vector<144x64xf32>
    %17 = arith.maximumf %11, %15 : vector<144x64xf32>
    %18 = arith.maximumf %16, %17 : vector<144x64xf32>
    %c0_19 = arith.constant 0 : index
    %c0_20 = arith.constant 0 : index
    %19 = vector.load %arg4[%c0_19, %c0_20] : memref<1x64xf32, #tpu.memory_space<vmem>>, vector<1x64xf32>
    %20 = vector.broadcast %19 : vector<1x64xf32> to vector<144x64xf32>
    %21 = arith.addf %18, %20 : vector<144x64xf32>
    %cst_21 = arith.constant 0.000000e+00 : f32
    %22 = vector.broadcast %cst_21 : f32 to vector<144x64xf32>
    %23 = arith.cmpf oge, %21, %22 : vector<144x64xf32>
    %cst_22 = arith.constant 0.00999999977 : f32
    %24 = vector.broadcast %cst_22 : f32 to vector<144x64xf32>
    %25 = arith.mulf %24, %21 : vector<144x64xf32>
    %26 = arith.select %23, %21, %25 : vector<144x64xi1>, vector<144x64xf32>
    %27 = arith.truncf %26 : vector<144x64xf32> to vector<144x64xbf16>
    %c0_23 = arith.constant 0 : index
    %c0_24 = arith.constant 0 : index
    %28 = vector.load %arg5[%c0_23, %c0_24] : memref<144x64xbf16, #tpu.memory_space<vmem>>, vector<144x64xbf16>
    tpu.vector_store %arg5[%c0_23, %c0_24], %27 {strides = array<i32>} : memref<144x64xbf16, #tpu.memory_space<vmem>>, vector<144x64xbf16>,
    return
  }
  func.func @transform_0(%arg0: i32, %arg1: i32) -> (i32, i32, i32) {
    %c0_i32 = arith.constant 0 : i32
    %c0_i32_0 = arith.constant 0 : i32
    %c0_i32_1 = arith.constant 0 : i32
    return %c0_i32, %arg0, %c0_i32_0 : i32, i32, i32
  }
  func.func @transform_1(%arg0: i32, %arg1: i32) -> (i32, i32) {
    %c0_i32 = arith.constant 0 : i32
    %c0_i32_0 = arith.constant 0 : i32
    return %c0_i32, %arg1 : i32, i32
  }
  func.func @transform_2(%arg0: i32, %arg1: i32) -> (i32, i32) {
    %c0_i32 = arith.constant 0 : i32
    %c0_i32_0 = arith.constant 0 : i32
    return %c0_i32, %arg1 : i32, i32
  }
  func.func @transform_3(%arg0: i32, %arg1: i32) -> (i32, i32) {
    %c0_i32 = arith.constant 0 : i32
    return %arg0, %arg1 : i32, i32
  }
}

module attributes {stable_mosaic.version = 11 : i64} {
  func.func @conv_bn_lrelu_pool_kernel(%arg0: i32, %arg1: i32, %arg2: memref<4x80x576xbf16, #tpu.memory_space<vmem>>, %arg3: memref<576x128xbf16, #tpu.memory_space<vmem>>, %arg4: memref<1x128xf32, #tpu.memory_space<vmem>>, %arg5: memref<80x128xbf16, #tpu.memory_space<vmem>>) attributes {dimension_semantics = [#tpu.dimension_semantics<parallel>, #tpu.dimension_semantics<parallel>], iteration_bounds = array<i64: 1, 1>, scalar_prefetch = 0 : i64, scratch_operands = 0 : i64, tpu.core_type = #tpu.core_type<tc>, window_params = [{transform_indices = @transform_0, window_bounds = array<i64: 4, 80, 576>}, {transform_indices = @transform_1, window_bounds = array<i64: 576, 128>}, {transform_indices = @transform_2, window_bounds = array<i64: 1, 128>}, {transform_indices = @transform_3, window_bounds = array<i64: 80, 128>}]} {
    %c0 = arith.constant 0 : index
    %c0_0 = arith.constant 0 : index
    %c0_1 = arith.constant 0 : index
    %0 = vector.load %arg2[%c0, %c0_0, %c0_1] : memref<4x80x576xbf16, #tpu.memory_space<vmem>>, vector<1x80x576xbf16>
    %1 = vector.shape_cast %0 : vector<1x80x576xbf16> to vector<80x576xbf16>
    %c0_2 = arith.constant 0 : index
    %c0_3 = arith.constant 0 : index
    %2 = vector.load %arg3[%c0_2, %c0_3] : memref<576x128xbf16, #tpu.memory_space<vmem>>, vector<576x128xbf16>
    %cst = arith.constant dense<0.000000e+00> : vector<80x128xf32>
    %3 = tpu.matmul %1, %2, %cst {dimension_numbers = #tpu.dot_dimension_numbers<[1], [0], [0], [1], [0, 0, 1, 1], [], []>} : vector<80x576xbf16>, vector<576x128xbf16>, vector<80x128xf32> -> vector<80x128xf32>
    %c1 = arith.constant 1 : index
    %c0_4 = arith.constant 0 : index
    %c0_5 = arith.constant 0 : index
    %4 = vector.load %arg2[%c1, %c0_4, %c0_5] : memref<4x80x576xbf16, #tpu.memory_space<vmem>>, vector<1x80x576xbf16>
    %5 = vector.shape_cast %4 : vector<1x80x576xbf16> to vector<80x576xbf16>
    %c0_6 = arith.constant 0 : index
    %c0_7 = arith.constant 0 : index
    %6 = vector.load %arg3[%c0_6, %c0_7] : memref<576x128xbf16, #tpu.memory_space<vmem>>, vector<576x128xbf16>
    %cst_8 = arith.constant dense<0.000000e+00> : vector<80x128xf32>
    %7 = tpu.matmul %5, %6, %cst_8 {dimension_numbers = #tpu.dot_dimension_numbers<[1], [0], [0], [1], [0, 0, 1, 1], [], []>} : vector<80x576xbf16>, vector<576x128xbf16>, vector<80x128xf32> -> vector<80x128xf32>
    %c2 = arith.constant 2 : index
    %c0_9 = arith.constant 0 : index
    %c0_10 = arith.constant 0 : index
    %8 = vector.load %arg2[%c2, %c0_9, %c0_10] : memref<4x80x576xbf16, #tpu.memory_space<vmem>>, vector<1x80x576xbf16>
    %9 = vector.shape_cast %8 : vector<1x80x576xbf16> to vector<80x576xbf16>
    %c0_11 = arith.constant 0 : index
    %c0_12 = arith.constant 0 : index
    %10 = vector.load %arg3[%c0_11, %c0_12] : memref<576x128xbf16, #tpu.memory_space<vmem>>, vector<576x128xbf16>
    %cst_13 = arith.constant dense<0.000000e+00> : vector<80x128xf32>
    %11 = tpu.matmul %9, %10, %cst_13 {dimension_numbers = #tpu.dot_dimension_numbers<[1], [0], [0], [1], [0, 0, 1, 1], [], []>} : vector<80x576xbf16>, vector<576x128xbf16>, vector<80x128xf32> -> vector<80x128xf32>
    %c3 = arith.constant 3 : index
    %c0_14 = arith.constant 0 : index
    %c0_15 = arith.constant 0 : index
    %12 = vector.load %arg2[%c3, %c0_14, %c0_15] : memref<4x80x576xbf16, #tpu.memory_space<vmem>>, vector<1x80x576xbf16>
    %13 = vector.shape_cast %12 : vector<1x80x576xbf16> to vector<80x576xbf16>
    %c0_16 = arith.constant 0 : index
    %c0_17 = arith.constant 0 : index
    %14 = vector.load %arg3[%c0_16, %c0_17] : memref<576x128xbf16, #tpu.memory_space<vmem>>, vector<576x128xbf16>
    %cst_18 = arith.constant dense<0.000000e+00> : vector<80x128xf32>
    %15 = tpu.matmul %13, %14, %cst_18 {dimension_numbers = #tpu.dot_dimension_numbers<[1], [0], [0], [1], [0, 0, 1, 1], [], []>} : vector<80x576xbf16>, vector<576x128xbf16>, vector<80x128xf32> -> vector<80x128xf32>
    %16 = arith.maximumf %3, %7 : vector<80x128xf32>
    %17 = arith.maximumf %11, %15 : vector<80x128xf32>
    %18 = arith.maximumf %16, %17 : vector<80x128xf32>
    %c0_19 = arith.constant 0 : index
    %c0_20 = arith.constant 0 : index
    %19 = vector.load %arg4[%c0_19, %c0_20] : memref<1x128xf32, #tpu.memory_space<vmem>>, vector<1x128xf32>
    %20 = vector.broadcast %19 : vector<1x128xf32> to vector<80x128xf32>
    %21 = arith.addf %18, %20 : vector<80x128xf32>
    %cst_21 = arith.constant 0.000000e+00 : f32
    %22 = vector.broadcast %cst_21 : f32 to vector<80x128xf32>
    %23 = arith.cmpf oge, %21, %22 : vector<80x128xf32>
    %cst_22 = arith.constant 0.00999999977 : f32
    %24 = vector.broadcast %cst_22 : f32 to vector<80x128xf32>
    %25 = arith.mulf %24, %21 : vector<80x128xf32>
    %26 = arith.select %23, %21, %25 : vector<80x128xi1>, vector<80x128xf32>
    %27 = arith.truncf %26 : vector<80x128xf32> to vector<80x128xbf16>
    %c0_23 = arith.constant 0 : index
    %c0_24 = arith.constant 0 : index
    %28 = vector.load %arg5[%c0_23, %c0_24] : memref<80x128xbf16, #tpu.memory_space<vmem>>, vector<80x128xbf16>
    tpu.vector_store %arg5[%c0_23, %c0_24], %27 {strides = array<i32>} : memref<80x128xbf16, #tpu.memory_space<vmem>>, vector<80x128xbf16>,
    return
  }
  func.func @transform_0(%arg0: i32, %arg1: i32) -> (i32, i32, i32) {
    %c0_i32 = arith.constant 0 : i32
    %c0_i32_0 = arith.constant 0 : i32
    %c0_i32_1 = arith.constant 0 : i32
    return %c0_i32, %arg0, %c0_i32_0 : i32, i32, i32
  }
  func.func @transform_1(%arg0: i32, %arg1: i32) -> (i32, i32) {
    %c0_i32 = arith.constant 0 : i32
    %c0_i32_0 = arith.constant 0 : i32
    return %c0_i32, %arg1 : i32, i32
  }
  func.func @transform_2(%arg0: i32, %arg1: i32) -> (i32, i32) {
    %c0_i32 = arith.constant 0 : i32
    %c0_i32_0 = arith.constant 0 : i32
    return %c0_i32, %arg1 : i32, i32
  }
  func.func @transform_3(%arg0: i32, %arg1: i32) -> (i32, i32) {
    %c0_i32 = arith.constant 0 : i32
    return %arg0, %arg1 : i32, i32
  }
}

module attributes {stable_mosaic.version = 11 : i64} {
  func.func @conv_bn_lrelu_pool_kernel(%arg0: i32, %arg1: i32, %arg2: memref<4x32x1152xbf16, #tpu.memory_space<vmem>>, %arg3: memref<1152x128xbf16, #tpu.memory_space<vmem>>, %arg4: memref<1x128xf32, #tpu.memory_space<vmem>>, %arg5: memref<32x128xbf16, #tpu.memory_space<vmem>>) attributes {dimension_semantics = [#tpu.dimension_semantics<parallel>, #tpu.dimension_semantics<parallel>], iteration_bounds = array<i64: 1, 2>, scalar_prefetch = 0 : i64, scratch_operands = 0 : i64, tpu.core_type = #tpu.core_type<tc>, window_params = [{transform_indices = @transform_0, window_bounds = array<i64: 4, 32, 1152>}, {transform_indices = @transform_1, window_bounds = array<i64: 1152, 128>}, {transform_indices = @transform_2, window_bounds = array<i64: 1, 128>}, {transform_indices = @transform_3, window_bounds = array<i64: 32, 128>}]} {
    %c0 = arith.constant 0 : index
    %c0_0 = arith.constant 0 : index
    %c0_1 = arith.constant 0 : index
    %0 = vector.load %arg2[%c0, %c0_0, %c0_1] : memref<4x32x1152xbf16, #tpu.memory_space<vmem>>, vector<1x32x1152xbf16>
    %1 = vector.shape_cast %0 : vector<1x32x1152xbf16> to vector<32x1152xbf16>
    %c0_2 = arith.constant 0 : index
    %c0_3 = arith.constant 0 : index
    %2 = vector.load %arg3[%c0_2, %c0_3] : memref<1152x128xbf16, #tpu.memory_space<vmem>>, vector<1152x128xbf16>
    %cst = arith.constant dense<0.000000e+00> : vector<32x128xf32>
    %3 = tpu.matmul %1, %2, %cst {dimension_numbers = #tpu.dot_dimension_numbers<[1], [0], [0], [1], [0, 0, 1, 1], [], []>} : vector<32x1152xbf16>, vector<1152x128xbf16>, vector<32x128xf32> -> vector<32x128xf32>
    %c1 = arith.constant 1 : index
    %c0_4 = arith.constant 0 : index
    %c0_5 = arith.constant 0 : index
    %4 = vector.load %arg2[%c1, %c0_4, %c0_5] : memref<4x32x1152xbf16, #tpu.memory_space<vmem>>, vector<1x32x1152xbf16>
    %5 = vector.shape_cast %4 : vector<1x32x1152xbf16> to vector<32x1152xbf16>
    %c0_6 = arith.constant 0 : index
    %c0_7 = arith.constant 0 : index
    %6 = vector.load %arg3[%c0_6, %c0_7] : memref<1152x128xbf16, #tpu.memory_space<vmem>>, vector<1152x128xbf16>
    %cst_8 = arith.constant dense<0.000000e+00> : vector<32x128xf32>
    %7 = tpu.matmul %5, %6, %cst_8 {dimension_numbers = #tpu.dot_dimension_numbers<[1], [0], [0], [1], [0, 0, 1, 1], [], []>} : vector<32x1152xbf16>, vector<1152x128xbf16>, vector<32x128xf32> -> vector<32x128xf32>
    %c2 = arith.constant 2 : index
    %c0_9 = arith.constant 0 : index
    %c0_10 = arith.constant 0 : index
    %8 = vector.load %arg2[%c2, %c0_9, %c0_10] : memref<4x32x1152xbf16, #tpu.memory_space<vmem>>, vector<1x32x1152xbf16>
    %9 = vector.shape_cast %8 : vector<1x32x1152xbf16> to vector<32x1152xbf16>
    %c0_11 = arith.constant 0 : index
    %c0_12 = arith.constant 0 : index
    %10 = vector.load %arg3[%c0_11, %c0_12] : memref<1152x128xbf16, #tpu.memory_space<vmem>>, vector<1152x128xbf16>
    %cst_13 = arith.constant dense<0.000000e+00> : vector<32x128xf32>
    %11 = tpu.matmul %9, %10, %cst_13 {dimension_numbers = #tpu.dot_dimension_numbers<[1], [0], [0], [1], [0, 0, 1, 1], [], []>} : vector<32x1152xbf16>, vector<1152x128xbf16>, vector<32x128xf32> -> vector<32x128xf32>
    %c3 = arith.constant 3 : index
    %c0_14 = arith.constant 0 : index
    %c0_15 = arith.constant 0 : index
    %12 = vector.load %arg2[%c3, %c0_14, %c0_15] : memref<4x32x1152xbf16, #tpu.memory_space<vmem>>, vector<1x32x1152xbf16>
    %13 = vector.shape_cast %12 : vector<1x32x1152xbf16> to vector<32x1152xbf16>
    %c0_16 = arith.constant 0 : index
    %c0_17 = arith.constant 0 : index
    %14 = vector.load %arg3[%c0_16, %c0_17] : memref<1152x128xbf16, #tpu.memory_space<vmem>>, vector<1152x128xbf16>
    %cst_18 = arith.constant dense<0.000000e+00> : vector<32x128xf32>
    %15 = tpu.matmul %13, %14, %cst_18 {dimension_numbers = #tpu.dot_dimension_numbers<[1], [0], [0], [1], [0, 0, 1, 1], [], []>} : vector<32x1152xbf16>, vector<1152x128xbf16>, vector<32x128xf32> -> vector<32x128xf32>
    %16 = arith.maximumf %3, %7 : vector<32x128xf32>
    %17 = arith.maximumf %11, %15 : vector<32x128xf32>
    %18 = arith.maximumf %16, %17 : vector<32x128xf32>
    %c0_19 = arith.constant 0 : index
    %c0_20 = arith.constant 0 : index
    %19 = vector.load %arg4[%c0_19, %c0_20] : memref<1x128xf32, #tpu.memory_space<vmem>>, vector<1x128xf32>
    %20 = vector.broadcast %19 : vector<1x128xf32> to vector<32x128xf32>
    %21 = arith.addf %18, %20 : vector<32x128xf32>
    %cst_21 = arith.constant 0.000000e+00 : f32
    %22 = vector.broadcast %cst_21 : f32 to vector<32x128xf32>
    %23 = arith.cmpf oge, %21, %22 : vector<32x128xf32>
    %cst_22 = arith.constant 0.00999999977 : f32
    %24 = vector.broadcast %cst_22 : f32 to vector<32x128xf32>
    %25 = arith.mulf %24, %21 : vector<32x128xf32>
    %26 = arith.select %23, %21, %25 : vector<32x128xi1>, vector<32x128xf32>
    %27 = arith.truncf %26 : vector<32x128xf32> to vector<32x128xbf16>
    %c0_23 = arith.constant 0 : index
    %c0_24 = arith.constant 0 : index
    %28 = vector.load %arg5[%c0_23, %c0_24] : memref<32x128xbf16, #tpu.memory_space<vmem>>, vector<32x128xbf16>
    tpu.vector_store %arg5[%c0_23, %c0_24], %27 {strides = array<i32>} : memref<32x128xbf16, #tpu.memory_space<vmem>>, vector<32x128xbf16>,
    return
  }
  func.func @transform_0(%arg0: i32, %arg1: i32) -> (i32, i32, i32) {
    %c0_i32 = arith.constant 0 : i32
    %c0_i32_0 = arith.constant 0 : i32
    %c0_i32_1 = arith.constant 0 : i32
    return %c0_i32, %arg0, %c0_i32_0 : i32, i32, i32
  }
  func.func @transform_1(%arg0: i32, %arg1: i32) -> (i32, i32) {
    %c0_i32 = arith.constant 0 : i32
    %c0_i32_0 = arith.constant 0 : i32
    return %c0_i32, %arg1 : i32, i32
  }
  func.func @transform_2(%arg0: i32, %arg1: i32) -> (i32, i32) {
    %c0_i32 = arith.constant 0 : i32
    %c0_i32_0 = arith.constant 0 : i32
    return %c0_i32, %arg1 : i32, i32
  }
  func.func @transform_3(%arg0: i32, %arg1: i32) -> (i32, i32) {
    %c0_i32 = arith.constant 0 : i32
    return %arg0, %arg1 : i32, i32
  }
}

module attributes {stable_mosaic.version = 11 : i64} {
  func.func @fc_fused_kernel(%arg0: i32, %arg1: memref<16x2304xbf16, #tpu.memory_space<vmem>>, %arg2: memref<2304x512xbf16, #tpu.memory_space<vmem>>, %arg3: memref<1x512xf32, #tpu.memory_space<vmem>>, %arg4: memref<512x128xbf16, #tpu.memory_space<vmem>>, %arg5: memref<1x128xf32, #tpu.memory_space<vmem>>, %arg6: memref<128x4xbf16, #tpu.memory_space<vmem>>, %arg7: memref<1x4xf32, #tpu.memory_space<vmem>>, %arg8: memref<16x4xf32, #tpu.memory_space<vmem>>) attributes {dimension_semantics = [#tpu.dimension_semantics<parallel>], iteration_bounds = array<i64: 1>, scalar_prefetch = 0 : i64, scratch_operands = 0 : i64, tpu.core_type = #tpu.core_type<tc>, window_params = [{transform_indices = @transform_0, window_bounds = array<i64: 16, 2304>}, {pipeline_mode = #tpu.pipeline_mode<synchronous>, transform_indices = @transform_1, window_bounds = array<i64: 2304, 512>}, {pipeline_mode = #tpu.pipeline_mode<synchronous>, transform_indices = @transform_2, window_bounds = array<i64: 1, 512>}, {pipeline_mode = #tpu.pipeline_mode<synchronous>, transform_indices = @transform_3, window_bounds = array<i64: 512, 128>}, {pipeline_mode = #tpu.pipeline_mode<synchronous>, transform_indices = @transform_4, window_bounds = array<i64: 1, 128>}, {pipeline_mode = #tpu.pipeline_mode<synchronous>, transform_indices = @transform_5, window_bounds = array<i64: 128, 4>}, {pipeline_mode = #tpu.pipeline_mode<synchronous>, transform_indices = @transform_6, window_bounds = array<i64: 1, 4>}, {transform_indices = @transform_7, window_bounds = array<i64: 16, 4>}]} {
    %c0 = arith.constant 0 : index
    %c0_0 = arith.constant 0 : index
    %0 = vector.load %arg1[%c0, %c0_0] : memref<16x2304xbf16, #tpu.memory_space<vmem>>, vector<16x2304xbf16>
    %c0_1 = arith.constant 0 : index
    %c0_2 = arith.constant 0 : index
    %1 = vector.load %arg2[%c0_1, %c0_2] : memref<2304x512xbf16, #tpu.memory_space<vmem>>, vector<2304x512xbf16>
    %cst = arith.constant dense<0.000000e+00> : vector<16x512xf32>
    %2 = tpu.matmul %0, %1, %cst {dimension_numbers = #tpu.dot_dimension_numbers<[1], [0], [0], [1], [0, 0, 1, 1], [], []>} : vector<16x2304xbf16>, vector<2304x512xbf16>, vector<16x512xf32> -> vector<16x512xf32>
    %c0_3 = arith.constant 0 : index
    %c0_4 = arith.constant 0 : index
    %3 = vector.load %arg3[%c0_3, %c0_4] : memref<1x512xf32, #tpu.memory_space<vmem>>, vector<1x512xf32>
    %4 = vector.broadcast %3 : vector<1x512xf32> to vector<16x512xf32>
    %5 = arith.addf %2, %4 : vector<16x512xf32>
    %cst_5 = arith.constant 0.000000e+00 : f32
    %6 = vector.broadcast %cst_5 : f32 to vector<16x512xf32>
    %7 = arith.cmpf oge, %5, %6 : vector<16x512xf32>
    %cst_6 = arith.constant 0.00999999977 : f32
    %8 = vector.broadcast %cst_6 : f32 to vector<16x512xf32>
    %9 = arith.mulf %8, %5 : vector<16x512xf32>
    %10 = arith.select %7, %5, %9 : vector<16x512xi1>, vector<16x512xf32>
    %11 = arith.truncf %10 : vector<16x512xf32> to vector<16x512xbf16>
    %c0_7 = arith.constant 0 : index
    %c0_8 = arith.constant 0 : index
    %12 = vector.load %arg4[%c0_7, %c0_8] : memref<512x128xbf16, #tpu.memory_space<vmem>>, vector<512x128xbf16>
    %cst_9 = arith.constant dense<0.000000e+00> : vector<16x128xf32>
    %13 = tpu.matmul %11, %12, %cst_9 {dimension_numbers = #tpu.dot_dimension_numbers<[1], [0], [0], [1], [0, 0, 1, 1], [], []>} : vector<16x512xbf16>, vector<512x128xbf16>, vector<16x128xf32> -> vector<16x128xf32>
    %c0_10 = arith.constant 0 : index
    %c0_11 = arith.constant 0 : index
    %14 = vector.load %arg5[%c0_10, %c0_11] : memref<1x128xf32, #tpu.memory_space<vmem>>, vector<1x128xf32>
    %15 = vector.broadcast %14 : vector<1x128xf32> to vector<16x128xf32>
    %16 = arith.addf %13, %15 : vector<16x128xf32>
    %cst_12 = arith.constant 0.000000e+00 : f32
    %17 = vector.broadcast %cst_12 : f32 to vector<16x128xf32>
    %18 = arith.cmpf oge, %16, %17 : vector<16x128xf32>
    %cst_13 = arith.constant 0.00999999977 : f32
    %19 = vector.broadcast %cst_13 : f32 to vector<16x128xf32>
    %20 = arith.mulf %19, %16 : vector<16x128xf32>
    %21 = arith.select %18, %16, %20 : vector<16x128xi1>, vector<16x128xf32>
    %22 = arith.truncf %21 : vector<16x128xf32> to vector<16x128xbf16>
    %c0_14 = arith.constant 0 : index
    %c0_15 = arith.constant 0 : index
    %23 = vector.load %arg6[%c0_14, %c0_15] : memref<128x4xbf16, #tpu.memory_space<vmem>>, vector<128x4xbf16>
    %cst_16 = arith.constant dense<0.000000e+00> : vector<16x4xf32>
    %24 = tpu.matmul %22, %23, %cst_16 {dimension_numbers = #tpu.dot_dimension_numbers<[1], [0], [0], [1], [0, 0, 1, 1], [], []>} : vector<16x128xbf16>, vector<128x4xbf16>, vector<16x4xf32> -> vector<16x4xf32>
    %c0_17 = arith.constant 0 : index
    %c0_18 = arith.constant 0 : index
    %25 = vector.load %arg7[%c0_17, %c0_18] : memref<1x4xf32, #tpu.memory_space<vmem>>, vector<1x4xf32>
    %26 = vector.broadcast %25 : vector<1x4xf32> to vector<16x4xf32>
    %27 = arith.addf %24, %26 : vector<16x4xf32>
    %c0_19 = arith.constant 0 : index
    %c0_20 = arith.constant 0 : index
    %28 = vector.load %arg8[%c0_19, %c0_20] : memref<16x4xf32, #tpu.memory_space<vmem>>, vector<16x4xf32>
    tpu.vector_store %arg8[%c0_19, %c0_20], %27 {strides = array<i32>} : memref<16x4xf32, #tpu.memory_space<vmem>>, vector<16x4xf32>,
    return
  }
  func.func @transform_0(%arg0: i32) -> (i32, i32) {
    %c0_i32 = arith.constant 0 : i32
    %c0_i32_0 = arith.constant 0 : i32
    return %arg0, %c0_i32 : i32, i32
  }
  func.func @transform_1(%arg0: i32) -> (i32, i32) {
    %c0_i32 = arith.constant 0 : i32
    %c0_i32_0 = arith.constant 0 : i32
    %c0_i32_1 = arith.constant 0 : i32
    return %c0_i32, %c0_i32_0 : i32, i32
  }
  func.func @transform_2(%arg0: i32) -> (i32, i32) {
    %c0_i32 = arith.constant 0 : i32
    %c0_i32_0 = arith.constant 0 : i32
    %c0_i32_1 = arith.constant 0 : i32
    return %c0_i32, %c0_i32_0 : i32, i32
  }
  func.func @transform_3(%arg0: i32) -> (i32, i32) {
    %c0_i32 = arith.constant 0 : i32
    %c0_i32_0 = arith.constant 0 : i32
    %c0_i32_1 = arith.constant 0 : i32
    return %c0_i32, %c0_i32_0 : i32, i32
  }
  func.func @transform_4(%arg0: i32) -> (i32, i32) {
    %c0_i32 = arith.constant 0 : i32
    %c0_i32_0 = arith.constant 0 : i32
    %c0_i32_1 = arith.constant 0 : i32
    return %c0_i32, %c0_i32_0 : i32, i32
  }
  func.func @transform_5(%arg0: i32) -> (i32, i32) {
    %c0_i32 = arith.constant 0 : i32
    %c0_i32_0 = arith.constant 0 : i32
    %c0_i32_1 = arith.constant 0 : i32
    return %c0_i32, %c0_i32_0 : i32, i32
  }
  func.func @transform_6(%arg0: i32) -> (i32, i32) {
    %c0_i32 = arith.constant 0 : i32
    %c0_i32_0 = arith.constant 0 : i32
    %c0_i32_1 = arith.constant 0 : i32
    return %c0_i32, %c0_i32_0 : i32, i32
  }
  func.func @transform_7(%arg0: i32) -> (i32, i32) {
    %c0_i32 = arith.constant 0 : i32
    %c0_i32_0 = arith.constant 0 : i32
    return %arg0, %c0_i32 : i32, i32
  }
}

</mosaic_0001>

<bundles_post_ra>
// kernel: variant2_forward.5
= control target key start
LH: loop header
LB: loop body
LE: loop exit
PB: predicated region body
PF: predicated region fallthrough
CT: control target
= control target key end

     0   :  { %s6493_s12 = smov 0   ;;  %s6495_s13 = smov 0   ;;  %s8019_s0 = inlined_call_operand.vmem [shape: bf16[4,1152,9], index: 0, kind: input, shape index: {}]   ;;  %s8020_s1 = inlined_call_operand.vmem [shape: bf16[9,32], index: 1, kind: input, shape index: {}]   ;;  %s8021_s2 = inlined_call_operand.vmem [shape: f32[1,32], index: 2, kind: input, shape index: {}]   ;;  %s8022_s3 = inlined_call_operand.vmem [shape: bf16[1152,32], index: 3, kind: output, shape index: {}]  }
   0x1   :  { %s6497_s14 = smov 0   ;;  %s6499_s15 = smov 0  }
   0x2   :  { %s6501_s16 = smov 0  }
   0x3 LB: > { %s25_s17 = sadd.s32 1, %s6466_s15  ;;  %p39_p1 = scmp.ne.s32.totalorder %s6458_s13, %s6454_s12  ;;  %s6470_s16 = sphi %s6501_s16, %s13_s16   ;;  %s6466_s15 = sphi %s6499_s15, %s8389_s15   ;;  %s6462_s14 = sphi %s6497_s14, %s8388_s14   ;;  %s6458_s13 = sphi %s6495_s13, %s8387_s13   ;;  %s6454_s12 = sphi %s6493_s12, %s8386_s12  }
   0x4   : > { %p27_p0 = scmp.ge.s32.totalorder %s25_s17, 2  ;;  %p40_p2 = scmp.eq.s32.totalorder %s6470_s16, 0 }
   0x5   : > { %s32_s19 = sadd.s32 1, %s6458_s13  ;;  %p5142_p5 = scmp.ge.s32.totalorder %s6470_s16, 2 }
   0x6   : > { %s8391_s17 = smov (%p27_p0, %s25_s17), 0  ;;  %p41_p3 = por %p40_p2, %p39_p1 }
   0x7   : > { %s29_s18 = ssub.s32 %s6466_s15, %s8391_s17  ;;  %158 = sbr.rel (%p5142_p5) target bundleno = 91 (0x5b), region = 24 }
   0x8   : > { %p30_p4 = scmp.eq.s32.totalorder %s29_s18, 0 }
   0xa   : > { %s6528_s20 = scalar_select %p30_p4, %s6458_s13, %s32_s19  }
   0xe   : > { %161 = sbr.rel (!%p41_p3) target bundleno = 91 (0x5b), region = 28  ;;  %s163_s21 = sand.u32 (%p41_p3), 1, %s6458_s13  }
   0xf   : > { %s5726_s22 = smul.u32 (%p41_p3), 288, %s6466_s15 }
  0x10   : > { %s6243_s23 = smul.u32 (%p41_p3), 1152, %s163_s21 }
  0x11   : > { %s6536_s26 = scalar_lea.vmem (%p41_p3), %s8019_s0, %s5726_s22 }
  0x12   : > { %v184_v0 = vld [vmem:[%s6536_s26] sm:$0xff] (%p41_p3)   ;;  %v188_v1 = vld [vmem:[%s6536_s26 + $0x8] sm:$0xff] (%p41_p3)   ;;  %v192_v2 = vld [vmem:[%s6536_s26 + $0x10] sm:$0xff] (%p41_p3)   ;;  %s6541_s27 = scalar_lea.vmem (%p41_p3), [#allocation2], %s6243_s23 }
  0x13   : > { %185 = vst [vmem:[%s6541_s27] sm:$0xff] (%p41_p3), %v184_v0   ;;  %189 = vst [vmem:[%s6541_s27 + $0x8] sm:$0xff] (%p41_p3), %v188_v1   ;;  %v196_v3 = vld [vmem:[%s6536_s26 + $0x18] sm:$0xff] (%p41_p3)   ;;  %v200_v4 = vld [vmem:[%s6536_s26 + $0x20] sm:$0xff] (%p41_p3)  }
  0x14   : > { %193 = vst [vmem:[%s6541_s27 + $0x10] sm:$0xff] (%p41_p3), %v192_v2   ;;  %v204_v5 = vld [vmem:[%s6536_s26 + $0x28] sm:$0xff] (%p41_p3)   ;;  %197 = vst [vmem:[%s6541_s27 + $0x18] sm:$0xff] (%p41_p3), %v196_v3   ;;  %v208_v6 = vld [vmem:[%s6536_s26 + $0x30] sm:$0xff] (%p41_p3)  }
  0x15   : > { %201 = vst [vmem:[%s6541_s27 + $0x20] sm:$0xff] %v200_v4   ;;  %205 = vst [vmem:[%s6541_s27 + $0x28] sm:$0xff] %v204_v5   ;;  %v212_v7 = vld [vmem:[%s6536_s26 + $0x38] sm:$0xff]   ;;  %v216_v8 = vld [vmem:[%s6536_s26 + $0x40] sm:$0xff]  }
  0x16   : > { %209 = vst [vmem:[%s6541_s27 + $0x30] sm:$0xff] %v208_v6   ;;  %213 = vst [vmem:[%s6541_s27 + $0x38] sm:$0xff] %v212_v7   ;;  %v220_v9 = vld [vmem:[%s6536_s26 + $0x48] sm:$0xff]   ;;  %v224_v10 = vld [vmem:[%s6536_s26 + $0x50] sm:$0xff]  }
  0x17   : > { %217 = vst [vmem:[%s6541_s27 + $0x40] sm:$0xff] %v216_v8   ;;  %v228_v11 = vld [vmem:[%s6536_s26 + $0x58] sm:$0xff]   ;;  %221 = vst [vmem:[%s6541_s27 + $0x48] sm:$0xff] %v220_v9   ;;  %v232_v12 = vld [vmem:[%s6536_s26 + $0x60] sm:$0xff]  }
  0x18   : > { %225 = vst [vmem:[%s6541_s27 + $0x50] sm:$0xff] %v224_v10   ;;  %229 = vst [vmem:[%s6541_s27 + $0x58] sm:$0xff] %v228_v11   ;;  %v236_v13 = vld [vmem:[%s6536_s26 + $0x68] sm:$0xff]   ;;  %v240_v14 = vld [vmem:[%s6536_s26 + $0x70] sm:$0xff]  }
  0x19   : > { %233 = vst [vmem:[%s6541_s27 + $0x60] sm:$0xff] %v232_v12   ;;  %237 = vst [vmem:[%s6541_s27 + $0x68] sm:$0xff] %v236_v13   ;;  %v244_v15 = vld [vmem:[%s6536_s26 + $0x78] sm:$0xff]   ;;  %v248_v16 = vld [vmem:[%s6536_s26 + $0x80] sm:$0xff]  }
  0x1a   : > { %241 = vst [vmem:[%s6541_s27 + $0x70] sm:$0xff] %v240_v14   ;;  %v252_v17 = vld [vmem:[%s6536_s26 + $0x88] sm:$0xff]   ;;  %245 = vst [vmem:[%s6541_s27 + $0x78] sm:$0xff] %v244_v15   ;;  %v256_v18 = vld [vmem:[%s6536_s26 + $0x90] sm:$0xff]  }
  0x1b   : > { %249 = vst [vmem:[%s6541_s27 + $0x80] sm:$0xff] %v248_v16   ;;  %253 = vst [vmem:[%s6541_s27 + $0x88] sm:$0xff] %v252_v17   ;;  %v260_v19 = vld [vmem:[%s6536_s26 + $0x98] sm:$0xff]   ;;  %v264_v20 = vld [vmem:[%s6536_s26 + $0xa0] sm:$0xff]  }
  0x1c   : > { %257 = vst [vmem:[%s6541_s27 + $0x90] sm:$0xff] %v256_v18   ;;  %261 = vst [vmem:[%s6541_s27 + $0x98] sm:$0xff] %v260_v19   ;;  %v268_v21 = vld [vmem:[%s6536_s26 + $0xa8] sm:$0xff]   ;;  %v272_v22 = vld [vmem:[%s6536_s26 + $0xb0] sm:$0xff]  }
  0x1d   : > { %265 = vst [vmem:[%s6541_s27 + $0xa0] sm:$0xff] %v264_v20   ;;  %v276_v23 = vld [vmem:[%s6536_s26 + $0xb8] sm:$0xff]   ;;  %269 = vst [vmem:[%s6541_s27 + $0xa8] sm:$0xff] %v268_v21   ;;  %v280_v24 = vld [vmem:[%s6536_s26 + $0xc0] sm:$0xff]  }
  0x1e   : > { %273 = vst [vmem:[%s6541_s27 + $0xb0] sm:$0xff] %v272_v22   ;;  %277 = vst [vmem:[%s6541_s27 + $0xb8] sm:$0xff] %v276_v23   ;;  %v284_v25 = vld [vmem:[%s6536_s26 + $0xc8] sm:$0xff]   ;;  %v288_v26 = vld [vmem:[%s6536_s26 + $0xd0] sm:$0xff]  }
  0x1f   : > { %281 = vst [vmem:[%s6541_s27 + $0xc0] sm:$0xff] %v280_v24   ;;  %285 = vst [vmem:[%s6541_s27 + $0xc8] sm:$0xff] %v284_v25   ;;  %v292_v27 = vld [vmem:[%s6536_s26 + $0xd8] sm:$0xff]   ;;  %v296_v28 = vld [vmem:[%s6536_s26 + $0xe0] sm:$0xff]  }
  0x20   : > { %289 = vst [vmem:[%s6541_s27 + $0xd0] sm:$0xff] %v288_v26   ;;  %v300_v29 = vld [vmem:[%s6536_s26 + $0xe8] sm:$0xff]   ;;  %293 = vst [vmem:[%s6541_s27 + $0xd8] sm:$0xff] %v292_v27   ;;  %v304_v30 = vld [vmem:[%s6536_s26 + $0xf0] sm:$0xff]  }
  0x21   : > { %297 = vst [vmem:[%s6541_s27 + $0xe0] sm:$0xff] %v296_v28   ;;  %301 = vst [vmem:[%s6541_s27 + $0xe8] sm:$0xff] %v300_v29   ;;  %v308_v31 = vld [vmem:[%s6536_s26 + $0xf8] sm:$0xff]   ;;  %v312_v32 = vld [vmem:[%s6536_s26 + $0x100] sm:$0xff]  }
  0x22   : > { %305 = vst [vmem:[%s6541_s27 + $0xf0] sm:$0xff] %v304_v30   ;;  %309 = vst [vmem:[%s6541_s27 + $0xf8] sm:$0xff] %v308_v31   ;;  %v316_v33 = vld [vmem:[%s6536_s26 + $0x108] sm:$0xff]   ;;  %v320_v34 = vld [vmem:[%s6536_s26 + $0x110] sm:$0xff]  }
  0x23   : > { %313 = vst [vmem:[%s6541_s27 + $0x100] sm:$0xff] %v312_v32   ;;  %v324_v35 = vld [vmem:[%s6536_s26 + $0x118] sm:$0xff]   ;;  %317 = vst [vmem:[%s6541_s27 + $0x108] sm:$0xff] %v316_v33   ;;  %v328_v36 = vld [vmem:[%s6536_s26 + $0x240] sm:$0xff]  }
  0x24   : > { %321 = vst [vmem:[%s6541_s27 + $0x110] sm:$0xff] %v320_v34   ;;  %325 = vst [vmem:[%s6541_s27 + $0x118] sm:$0xff] %v324_v35   ;;  %v332_v37 = vld [vmem:[%s6536_s26 + $0x248] sm:$0xff]   ;;  %v336_v38 = vld [vmem:[%s6536_s26 + $0x250] sm:$0xff]  }
  0x25   : > { %329 = vst [vmem:[%s6541_s27 + $0x120] sm:$0xff] %v328_v36   ;;  %333 = vst [vmem:[%s6541_s27 + $0x128] sm:$0xff] %v332_v37   ;;  %v340_v39 = vld [vmem:[%s6536_s26 + $0x258] sm:$0xff]   ;;  %v344_v40 = vld [vmem:[%s6536_s26 + $0x260] sm:$0xff]  }
  0x26   : > { %337 = vst [vmem:[%s6541_s27 + $0x130] sm:$0xff] %v336_v38   ;;  %v348_v41 = vld [vmem:[%s6536_s26 + $0x268] sm:$0xff]   ;;  %341 = vst [vmem:[%s6541_s27 + $0x138] sm:$0xff] %v340_v39   ;;  %v352_v42 = vld [vmem:[%s6536_s26 + $0x270] sm:$0xff]  }
  0x27   : > { %345 = vst [vmem:[%s6541_s27 + $0x140] sm:$0xff] %v344_v40   ;;  %349 = vst [vmem:[%s6541_s27 + $0x148] sm:$0xff] %v348_v41   ;;  %v356_v43 = vld [vmem:[%s6536_s26 + $0x278] sm:$0xff]   ;;  %v360_v44 = vld [vmem:[%s6536_s26 + $0x280] sm:$0xff]  }
  0x28   : > { %353 = vst [vmem:[%s6541_s27 + $0x150] sm:$0xff] %v352_v42   ;;  %357 = vst [vmem:[%s6541_s27 + $0x158] sm:$0xff] %v356_v43   ;;  %v364_v45 = vld [vmem:[%s6536_s26 + $0x288] sm:$0xff]   ;;  %v368_v46 = vld [vmem:[%s6536_s26 + $0x290] sm:$0xff]  }
  0x29   : > { %361 = vst [vmem:[%s6541_s27 + $0x160] sm:$0xff] %v360_v44   ;;  %v372_v47 = vld [vmem:[%s6536_s26 + $0x298] sm:$0xff]   ;;  %365 = vst [vmem:[%s6541_s27 + $0x168] sm:$0xff] %v364_v45   ;;  %v376_v48 = vld [vmem:[%s6536_s26 + $0x2a0] sm:$0xff]  }
  0x2a   : > { %369 = vst [vmem:[%s6541_s27 + $0x170] sm:$0xff] %v368_v46   ;;  %373 = vst [vmem:[%s6541_s27 + $0x178] sm:$0xff] %v372_v47   ;;  %v380_v49 = vld [vmem:[%s6536_s26 + $0x2a8] sm:$0xff]   ;;  %v384_v50 = vld [vmem:[%s6536_s26 + $0x2b0] sm:$0xff]  }
  0x2b   : > { %377 = vst [vmem:[%s6541_s27 + $0x180] sm:$0xff] %v376_v48   ;;  %381 = vst [vmem:[%s6541_s27 + $0x188] sm:$0xff] %v380_v49   ;;  %v388_v51 = vld [vmem:[%s6536_s26 + $0x2b8] sm:$0xff]   ;;  %v392_v52 = vld [vmem:[%s6536_s26 + $0x2c0] sm:$0xff]  }
  0x2c   : > { %385 = vst [vmem:[%s6541_s27 + $0x190] sm:$0xff] %v384_v50   ;;  %v396_v53 = vld [vmem:[%s6536_s26 + $0x2c8] sm:$0xff]   ;;  %389 = vst [vmem:[%s6541_s27 + $0x198] sm:$0xff] %v388_v51   ;;  %v400_v54 = vld [vmem:[%s6536_s26 + $0x2d0] sm:$0xff]  }
  0x2d   : > { %393 = vst [vmem:[%s6541_s27 + $0x1a0] sm:$0xff] %v392_v52   ;;  %397 = vst [vmem:[%s6541_s27 + $0x1a8] sm:$0xff] %v396_v53   ;;  %v404_v55 = vld [vmem:[%s6536_s26 + $0x2d8] sm:$0xff]   ;;  %v408_v56 = vld [vmem:[%s6536_s26 + $0x2e0] sm:$0xff]  }
  0x2e   : > { %401 = vst [vmem:[%s6541_s27 + $0x1b0] sm:$0xff] %v400_v54   ;;  %405 = vst [vmem:[%s6541_s27 + $0x1b8] sm:$0xff] %v404_v55   ;;  %v412_v57 = vld [vmem:[%s6536_s26 + $0x2e8] sm:$0xff]   ;;  %v416_v58 = vld [vmem:[%s6536_s26 + $0x2f0] sm:$0xff]  }
  0x2f   : > { %409 = vst [vmem:[%s6541_s27 + $0x1c0] sm:$0xff] %v408_v56   ;;  %v420_v59 = vld [vmem:[%s6536_s26 + $0x2f8] sm:$0xff]   ;;  %413 = vst [vmem:[%s6541_s27 + $0x1c8] sm:$0xff] %v412_v57   ;;  %v424_v60 = vld [vmem:[%s6536_s26 + $0x300] sm:$0xff]  }
  0x30   : > { %417 = vst [vmem:[%s6541_s27 + $0x1d0] sm:$0xff] %v416_v58   ;;  %421 = vst [vmem:[%s6541_s27 + $0x1d8] sm:$0xff] %v420_v59   ;;  %v428_v61 = vld [vmem:[%s6536_s26 + $0x308] sm:$0xff]   ;;  %v432_v62 = vld [vmem:[%s6536_s26 + $0x310] sm:$0xff]  }
  0x31   : > { %425 = vst [vmem:[%s6541_s27 + $0x1e0] sm:$0xff] %v424_v60   ;;  %429 = vst [vmem:[%s6541_s27 + $0x1e8] sm:$0xff] %v428_v61   ;;  %v436_v63 = vld [vmem:[%s6536_s26 + $0x318] sm:$0xff]   ;;  %v440_v0 = vld [vmem:[%s6536_s26 + $0x320] sm:$0xff]  }
  0x32   : > { %433 = vst [vmem:[%s6541_s27 + $0x1f0] sm:$0xff] %v432_v62   ;;  %v444_v1 = vld [vmem:[%s6536_s26 + $0x328] sm:$0xff]   ;;  %437 = vst [vmem:[%s6541_s27 + $0x1f8] sm:$0xff] %v436_v63   ;;  %v448_v2 = vld [vmem:[%s6536_s26 + $0x330] sm:$0xff]  }
  0x33   : > { %441 = vst [vmem:[%s6541_s27 + $0x200] sm:$0xff] %v440_v0   ;;  %445 = vst [vmem:[%s6541_s27 + $0x208] sm:$0xff] %v444_v1   ;;  %v452_v3 = vld [vmem:[%s6536_s26 + $0x338] sm:$0xff]   ;;  %v456_v4 = vld [vmem:[%s6536_s26 + $0x340] sm:$0xff]  }
  0x34   : > { %449 = vst [vmem:[%s6541_s27 + $0x210] sm:$0xff] %v448_v2   ;;  %453 = vst [vmem:[%s6541_s27 + $0x218] sm:$0xff] %v452_v3   ;;  %v460_v5 = vld [vmem:[%s6536_s26 + $0x348] sm:$0xff]   ;;  %v464_v6 = vld [vmem:[%s6536_s26 + $0x350] sm:$0xff]  }
  0x35   : > { %457 = vst [vmem:[%s6541_s27 + $0x220] sm:$0xff] %v456_v4   ;;  %v468_v7 = vld [vmem:[%s6536_s26 + $0x358] sm:$0xff]   ;;  %461 = vst [vmem:[%s6541_s27 + $0x228] sm:$0xff] %v460_v5   ;;  %v472_v8 = vld [vmem:[%s6536_s26 + $0x480] sm:$0xff]  }
  0x36   : > { %465 = vst [vmem:[%s6541_s27 + $0x230] sm:$0xff] %v464_v6   ;;  %469 = vst [vmem:[%s6541_s27 + $0x238] sm:$0xff] %v468_v7   ;;  %v476_v9 = vld [vmem:[%s6536_s26 + $0x488] sm:$0xff]   ;;  %v480_v10 = vld [vmem:[%s6536_s26 + $0x490] sm:$0xff]  }
  0x37   : > { %473 = vst [vmem:[%s6541_s27 + $0x240] sm:$0xff] %v472_v8   ;;  %477 = vst [vmem:[%s6541_s27 + $0x248] sm:$0xff] %v476_v9   ;;  %v484_v11 = vld [vmem:[%s6536_s26 + $0x498] sm:$0xff]   ;;  %v488_v12 = vld [vmem:[%s6536_s26 + $0x4a0] sm:$0xff]  }
  0x38   : > { %481 = vst [vmem:[%s6541_s27 + $0x250] sm:$0xff] %v480_v10   ;;  %v492_v13 = vld [vmem:[%s6536_s26 + $0x4a8] sm:$0xff]   ;;  %485 = vst [vmem:[%s6541_s27 + $0x258] sm:$0xff] %v484_v11   ;;  %v496_v14 = vld [vmem:[%s6536_s26 + $0x4b0] sm:$0xff]  }
  0x39   : > { %489 = vst [vmem:[%s6541_s27 + $0x260] sm:$0xff] %v488_v12   ;;  %493 = vst [vmem:[%s6541_s27 + $0x268] sm:$0xff] %v492_v13   ;;  %v500_v15 = vld [vmem:[%s6536_s26 + $0x4b8] sm:$0xff]   ;;  %v504_v16 = vld [vmem:[%s6536_s26 + $0x4c0] sm:$0xff]  }
  0x3a   : > { %497 = vst [vmem:[%s6541_s27 + $0x270] sm:$0xff] %v496_v14   ;;  %501 = vst [vmem:[%s6541_s27 + $0x278] sm:$0xff] %v500_v15   ;;  %v508_v17 = vld [vmem:[%s6536_s26 + $0x4c8] sm:$0xff]   ;;  %v512_v18 = vld [vmem:[%s6536_s26 + $0x4d0] sm:$0xff]  }
  0x3b   : > { %505 = vst [vmem:[%s6541_s27 + $0x280] sm:$0xff] %v504_v16   ;;  %v516_v19 = vld [vmem:[%s6536_s26 + $0x4d8] sm:$0xff]   ;;  %509 = vst [vmem:[%s6541_s27 + $0x288] sm:$0xff] %v508_v17   ;;  %v520_v20 = vld [vmem:[%s6536_s26 + $0x4e0] sm:$0xff]  }
  0x3c   : > { %513 = vst [vmem:[%s6541_s27 + $0x290] sm:$0xff] %v512_v18   ;;  %517 = vst [vmem:[%s6541_s27 + $0x298] sm:$0xff] %v516_v19   ;;  %v524_v21 = vld [vmem:[%s6536_s26 + $0x4e8] sm:$0xff]   ;;  %v528_v22 = vld [vmem:[%s6536_s26 + $0x4f0] sm:$0xff]  }
  0x3d   : > { %521 = vst [vmem:[%s6541_s27 + $0x2a0] sm:$0xff] %v520_v20   ;;  %525 = vst [vmem:[%s6541_s27 + $0x2a8] sm:$0xff] %v524_v21   ;;  %v532_v23 = vld [vmem:[%s6536_s26 + $0x4f8] sm:$0xff]   ;;  %v536_v24 = vld [vmem:[%s6536_s26 + $0x500] sm:$0xff]  }
  0x3e   : > { %529 = vst [vmem:[%s6541_s27 + $0x2b0] sm:$0xff] %v528_v22   ;;  %v540_v25 = vld [vmem:[%s6536_s26 + $0x508] sm:$0xff]   ;;  %533 = vst [vmem:[%s6541_s27 + $0x2b8] sm:$0xff] %v532_v23   ;;  %v544_v26 = vld [vmem:[%s6536_s26 + $0x510] sm:$0xff]  }
  0x3f   : > { %537 = vst [vmem:[%s6541_s27 + $0x2c0] sm:$0xff] %v536_v24   ;;  %541 = vst [vmem:[%s6541_s27 + $0x2c8] sm:$0xff] %v540_v25   ;;  %v548_v27 = vld [vmem:[%s6536_s26 + $0x518] sm:$0xff]   ;;  %v552_v28 = vld [vmem:[%s6536_s26 + $0x520] sm:$0xff]  }
  0x40   : > { %545 = vst [vmem:[%s6541_s27 + $0x2d0] sm:$0xff] %v544_v26   ;;  %549 = vst [vmem:[%s6541_s27 + $0x2d8] sm:$0xff] %v548_v27   ;;  %v556_v29 = vld [vmem:[%s6536_s26 + $0x528] sm:$0xff]   ;;  %v560_v30 = vld [vmem:[%s6536_s26 + $0x530] sm:$0xff]  }
  0x41   : > { %553 = vst [vmem:[%s6541_s27 + $0x2e0] sm:$0xff] %v552_v28   ;;  %v564_v31 = vld [vmem:[%s6536_s26 + $0x538] sm:$0xff]   ;;  %557 = vst [vmem:[%s6541_s27 + $0x2e8] sm:$0xff] %v556_v29   ;;  %v568_v32 = vld [vmem:[%s6536_s26 + $0x540] sm:$0xff]  }
  0x42   : > { %561 = vst [vmem:[%s6541_s27 + $0x2f0] sm:$0xff] %v560_v30   ;;  %565 = vst [vmem:[%s6541_s27 + $0x2f8] sm:$0xff] %v564_v31   ;;  %v572_v33 = vld [vmem:[%s6536_s26 + $0x548] sm:$0xff]   ;;  %v576_v34 = vld [vmem:[%s6536_s26 + $0x550] sm:$0xff]  }
  0x43   : > { %569 = vst [vmem:[%s6541_s27 + $0x300] sm:$0xff] %v568_v32   ;;  %573 = vst [vmem:[%s6541_s27 + $0x308] sm:$0xff] %v572_v33   ;;  %v580_v35 = vld [vmem:[%s6536_s26 + $0x558] sm:$0xff]   ;;  %v584_v36 = vld [vmem:[%s6536_s26 + $0x560] sm:$0xff]  }
  0x44   : > { %577 = vst [vmem:[%s6541_s27 + $0x310] sm:$0xff] %v576_v34   ;;  %v588_v37 = vld [vmem:[%s6536_s26 + $0x568] sm:$0xff]   ;;  %581 = vst [vmem:[%s6541_s27 + $0x318] sm:$0xff] %v580_v35   ;;  %v592_v38 = vld [vmem:[%s6536_s26 + $0x570] sm:$0xff]  }
  0x45   : > { %585 = vst [vmem:[%s6541_s27 + $0x320] sm:$0xff] %v584_v36   ;;  %589 = vst [vmem:[%s6541_s27 + $0x328] sm:$0xff] %v588_v37   ;;  %v596_v39 = vld [vmem:[%s6536_s26 + $0x578] sm:$0xff]   ;;  %v600_v40 = vld [vmem:[%s6536_s26 + $0x580] sm:$0xff]  }
  0x46   : > { %593 = vst [vmem:[%s6541_s27 + $0x330] sm:$0xff] %v592_v38   ;;  %597 = vst [vmem:[%s6541_s27 + $0x338] sm:$0xff] %v596_v39   ;;  %v604_v41 = vld [vmem:[%s6536_s26 + $0x588] sm:$0xff]   ;;  %v608_v42 = vld [vmem:[%s6536_s26 + $0x590] sm:$0xff]  }
  0x47   : > { %601 = vst [vmem:[%s6541_s27 + $0x340] sm:$0xff] %v600_v40   ;;  %v612_v43 = vld [vmem:[%s6536_s26 + $0x598] sm:$0xff]   ;;  %605 = vst [vmem:[%s6541_s27 + $0x348] sm:$0xff] %v604_v41   ;;  %v616_v44 = vld [vmem:[%s6536_s26 + $0x6c0] sm:$0xff]  }
  0x48   : > { %609 = vst [vmem:[%s6541_s27 + $0x350] sm:$0xff] %v608_v42   ;;  %613 = vst [vmem:[%s6541_s27 + $0x358] sm:$0xff] %v612_v43   ;;  %v620_v45 = vld [vmem:[%s6536_s26 + $0x6c8] sm:$0xff]   ;;  %v624_v46 = vld [vmem:[%s6536_s26 + $0x6d0] sm:$0xff]  }
  0x49   : > { %617 = vst [vmem:[%s6541_s27 + $0x360] sm:$0xff] %v616_v44   ;;  %621 = vst [vmem:[%s6541_s27 + $0x368] sm:$0xff] %v620_v45   ;;  %v628_v47 = vld [vmem:[%s6536_s26 + $0x6d8] sm:$0xff]   ;;  %v632_v48 = vld [vmem:[%s6536_s26 + $0x6e0] sm:$0xff]  }
  0x4a   : > { %625 = vst [vmem:[%s6541_s27 + $0x370] sm:$0xff] %v624_v46   ;;  %v636_v49 = vld [vmem:[%s6536_s26 + $0x6e8] sm:$0xff]   ;;  %629 = vst [vmem:[%s6541_s27 + $0x378] sm:$0xff] %v628_v47   ;;  %v640_v50 = vld [vmem:[%s6536_s26 + $0x6f0] sm:$0xff]  }
  0x4b   : > { %633 = vst [vmem:[%s6541_s27 + $0x380] sm:$0xff] %v632_v48   ;;  %637 = vst [vmem:[%s6541_s27 + $0x388] sm:$0xff] %v636_v49   ;;  %v644_v51 = vld [vmem:[%s6536_s26 + $0x6f8] sm:$0xff]   ;;  %v648_v52 = vld [vmem:[%s6536_s26 + $0x700] sm:$0xff]  }
  0x4c   : > { %641 = vst [vmem:[%s6541_s27 + $0x390] sm:$0xff] %v640_v50   ;;  %645 = vst [vmem:[%s6541_s27 + $0x398] sm:$0xff] %v644_v51   ;;  %v652_v53 = vld [vmem:[%s6536_s26 + $0x708] sm:$0xff]   ;;  %v656_v54 = vld [vmem:[%s6536_s26 + $0x710] sm:$0xff]  }
  0x4d   : > { %649 = vst [vmem:[%s6541_s27 + $0x3a0] sm:$0xff] %v648_v52   ;;  %v660_v55 = vld [vmem:[%s6536_s26 + $0x718] sm:$0xff]   ;;  %653 = vst [vmem:[%s6541_s27 + $0x3a8] sm:$0xff] %v652_v53   ;;  %v664_v56 = vld [vmem:[%s6536_s26 + $0x720] sm:$0xff]  }
  0x4e   : > { %657 = vst [vmem:[%s6541_s27 + $0x3b0] sm:$0xff] %v656_v54   ;;  %661 = vst [vmem:[%s6541_s27 + $0x3b8] sm:$0xff] %v660_v55   ;;  %v668_v57 = vld [vmem:[%s6536_s26 + $0x728] sm:$0xff]   ;;  %v672_v58 = vld [vmem:[%s6536_s26 + $0x730] sm:$0xff]  }
  0x4f   : > { %665 = vst [vmem:[%s6541_s27 + $0x3c0] sm:$0xff] %v664_v56   ;;  %669 = vst [vmem:[%s6541_s27 + $0x3c8] sm:$0xff] %v668_v57   ;;  %v676_v59 = vld [vmem:[%s6536_s26 + $0x738] sm:$0xff]   ;;  %v680_v60 = vld [vmem:[%s6536_s26 + $0x740] sm:$0xff]  }
  0x50   : > { %673 = vst [vmem:[%s6541_s27 + $0x3d0] sm:$0xff] %v672_v58   ;;  %v684_v61 = vld [vmem:[%s6536_s26 + $0x748] sm:$0xff]   ;;  %677 = vst [vmem:[%s6541_s27 + $0x3d8] sm:$0xff] %v676_v59   ;;  %v688_v62 = vld [vmem:[%s6536_s26 + $0x750] sm:$0xff]  }
  0x51   : > { %681 = vst [vmem:[%s6541_s27 + $0x3e0] sm:$0xff] %v680_v60   ;;  %685 = vst [vmem:[%s6541_s27 + $0x3e8] sm:$0xff] %v684_v61   ;;  %v692_v63 = vld [vmem:[%s6536_s26 + $0x758] sm:$0xff]   ;;  %v696_v0 = vld [vmem:[%s6536_s26 + $0x760] sm:$0xff]  }
  0x52   : > { %689 = vst [vmem:[%s6541_s27 + $0x3f0] sm:$0xff] %v688_v62   ;;  %693 = vst [vmem:[%s6541_s27 + $0x3f8] sm:$0xff] %v692_v63   ;;  %v700_v1 = vld [vmem:[%s6536_s26 + $0x768] sm:$0xff]   ;;  %v704_v2 = vld [vmem:[%s6536_s26 + $0x770] sm:$0xff]  }
  0x53   : > { %697 = vst [vmem:[%s6541_s27 + $0x400] sm:$0xff] %v696_v0   ;;  %v708_v3 = vld [vmem:[%s6536_s26 + $0x778] sm:$0xff]   ;;  %701 = vst [vmem:[%s6541_s27 + $0x408] sm:$0xff] %v700_v1   ;;  %v712_v4 = vld [vmem:[%s6536_s26 + $0x780] sm:$0xff]  }
  0x54   : > { %705 = vst [vmem:[%s6541_s27 + $0x410] sm:$0xff] %v704_v2   ;;  %709 = vst [vmem:[%s6541_s27 + $0x418] sm:$0xff] %v708_v3   ;;  %v716_v5 = vld [vmem:[%s6536_s26 + $0x788] sm:$0xff]   ;;  %v720_v6 = vld [vmem:[%s6536_s26 + $0x790] sm:$0xff]  }
  0x55   : > { %713 = vst [vmem:[%s6541_s27 + $0x420] sm:$0xff] %v712_v4   ;;  %717 = vst [vmem:[%s6541_s27 + $0x428] sm:$0xff] %v716_v5   ;;  %v724_v7 = vld [vmem:[%s6536_s26 + $0x798] sm:$0xff]   ;;  %v728_v8 = vld [vmem:[%s6536_s26 + $0x7a0] sm:$0xff]  }
  0x56   : > { %721 = vst [vmem:[%s6541_s27 + $0x430] sm:$0xff] %v720_v6   ;;  %v732_v9 = vld [vmem:[%s6536_s26 + $0x7a8] sm:$0xff]   ;;  %725 = vst [vmem:[%s6541_s27 + $0x438] sm:$0xff] %v724_v7   ;;  %v736_v10 = vld [vmem:[%s6536_s26 + $0x7b0] sm:$0xff]  }
  0x57   : > { %729 = vst [vmem:[%s6541_s27 + $0x440] sm:$0xff] %v728_v8   ;;  %733 = vst [vmem:[%s6541_s27 + $0x448] sm:$0xff] %v732_v9   ;;  %v740_v11 = vld [vmem:[%s6536_s26 + $0x7b8] sm:$0xff]   ;;  %v744_v12 = vld [vmem:[%s6536_s26 + $0x7c0] sm:$0xff]  }
  0x58   : > { %737 = vst [vmem:[%s6541_s27 + $0x450] sm:$0xff] %v736_v10   ;;  %741 = vst [vmem:[%s6541_s27 + $0x458] sm:$0xff] %v740_v11   ;;  %v748_v13 = vld [vmem:[%s6536_s26 + $0x7c8] sm:$0xff]   ;;  %v752_v14 = vld [vmem:[%s6536_s26 + $0x7d0] sm:$0xff]  }
  0x59   : > { %745 = vst [vmem:[%s6541_s27 + $0x460] sm:$0xff] %v744_v12   ;;  %v756_v15 = vld [vmem:[%s6536_s26 + $0x7d8] sm:$0xff]   ;;  %749 = vst [vmem:[%s6541_s27 + $0x468] sm:$0xff] %v748_v13  }
  0x5a   : > { %753 = vst [vmem:[%s6541_s27 + $0x470] sm:$0xff] %v752_v14   ;;  %757 = vst [vmem:[%s6541_s27 + $0x478] sm:$0xff] %v756_v15  }
  0x5b PF: > { %p5144_p6 = scmp.ge.s32.totalorder %s6470_s16, 1  ;;  %p1357_p7 = scmp.lt.s32.totalorder %s6470_s16, 3 }
  0x5d   : > { %p1358_p8 = pnand %p5144_p6, %p1357_p7 }
  0x5f   : > { %1361 = sbr.rel (%p1358_p8) target bundleno = 621 (0x26d), region = 69 }
  0x66   : > { %v6286_v16 = vld [vmem:[%s8020_s1] sm:$0x1f]   ;;  %vm1783_vm0 = vcmask 1043456   ;;  %vm1784_vm1 = vcmask 1044480   ;;  %s1364_s30 = sand.u32 1, %s6454_s12   ;;  %v6472_v17 = vmov 65535  }
  0x67   : > { %v1785_v18 = vsel %vm1783_vm0, 4294967295, %v6472_v17  ;;  %s6244_s4 = smul.u32 1152, %s1364_s30  ;;  %vm1674_vm2 = vcmask 72704   ;;  %vm4956_vm4 = vcmask 257024  }
  0x68   : > { %v1786_v19 = vsel %vm1784_vm1, %v1785_v18, 0  ;;  %s1405_s6 = smul.u32 72, %s6462_s14 }
  0x69   : > { %v1788_v20 = vand.u32 %v6286_v16, %v1786_v19  ;;  %s6834_s5 = scalar_lea.vmem [#allocation2], %s6244_s4 }
  0x6a   : > { %v6287_v21 = vld [vmem:[%s6834_s5] sm:$0xff]   ;;  %v6289_v23 = vld [vmem:[%s6834_s5 + $0x8] sm:$0xff]   ;;  %v6291_v25 = vld [vmem:[%s6834_s5 + $0x10] sm:$0xff]   ;;  %p1406_p9 = scmp.lt.s32.totalorder %s1405_s6, 143 }
  0x6b   : > { %5947 = vmatprep.subr.bf16.mxu0 %v1788_v20  ;;  %6021 = vmatprep.subr.bf16.mxu1 %v1788_v20  ;;  %v6288_v22 = vld [vmem:[%s6834_s5 + $0x120] sm:$0xff]   ;;  %v6290_v24 = vld [vmem:[%s6834_s5 + $0x128] sm:$0xff]   ;;  %v6292_v26 = vld [vmem:[%s6834_s5 + $0x130] sm:$0xff]  }
  0x6c   : > { %5948 = vmatpush3.bf16.msra.mxu0 %v1788_v20  ;;  %6022 = vmatpush3.bf16.msra.mxu1 %v1788_v20  ;;  %v6293_v27 = vld [vmem:[%s6834_s5 + $0x18] sm:$0xff]   ;;  %v6295_v29 = vld [vmem:[%s6834_s5 + $0x20] sm:$0xff]   ;;  %v6297_v31 = vld [vmem:[%s6834_s5 + $0x28] sm:$0xff]   ;;  %s8393_s6 = smov (!%p1406_p9, %s1405_s6), 143 }
  0x6d   : > { %5949 = vmatprep.mubr.msk.bf16.mxu0 %vm1674_vm2, %v6287_v21  ;;  %6023 = vmatprep.mubr.msk.bf16.mxu1 %vm1674_vm2, %v6288_v22  ;;  %v6294_v28 = vld [vmem:[%s6834_s5 + $0x138] sm:$0xff]   ;;  %v6296_v30 = vld [vmem:[%s6834_s5 + $0x140] sm:$0xff]   ;;  %v6298_v32 = vld [vmem:[%s6834_s5 + $0x148] sm:$0xff]   ;;  %s5145_s9 = sshll.u32 %s8393_s6, 2 }
  0x6e   : > { %6095 = vmatprep.subr.bf16.mxu0 %v1788_v20  ;;  %6169 = vmatprep.subr.bf16.mxu1 %v1788_v20  ;;  %v6299_v33 = vld [vmem:[%s6834_s5 + $0x30] sm:$0xff]   ;;  %v6301_v35 = vld [vmem:[%s6834_s5 + $0x38] sm:$0xff]   ;;  %v6303_v37 = vld [vmem:[%s6834_s5 + $0x40] sm:$0xff]   ;;  %s7581_s12 = scalar_lea.vmem %s8022_s3, %s5145_s9 }
  0x6f   : > { %5950 = vmatmul.mubr.msk.bf16.vlgmr.msra.gmra.mrb[0].mxu0 %vm1674_vm2, %v6289_v23  ;;  %6024 = vmatmul.mubr.msk.bf16.vlgmr.msra.gmra.mrb[0].mxu1 %vm1674_vm2, %v6290_v24  ;;  %v6300_v34 = vld [vmem:[%s6834_s5 + $0x150] sm:$0xff]   ;;  %v6302_v36 = vld [vmem:[%s6834_s5 + $0x158] sm:$0xff]   ;;  %v6304_v38 = vld [vmem:[%s6834_s5 + $0x160] sm:$0xff]  }
  0x70   : > { %6096 = vmatpush3.bf16.msra.mxu0 %v1788_v20  ;;  %6170 = vmatpush3.bf16.msra.mxu1 %v1788_v20  ;;  %v6305_v39 = vld [vmem:[%s6834_s5 + $0x48] sm:$0xff]   ;;  %v6307_v41 = vld [vmem:[%s6834_s5 + $0x50] sm:$0xff]   ;;  %v6309_v43 = vld [vmem:[%s6834_s5 + $0x58] sm:$0xff]  }
  0x71   : > { %5953 = vmatprep.mubr.msk.bf16.mxu0 %vm1674_vm2, %v6291_v25  ;;  %6027 = vmatprep.mubr.msk.bf16.mxu1 %vm1674_vm2, %v6292_v26  ;;  %v6306_v40 = vld [vmem:[%s6834_s5 + $0x168] sm:$0xff]   ;;  %v6308_v42 = vld [vmem:[%s6834_s5 + $0x170] sm:$0xff]   ;;  %v6310_v44 = vld [vmem:[%s6834_s5 + $0x178] sm:$0xff]  }
  0x72   : > { %v6311_v45 = vld [vmem:[%s6834_s5 + $0x60] sm:$0xff]   ;;  %v6313_v47 = vld [vmem:[%s6834_s5 + $0x68] sm:$0xff]   ;;  %v6315_v49 = vld [vmem:[%s6834_s5 + $0x70] sm:$0xff]  }
  0x73   : > { %v6312_v46 = vld [vmem:[%s6834_s5 + $0x180] sm:$0xff]   ;;  %v6314_v48 = vld [vmem:[%s6834_s5 + $0x188] sm:$0xff]   ;;  %v6316_v50 = vld [vmem:[%s6834_s5 + $0x190] sm:$0xff]  }
  0x74   : > { %v6317_v51 = vld [vmem:[%s6834_s5 + $0x78] sm:$0xff]   ;;  %v6319_v53 = vld [vmem:[%s6834_s5 + $0x80] sm:$0xff]   ;;  %v6321_v55 = vld [vmem:[%s6834_s5 + $0x88] sm:$0xff]  }
  0x75   : > { %v6318_v52 = vld [vmem:[%s6834_s5 + $0x198] sm:$0xff]   ;;  %v6320_v54 = vld [vmem:[%s6834_s5 + $0x1a0] sm:$0xff]   ;;  %v6322_v56 = vld [vmem:[%s6834_s5 + $0x1a8] sm:$0xff]  }
  0x76   : > { %v6323_v57 = vld [vmem:[%s6834_s5 + $0x90] sm:$0xff]   ;;  %v6325_v59 = vld [vmem:[%s6834_s5 + $0x98] sm:$0xff]   ;;  %v6327_v61 = vld [vmem:[%s6834_s5 + $0xa0] sm:$0xff]  }
  0x77   : > { %5954 = vmatmul.mubr.msk.bf16.gmra.mrb[4].mxu0 %vm1674_vm2, %v6293_v27  ;;  %6028 = vmatmul.mubr.msk.bf16.gmra.mrb[4].mxu1 %vm1674_vm2, %v6294_v28  ;;  %v6324_v58 = vld [vmem:[%s6834_s5 + $0x1b0] sm:$0xff]   ;;  %v6326_v60 = vld [vmem:[%s6834_s5 + $0x1b8] sm:$0xff]   ;;  %v6328_v62 = vld [vmem:[%s6834_s5 + $0x1c0] sm:$0xff]  }
  0x78   : > { %5957 = vmatprep.mubr.msk.bf16.mxu0 %vm1674_vm2, %v6295_v29  ;;  %6031 = vmatprep.mubr.msk.bf16.mxu1 %vm1674_vm2, %v6296_v30  ;;  %v6329_v63 = vld [vmem:[%s6834_s5 + $0xa8] sm:$0xff]   ;;  %v6331_v1 = vld [vmem:[%s6834_s5 + $0xb0] sm:$0xff]   ;;  %v6333_v3 = vld [vmem:[%s6834_s5 + $0xb8] sm:$0xff]  }
  0x79   : > { %v6330_v0 = vld [vmem:[%s6834_s5 + $0x1c8] sm:$0xff]   ;;  %v6332_v2 = vld [vmem:[%s6834_s5 + $0x1d0] sm:$0xff]   ;;  %v6334_v4 = vld [vmem:[%s6834_s5 + $0x1d8] sm:$0xff]  }
  0x7a   : > { %v6335_v5 = vld [vmem:[%s6834_s5 + $0xc0] sm:$0xff]   ;;  %v6337_v7 = vld [vmem:[%s6834_s5 + $0xc8] sm:$0xff]   ;;  %v6339_v9 = vld [vmem:[%s6834_s5 + $0xd0] sm:$0xff]  }
  0x7b   : > { %v6336_v6 = vld [vmem:[%s6834_s5 + $0x1e0] sm:$0xff]   ;;  %v6338_v8 = vld [vmem:[%s6834_s5 + $0x1e8] sm:$0xff]   ;;  %v6340_v10 = vld [vmem:[%s6834_s5 + $0x1f0] sm:$0xff]  }
  0x7c   : > { %v6341_v11 = vld [vmem:[%s6834_s5 + $0xd8] sm:$0xff]   ;;  %v6343_v13 = vld [vmem:[%s6834_s5 + $0xe0] sm:$0xff]   ;;  %v6345_v15 = vld [vmem:[%s6834_s5 + $0xe8] sm:$0xff]  }
  0x7d   : > { %v6342_v12 = vld [vmem:[%s6834_s5 + $0x1f8] sm:$0xff]   ;;  %v6344_v14 = vld [vmem:[%s6834_s5 + $0x200] sm:$0xff]   ;;  %v6346_v16 = vld [vmem:[%s6834_s5 + $0x208] sm:$0xff]  }
  0x7e   : > { %v6347_v17 = vld [vmem:[%s6834_s5 + $0xf0] sm:$0xff]   ;;  %v6349_v19 = vld [vmem:[%s6834_s5 + $0xf8] sm:$0xff]   ;;  %v6351_v21 = vld [vmem:[%s6834_s5 + $0x100] sm:$0xff]  }
  0x7f   : > { %5958 = vmatmul.mubr.msk.bf16.gmra.mrb[8].mxu0 %vm1674_vm2, %v6297_v31  ;;  %6032 = vmatmul.mubr.msk.bf16.gmra.mrb[8].mxu1 %vm1674_vm2, %v6298_v32  ;;  %v6348_v18 = vld [vmem:[%s6834_s5 + $0x210] sm:$0xff]   ;;  %v6350_v20 = vld [vmem:[%s6834_s5 + $0x218] sm:$0xff]   ;;  %v6352_v22 = vld [vmem:[%s6834_s5 + $0x220] sm:$0xff]  }
  0x80   : > { %5961 = vmatprep.mubr.msk.bf16.mxu0 %vm1674_vm2, %v6299_v33  ;;  %6035 = vmatprep.mubr.msk.bf16.mxu1 %vm1674_vm2, %v6300_v34  ;;  %v6353_v23 = vld [vmem:[%s6834_s5 + $0x108] sm:$0xff]   ;;  %v6355_v25 = vld [vmem:[%s6834_s5 + $0x110] sm:$0xff]   ;;  %v6357_v27 = vld [vmem:[%s6834_s5 + $0x118] sm:$0xff]  }
  0x81   : > { %v6354_v24 = vld [vmem:[%s6834_s5 + $0x228] sm:$0xff]   ;;  %v6356_v26 = vld [vmem:[%s6834_s5 + $0x230] sm:$0xff]   ;;  %v6358_v28 = vld [vmem:[%s6834_s5 + $0x238] sm:$0xff]  }
  0x82   : > { %v6359_v29 = vld [vmem:[%s6834_s5 + $0x240] sm:$0xff]   ;;  %v6361_v31 = vld [vmem:[%s6834_s5 + $0x248] sm:$0xff]   ;;  %v6363_v33 = vld [vmem:[%s6834_s5 + $0x250] sm:$0xff]  }
  0x83   : > { %v6360_v30 = vld [vmem:[%s6834_s5 + $0x360] sm:$0xff]   ;;  %v6362_v32 = vld [vmem:[%s6834_s5 + $0x368] sm:$0xff]   ;;  %v6364_v34 = vld [vmem:[%s6834_s5 + $0x370] sm:$0xff]  }
  0x87   : > { %5962 = vmatmul.mubr.msk.bf16.gmra.mrb[12].mxu0 %vm1674_vm2, %v6301_v35  ;;  %6036 = vmatmul.mubr.msk.bf16.gmra.mrb[12].mxu1 %vm1674_vm2, %v6302_v36  ;;  %v6365_v35 = vld [vmem:[%s6834_s5 + $0x258] sm:$0xff]  }
  0x88   : > { %5965 = vmatprep.mubr.msk.bf16.mxu0 %vm1674_vm2, %v6303_v37  ;;  %6039 = vmatprep.mubr.msk.bf16.mxu1 %vm1674_vm2, %v6304_v38  ;;  %v6366_v36 = vld [vmem:[%s6834_s5 + $0x378] sm:$0xff]   ;;  %v6367_v37 = vld [vmem:[%s6834_s5 + $0x260] sm:$0xff]  }
  0x89   : > { %v6368_v38 = vld [vmem:[%s6834_s5 + $0x380] sm:$0xff]  }
  0x8f   : > { %5966 = vmatmul.mubr.msk.bf16.gmra.mrb[16].mxu0 %vm1674_vm2, %v6305_v39  ;;  %6040 = vmatmul.mubr.msk.bf16.gmra.mrb[16].mxu1 %vm1674_vm2, %v6306_v40  ;;  %v6369_v39 = vld [vmem:[%s6834_s5 + $0x268] sm:$0xff]  }
  0x90   : > { %5969 = vmatprep.mubr.msk.bf16.mxu0 %vm1674_vm2, %v6307_v41  ;;  %6043 = vmatprep.mubr.msk.bf16.mxu1 %vm1674_vm2, %v6308_v42  ;;  %v6370_v40 = vld [vmem:[%s6834_s5 + $0x388] sm:$0xff]   ;;  %v6371_v41 = vld [vmem:[%s6834_s5 + $0x270] sm:$0xff]  }
  0x91   : > { %v6372_v42 = vld [vmem:[%s6834_s5 + $0x390] sm:$0xff]  }
  0x97   : > { %5970 = vmatmul.mubr.msk.bf16.gmra.mrb[20].mxu0 %vm1674_vm2, %v6309_v43  ;;  %6044 = vmatmul.mubr.msk.bf16.gmra.mrb[20].mxu1 %vm1674_vm2, %v6310_v44  ;;  %v6373_v43 = vld [vmem:[%s6834_s5 + $0x278] sm:$0xff]  }
  0x98   : > { %5973 = vmatprep.mubr.msk.bf16.mxu0 %vm1674_vm2, %v6311_v45  ;;  %6047 = vmatprep.mubr.msk.bf16.mxu1 %vm1674_vm2, %v6312_v46  ;;  %v6374_v44 = vld [vmem:[%s6834_s5 + $0x398] sm:$0xff]   ;;  %v6375_v45 = vld [vmem:[%s6834_s5 + $0x280] sm:$0xff]  }
  0x99   : > { %v6376_v46 = vld [vmem:[%s6834_s5 + $0x3a0] sm:$0xff]  }
  0x9f   : > { %5974 = vmatmul.mubr.msk.bf16.gmra.mrb[24].mxu0 %vm1674_vm2, %v6313_v47  ;;  %6048 = vmatmul.mubr.msk.bf16.gmra.mrb[24].mxu1 %vm1674_vm2, %v6314_v48  ;;  %v6377_v47 = vld [vmem:[%s6834_s5 + $0x288] sm:$0xff]  }
  0xa0   : > { %5977 = vmatprep.mubr.msk.bf16.mxu0 %vm1674_vm2, %v6315_v49  ;;  %6051 = vmatprep.mubr.msk.bf16.mxu1 %vm1674_vm2, %v6316_v50  ;;  %v6378_v48 = vld [vmem:[%s6834_s5 + $0x3a8] sm:$0xff]   ;;  %v6379_v49 = vld [vmem:[%s6834_s5 + $0x290] sm:$0xff]  }
  0xa1   : > { %v6380_v50 = vld [vmem:[%s6834_s5 + $0x3b0] sm:$0xff]  }
  0xa7   : > { %5978 = vmatmul.mubr.msk.bf16.gmra.mrb[28].mxu0 %vm1674_vm2, %v6317_v51  ;;  %6052 = vmatmul.mubr.msk.bf16.gmra.mrb[28].mxu1 %vm1674_vm2, %v6318_v52  ;;  %v6381_v51 = vld [vmem:[%s6834_s5 + $0x298] sm:$0xff]  }
  0xa8   : > { %5981 = vmatprep.mubr.msk.bf16.mxu0 %vm1674_vm2, %v6319_v53  ;;  %6055 = vmatprep.mubr.msk.bf16.mxu1 %vm1674_vm2, %v6320_v54  ;;  %v6382_v52 = vld [vmem:[%s6834_s5 + $0x3b8] sm:$0xff]   ;;  %v6383_v53 = vld [vmem:[%s6834_s5 + $0x2a0] sm:$0xff]  }
  0xa9   : > { %v6384_v54 = vld [vmem:[%s6834_s5 + $0x3c0] sm:$0xff]  }
  0xaf   : > { %5982 = vmatmul.mubr.msk.bf16.gmra.mrb[32].mxu0 %vm1674_vm2, %v6321_v55  ;;  %6056 = vmatmul.mubr.msk.bf16.gmra.mrb[32].mxu1 %vm1674_vm2, %v6322_v56  ;;  %v6385_v55 = vld [vmem:[%s6834_s5 + $0x2a8] sm:$0xff]  }
  0xb0   : > { %5985 = vmatprep.mubr.msk.bf16.mxu0 %vm1674_vm2, %v6323_v57  ;;  %6059 = vmatprep.mubr.msk.bf16.mxu1 %vm1674_vm2, %v6324_v58  ;;  %v6386_v56 = vld [vmem:[%s6834_s5 + $0x3c8] sm:$0xff]   ;;  %v6387_v57 = vld [vmem:[%s6834_s5 + $0x2b0] sm:$0xff]  }
  0xb1   : > { %v6388_v58 = vld [vmem:[%s6834_s5 + $0x3d0] sm:$0xff]  }
  0xb7   : > { %5986 = vmatmul.mubr.msk.bf16.gmra.mrb[36].mxu0 %vm1674_vm2, %v6325_v59  ;;  %6060 = vmatmul.mubr.msk.bf16.gmra.mrb[36].mxu1 %vm1674_vm2, %v6326_v60  ;;  %v6389_v59 = vld [vmem:[%s6834_s5 + $0x2b8] sm:$0xff]  }
  0xb8   : > { %5989 = vmatprep.mubr.msk.bf16.mxu0 %vm1674_vm2, %v6327_v61  ;;  %6063 = vmatprep.mubr.msk.bf16.mxu1 %vm1674_vm2, %v6328_v62  ;;  %v6390_v60 = vld [vmem:[%s6834_s5 + $0x3d8] sm:$0xff]   ;;  %v6391_v61 = vld [vmem:[%s6834_s5 + $0x2c0] sm:$0xff]  }
  0xb9   : > { %v6392_v62 = vld [vmem:[%s6834_s5 + $0x3e0] sm:$0xff]  }
  0xbf   : > { %5990 = vmatmul.mubr.msk.bf16.gmra.mrb[40].mxu0 %vm1674_vm2, %v6329_v63  ;;  %6064 = vmatmul.mubr.msk.bf16.gmra.mrb[40].mxu1 %vm1674_vm2, %v6330_v0  ;;  %v6393_v63 = vld [vmem:[%s6834_s5 + $0x2c8] sm:$0xff]  }
  0xc0   : > { %5993 = vmatprep.mubr.msk.bf16.mxu0 %vm1674_vm2, %v6331_v1  ;;  %6067 = vmatprep.mubr.msk.bf16.mxu1 %vm1674_vm2, %v6332_v2  ;;  %v6394_v0 = vld [vmem:[%s6834_s5 + $0x3e8] sm:$0xff]   ;;  %v6395_v1 = vld [vmem:[%s6834_s5 + $0x2d0] sm:$0xff]  }
  0xc1   : > { %v6396_v2 = vld [vmem:[%s6834_s5 + $0x3f0] sm:$0xff]  }
  0xc7   : > { %5994 = vmatmul.mubr.msk.bf16.gmra.mrb[44].mxu0 %vm1674_vm2, %v6333_v3  ;;  %6068 = vmatmul.mubr.msk.bf16.gmra.mrb[44].mxu1 %vm1674_vm2, %v6334_v4 }
  0xc8   : > { %5997 = vmatprep.mubr.msk.bf16.mxu0 %vm1674_vm2, %v6335_v5  ;;  %6071 = vmatprep.mubr.msk.bf16.mxu1 %vm1674_vm2, %v6336_v6 }
  0xcf   : > { %5998 = vmatmul.mubr.msk.bf16.gmra.mrb[48].mxu0 %vm1674_vm2, %v6337_v7  ;;  %6072 = vmatmul.mubr.msk.bf16.gmra.mrb[48].mxu1 %vm1674_vm2, %v6338_v8  ;;  %v6397_v8 = vld [vmem:[%s6834_s5 + $0x2d8] sm:$0xff]  }
  0xd0   : > { %6001 = vmatprep.mubr.msk.bf16.mxu0 %vm1674_vm2, %v6339_v9  ;;  %6075 = vmatprep.mubr.msk.bf16.mxu1 %vm1674_vm2, %v6340_v10  ;;  %v6398_v9 = vld [vmem:[%s6834_s5 + $0x3f8] sm:$0xff]   ;;  %v6425_v10 = vld [vmem:[%s6834_s5 + $0x348] sm:$0xff]  }
  0xd7   : > { %6002 = vmatmul.mubr.msk.bf16.gmra.mrb[52].mxu0 %vm1674_vm2, %v6341_v11  ;;  %6076 = vmatmul.mubr.msk.bf16.gmra.mrb[52].mxu1 %vm1674_vm2, %v6342_v12 }
  0xd8   : > { %6005 = vmatprep.mubr.msk.bf16.mxu0 %vm1674_vm2, %v6343_v13  ;;  %6079 = vmatprep.mubr.msk.bf16.mxu1 %vm1674_vm2, %v6344_v14  ;;  %v6399_v13 = vld [vmem:[%s6834_s5 + $0x2e0] sm:$0xff]  }
  0xd9   : > { %v6400_v14 = vld [vmem:[%s6834_s5 + $0x400] sm:$0xff]  }
  0xdf   : > { %6006 = vmatmul.mubr.msk.bf16.gmra.mrb[56].mxu0 %vm1674_vm2, %v6345_v15  ;;  %6080 = vmatmul.mubr.msk.bf16.gmra.mrb[56].mxu1 %vm1674_vm2, %v6346_v16 }
  0xe0   : > { %6009 = vmatprep.mubr.msk.bf16.mxu0 %vm1674_vm2, %v6347_v17  ;;  %6083 = vmatprep.mubr.msk.bf16.mxu1 %vm1674_vm2, %v6348_v18 }
  0xe7   : > { %6010 = vmatmul.mubr.msk.bf16.gmra.mrb[60].mxu0 %vm1674_vm2, %v6349_v19  ;;  %6084 = vmatmul.mubr.msk.bf16.gmra.mrb[60].mxu1 %vm1674_vm2, %v6350_v20 }
  0xe8   : > { %6013 = vmatprep.mubr.msk.bf16.mxu0 %vm1674_vm2, %v6351_v21  ;;  %6087 = vmatprep.mubr.msk.bf16.mxu1 %vm1674_vm2, %v6352_v22  ;;  %v6424_v21 = vld [vmem:[%s6834_s5 + $0x460] sm:$0xff]  }
  0xef   : > { %6014 = vmatmul.mubr.msk.bf16.gmra.mrb[64].mxu0 %vm1674_vm2, %v6353_v23  ;;  %6088 = vmatmul.mubr.msk.bf16.gmra.mrb[64].mxu1 %vm1674_vm2, %v6354_v24  ;;  %v6401_v24 = vld [vmem:[%s6834_s5 + $0x2e8] sm:$0xff]  }
  0xf0   : > { %6017 = vmatprep.mubr.msk.bf16.mxu0 %vm1674_vm2, %v6355_v25  ;;  %6091 = vmatprep.mubr.msk.bf16.mxu1 %vm1674_vm2, %v6356_v26  ;;  %v6402_v25 = vld [vmem:[%s6834_s5 + $0x408] sm:$0xff]   ;;  %v6422_v26 = vld [vmem:[%s6834_s5 + $0x458] sm:$0xff]  }
  0xf7   : > { %6018 = vmatmul.mubr.msk.bf16.gmra.mrb[68].mxu0 %vm1674_vm2, %v6357_v27  ;;  %6092 = vmatmul.mubr.msk.bf16.gmra.mrb[68].mxu1 %vm1674_vm2, %v6358_v28 }
  0xf8   : > { %6097 = vmatprep.mubr.msk.bf16.mxu0 %vm1674_vm2, %v6359_v29  ;;  %6171 = vmatprep.mubr.msk.bf16.mxu1 %vm1674_vm2, %v6360_v30  ;;  %v6403_v29 = vld [vmem:[%s6834_s5 + $0x2f0] sm:$0xff]  }
  0xf9   : > { %v6404_v30 = vld [vmem:[%s6834_s5 + $0x410] sm:$0xff]  }
  0xff   : > { %6098 = vmatmul.mubr.msk.bf16.vlgmr.msra.gmra.mrb[72].mxu0 %vm1674_vm2, %v6361_v31  ;;  %6172 = vmatmul.mubr.msk.bf16.vlgmr.msra.gmra.mrb[72].mxu1 %vm1674_vm2, %v6362_v32 }
 0x100   : > { %6101 = vmatprep.mubr.msk.bf16.mxu0 %vm1674_vm2, %v6363_v33  ;;  %6175 = vmatprep.mubr.msk.bf16.mxu1 %vm1674_vm2, %v6364_v34 }
 0x107   : > { %6102 = vmatmul.mubr.msk.bf16.gmra.mrb[76].mxu0 %vm1674_vm2, %v6365_v35  ;;  %6176 = vmatmul.mubr.msk.bf16.gmra.mrb[76].mxu1 %vm1674_vm2, %v6366_v36 }
 0x108   : > { %6105 = vmatprep.mubr.msk.bf16.mxu0 %vm1674_vm2, %v6367_v37  ;;  %6179 = vmatprep.mubr.msk.bf16.mxu1 %vm1674_vm2, %v6368_v38 }
 0x10f   : > { %6106 = vmatmul.mubr.msk.bf16.gmra.mrb[80].mxu0 %vm1674_vm2, %v6369_v39  ;;  %6180 = vmatmul.mubr.msk.bf16.gmra.mrb[80].mxu1 %vm1674_vm2, %v6370_v40  ;;  %v6405_v40 = vld [vmem:[%s6834_s5 + $0x2f8] sm:$0xff]  }
 0x110   : > { %6109 = vmatprep.mubr.msk.bf16.mxu0 %vm1674_vm2, %v6371_v41  ;;  %6183 = vmatprep.mubr.msk.bf16.mxu1 %vm1674_vm2, %v6372_v42  ;;  %v6406_v41 = vld [vmem:[%s6834_s5 + $0x418] sm:$0xff]  }
 0x111   : > { %v6421_v42 = vld [vmem:[%s6834_s5 + $0x338] sm:$0xff]  }
 0x117   : > { %6110 = vmatmul.mubr.msk.bf16.gmra.mrb[84].mxu0 %vm1674_vm2, %v6373_v43  ;;  %6184 = vmatmul.mubr.msk.bf16.gmra.mrb[84].mxu1 %vm1674_vm2, %v6374_v44 }
 0x118   : > { %6113 = vmatprep.mubr.msk.bf16.mxu0 %vm1674_vm2, %v6375_v45  ;;  %6187 = vmatprep.mubr.msk.bf16.mxu1 %vm1674_vm2, %v6376_v46  ;;  %v6407_v45 = vld [vmem:[%s6834_s5 + $0x300] sm:$0xff]  }
 0x119   : > { %v6408_v46 = vld [vmem:[%s6834_s5 + $0x420] sm:$0xff]  }
 0x11f   : > { %6114 = vmatmul.mubr.msk.bf16.gmra.mrb[88].mxu0 %vm1674_vm2, %v6377_v47  ;;  %6188 = vmatmul.mubr.msk.bf16.gmra.mrb[88].mxu1 %vm1674_vm2, %v6378_v48 }
 0x120   : > { %6117 = vmatprep.mubr.msk.bf16.mxu0 %vm1674_vm2, %v6379_v49  ;;  %6191 = vmatprep.mubr.msk.bf16.mxu1 %vm1674_vm2, %v6380_v50 }
 0x127   : > { %6118 = vmatmul.mubr.msk.bf16.gmra.mrb[92].mxu0 %vm1674_vm2, %v6381_v51  ;;  %6192 = vmatmul.mubr.msk.bf16.gmra.mrb[92].mxu1 %vm1674_vm2, %v6382_v52 }
 0x128   : > { %6121 = vmatprep.mubr.msk.bf16.mxu0 %vm1674_vm2, %v6383_v53  ;;  %6195 = vmatprep.mubr.msk.bf16.mxu1 %vm1674_vm2, %v6384_v54  ;;  %v6420_v53 = vld [vmem:[%s6834_s5 + $0x450] sm:$0xff]  }
 0x12f   : > { %6122 = vmatmul.mubr.msk.bf16.gmra.mrb[96].mxu0 %vm1674_vm2, %v6385_v55  ;;  %6196 = vmatmul.mubr.msk.bf16.gmra.mrb[96].mxu1 %vm1674_vm2, %v6386_v56  ;;  %v6409_v56 = vld [vmem:[%s6834_s5 + $0x308] sm:$0xff]  }
 0x130   : > { %6125 = vmatprep.mubr.msk.bf16.mxu0 %vm1674_vm2, %v6387_v57  ;;  %6199 = vmatprep.mubr.msk.bf16.mxu1 %vm1674_vm2, %v6388_v58  ;;  %v6410_v57 = vld [vmem:[%s6834_s5 + $0x428] sm:$0xff]  }
 0x131   : > { %v6418_v58 = vld [vmem:[%s6834_s5 + $0x448] sm:$0xff]  }
 0x137   : > { %6126 = vmatmul.mubr.msk.bf16.gmra.mrb[100].mxu0 %vm1674_vm2, %v6389_v59  ;;  %6200 = vmatmul.mubr.msk.bf16.gmra.mrb[100].mxu1 %vm1674_vm2, %v6390_v60 }
 0x138   : > { %6129 = vmatprep.mubr.msk.bf16.mxu0 %vm1674_vm2, %v6391_v61  ;;  %6203 = vmatprep.mubr.msk.bf16.mxu1 %vm1674_vm2, %v6392_v62  ;;  %v6411_v61 = vld [vmem:[%s6834_s5 + $0x310] sm:$0xff]  }
 0x139   : > { %v6412_v62 = vld [vmem:[%s6834_s5 + $0x430] sm:$0xff]  }
 0x13f   : > { %6130 = vmatmul.mubr.msk.bf16.gmra.mrb[104].mxu0 %vm1674_vm2, %v6393_v63  ;;  %6204 = vmatmul.mubr.msk.bf16.gmra.mrb[104].mxu1 %vm1674_vm2, %v6394_v0 }
 0x140   : > { %6133 = vmatprep.mubr.msk.bf16.mxu0 %vm1674_vm2, %v6395_v1  ;;  %6207 = vmatprep.mubr.msk.bf16.mxu1 %vm1674_vm2, %v6396_v2 }
 0x142   : > { %v7056_v3 = vpop.f32.mrb[0].mxu0  ;;  %v7058_v4 = vpop.f32.mrb[0].mxu1 }
 0x143   : > { %v7062_v6 = vpop.f32.mrb[1].mxu0  ;;  %v7064_v7 = vpop.f32.mrb[1].mxu1 }
 0x144   : > { %v7070_v11 = vpop.f32.mrb[2].mxu0  ;;  %v7072_v12 = vpop.f32.mrb[2].mxu1 }
 0x145   : > { %v7078_v16 = vpop.f32.mrb[3].mxu0  ;;  %v7080_v17 = vpop.f32.mrb[3].mxu1 }
 0x147   : > { %6134 = vmatmul.mubr.msk.bf16.gmra.mrb[108].mxu0 %vm1674_vm2, %v6397_v8  ;;  %6208 = vmatmul.mubr.msk.bf16.gmra.mrb[108].mxu1 %vm1674_vm2, %v6398_v9 }
 0x148   : > { %6137 = vmatprep.mubr.msk.bf16.mxu0 %vm1674_vm2, %v6399_v13  ;;  %6211 = vmatprep.mubr.msk.bf16.mxu1 %vm1674_vm2, %v6400_v14 }
 0x14a   : > { %v7088_v19 = vpop.f32.mrb[4].mxu0  ;;  %v7090_v20 = vpop.f32.mrb[4].mxu1 }
 0x14b   : > { %v7094_v22 = vpop.f32.mrb[5].mxu0  ;;  %v7096_v23 = vpop.f32.mrb[5].mxu1 }
 0x14c   : > { %v7102_v27 = vpop.f32.mrb[6].mxu0  ;;  %v7104_v28 = vpop.f32.mrb[6].mxu1 }
 0x14d   : > { %v7110_v32 = vpop.f32.mrb[7].mxu0  ;;  %v7112_v33 = vpop.f32.mrb[7].mxu1 }
 0x14f   : > { %6138 = vmatmul.mubr.msk.bf16.gmra.mrb[112].mxu0 %vm1674_vm2, %v6401_v24  ;;  %6212 = vmatmul.mubr.msk.bf16.gmra.mrb[112].mxu1 %vm1674_vm2, %v6402_v25  ;;  %v6413_v25 = vld [vmem:[%s6834_s5 + $0x318] sm:$0xff]  }
 0x150   : > { %6141 = vmatprep.mubr.msk.bf16.mxu0 %vm1674_vm2, %v6403_v29  ;;  %6215 = vmatprep.mubr.msk.bf16.mxu1 %vm1674_vm2, %v6404_v30  ;;  %v6414_v29 = vld [vmem:[%s6834_s5 + $0x438] sm:$0xff]  }
 0x152   : > { %v7120_v35 = vpop.f32.mrb[8].mxu0  ;;  %v7122_v36 = vpop.f32.mrb[8].mxu1 }
 0x153   : > { %v7126_v38 = vpop.f32.mrb[9].mxu0  ;;  %v7128_v39 = vpop.f32.mrb[9].mxu1 }
 0x154   : > { %v7134_v43 = vpop.f32.mrb[10].mxu0  ;;  %v7136_v44 = vpop.f32.mrb[10].mxu1 }
 0x155   : > { %v7142_v48 = vpop.f32.mrb[11].mxu0  ;;  %v7144_v49 = vpop.f32.mrb[11].mxu1 }
 0x157   : > { %6142 = vmatmul.mubr.msk.bf16.gmra.mrb[116].mxu0 %vm1674_vm2, %v6405_v40  ;;  %6216 = vmatmul.mubr.msk.bf16.gmra.mrb[116].mxu1 %vm1674_vm2, %v6406_v41 }
 0x158   : > { %6145 = vmatprep.mubr.msk.bf16.mxu0 %vm1674_vm2, %v6407_v45  ;;  %6219 = vmatprep.mubr.msk.bf16.mxu1 %vm1674_vm2, %v6408_v46  ;;  %v6415_v45 = vld [vmem:[%s6834_s5 + $0x320] sm:$0xff]  }
 0x159   : > { %v6416_v46 = vld [vmem:[%s6834_s5 + $0x440] sm:$0xff]  }
 0x15a   : > { %v7152_v51 = vpop.f32.mrb[12].mxu0  ;;  %v7154_v52 = vpop.f32.mrb[12].mxu1 }
 0x15b   : > { %v7158_v54 = vpop.f32.mrb[13].mxu0  ;;  %v7160_v55 = vpop.f32.mrb[13].mxu1 }
 0x15c   : > { %v7166_v59 = vpop.f32.mrb[14].mxu0  ;;  %v7168_v60 = vpop.f32.mrb[14].mxu1 }
 0x15d   : > { %v7174_v0 = vpop.f32.mrb[15].mxu0  ;;  %v7176_v1 = vpop.f32.mrb[15].mxu1 }
 0x15f   : > { %6146 = vmatmul.mubr.msk.bf16.gmra.mrb[120].mxu0 %vm1674_vm2, %v6409_v56  ;;  %6220 = vmatmul.mubr.msk.bf16.gmra.mrb[120].mxu1 %vm1674_vm2, %v6410_v57 }
 0x160   : > { %6149 = vmatprep.mubr.msk.bf16.mxu0 %vm1674_vm2, %v6411_v61  ;;  %6223 = vmatprep.mubr.msk.bf16.mxu1 %vm1674_vm2, %v6412_v62  ;;  %v6417_v62 = vld [vmem:[%s6834_s5 + $0x328] sm:$0xff]  }
 0x162   : > { %v7184_v8 = vpop.f32.mrb[16].mxu0  ;;  %v7186_v9 = vpop.f32.mrb[16].mxu1 }
 0x163   : > { %v7190_v14 = vpop.f32.mrb[17].mxu0  ;;  %v7192_v24 = vpop.f32.mrb[17].mxu1 }
 0x164   : > { %v7198_v40 = vpop.f32.mrb[18].mxu0  ;;  %v7200_v41 = vpop.f32.mrb[18].mxu1 }
 0x165   : > { %v7206_v57 = vpop.f32.mrb[19].mxu0  ;;  %v7208_v61 = vpop.f32.mrb[19].mxu1 }
 0x167   : > { %6150 = vmatmul.mubr.msk.bf16.gmra.mrb[124].mxu0 %vm1674_vm2, %v6413_v25  ;;  %6224 = vmatmul.mubr.msk.bf16.gmra.mrb[124].mxu1 %vm1674_vm2, %v6414_v29 }
 0x168   : > { %6153 = vmatprep.mubr.msk.bf16.mxu0 %vm1674_vm2, %v6415_v45  ;;  %6227 = vmatprep.mubr.msk.bf16.mxu1 %vm1674_vm2, %v6416_v46  ;;  %v6419_v46 = vld [vmem:[%s6834_s5 + $0x330] sm:$0xff]  }
 0x16a   : > { %v7216_v30 = vpop.f32.mrb[20].mxu0  ;;  %v7218_v56 = vpop.f32.mrb[20].mxu1 }
 0x16b   : > { %v7222_v2 = vpop.f32.mrb[21].mxu0  ;;  %v7224_v63 = vpop.f32.mrb[21].mxu1 }
 0x16c   : > { %v7230_v29 = vpop.f32.mrb[22].mxu0  ;;  %v7232_v45 = vpop.f32.mrb[22].mxu1 }
 0x16d   : > { %v7238_v50 = vpop.f32.mrb[23].mxu0  ;;  %v7240_v47 = vpop.f32.mrb[23].mxu1 }
 0x16e   : > { %8120 = vst [vmem:[#allocation3_spill] sm:$0xff] %v7240_v47  ;;  %v8219_v47 = vmax.f32 %v7070_v11, %v7072_v12 }
 0x16f   : > { %6154 = vmatmul.mubr.msk.bf16.gmra.mrb[128].mxu0 %vm1674_vm2, %v6417_v62  ;;  %6228 = vmatmul.mubr.msk.bf16.gmra.mrb[128].mxu1 %vm1674_vm2, %v6418_v58 }
 0x170   : > { %6157 = vmatprep.mubr.msk.bf16.mxu0 %vm1674_vm2, %v6419_v46  ;;  %6231 = vmatprep.mubr.msk.bf16.mxu1 %vm1674_vm2, %v6420_v53  ;;  %v6423_v53 = vld [vmem:[%s6834_s5 + $0x340] sm:$0xff]  }
 0x172   : > { %v7248_v25 = vpop.f32.mrb[24].mxu0  ;;  %v7250_v13 = vpop.f32.mrb[24].mxu1 }
 0x173   : > { %8121 = vst [vmem:[#allocation4_spill] sm:$0xff] %v7248_v25  ;;  %8122 = vst [vmem:[#allocation5_spill] sm:$0xff] %v7250_v13  ;;  %v7254_v34 = vpop.f32.mrb[25].mxu0  ;;  %v7256_v31 = vpop.f32.mrb[25].mxu1 }
 0x174   : > { %8123 = vst [vmem:[#allocation6_spill] sm:$0xff] %v7254_v34  ;;  %8124 = vst [vmem:[#allocation7_spill] sm:$0xff] %v7256_v31  ;;  %v7262_v62 = vpop.f32.mrb[26].mxu0  ;;  %v7264_v46 = vpop.f32.mrb[26].mxu1  ;;  %v6429_v31 = vld [vmem:[%s6834_s5 + $0x358] sm:$0xff]  }
 0x175   : > { %8125 = vst [vmem:[#allocation8_spill] sm:$0xff] %v7262_v62  ;;  %8126 = vst [vmem:[#allocation9_spill] sm:$0xff] %v7264_v46  ;;  %v7270_v18 = vpop.f32.mrb[27].mxu0  ;;  %v7272_v15 = vpop.f32.mrb[27].mxu1 }
 0x176   : > { %8127 = vst [vmem:[#allocation10_spill] sm:$0xff] %v7270_v18  ;;  %8128 = vst [vmem:[#allocation11_spill] sm:$0xff] %v7272_v15  ;;  %v6426_v15 = vld [vmem:[%s6834_s5 + $0x468] sm:$0xff]   ;;  %v6428_v18 = vld [vmem:[%s6834_s5 + $0x470] sm:$0xff]  }
 0x177   : > { %6158 = vmatmul.mubr.msk.bf16.gmra.mrb[132].mxu0 %vm1674_vm2, %v6421_v42  ;;  %6232 = vmatmul.mubr.msk.bf16.gmra.mrb[132].mxu1 %vm1674_vm2, %v6422_v26 }
 0x178   : > { %6161 = vmatprep.mubr.msk.bf16.mxu0 %vm1674_vm2, %v6423_v53  ;;  %6235 = vmatprep.mubr.msk.bf16.mxu1 %vm1674_vm2, %v6424_v21  ;;  %v6427_v21 = vld [vmem:[%s6834_s5 + $0x350] sm:$0xff]  }
 0x17a   : > { %v7280_v58 = vpop.f32.mrb[28].mxu0  ;;  %v7282_v37 = vpop.f32.mrb[28].mxu1 }
 0x17b   : > { %8129 = vst [vmem:[#allocation12_spill] sm:$0xff] %v7280_v58  ;;  %8130 = vst [vmem:[#allocation13_spill] sm:$0xff] %v7282_v37  ;;  %v7286_v46 = vpop.f32.mrb[29].mxu0  ;;  %v7288_v62 = vpop.f32.mrb[29].mxu1 }
 0x17c   : > { %8131 = vst [vmem:[#allocation14_spill] sm:$0xff] %v7286_v46  ;;  %8132 = vst [vmem:[#allocation15_spill] sm:$0xff] %v7288_v62  ;;  %v7294_v42 = vpop.f32.mrb[30].mxu0  ;;  %v7296_v53 = vpop.f32.mrb[30].mxu1 }
 0x17d   : > { %8133 = vst [vmem:[#allocation16_spill] sm:$0xff] %v7294_v42  ;;  %8134 = vst [vmem:[#allocation17_spill] sm:$0xff] %v7296_v53  ;;  %v7302_v37 = vpop.f32.mrb[31].mxu0  ;;  %v7304_v58 = vpop.f32.mrb[31].mxu1 }
 0x17e   : > { %8135 = vst [vmem:[#allocation18_spill] sm:$0xff] %v7302_v37  ;;  %8136 = vst [vmem:[#allocation19_spill] sm:$0xff] %v7304_v58  ;;  %v6430_v58 = vld [vmem:[%s6834_s5 + $0x478] sm:$0xff]  }
 0x17f   : > { %6162 = vmatmul.mubr.msk.bf16.gmra.mrb[136].mxu0 %vm1674_vm2, %v6425_v10  ;;  %6236 = vmatmul.mubr.msk.bf16.gmra.mrb[136].mxu1 %vm1674_vm2, %v6426_v15 }
 0x180   : > { %6165 = vmatprep.mubr.msk.bf16.mxu0 %vm1674_vm2, %v6427_v21  ;;  %6239 = vmatprep.mubr.msk.bf16.mxu1 %vm1674_vm2, %v6428_v18 }
 0x182   : > { %v7312_v26 = vpop.f32.mrb[32].mxu0  ;;  %v7314_v62 = vpop.f32.mrb[32].mxu1 }
 0x183   : > { %8137 = vst [vmem:[#allocation20_spill] sm:$0xff] %v7312_v26  ;;  %8138 = vst [vmem:[#allocation21_spill] sm:$0xff] %v7314_v62  ;;  %v7318_v53 = vpop.f32.mrb[33].mxu0  ;;  %v7320_v42 = vpop.f32.mrb[33].mxu1  ;;  %v8217_v26 = vmax.f32 %v7056_v3, %v7058_v4  ;;  %v8220_v3 = vmax.f32 %v7078_v16, %v7080_v17 }
 0x184   : > { %8139 = vst [vmem:[#allocation22_spill] sm:$0xff] %v7318_v53  ;;  %8140 = vst [vmem:[#allocation23_spill] sm:$0xff] %v7320_v42  ;;  %v7326_v15 = vpop.f32.mrb[34].mxu0  ;;  %v7328_v21 = vpop.f32.mrb[34].mxu1 }
 0x185   : > { %8141 = vst [vmem:[#allocation24_spill] sm:$0xff] %v7326_v15  ;;  %8142 = vst [vmem:[#allocation25_spill] sm:$0xff] %v7328_v21  ;;  %v7332_v37 = vpop.f32.mrb[35].mxu0  ;;  %v7334_v46 = vpop.f32.mrb[35].mxu1 }
 0x186   : > { %8143 = vst [vmem:[#allocation26_spill] sm:$0xff] %v7332_v37  ;;  %8144 = vst [vmem:[#allocation27_spill] sm:$0xff] %v7334_v46 }
 0x187   : > { %6166 = vmatmul.mubr.msk.bf16.gmra.mrb[140].mxu0 %vm1674_vm2, %v6429_v31  ;;  %6240 = vmatmul.mubr.msk.bf16.gmra.mrb[140].mxu1 %vm1674_vm2, %v6430_v58 }
 0x18a   : > { %v7340_v62 = vpop.f32.mrb[36].mxu0  ;;  %v7342_v10 = vpop.f32.mrb[36].mxu1 }
 0x18b   : > { %8145 = vst [vmem:[#allocation28_spill] sm:$0xff] %v7340_v62  ;;  %8146 = vst [vmem:[#allocation29_spill] sm:$0xff] %v7342_v10  ;;  %v7346_v53 = vpop.f32.mrb[37].mxu0  ;;  %v7348_v18 = vpop.f32.mrb[37].mxu1 }
 0x18c   : > { %8147 = vst [vmem:[#allocation30_spill] sm:$0xff] %v7346_v53  ;;  %8148 = vst [vmem:[#allocation31_spill] sm:$0xff] %v7348_v18  ;;  %v7352_v15 = vpop.f32.mrb[38].mxu0  ;;  %v7354_v5 = vpop.f32.mrb[38].mxu1 }
 0x18d   : > { %8149 = vst [vmem:[#allocation32_spill] sm:$0xff] %v7352_v15  ;;  %8150 = vst [vmem:[#allocation33_spill] sm:$0xff] %v7354_v5  ;;  %v7358_v58 = vpop.f32.mrb[39].mxu0  ;;  %v7360_v46 = vpop.f32.mrb[39].mxu1 }
 0x18e   : > { %8151 = vst [vmem:[#allocation34_spill] sm:$0xff] %v7358_v58  ;;  %8152 = vst [vmem:[#allocation35_spill] sm:$0xff] %v7360_v46 }
 0x192   : > { %v7364_v10 = vpop.f32.mrb[40].mxu0  ;;  %v7366_v62 = vpop.f32.mrb[40].mxu1 }
 0x193   : > { %8153 = vst [vmem:[#allocation36_spill] sm:$0xff] %v7364_v10  ;;  %8154 = vst [vmem:[#allocation37_spill] sm:$0xff] %v7366_v62  ;;  %v7370_v18 = vpop.f32.mrb[41].mxu0  ;;  %v7372_v53 = vpop.f32.mrb[41].mxu1 }
 0x194   : > { %8155 = vst [vmem:[#allocation38_spill] sm:$0xff] %v7370_v18  ;;  %8156 = vst [vmem:[#allocation39_spill] sm:$0xff] %v7372_v53  ;;  %v7376_v5 = vpop.f32.mrb[42].mxu0  ;;  %v7378_v15 = vpop.f32.mrb[42].mxu1 }
 0x195   : > { %8157 = vst [vmem:[#allocation40_spill] sm:$0xff] %v7376_v5  ;;  %8158 = vst [vmem:[#allocation41_spill] sm:$0xff] %v7378_v15  ;;  %v7382_v46 = vpop.f32.mrb[43].mxu0  ;;  %v7384_v58 = vpop.f32.mrb[43].mxu1 }
 0x196   : > { %8159 = vst [vmem:[#allocation42_spill] sm:$0xff] %v7382_v46  ;;  %8160 = vst [vmem:[#allocation43_spill] sm:$0xff] %v7384_v58 }
 0x19a   : > { %v7388_v62 = vpop.f32.mrb[44].mxu0  ;;  %v7390_v10 = vpop.f32.mrb[44].mxu1 }
 0x19b   : > { %8161 = vst [vmem:[#allocation44_spill] sm:$0xff] %v7388_v62  ;;  %8162 = vst [vmem:[#allocation45_spill] sm:$0xff] %v7390_v10  ;;  %v7394_v53 = vpop.f32.mrb[45].mxu0  ;;  %v7396_v18 = vpop.f32.mrb[45].mxu1 }
 0x19c   : > { %8163 = vst [vmem:[#allocation46_spill] sm:$0xff] %v7394_v53  ;;  %8164 = vst [vmem:[#allocation47_spill] sm:$0xff] %v7396_v18  ;;  %v7400_v15 = vpop.f32.mrb[46].mxu0  ;;  %v7402_v5 = vpop.f32.mrb[46].mxu1 }
 0x19d   : > { %8165 = vst [vmem:[#allocation48_spill] sm:$0xff] %v7400_v15  ;;  %8166 = vst [vmem:[#allocation49_spill] sm:$0xff] %v7402_v5  ;;  %v7406_v58 = vpop.f32.mrb[47].mxu0  ;;  %v7408_v46 = vpop.f32.mrb[47].mxu1 }
 0x19e   : > { %8167 = vst [vmem:[#allocation50_spill] sm:$0xff] %v7406_v58  ;;  %8168 = vst [vmem:[#allocation51_spill] sm:$0xff] %v7408_v46 }
 0x1a2   : > { %v7412_v10 = vpop.f32.mrb[48].mxu0  ;;  %v7414_v62 = vpop.f32.mrb[48].mxu1 }
 0x1a3   : > { %8169 = vst [vmem:[#allocation52_spill] sm:$0xff] %v7412_v10  ;;  %8170 = vst [vmem:[#allocation53_spill] sm:$0xff] %v7414_v62  ;;  %v7418_v18 = vpop.f32.mrb[49].mxu0  ;;  %v7420_v53 = vpop.f32.mrb[49].mxu1 }
 0x1a4   : > { %8171 = vst [vmem:[#allocation54_spill] sm:$0xff] %v7418_v18  ;;  %8172 = vst [vmem:[#allocation55_spill] sm:$0xff] %v7420_v53  ;;  %v7424_v5 = vpop.f32.mrb[50].mxu0  ;;  %v7426_v15 = vpop.f32.mrb[50].mxu1 }
 0x1a5   : > { %8173 = vst [vmem:[#allocation56_spill] sm:$0xff] %v7424_v5  ;;  %8174 = vst [vmem:[#allocation57_spill] sm:$0xff] %v7426_v15  ;;  %v7430_v46 = vpop.f32.mrb[51].mxu0  ;;  %v7432_v58 = vpop.f32.mrb[51].mxu1 }
 0x1a6   : > { %8175 = vst [vmem:[#allocation58_spill] sm:$0xff] %v7430_v46  ;;  %8176 = vst [vmem:[#allocation59_spill] sm:$0xff] %v7432_v58 }
 0x1aa   : > { %v7436_v62 = vpop.f32.mrb[52].mxu0  ;;  %v7438_v10 = vpop.f32.mrb[52].mxu1 }
 0x1ab   : > { %8177 = vst [vmem:[#allocation60_spill] sm:$0xff] %v7436_v62  ;;  %8178 = vst [vmem:[#allocation61_spill] sm:$0xff] %v7438_v10  ;;  %v7442_v53 = vpop.f32.mrb[53].mxu0  ;;  %v7444_v18 = vpop.f32.mrb[53].mxu1 }
 0x1ac   : > { %8179 = vst [vmem:[#allocation62_spill] sm:$0xff] %v7442_v53  ;;  %8180 = vst [vmem:[#allocation63_spill] sm:$0xff] %v7444_v18  ;;  %v7448_v15 = vpop.f32.mrb[54].mxu0  ;;  %v7450_v5 = vpop.f32.mrb[54].mxu1 }
 0x1ad   : > { %8181 = vst [vmem:[#allocation64_spill] sm:$0xff] %v7448_v15  ;;  %8182 = vst [vmem:[#allocation65_spill] sm:$0xff] %v7450_v5  ;;  %v7454_v58 = vpop.f32.mrb[55].mxu0  ;;  %v7456_v46 = vpop.f32.mrb[55].mxu1 }
 0x1ae   : > { %8183 = vst [vmem:[#allocation66_spill] sm:$0xff] %v7454_v58  ;;  %8184 = vst [vmem:[#allocation67_spill] sm:$0xff] %v7456_v46 }
 0x1b2   : > { %v7460_v10 = vpop.f32.mrb[56].mxu0  ;;  %v7462_v62 = vpop.f32.mrb[56].mxu1 }
 0x1b3   : > { %8185 = vst [vmem:[#allocation68_spill] sm:$0xff] %v7460_v10  ;;  %8186 = vst [vmem:[#allocation69_spill] sm:$0xff] %v7462_v62  ;;  %v7466_v18 = vpop.f32.mrb[57].mxu0  ;;  %v7468_v53 = vpop.f32.mrb[57].mxu1 }
 0x1b4   : > { %8187 = vst [vmem:[#allocation70_spill] sm:$0xff] %v7466_v18  ;;  %8188 = vst [vmem:[#allocation71_spill] sm:$0xff] %v7468_v53  ;;  %v7472_v5 = vpop.f32.mrb[58].mxu0  ;;  %v7474_v15 = vpop.f32.mrb[58].mxu1 }
 0x1b5   : > { %8189 = vst [vmem:[#allocation72_spill] sm:$0xff] %v7472_v5  ;;  %8190 = vst [vmem:[#allocation73_spill] sm:$0xff] %v7474_v15  ;;  %v7478_v46 = vpop.f32.mrb[59].mxu0  ;;  %v7480_v58 = vpop.f32.mrb[59].mxu1 }
 0x1b6   : > { %8191 = vst [vmem:[#allocation74_spill] sm:$0xff] %v7478_v46  ;;  %8192 = vst [vmem:[#allocation75_spill] sm:$0xff] %v7480_v58 }
 0x1ba   : > { %v7484_v62 = vpop.f32.mrb[60].mxu0  ;;  %v7486_v10 = vpop.f32.mrb[60].mxu1 }
 0x1bb   : > { %8193 = vst [vmem:[#allocation76_spill] sm:$0xff] %v7484_v62  ;;  %8194 = vst [vmem:[#allocation77_spill] sm:$0xff] %v7486_v10  ;;  %v7490_v53 = vpop.f32.mrb[61].mxu0  ;;  %v7492_v18 = vpop.f32.mrb[61].mxu1 }
 0x1bc   : > { %8195 = vst [vmem:[#allocation78_spill] sm:$0xff] %v7490_v53  ;;  %8196 = vst [vmem:[#allocation79_spill] sm:$0xff] %v7492_v18  ;;  %v7496_v15 = vpop.f32.mrb[62].mxu0  ;;  %v7498_v5 = vpop.f32.mrb[62].mxu1 }
 0x1bd   : > { %8197 = vst [vmem:[#allocation80_spill] sm:$0xff] %v7496_v15  ;;  %8198 = vst [vmem:[#allocation81_spill] sm:$0xff] %v7498_v5  ;;  %v7502_v58 = vpop.f32.mrb[63].mxu0  ;;  %v7504_v46 = vpop.f32.mrb[63].mxu1 }
 0x1be   : > { %8199 = vst [vmem:[#allocation82_spill] sm:$0xff] %v7502_v58  ;;  %8200 = vst [vmem:[#allocation83_spill] sm:$0xff] %v7504_v46 }
 0x1c2   : > { %v7508_v10 = vpop.f32.mrb[64].mxu0  ;;  %v7510_v62 = vpop.f32.mrb[64].mxu1 }
 0x1c3   : > { %8201 = vst [vmem:[#allocation84_spill] sm:$0xff] %v7508_v10  ;;  %8202 = vst [vmem:[#allocation85_spill] sm:$0xff] %v7510_v62  ;;  %v7514_v18 = vpop.f32.mrb[65].mxu0  ;;  %v7516_v53 = vpop.f32.mrb[65].mxu1 }
 0x1c4   : > { %8203 = vst [vmem:[#allocation86_spill] sm:$0xff] %v7514_v18  ;;  %8204 = vst [vmem:[#allocation87_spill] sm:$0xff] %v7516_v53  ;;  %v7520_v5 = vpop.f32.mrb[66].mxu0  ;;  %v7522_v15 = vpop.f32.mrb[66].mxu1 }
 0x1c5   : > { %8205 = vst [vmem:[#allocation88_spill] sm:$0xff] %v7520_v5  ;;  %8206 = vst [vmem:[#allocation89_spill] sm:$0xff] %v7522_v15  ;;  %v7526_v46 = vpop.f32.mrb[67].mxu0  ;;  %v7528_v58 = vpop.f32.mrb[67].mxu1 }
 0x1c6   : > { %8207 = vst [vmem:[#allocation90_spill] sm:$0xff] %v7526_v46  ;;  %8208 = vst [vmem:[#allocation91_spill] sm:$0xff] %v7528_v58 }
 0x1ca   : > { %v7532_v62 = vpop.f32.mrb[68].mxu0  ;;  %v7534_v10 = vpop.f32.mrb[68].mxu1 }
 0x1cb   : > { %8209 = vst [vmem:[#allocation92_spill] sm:$0xff] %v7532_v62  ;;  %8210 = vst [vmem:[#allocation93_spill] sm:$0xff] %v7534_v10  ;;  %v7538_v53 = vpop.f32.mrb[69].mxu0  ;;  %v7540_v18 = vpop.f32.mrb[69].mxu1 }
 0x1cc   : > { %8211 = vst [vmem:[#allocation94_spill] sm:$0xff] %v7538_v53  ;;  %8212 = vst [vmem:[#allocation95_spill] sm:$0xff] %v7540_v18  ;;  %v7544_v15 = vpop.f32.mrb[70].mxu0  ;;  %v7546_v5 = vpop.f32.mrb[70].mxu1  ;;  %v7560_v53 = vld [vmem:[%s8021_s2] ss:$0 sm:$0xff] }
 0x1cd   : > { %8213 = vst [vmem:[#allocation96_spill] sm:$0xff] %v7544_v15  ;;  %8214 = vst [vmem:[#allocation97_spill] sm:$0xff] %v7546_v5  ;;  %v7551_v58 = vpop.f32.mrb[71].mxu0  ;;  %v7553_v46 = vpop.f32.mrb[71].mxu1 }
 0x1ce   : > { %8215 = vst [vmem:[#allocation98_spill] sm:$0xff] %v7551_v58  ;;  %8216 = vst [vmem:[#allocation99_spill] sm:$0xff] %v7553_v46 }
 0x1d2   : > { %v6099_v10 = vpop.f32.mrb[72].mxu0  ;;  %v6173_v62 = vpop.f32.mrb[72].mxu1 }
 0x1d3   : > { %v4231_v37 = vmax.f32 %v6099_v10, %v6173_v62  ;;  %v3188_v42 = vpop.f32.mrb[73].mxu0  ;;  %v3870_v18 = vpop.f32.mrb[73].mxu1  ;;  %v8218_v62 = vmax.f32 %v7062_v6, %v7064_v7 }
 0x1d4   : > { %v4229_v21 = vmax.f32 %v3188_v42, %v3870_v18  ;;  %v6100_v5 = vpop.f32.mrb[74].mxu0  ;;  %v6174_v15 = vpop.f32.mrb[74].mxu1 }
 0x1d5   : > { %v4303_v34 = vmax.f32 %v8217_v26, %v4231_v37  ;;  %v4232_v31 = vmax.f32 %v6100_v5, %v6174_v15  ;;  %v3191_v46 = vpop.f32.mrb[75].mxu0  ;;  %v3873_v58 = vpop.f32.mrb[75].mxu1 }
 0x1d6   : > { %v4301_v10 = vmax.f32 %v8218_v62, %v4229_v21  ;;  %v4230_v13 = vmax.f32 %v3191_v46, %v3873_v58 }
 0x1d7   : > { %v4382_v25 = vadd.f32 %v7560_v53, %v4303_v34  ;;  %v4304_v42 = vmax.f32 %v8219_v47, %v4232_v31 }
 0x1d8   : > { %v4380_v18 = vadd.f32 %v7560_v53, %v4301_v10  ;;  %v4302_v4 = vmax.f32 %v8220_v3, %v4230_v13  ;;  %v8221_v10 = vmax.f32 %v7088_v19, %v7090_v20  ;;  %v8223_v20 = vmax.f32 %v7102_v27, %v7104_v28 }
 0x1d9   : > { %vm4454_vm3 = vcmp.ge.f32.partialorder %v4382_v25, 0.0  ;;  %v4526_v5 = vmul.f32 0.01, %v4382_v25  ;;  %v4383_v37 = vadd.f32 %v7560_v53, %v4304_v42 }
 0x1da   : > { %vm4452_vm5 = vcmp.ge.f32.partialorder %v4380_v18, 0.0  ;;  %v4524_v6 = vmul.f32 0.01, %v4380_v18  ;;  %v4381_v7 = vadd.f32 %v7560_v53, %v4302_v4  ;;  %v6103_v34 = vpop.f32.mrb[76].mxu0  ;;  %v6177_v46 = vpop.f32.mrb[76].mxu1 }
 0x1db   : > { %v4598_v11 = vsel %vm4454_vm3, %v4382_v25, %v4526_v5  ;;  %vm4455_vm6 = vcmp.ge.f32.partialorder %v4383_v37, 0.0  ;;  %v4527_v12 = vmul.f32 0.01, %v4383_v37  ;;  %v4235_v16 = vmax.f32 %v6103_v34, %v6177_v46  ;;  %v3204_v17 = vpop.f32.mrb[77].mxu0  ;;  %v3886_v47 = vpop.f32.mrb[77].mxu1 }
 0x1dc   : > { %v5729_v13 = vpack.c.bf16 %v4598_v11, %v4598_v11  ;;  %v4596_v26 = vsel %vm4452_vm5, %v4380_v18, %v4524_v6  ;;  %vm4453_vm7 = vcmp.ge.f32.partialorder %v4381_v7, 0.0  ;;  %v4525_v15 = vmul.f32 0.01, %v4381_v7  ;;  %v6104_v21 = vpop.f32.mrb[78].mxu0  ;;  %v6178_v31 = vpop.f32.mrb[78].mxu1 }
 0x1dd   : > { %v5727_v58 = vpack.c.bf16 %v4596_v26, %v4596_v26  ;;  %v4599_v62 = vsel %vm4455_vm6, %v4383_v37, %v4527_v12  ;;  %v4307_v25 = vmax.f32 %v8221_v10, %v4235_v16  ;;  %v4233_v42 = vmax.f32 %v3204_v17, %v3886_v47  ;;  %v3207_v3 = vpop.f32.mrb[79].mxu0  ;;  %v3889_v4 = vpop.f32.mrb[79].mxu1 }
 0x1de   : > { %4959 = vst.msk [vmem:[%s7581_s12 + $0x8] sm:$0xf] %vm4956_vm4, %v5729_v13  ;;  %v5730_v5 = vpack.c.bf16 %v4599_v62, %v4599_v62  ;;  %v4597_v18 = vsel %vm4453_vm7, %v4381_v7, %v4525_v15  ;;  %v4236_v6 = vmax.f32 %v6104_v21, %v6178_v31  ;;  %v4234_v34 = vmax.f32 %v3207_v3, %v3889_v4 }
 0x1df   : > { %4957 = vst.msk [vmem:[%s7581_s12] sm:$0xf] %vm4956_vm4, %v5727_v58  ;;  %v5728_v46 = vpack.c.bf16 %v4597_v18, %v4597_v18  ;;  %v4386_v11 = vadd.f32 %v7560_v53, %v4307_v25  ;;  %v8222_v37 = vmax.f32 %v7094_v22, %v7096_v23  ;;  %v8224_v7 = vmax.f32 %v7110_v32, %v7112_v33 }
 0x1e0   : > { %4960 = vst.msk [vmem:[%s7581_s12 + $0xc] sm:$0xf] %vm4956_vm4, %v5730_v5  ;;  %v4308_v12 = vmax.f32 %v8223_v20, %v4236_v6 }
 0x1e1   : > { %v4305_v19 = vmax.f32 %v8222_v37, %v4233_v42  ;;  %v4306_v16 = vmax.f32 %v8224_v7, %v4234_v34  ;;  %4958 = vst.msk [vmem:[%s7581_s12 + $0x4] sm:$0xf] %vm4956_vm4, %v5728_v46  ;;  %vm4458_vm8 = vcmp.ge.f32.partialorder %v4386_v11, 0.0  ;;  %v4530_v17 = vmul.f32 0.01, %v4386_v11 }
 0x1e2   : > { %v4387_v13 = vadd.f32 %v7560_v53, %v4308_v12  ;;  %v6107_v23 = vpop.f32.mrb[80].mxu0  ;;  %v6181_v26 = vpop.f32.mrb[80].mxu1  ;;  %v8225_v42 = vmax.f32 %v7120_v35, %v7122_v36  ;;  %v8226_v12 = vmax.f32 %v7126_v38, %v7128_v39  ;;  %v8227_v7 = vmax.f32 %v7134_v43, %v7136_v44 }
 0x1e3   : > { %v4384_v47 = vadd.f32 %v7560_v53, %v4305_v19  ;;  %v4385_v22 = vadd.f32 %v7560_v53, %v4306_v16  ;;  %v4602_v15 = vsel %vm4458_vm8, %v4386_v11, %v4530_v17  ;;  %v4239_v28 = vmax.f32 %v6107_v23, %v6181_v26  ;;  %v3220_v21 = vpop.f32.mrb[81].mxu0  ;;  %v3902_v32 = vpop.f32.mrb[81].mxu1 }
 0x1e4   : > { %v5733_v33 = vpack.c.bf16 %v4602_v15, %v4602_v15  ;;  %vm4459_vm10 = vcmp.ge.f32.partialorder %v4387_v13, 0.0  ;;  %v4531_v31 = vmul.f32 0.01, %v4387_v13  ;;  %v6108_v58 = vpop.f32.mrb[82].mxu0  ;;  %v6182_v62 = vpop.f32.mrb[82].mxu1  ;;  %v4237_v4 = vmax.f32 %v3220_v21, %v3902_v32 }
 0x1e5   : > { %vm4456_vm9 = vcmp.ge.f32.partialorder %v4384_v47, 0.0  ;;  %v4528_v27 = vmul.f32 0.01, %v4384_v47  ;;  %vm4457_vm11 = vcmp.ge.f32.partialorder %v4385_v22, 0.0  ;;  %v4529_v25 = vmul.f32 0.01, %v4385_v22 }
 0x1e6   : > { %v4311_v3 = vmax.f32 %v8225_v42, %v4239_v28  ;;  %v3223_v5 = vpop.f32.mrb[83].mxu0  ;;  %v3905_v18 = vpop.f32.mrb[83].mxu1  ;;  %4963 = vst.msk [vmem:[%s7581_s12 + $0x18] sm:$0xf] %vm4956_vm4, %v5733_v33  ;;  %v4603_v34 = vsel %vm4459_vm10, %v4387_v13, %v4531_v31  ;;  %v4240_v46 = vmax.f32 %v6108_v58, %v6182_v62  ;;  %v4309_v35 = vmax.f32 %v8226_v12, %v4237_v4 }
 0x1e7   : > { %v4600_v10 = vsel %vm4456_vm9, %v4384_v47, %v4528_v27  ;;  %v4238_v11 = vmax.f32 %v3223_v5, %v3905_v18  ;;  %v5734_v37 = vpack.c.bf16 %v4603_v34, %v4603_v34  ;;  %v4601_v19 = vsel %vm4457_vm11, %v4385_v22, %v4529_v25 }
 0x1e8   : > { %v5731_v6 = vpack.c.bf16 %v4600_v10, %v4600_v10  ;;  %v4390_v20 = vadd.f32 %v7560_v53, %v4311_v3  ;;  %v5732_v36 = vpack.c.bf16 %v4601_v19, %v4601_v19  ;;  %v4312_v16 = vmax.f32 %v8227_v7, %v4240_v46 }
 0x1e9   : > { %v8228_v17 = vmax.f32 %v7142_v48, %v7144_v49  ;;  %4964 = vst.msk [vmem:[%s7581_s12 + $0x1c] sm:$0xf] %vm4956_vm4, %v5734_v37  ;;  %v4388_v22 = vadd.f32 %v7560_v53, %v4309_v35  ;;  %v8229_v58 = vmax.f32 %v7152_v51, %v7154_v52  ;;  %v8231_v37 = vmax.f32 %v7166_v59, %v7168_v60 }
 0x1ea   : > { %4961 = vst.msk [vmem:[%s7581_s12 + $0x10] sm:$0xf] %vm4956_vm4, %v5731_v6  ;;  %vm4462_vm12 = vcmp.ge.f32.partialorder %v4390_v20, 0.0  ;;  %v4534_v13 = vmul.f32 0.01, %v4390_v20  ;;  %v4391_v38 = vadd.f32 %v7560_v53, %v4312_v16  ;;  %v6111_v23 = vpop.f32.mrb[84].mxu0 }
 0x1eb   : > { %v4310_v47 = vmax.f32 %v8228_v17, %v4238_v11  ;;  %4962 = vst.msk [vmem:[%s7581_s12 + $0x14] sm:$0xf] %vm4956_vm4, %v5732_v36  ;;  %v6185_v26 = vpop.f32.mrb[84].mxu1  ;;  %vm4460_vm13 = vcmp.ge.f32.partialorder %v4388_v22, 0.0  ;;  %v4532_v44 = vmul.f32 0.01, %v4388_v22  ;;  %v8230_v11 = vmax.f32 %v7158_v54, %v7160_v55 }
 0x1ec   : > { %v4606_v43 = vsel %vm4462_vm12, %v4390_v20, %v4534_v13  ;;  %v4243_v48 = vmax.f32 %v6111_v23, %v6185_v26  ;;  %v3236_v49 = vpop.f32.mrb[85].mxu0  ;;  %v3918_v15 = vpop.f32.mrb[85].mxu1  ;;  %vm4463_vm14 = vcmp.ge.f32.partialorder %v4391_v38, 0.0  ;;  %v4535_v28 = vmul.f32 0.01, %v4391_v38 }
 0x1ed   : > { %v4389_v39 = vadd.f32 %v7560_v53, %v4310_v47  ;;  %v5737_v27 = vpack.c.bf16 %v4606_v43, %v4606_v43  ;;  %v6112_v21 = vpop.f32.mrb[86].mxu0  ;;  %v6186_v32 = vpop.f32.mrb[86].mxu1  ;;  %v4604_v33 = vsel %vm4460_vm13, %v4388_v22, %v4532_v44  ;;  %v4241_v10 = vmax.f32 %v3236_v49, %v3918_v15 }
 0x1ee   : > { %v4315_v62 = vmax.f32 %v8229_v58, %v4243_v48  ;;  %v3239_v25 = vpop.f32.mrb[87].mxu0  ;;  %v3921_v42 = vpop.f32.mrb[87].mxu1  ;;  %v5735_v3 = vpack.c.bf16 %v4604_v33, %v4604_v33  ;;  %v4607_v4 = vsel %vm4463_vm14, %v4391_v38, %v4535_v28  ;;  %v4244_v5 = vmax.f32 %v6112_v21, %v6186_v32 }
 0x1ef   : > { %vm4461_vm15 = vcmp.ge.f32.partialorder %v4389_v39, 0.0  ;;  %v4533_v31 = vmul.f32 0.01, %v4389_v39  ;;  %4967 = vst.msk [vmem:[%s7581_s12 + $0x28] sm:$0xf] %vm4956_vm4, %v5737_v27  ;;  %v4242_v18 = vmax.f32 %v3239_v25, %v3921_v42  ;;  %v5738_v6 = vpack.c.bf16 %v4607_v4, %v4607_v4 }
 0x1f0   : > { %v4394_v46 = vadd.f32 %v7560_v53, %v4315_v62  ;;  %v4313_v51 = vmax.f32 %v8230_v11, %v4241_v10  ;;  %4965 = vst.msk [vmem:[%s7581_s12 + $0x20] sm:$0xf] %vm4956_vm4, %v5735_v3  ;;  %v4316_v19 = vmax.f32 %v8231_v37, %v4244_v5  ;;  %v8232_v20 = vmax.f32 %v7174_v0, %v7176_v1 }
 0x1f1   : > { %v4605_v34 = vsel %vm4461_vm15, %v4389_v39, %v4533_v31  ;;  %4968 = vst.msk [vmem:[%s7581_s12 + $0x2c] sm:$0xf] %vm4956_vm4, %v5738_v6  ;;  %v8233_v26 = vmax.f32 %v7184_v8, %v7186_v9  ;;  %v8234_v58 = vmax.f32 %v7190_v14, %v7192_v24  ;;  %v8235_v62 = vmax.f32 %v7198_v40, %v7200_v41 }
 0x1f2   : > { %v5736_v52 = vpack.c.bf16 %v4605_v34, %v4605_v34  ;;  %v4314_v12 = vmax.f32 %v8232_v20, %v4242_v18  ;;  %vm4466_vm0 = vcmp.ge.f32.partialorder %v4394_v46, 0.0  ;;  %v4538_v35 = vmul.f32 0.01, %v4394_v46  ;;  %v6115_v7 = vpop.f32.mrb[88].mxu0  ;;  %v6189_v16 = vpop.f32.mrb[88].mxu1 }
 0x1f3   : > { %v4392_v36 = vadd.f32 %v7560_v53, %v4313_v51  ;;  %v4395_v54 = vadd.f32 %v7560_v53, %v4316_v19  ;;  %v4247_v0 = vmax.f32 %v6115_v7, %v6189_v16  ;;  %v3252_v1 = vpop.f32.mrb[89].mxu0  ;;  %v3934_v17 = vpop.f32.mrb[89].mxu1  ;;  %v8236_v25 = vmax.f32 %v7206_v57, %v7208_v61 }
 0x1f4   : > { %4966 = vst.msk [vmem:[%s7581_s12 + $0x24] sm:$0xf] %vm4956_vm4, %v5736_v52  ;;  %v4393_v55 = vadd.f32 %v7560_v53, %v4314_v12  ;;  %v4610_v59 = vsel %vm4466_vm0, %v4394_v46, %v4538_v35  ;;  %v6116_v22 = vpop.f32.mrb[90].mxu0  ;;  %v6190_v38 = vpop.f32.mrb[90].mxu1  ;;  %v4245_v44 = vmax.f32 %v3252_v1, %v3934_v17  ;;  %v8237_v19 = vmax.f32 %v7216_v30, %v7218_v56 }
 0x1f5   : > { %vm4464_vm1 = vcmp.ge.f32.partialorder %v4392_v36, 0.0  ;;  %v4536_v60 = vmul.f32 0.01, %v4392_v36  ;;  %v5741_v47 = vpack.c.bf16 %v4610_v59, %v4610_v59  ;;  %vm4467_vm2 = vcmp.ge.f32.partialorder %v4395_v54, 0.0  ;;  %v3255_v48 = vpop.f32.mrb[91].mxu0  ;;  %v3937_v49 = vpop.f32.mrb[91].mxu1 }
 0x1f6   : > { %v4539_v13 = vmul.f32 0.01, %v4395_v54  ;;  %vm4465_vm3 = vcmp.ge.f32.partialorder %v4393_v55, 0.0  ;;  %v4537_v23 = vmul.f32 0.01, %v4393_v55  ;;  %v4319_v43 = vmax.f32 %v8233_v26, %v4247_v0 }
 0x1f7   : > { %v4608_v39 = vsel %vm4464_vm1, %v4392_v36, %v4536_v60  ;;  %4971 = vst.msk [vmem:[%s7581_s12 + $0x38] sm:$0xf] %vm4956_vm4, %v5741_v47  ;;  %v4248_v28 = vmax.f32 %v6116_v22, %v6190_v38  ;;  %v4246_v21 = vmax.f32 %v3255_v48, %v3937_v49  ;;  %v4317_v8 = vmax.f32 %v8234_v58, %v4245_v44 }
 0x1f8   : > { %v5739_v15 = vpack.c.bf16 %v4608_v39, %v4608_v39  ;;  %v4611_v27 = vsel %vm4467_vm2, %v4395_v54, %v4539_v13  ;;  %v4609_v33 = vsel %vm4465_vm3, %v4393_v55, %v4537_v23  ;;  %v4398_v31 = vadd.f32 %v7560_v53, %v4319_v43  ;;  %v8240_v13 = vld [vmem:[#allocation3_spill] sm:$0xff] }
 0x1f9   : > { %v5742_v32 = vpack.c.bf16 %v4611_v27, %v4611_v27  ;;  %v5740_v9 = vpack.c.bf16 %v4609_v33, %v4609_v33  ;;  %v4320_v10 = vmax.f32 %v8235_v62, %v4248_v28  ;;  %v4318_v42 = vmax.f32 %v8236_v25, %v4246_v21  ;;  %v8242_v33 = vld [vmem:[#allocation4_spill] sm:$0xff] }
 0x1fa   : > { %4969 = vst.msk [vmem:[%s7581_s12 + $0x30] sm:$0xf] %vm4956_vm4, %v5739_v15  ;;  %vm4470_vm5 = vcmp.ge.f32.partialorder %v4398_v31, 0.0  ;;  %v4542_v3 = vmul.f32 0.01, %v4398_v31  ;;  %v4396_v4 = vadd.f32 %v7560_v53, %v4317_v8  ;;  %v6119_v5 = vpop.f32.mrb[92].mxu0  ;;  %v8238_v1 = vmax.f32 %v7222_v2, %v7224_v63 }
 0x1fb   : > { %4972 = vst.msk [vmem:[%s7581_s12 + $0x3c] sm:$0xf] %vm4956_vm4, %v5742_v32  ;;  %4970 = vst.msk [vmem:[%s7581_s12 + $0x34] sm:$0xf] %vm4956_vm4, %v5740_v9  ;;  %v4399_v14 = vadd.f32 %v7560_v53, %v4320_v10  ;;  %v4397_v24 = vadd.f32 %v7560_v53, %v4318_v42  ;;  %v6193_v18 = vpop.f32.mrb[92].mxu1  ;;  %v3268_v61 = vpop.f32.mrb[93].mxu0  ;;  %v8239_v17 = vmax.f32 %v7230_v29, %v7232_v45 }
 0x1fc   : > { %v4614_v40 = vsel %vm4470_vm5, %v4398_v31, %v4542_v3  ;;  %vm4468_vm6 = vcmp.ge.f32.partialorder %v4396_v4, 0.0  ;;  %v4540_v41 = vmul.f32 0.01, %v4396_v4  ;;  %v4251_v57 = vmax.f32 %v6119_v5, %v6193_v18  ;;  %v3950_v6 = vpop.f32.mrb[93].mxu1  ;;  %v6120_v11 = vpop.f32.mrb[94].mxu0  ;;  %v8243_v31 = vld [vmem:[#allocation5_spill] sm:$0xff] }
 0x1fd   : > { %v5745_v34 = vpack.c.bf16 %v4614_v40, %v4614_v40  ;;  %vm4471_vm7 = vcmp.ge.f32.partialorder %v4399_v14, 0.0  ;;  %v4543_v46 = vmul.f32 0.01, %v4399_v14  ;;  %vm4469_vm8 = vcmp.ge.f32.partialorder %v4397_v24, 0.0  ;;  %v6194_v51 = vpop.f32.mrb[94].mxu1  ;;  %v3271_v35 = vpop.f32.mrb[95].mxu0 }
 0x1fe   : > { %v4612_v52 = vsel %vm4468_vm6, %v4396_v4, %v4540_v41  ;;  %v4541_v37 = vmul.f32 0.01, %v4397_v24  ;;  %v4323_v20 = vmax.f32 %v8237_v19, %v4251_v57  ;;  %v4249_v12 = vmax.f32 %v3268_v61, %v3950_v6  ;;  %v3953_v36 = vpop.f32.mrb[95].mxu1  ;;  %v8245_v18 = vld [vmem:[#allocation6_spill] sm:$0xff]  ;;  %v8246_v40 = vld [vmem:[#allocation7_spill] sm:$0xff]  ;;  %v8248_v6 = vld [vmem:[#allocation8_spill] sm:$0xff] }
 0x1ff   : > { %4975 = vst.msk [vmem:[%s7581_s12 + $0x48] sm:$0xf] %vm4956_vm4, %v5745_v34  ;;  %v5743_v54 = vpack.c.bf16 %v4612_v52, %v4612_v52  ;;  %v4615_v55 = vsel %vm4471_vm7, %v4399_v14, %v4543_v46  ;;  %v4252_v7 = vmax.f32 %v6120_v11, %v6194_v51  ;;  %v4250_v16 = vmax.f32 %v3271_v35, %v3953_v36  ;;  %v8249_v34 = vld [vmem:[#allocation9_spill] sm:$0xff]  ;;  %v8251_v51 = vld [vmem:[#allocation10_spill] sm:$0xff]  ;;  %v8252_v52 = vld [vmem:[#allocation11_spill] sm:$0xff] }
 0x200   : > { %v5746_v59 = vpack.c.bf16 %v4615_v55, %v4615_v55  ;;  %v4613_v60 = vsel %vm4469_vm8, %v4397_v24, %v4541_v37  ;;  %v4402_v0 = vadd.f32 %v7560_v53, %v4323_v20  ;;  %v4321_v30 = vmax.f32 %v8238_v1, %v4249_v12 }
 0x201   : > { %4973 = vst.msk [vmem:[%s7581_s12 + $0x40] sm:$0xf] %vm4956_vm4, %v5743_v54  ;;  %v5744_v56 = vpack.c.bf16 %v4613_v60, %v4613_v60  ;;  %v4324_v47 = vmax.f32 %v8239_v17, %v4252_v7  ;;  %v8241_v22 = vmax.f32 %v7238_v50, %v8240_v13  ;;  %v8244_v58 = vmax.f32 %v8242_v33, %v8243_v31  ;;  %v8260_v33 = vld [vmem:[#allocation16_spill] sm:$0xff]  ;;  %v8261_v31 = vld [vmem:[#allocation17_spill] sm:$0xff] }
 0x202   : > { %4976 = vst.msk [vmem:[%s7581_s12 + $0x4c] sm:$0xf] %vm4956_vm4, %v5746_v59  ;;  %vm4474_vm9 = vcmp.ge.f32.partialorder %v4402_v0, 0.0  ;;  %v4546_v39 = vmul.f32 0.01, %v4402_v0  ;;  %v4400_v23 = vadd.f32 %v7560_v53, %v4321_v30  ;;  %v6123_v26 = vpop.f32.mrb[96].mxu0  ;;  %v8247_v41 = vmax.f32 %v8245_v18, %v8246_v40 }
 0x203   : > { %v4322_v38 = vmax.f32 %v8241_v22, %v4250_v16  ;;  %4974 = vst.msk [vmem:[%s7581_s12 + $0x44] sm:$0xf] %vm4956_vm4, %v5744_v56  ;;  %v4403_v63 = vadd.f32 %v7560_v53, %v4324_v47  ;;  %v6197_v43 = vpop.f32.mrb[96].mxu1  ;;  %v3284_v44 = vpop.f32.mrb[97].mxu0  ;;  %v8250_v46 = vmax.f32 %v8248_v6, %v8249_v34  ;;  %v8253_v37 = vmax.f32 %v8251_v51, %v8252_v52  ;;  %v8254_v22 = vld [vmem:[#allocation12_spill] sm:$0xff] }
 0x204   : > { %v4618_v29 = vsel %vm4474_vm9, %v4402_v0, %v4546_v39  ;;  %vm4472_vm10 = vcmp.ge.f32.partialorder %v4400_v23, 0.0  ;;  %v4544_v45 = vmul.f32 0.01, %v4400_v23  ;;  %v4255_v50 = vmax.f32 %v6123_v26, %v6197_v43  ;;  %v3966_v48 = vpop.f32.mrb[97].mxu1  ;;  %v6124_v27 = vpop.f32.mrb[98].mxu0 }
 0x205   : > { %v4401_v2 = vadd.f32 %v7560_v53, %v4322_v38  ;;  %v5749_v49 = vpack.c.bf16 %v4618_v29, %v4618_v29  ;;  %vm4475_vm11 = vcmp.ge.f32.partialorder %v4403_v63, 0.0  ;;  %v4547_v15 = vmul.f32 0.01, %v4403_v63  ;;  %v6198_v28 = vpop.f32.mrb[98].mxu1  ;;  %v3287_v62 = vpop.f32.mrb[99].mxu0  ;;  %v8255_v38 = vld [vmem:[#allocation13_spill] sm:$0xff] }
 0x206   : > { %v4616_v21 = vsel %vm4472_vm10, %v4400_v23, %v4544_v45  ;;  %v4327_v8 = vmax.f32 %v8244_v58, %v4255_v50  ;;  %v4253_v9 = vmax.f32 %v3284_v44, %v3966_v48  ;;  %v3969_v10 = vpop.f32.mrb[99].mxu1  ;;  %v4256_v3 = vmax.f32 %v6124_v27, %v6198_v28  ;;  %v8258_v27 = vld [vmem:[#allocation15_spill] sm:$0xff] }
 0x207   : > { %vm4473_vm12 = vcmp.ge.f32.partialorder %v4401_v2, 0.0  ;;  %v4545_v32 = vmul.f32 0.01, %v4401_v2  ;;  %4979 = vst.msk [vmem:[%s7581_s12 + $0x58] sm:$0xf] %vm4956_vm4, %v5749_v49  ;;  %v5747_v25 = vpack.c.bf16 %v4616_v21, %v4616_v21  ;;  %v4619_v42 = vsel %vm4475_vm11, %v4403_v63, %v4547_v15  ;;  %v8257_v15 = vld [vmem:[#allocation14_spill] sm:$0xff] }
 0x208   : > { %v4254_v4 = vmax.f32 %v3287_v62, %v3969_v10  ;;  %v5750_v14 = vpack.c.bf16 %v4619_v42, %v4619_v42  ;;  %v4406_v5 = vadd.f32 %v7560_v53, %v4327_v8  ;;  %v4325_v57 = vmax.f32 %v8247_v41, %v4253_v9  ;;  %v8263_v9 = vld [vmem:[#allocation18_spill] sm:$0xff]  ;;  %v8264_v62 = vld [vmem:[#allocation19_spill] sm:$0xff] }
 0x209   : > { %v4617_v24 = vsel %vm4473_vm12, %v4401_v2, %v4545_v32  ;;  %4977 = vst.msk [vmem:[%s7581_s12 + $0x50] sm:$0xf] %vm4956_vm4, %v5747_v25  ;;  %v4328_v11 = vmax.f32 %v8250_v46, %v4256_v3  ;;  %v8256_v39 = vmax.f32 %v8254_v22, %v8255_v38  ;;  %v8259_v28 = vmax.f32 %v8257_v15, %v8258_v27  ;;  %v8272_v22 = vld [vmem:[#allocation24_spill] sm:$0xff]  ;;  %v8273_v38 = vld [vmem:[#allocation25_spill] sm:$0xff] }
 0x20a   : > { %v5748_v61 = vpack.c.bf16 %v4617_v24, %v4617_v24  ;;  %v4326_v19 = vmax.f32 %v8253_v37, %v4254_v4  ;;  %4980 = vst.msk [vmem:[%s7581_s12 + $0x5c] sm:$0xf] %vm4956_vm4, %v5750_v14  ;;  %vm4478_vm13 = vcmp.ge.f32.partialorder %v4406_v5, 0.0  ;;  %v4550_v20 = vmul.f32 0.01, %v4406_v5  ;;  %v6127_v54 = vpop.f32.mrb[100].mxu0 }
 0x20b   : > { %v4404_v12 = vadd.f32 %v7560_v53, %v4325_v57  ;;  %v4407_v35 = vadd.f32 %v7560_v53, %v4328_v11  ;;  %v6201_v55 = vpop.f32.mrb[100].mxu1  ;;  %v3300_v60 = vpop.f32.mrb[101].mxu0  ;;  %v8262_v58 = vmax.f32 %v8260_v33, %v8261_v31  ;;  %v8265_v10 = vmax.f32 %v8263_v9, %v8264_v62  ;;  %v8266_v37 = vld [vmem:[#allocation20_spill] sm:$0xff] }
 0x20c   : > { %4978 = vst.msk [vmem:[%s7581_s12 + $0x54] sm:$0xf] %vm4956_vm4, %v5748_v61  ;;  %v4405_v36 = vadd.f32 %v7560_v53, %v4326_v19  ;;  %v4622_v7 = vsel %vm4478_vm13, %v4406_v5, %v4550_v20  ;;  %v4259_v59 = vmax.f32 %v6127_v54, %v6201_v55  ;;  %v3982_v0 = vpop.f32.mrb[101].mxu1  ;;  %v6128_v56 = vpop.f32.mrb[102].mxu0  ;;  %v8267_v19 = vld [vmem:[#allocation21_spill] sm:$0xff] }
 0x20d   : > { %vm4476_vm14 = vcmp.ge.f32.partialorder %v4404_v12, 0.0  ;;  %v4548_v16 = vmul.f32 0.01, %v4404_v12  ;;  %v5753_v1 = vpack.c.bf16 %v4622_v7, %v4622_v7  ;;  %vm4479_vm15 = vcmp.ge.f32.partialorder %v4407_v35, 0.0  ;;  %v6202_v17 = vpop.f32.mrb[102].mxu1  ;;  %v3303_v2 = vpop.f32.mrb[103].mxu0 }
 0x20e   : > { %v4551_v30 = vmul.f32 0.01, %v4407_v35  ;;  %vm4477_vm0 = vcmp.ge.f32.partialorder %v4405_v36, 0.0  ;;  %v4549_v13 = vmul.f32 0.01, %v4405_v36  ;;  %v4331_v23 = vmax.f32 %v8256_v39, %v4259_v59  ;;  %v3985_v26 = vpop.f32.mrb[103].mxu1 }
 0x20f   : > { %v4620_v47 = vsel %vm4476_vm14, %v4404_v12, %v4548_v16  ;;  %v4257_v63 = vmax.f32 %v3300_v60, %v3982_v0  ;;  %4983 = vst.msk [vmem:[%s7581_s12 + $0x68] sm:$0xf] %vm4956_vm4, %v5753_v1  ;;  %v4260_v45 = vmax.f32 %v6128_v56, %v6202_v17  ;;  %v4258_v50 = vmax.f32 %v3303_v2, %v3985_v26  ;;  %v8270_v56 = vld [vmem:[#allocation23_spill] sm:$0xff] }
 0x210   : > { %v5751_v43 = vpack.c.bf16 %v4620_v47, %v4620_v47  ;;  %v4623_v29 = vsel %vm4479_vm15, %v4407_v35, %v4551_v30  ;;  %v4621_v48 = vsel %vm4477_vm0, %v4405_v36, %v4549_v13  ;;  %v4410_v49 = vadd.f32 %v7560_v53, %v4331_v23  ;;  %v8269_v30 = vld [vmem:[#allocation22_spill] sm:$0xff]  ;;  %v8276_v2 = vld [vmem:[#allocation27_spill] sm:$0xff] }
 0x211   : > { %v5754_v44 = vpack.c.bf16 %v4623_v29, %v4623_v29  ;;  %v4329_v21 = vmax.f32 %v8259_v28, %v4257_v63  ;;  %v5752_v32 = vpack.c.bf16 %v4621_v48, %v4621_v48  ;;  %v4332_v8 = vmax.f32 %v8262_v58, %v4260_v45  ;;  %v8275_v63 = vld [vmem:[#allocation26_spill] sm:$0xff] }
 0x212   : > { %4981 = vst.msk [vmem:[%s7581_s12 + $0x60] sm:$0xf] %vm4956_vm4, %v5751_v43  ;;  %v4330_v25 = vmax.f32 %v8265_v10, %v4258_v50  ;;  %vm4482_vm1 = vcmp.ge.f32.partialorder %v4410_v49, 0.0  ;;  %v4554_v42 = vmul.f32 0.01, %v4410_v49  ;;  %v6131_v24 = vpop.f32.mrb[104].mxu0  ;;  %v8268_v20 = vmax.f32 %v8266_v37, %v8267_v19 }
 0x213   : > { %4984 = vst.msk [vmem:[%s7581_s12 + $0x6c] sm:$0xf] %vm4956_vm4, %v5754_v44  ;;  %v4408_v3 = vadd.f32 %v7560_v53, %v4329_v21  ;;  %4982 = vst.msk [vmem:[%s7581_s12 + $0x64] sm:$0xf] %vm4956_vm4, %v5752_v32  ;;  %v4411_v4 = vadd.f32 %v7560_v53, %v4332_v8  ;;  %v6205_v5 = vpop.f32.mrb[104].mxu1  ;;  %v3316_v57 = vpop.f32.mrb[105].mxu0  ;;  %v8271_v17 = vmax.f32 %v8269_v30, %v8270_v56 }
 0x214   : > { %v4409_v14 = vadd.f32 %v7560_v53, %v4330_v25  ;;  %v4626_v18 = vsel %vm4482_vm1, %v4410_v49, %v4554_v42  ;;  %v4263_v41 = vmax.f32 %v6131_v24, %v6205_v5  ;;  %v3998_v61 = vpop.f32.mrb[105].mxu1  ;;  %v6132_v46 = vpop.f32.mrb[106].mxu0  ;;  %v8274_v39 = vmax.f32 %v8272_v22, %v8273_v38  ;;  %v8278_v10 = vld [vmem:[#allocation28_spill] sm:$0xff]  ;;  %v8279_v25 = vld [vmem:[#allocation29_spill] sm:$0xff] }
 0x215   : > { %vm4480_vm2 = vcmp.ge.f32.partialorder %v4408_v3, 0.0  ;;  %v4552_v40 = vmul.f32 0.01, %v4408_v3  ;;  %v5757_v6 = vpack.c.bf16 %v4626_v18, %v4626_v18  ;;  %vm4483_vm3 = vcmp.ge.f32.partialorder %v4411_v4, 0.0  ;;  %v6206_v11 = vpop.f32.mrb[106].mxu1  ;;  %v3319_v36 = vpop.f32.mrb[107].mxu0 }
 0x216   : > { %v4555_v34 = vmul.f32 0.01, %v4411_v4  ;;  %vm4481_vm5 = vcmp.ge.f32.partialorder %v4409_v14, 0.0  ;;  %v4553_v52 = vmul.f32 0.01, %v4409_v14  ;;  %v4335_v12 = vmax.f32 %v8268_v20, %v4263_v41  ;;  %v4001_v54 = vpop.f32.mrb[107].mxu1 }
 0x217   : > { %v4624_v51 = vsel %vm4480_vm2, %v4408_v3, %v4552_v40  ;;  %v4261_v35 = vmax.f32 %v3316_v57, %v3998_v61  ;;  %4987 = vst.msk [vmem:[%s7581_s12 + $0x78] sm:$0xf] %vm4956_vm4, %v5757_v6  ;;  %v4264_v16 = vmax.f32 %v6132_v46, %v6206_v11  ;;  %v4262_v59 = vmax.f32 %v3319_v36, %v4001_v54  ;;  %v8282_v46 = vld [vmem:[#allocation31_spill] sm:$0xff]  ;;  %v8284_v37 = vld [vmem:[#allocation32_spill] sm:$0xff]  ;;  %v8285_v19 = vld [vmem:[#allocation33_spill] sm:$0xff] }
 0x218   : > { %v5755_v55 = vpack.c.bf16 %v4624_v51, %v4624_v51  ;;  %v4627_v7 = vsel %vm4483_vm3, %v4411_v4, %v4555_v34  ;;  %v4625_v0 = vsel %vm4481_vm5, %v4409_v14, %v4553_v52  ;;  %v4414_v1 = vadd.f32 %v7560_v53, %v4335_v12  ;;  %v8281_v34 = vld [vmem:[#allocation30_spill] sm:$0xff]  ;;  %v8288_v36 = vld [vmem:[#allocation35_spill] sm:$0xff] }
 0x219   : > { %v5758_v60 = vpack.c.bf16 %v4627_v7, %v4627_v7  ;;  %v4333_v47 = vmax.f32 %v8271_v17, %v4261_v35  ;;  %v5756_v13 = vpack.c.bf16 %v4625_v0, %v4625_v0  ;;  %v4336_v23 = vmax.f32 %v8274_v39, %v4264_v16  ;;  %v8287_v35 = vld [vmem:[#allocation34_spill] sm:$0xff] }
 0x21a   : > { %4985 = vst.msk [vmem:[%s7581_s12 + $0x70] sm:$0xf] %vm4956_vm4, %v5755_v55  ;;  %v8277_v26 = vmax.f32 %v8275_v63, %v8276_v2  ;;  %vm4486_vm6 = vcmp.ge.f32.partialorder %v4414_v1, 0.0  ;;  %v4558_v29 = vmul.f32 0.01, %v4414_v1  ;;  %v6135_v48 = vpop.f32.mrb[108].mxu0  ;;  %v8280_v42 = vmax.f32 %v8278_v10, %v8279_v25 }
 0x21b   : > { %4988 = vst.msk [vmem:[%s7581_s12 + $0x7c] sm:$0xf] %vm4956_vm4, %v5758_v60  ;;  %v4412_v45 = vadd.f32 %v7560_v53, %v4333_v47  ;;  %4986 = vst.msk [vmem:[%s7581_s12 + $0x74] sm:$0xf] %vm4956_vm4, %v5756_v13  ;;  %v4415_v50 = vadd.f32 %v7560_v53, %v4336_v23  ;;  %v6209_v49 = vpop.f32.mrb[108].mxu1  ;;  %v3332_v21 = vpop.f32.mrb[109].mxu0  ;;  %v8283_v11 = vmax.f32 %v8281_v34, %v8282_v46 }
 0x21c   : > { %v4334_v43 = vmax.f32 %v8277_v26, %v4262_v59  ;;  %v4630_v15 = vsel %vm4486_vm6, %v4414_v1, %v4558_v29  ;;  %v4267_v28 = vmax.f32 %v6135_v48, %v6209_v49  ;;  %v4014_v32 = vpop.f32.mrb[109].mxu1  ;;  %v6136_v58 = vpop.f32.mrb[110].mxu0  ;;  %v8286_v20 = vmax.f32 %v8284_v37, %v8285_v19  ;;  %v8290_v26 = vld [vmem:[#allocation36_spill] sm:$0xff]  ;;  %v8297_v25 = vld [vmem:[#allocation41_spill] sm:$0xff] }
 0x21d   : > { %vm4484_vm7 = vcmp.ge.f32.partialorder %v4412_v45, 0.0  ;;  %v4556_v27 = vmul.f32 0.01, %v4412_v45  ;;  %v5761_v33 = vpack.c.bf16 %v4630_v15, %v4630_v15  ;;  %vm4487_vm8 = vcmp.ge.f32.partialorder %v4415_v50, 0.0  ;;  %v6210_v8 = vpop.f32.mrb[110].mxu1  ;;  %v3335_v14 = vpop.f32.mrb[111].mxu0 }
 0x21e   : > { %v4413_v44 = vadd.f32 %v7560_v53, %v4334_v43  ;;  %v4559_v31 = vmul.f32 0.01, %v4415_v50  ;;  %v4339_v3 = vmax.f32 %v8280_v42, %v4267_v28  ;;  %v4265_v4 = vmax.f32 %v3332_v21, %v4014_v32  ;;  %v4017_v24 = vpop.f32.mrb[111].mxu1  ;;  %v8291_v43 = vld [vmem:[#allocation37_spill] sm:$0xff]  ;;  %v8296_v10 = vld [vmem:[#allocation40_spill] sm:$0xff] }
 0x21f   : > { %v4628_v9 = vsel %vm4484_vm7, %v4412_v45, %v4556_v27  ;;  %4991 = vst.msk [vmem:[%s7581_s12 + $0x88] sm:$0xf] %vm4956_vm4, %v5761_v33  ;;  %v4268_v40 = vmax.f32 %v6136_v58, %v6210_v8  ;;  %v4266_v41 = vmax.f32 %v3335_v14, %v4017_v24  ;;  %v8289_v54 = vmax.f32 %v8287_v35, %v8288_v36  ;;  %v8294_v58 = vld [vmem:[#allocation39_spill] sm:$0xff] }
 0x220   : > { %vm4485_vm9 = vcmp.ge.f32.partialorder %v4413_v44, 0.0  ;;  %v4557_v62 = vmul.f32 0.01, %v4413_v44  ;;  %v5759_v5 = vpack.c.bf16 %v4628_v9, %v4628_v9  ;;  %v4631_v18 = vsel %vm4487_vm8, %v4415_v50, %v4559_v31  ;;  %v8293_v31 = vld [vmem:[#allocation38_spill] sm:$0xff]  ;;  %v8300_v14 = vld [vmem:[#allocation43_spill] sm:$0xff] }
 0x221   : > { %v5762_v57 = vpack.c.bf16 %v4631_v18, %v4631_v18  ;;  %v4418_v6 = vadd.f32 %v7560_v53, %v4339_v3  ;;  %v4337_v51 = vmax.f32 %v8283_v11, %v4265_v4  ;;  %v4340_v12 = vmax.f32 %v8286_v20, %v4268_v40  ;;  %v8299_v4 = vld [vmem:[#allocation42_spill] sm:$0xff] }
 0x222   : > { %v4629_v61 = vsel %vm4485_vm9, %v4413_v44, %v4557_v62  ;;  %4989 = vst.msk [vmem:[%s7581_s12 + $0x80] sm:$0xf] %vm4956_vm4, %v5759_v5  ;;  %v4338_v55 = vmax.f32 %v8289_v54, %v4266_v41  ;;  %v6139_v0 = vpop.f32.mrb[112].mxu0  ;;  %v6213_v1 = vpop.f32.mrb[112].mxu1  ;;  %v8292_v29 = vmax.f32 %v8290_v26, %v8291_v43  ;;  %v8295_v8 = vmax.f32 %v8293_v31, %v8294_v58  ;;  %v8302_v54 = vld [vmem:[#allocation44_spill] sm:$0xff]  ;;  %v8309_v43 = vld [vmem:[#allocation49_spill] sm:$0xff] }
 0x223   : > { %v5760_v52 = vpack.c.bf16 %v4629_v61, %v4629_v61  ;;  %4992 = vst.msk [vmem:[%s7581_s12 + $0x8c] sm:$0xf] %vm4956_vm4, %v5762_v57  ;;  %vm4490_vm10 = vcmp.ge.f32.partialorder %v4418_v6, 0.0  ;;  %v4562_v7 = vmul.f32 0.01, %v4418_v6  ;;  %v4416_v16 = vadd.f32 %v7560_v53, %v4337_v51  ;;  %v3348_v47 = vpop.f32.mrb[113].mxu0 }
 0x224   : > { %v4419_v59 = vadd.f32 %v7560_v53, %v4340_v12  ;;  %v4417_v60 = vadd.f32 %v7560_v53, %v4338_v55  ;;  %v4271_v17 = vmax.f32 %v6139_v0, %v6213_v1  ;;  %v4030_v13 = vpop.f32.mrb[113].mxu1  ;;  %v6140_v39 = vpop.f32.mrb[114].mxu0  ;;  %v8298_v42 = vmax.f32 %v8296_v10, %v8297_v25  ;;  %v8303_v55 = vld [vmem:[#allocation45_spill] sm:$0xff]  ;;  %v8308_v26 = vld [vmem:[#allocation48_spill] sm:$0xff] }
 0x225   : > { %4990 = vst.msk [vmem:[%s7581_s12 + $0x84] sm:$0xf] %vm4956_vm4, %v5760_v52  ;;  %v4634_v30 = vsel %vm4490_vm10, %v4418_v6, %v4562_v7  ;;  %vm4488_vm11 = vcmp.ge.f32.partialorder %v4416_v16, 0.0  ;;  %v4560_v56 = vmul.f32 0.01, %v4416_v16  ;;  %v6214_v23 = vpop.f32.mrb[114].mxu1  ;;  %v4269_v50 = vmax.f32 %v3348_v47, %v4030_v13 }
 0x226   : > { %v5765_v22 = vpack.c.bf16 %v4634_v30, %v4634_v30  ;;  %vm4491_vm12 = vcmp.ge.f32.partialorder %v4419_v59, 0.0  ;;  %v4563_v38 = vmul.f32 0.01, %v4419_v59  ;;  %vm4489_vm13 = vcmp.ge.f32.partialorder %v4417_v60, 0.0  ;;  %v3351_v44 = vpop.f32.mrb[115].mxu0  ;;  %v4033_v48 = vpop.f32.mrb[115].mxu1 }
 0x227   : > { %v4632_v63 = vsel %vm4488_vm11, %v4416_v16, %v4560_v56  ;;  %v4561_v2 = vmul.f32 0.01, %v4417_v60  ;;  %v4343_v45 = vmax.f32 %v8292_v29, %v4271_v17  ;;  %v4272_v27 = vmax.f32 %v6140_v39, %v6214_v23  ;;  %v8306_v39 = vld [vmem:[#allocation47_spill] sm:$0xff] }
 0x228   : > { %4995 = vst.msk [vmem:[%s7581_s12 + $0x98] sm:$0xf] %vm4956_vm4, %v5765_v22  ;;  %v5763_v49 = vpack.c.bf16 %v4632_v63, %v4632_v63  ;;  %v4635_v15 = vsel %vm4491_vm12, %v4419_v59, %v4563_v38  ;;  %v4270_v28 = vmax.f32 %v3351_v44, %v4033_v48  ;;  %v4341_v9 = vmax.f32 %v8295_v8, %v4269_v50  ;;  %v8305_v38 = vld [vmem:[#allocation46_spill] sm:$0xff]  ;;  %v8312_v44 = vld [vmem:[#allocation51_spill] sm:$0xff] }
 0x229   : > { %v5766_v21 = vpack.c.bf16 %v4635_v15, %v4635_v15  ;;  %v4633_v32 = vsel %vm4489_vm13, %v4417_v60, %v4561_v2  ;;  %v4422_v33 = vadd.f32 %v7560_v53, %v4343_v45  ;;  %v4344_v3 = vmax.f32 %v8298_v42, %v4272_v27  ;;  %v8311_v50 = vld [vmem:[#allocation50_spill] sm:$0xff] }
 0x22a   : > { %4993 = vst.msk [vmem:[%s7581_s12 + $0x90] sm:$0xf] %vm4956_vm4, %v5763_v49  ;;  %v5764_v62 = vpack.c.bf16 %v4633_v32, %v4633_v32  ;;  %v8301_v24 = vmax.f32 %v8299_v4, %v8300_v14  ;;  %v4420_v40 = vadd.f32 %v7560_v53, %v4341_v9  ;;  %v6143_v61 = vpop.f32.mrb[116].mxu0  ;;  %v6217_v6 = vpop.f32.mrb[116].mxu1  ;;  %v8304_v7 = vmax.f32 %v8302_v54, %v8303_v55  ;;  %v8320_v54 = vld [vmem:[#allocation56_spill] sm:$0xff]  ;;  %v8321_v55 = vld [vmem:[#allocation57_spill] sm:$0xff] }
 0x22b   : > { %4996 = vst.msk [vmem:[%s7581_s12 + $0x9c] sm:$0xf] %vm4956_vm4, %v5766_v21  ;;  %vm4494_vm14 = vcmp.ge.f32.partialorder %v4422_v33, 0.0  ;;  %v4566_v18 = vmul.f32 0.01, %v4422_v33  ;;  %v4423_v41 = vadd.f32 %v7560_v53, %v4344_v3  ;;  %v4275_v11 = vmax.f32 %v6143_v61, %v6217_v6  ;;  %v3364_v51 = vpop.f32.mrb[117].mxu0 }
 0x22c   : > { %v4342_v5 = vmax.f32 %v8301_v24, %v4270_v28  ;;  %4994 = vst.msk [vmem:[%s7581_s12 + $0x94] sm:$0xf] %vm4956_vm4, %v5764_v62  ;;  %vm4492_vm15 = vcmp.ge.f32.partialorder %v4420_v40, 0.0  ;;  %v4564_v46 = vmul.f32 0.01, %v4420_v40  ;;  %v4046_v52 = vpop.f32.mrb[117].mxu1  ;;  %v8307_v23 = vmax.f32 %v8305_v38, %v8306_v39 }
 0x22d   : > { %v4638_v34 = vsel %vm4494_vm14, %v4422_v33, %v4566_v18  ;;  %vm4495_vm0 = vcmp.ge.f32.partialorder %v4423_v41, 0.0  ;;  %v4567_v19 = vmul.f32 0.01, %v4423_v41  ;;  %v6144_v20 = vpop.f32.mrb[118].mxu0  ;;  %v6218_v12 = vpop.f32.mrb[118].mxu1  ;;  %v4347_v16 = vmax.f32 %v8304_v7, %v4275_v11  ;;  %v8314_v24 = vld [vmem:[#allocation52_spill] sm:$0xff] }
 0x22e   : > { %v4421_v57 = vadd.f32 %v7560_v53, %v4342_v5  ;;  %v5769_v37 = vpack.c.bf16 %v4638_v34, %v4638_v34  ;;  %v4636_v35 = vsel %vm4492_vm15, %v4420_v40, %v4564_v46  ;;  %v4273_v59 = vmax.f32 %v3364_v51, %v4046_v52  ;;  %v3367_v60 = vpop.f32.mrb[119].mxu0  ;;  %v4049_v0 = vpop.f32.mrb[119].mxu1  ;;  %v8315_v5 = vld [vmem:[#allocation53_spill] sm:$0xff] }
 0x22f   : > { %v5767_v1 = vpack.c.bf16 %v4636_v35, %v4636_v35  ;;  %v4639_v30 = vsel %vm4495_vm0, %v4423_v41, %v4567_v19  ;;  %v4276_v56 = vmax.f32 %v6144_v20, %v6218_v12  ;;  %v4274_v17 = vmax.f32 %v3367_v60, %v4049_v0  ;;  %v8317_v19 = vld [vmem:[#allocation54_spill] sm:$0xff]  ;;  %v8318_v20 = vld [vmem:[#allocation55_spill] sm:$0xff] }
 0x230   : > { %vm4493_vm1 = vcmp.ge.f32.partialorder %v4421_v57, 0.0  ;;  %v4565_v36 = vmul.f32 0.01, %v4421_v57  ;;  %4999 = vst.msk [vmem:[%s7581_s12 + $0xa8] sm:$0xf] %vm4956_vm4, %v5769_v37  ;;  %v5770_v47 = vpack.c.bf16 %v4639_v30, %v4639_v30  ;;  %v4426_v22 = vadd.f32 %v7560_v53, %v4347_v16  ;;  %v8324_v60 = vld [vmem:[#allocation59_spill] sm:$0xff] }
 0x231   : > { %v4345_v63 = vmax.f32 %v8307_v23, %v4273_v59  ;;  %4997 = vst.msk [vmem:[%s7581_s12 + $0xa0] sm:$0xf] %vm4956_vm4, %v5767_v1  ;;  %v8310_v29 = vmax.f32 %v8308_v26, %v8309_v43  ;;  %v8313_v48 = vmax.f32 %v8311_v50, %v8312_v44  ;;  %v8316_v18 = vmax.f32 %v8314_v24, %v8315_v5  ;;  %v8323_v59 = vld [vmem:[#allocation58_spill] sm:$0xff]  ;;  %v8332_v24 = vld [vmem:[#allocation64_spill] sm:$0xff]  ;;  %v8333_v5 = vld [vmem:[#allocation65_spill] sm:$0xff] }
 0x232   : > { %v4637_v13 = vsel %vm4493_vm1, %v4421_v57, %v4565_v36  ;;  %5000 = vst.msk [vmem:[%s7581_s12 + $0xac] sm:$0xf] %vm4956_vm4, %v5770_v47  ;;  %vm4498_vm2 = vcmp.ge.f32.partialorder %v4426_v22, 0.0  ;;  %v4570_v15 = vmul.f32 0.01, %v4426_v22  ;;  %v6147_v32 = vpop.f32.mrb[120].mxu0  ;;  %v8319_v12 = vmax.f32 %v8317_v19, %v8318_v20 }
 0x233   : > { %v5768_v2 = vpack.c.bf16 %v4637_v13, %v4637_v13  ;;  %v4348_v45 = vmax.f32 %v8310_v29, %v4276_v56  ;;  %v4346_v49 = vmax.f32 %v8313_v48, %v4274_v17  ;;  %v4424_v27 = vadd.f32 %v7560_v53, %v4345_v63  ;;  %v6221_v33 = vpop.f32.mrb[120].mxu1  ;;  %v3380_v9 = vpop.f32.mrb[121].mxu0  ;;  %v8326_v48 = vld [vmem:[#allocation60_spill] sm:$0xff] }
 0x234   : > { %v4642_v31 = vsel %vm4498_vm2, %v4426_v22, %v4570_v15  ;;  %v4279_v8 = vmax.f32 %v6147_v32, %v6221_v33  ;;  %v4062_v62 = vpop.f32.mrb[121].mxu1  ;;  %v6148_v42 = vpop.f32.mrb[122].mxu0  ;;  %v8322_v7 = vmax.f32 %v8320_v54, %v8321_v55  ;;  %v8325_v0 = vmax.f32 %v8323_v59, %v8324_v60 }
 0x235   : > { %4998 = vst.msk [vmem:[%s7581_s12 + $0xa4] sm:$0xf] %vm4956_vm4, %v5768_v2  ;;  %v4427_v28 = vadd.f32 %v7560_v53, %v4348_v45  ;;  %v4425_v21 = vadd.f32 %v7560_v53, %v4346_v49  ;;  %vm4496_vm3 = vcmp.ge.f32.partialorder %v4424_v27, 0.0  ;;  %v4568_v58 = vmul.f32 0.01, %v4424_v27  ;;  %v6222_v3 = vpop.f32.mrb[122].mxu1 }
 0x236   : > { %v5773_v10 = vpack.c.bf16 %v4642_v31, %v4642_v31  ;;  %v4351_v40 = vmax.f32 %v8316_v18, %v4279_v8  ;;  %v4277_v41 = vmax.f32 %v3380_v9, %v4062_v62  ;;  %v3383_v57 = vpop.f32.mrb[123].mxu0  ;;  %v4065_v61 = vpop.f32.mrb[123].mxu1  ;;  %v4280_v46 = vmax.f32 %v6148_v42, %v6222_v3  ;;  %v7879_v62 = vld [vmem:[%s8021_s2] ss:$0 sm:$0xff] }
 0x237   : > { %vm4499_vm5 = vcmp.ge.f32.partialorder %v4427_v28, 0.0  ;;  %v4571_v25 = vmul.f32 0.01, %v4427_v28  ;;  %vm4497_vm6 = vcmp.ge.f32.partialorder %v4425_v21, 0.0  ;;  %v4640_v4 = vsel %vm4496_vm3, %v4424_v27, %v4568_v58  ;;  %v8330_v42 = vld [vmem:[#allocation63_spill] sm:$0xff] }
 0x238   : > { %v4569_v14 = vmul.f32 0.01, %v4425_v21  ;;  %5003 = vst.msk [vmem:[%s7581_s12 + $0xb8] sm:$0xf] %vm4956_vm4, %v5773_v10  ;;  %v5771_v6 = vpack.c.bf16 %v4640_v4, %v4640_v4  ;;  %v4278_v11 = vmax.f32 %v3383_v57, %v4065_v61  ;;  %v4430_v37 = vadd.f32 %v7560_v53, %v4351_v40  ;;  %v8336_v57 = vld [vmem:[#allocation67_spill] sm:$0xff] }
 0x239   : > { %v4643_v34 = vsel %vm4499_vm5, %v4427_v28, %v4571_v25  ;;  %v4349_v35 = vmax.f32 %v8319_v12, %v4277_v41  ;;  %v4352_v16 = vmax.f32 %v8322_v7, %v4280_v46  ;;  %v8329_v25 = vld [vmem:[#allocation62_spill] sm:$0xff]  ;;  %v8334_v18 = vmax.f32 %v8332_v24, %v8333_v5 }
 0x23a   : > { %v5774_v51 = vpack.c.bf16 %v4643_v34, %v4643_v34  ;;  %v4641_v52 = vsel %vm4497_vm6, %v4425_v21, %v4569_v14  ;;  %5001 = vst.msk [vmem:[%s7581_s12 + $0xb0] sm:$0xf] %vm4956_vm4, %v5771_v6  ;;  %v4350_v1 = vmax.f32 %v8325_v0, %v4278_v11  ;;  %vm4502_vm7 = vcmp.ge.f32.partialorder %v4430_v37, 0.0  ;;  %v6151_v13 = vpop.f32.mrb[124].mxu0  ;;  %v6225_v22 = vpop.f32.mrb[124].mxu1  ;;  %v8335_v41 = vld [vmem:[#allocation66_spill] sm:$0xff] }
 0x23b   : > { %v5772_v36 = vpack.c.bf16 %v4641_v52, %v4641_v52  ;;  %v4574_v30 = vmul.f32 0.01, %v4430_v37  ;;  %v4428_v56 = vadd.f32 %v7560_v53, %v4349_v35  ;;  %v4431_v17 = vadd.f32 %v7560_v53, %v4352_v16  ;;  %v3396_v63 = vpop.f32.mrb[125].mxu0  ;;  %v4078_v2 = vpop.f32.mrb[125].mxu1  ;;  %v8338_v0 = vld [vmem:[#allocation68_spill] sm:$0xff] }
 0x23c   : > { %5004 = vst.msk [vmem:[%s7581_s12 + $0xbc] sm:$0xf] %vm4956_vm4, %v5774_v51  ;;  %v4429_v47 = vadd.f32 %v7560_v53, %v4350_v1  ;;  %v4283_v23 = vmax.f32 %v6151_v13, %v6225_v22  ;;  %v6152_v29 = vpop.f32.mrb[126].mxu0  ;;  %v6226_v45 = vpop.f32.mrb[126].mxu1  ;;  %v8327_v53 = vld [vmem:[#allocation61_spill] sm:$0xff]  ;;  %v4281_v27 = vmax.f32 %v3396_v63, %v4078_v2  ;;  %v8331_v3 = vmax.f32 %v8329_v25, %v8330_v42 }
 0x23d   : > { %5002 = vst.msk [vmem:[%s7581_s12 + $0xb4] sm:$0xf] %vm4956_vm4, %v5772_v36  ;;  %v4646_v38 = vsel %vm4502_vm7, %v4430_v37, %v4574_v30  ;;  %vm4500_vm8 = vcmp.ge.f32.partialorder %v4428_v56, 0.0  ;;  %v4572_v39 = vmul.f32 0.01, %v4428_v56  ;;  %vm4503_vm9 = vcmp.ge.f32.partialorder %v4431_v17, 0.0 }
 0x23e   : > { %v5777_v26 = vpack.c.bf16 %v4646_v38, %v4646_v38  ;;  %v4575_v43 = vmul.f32 0.01, %v4431_v17  ;;  %vm4501_vm10 = vcmp.ge.f32.partialorder %v4429_v47, 0.0  ;;  %v4573_v44 = vmul.f32 0.01, %v4429_v47  ;;  %v3399_v28 = vpop.f32.mrb[127].mxu0 }
 0x23f   : > { %v4644_v50 = vsel %vm4500_vm8, %v4428_v56, %v4572_v39  ;;  %v8328_v49 = vmax.f32 %v8326_v48, %v8327_v53  ;;  %v4081_v21 = vpop.f32.mrb[127].mxu1  ;;  %v4284_v31 = vmax.f32 %v6152_v29, %v6226_v45  ;;  %v4353_v4 = vmax.f32 %v8331_v3, %v4281_v27  ;;  %v8339_v1 = vld [vmem:[#allocation69_spill] sm:$0xff]  ;;  %v8342_v29 = vld [vmem:[#allocation71_spill] sm:$0xff]  ;;  %v8344_v48 = vld [vmem:[#allocation72_spill] sm:$0xff] }
 0x240   : > { %5007 = vst.msk [vmem:[%s7581_s12 + $0xc8] sm:$0xf] %vm4956_vm4, %v5777_v26  ;;  %v5775_v32 = vpack.c.bf16 %v4644_v50, %v4644_v50  ;;  %v4647_v33 = vsel %vm4503_vm9, %v4431_v17, %v4575_v43  ;;  %v4282_v58 = vmax.f32 %v3399_v28, %v4081_v21  ;;  %v4645_v9 = vsel %vm4501_vm10, %v4429_v47, %v4573_v44  ;;  %v8341_v43 = vld [vmem:[#allocation70_spill] sm:$0xff]  ;;  %v8345_v53 = vld [vmem:[#allocation73_spill] sm:$0xff]  ;;  %v8348_v28 = vld [vmem:[#allocation75_spill] sm:$0xff] }
 0x241   : > { %v4355_v15 = vmax.f32 %v8328_v49, %v4283_v23  ;;  %v5778_v8 = vpack.c.bf16 %v4647_v33, %v4647_v33  ;;  %v5776_v14 = vpack.c.bf16 %v4645_v9, %v4645_v9  ;;  %v4356_v40 = vmax.f32 %v8334_v18, %v4284_v31  ;;  %v8347_v27 = vld [vmem:[#allocation74_spill] sm:$0xff] }
 0x242   : > { %5005 = vst.msk [vmem:[%s7581_s12 + $0xc0] sm:$0xf] %vm4956_vm4, %v5775_v32  ;;  %v8337_v61 = vmax.f32 %v8335_v41, %v8336_v57  ;;  %v4432_v46 = vadd.f32 %v7879_v62, %v4353_v4  ;;  %v6155_v52 = vpop.f32.mrb[128].mxu0  ;;  %v6229_v37 = vpop.f32.mrb[128].mxu1  ;;  %v8340_v30 = vmax.f32 %v8338_v0, %v8339_v1  ;;  %v8343_v45 = vmax.f32 %v8341_v43, %v8342_v29  ;;  %v8356_v0 = vld [vmem:[#allocation80_spill] sm:$0xff]  ;;  %v8357_v1 = vld [vmem:[#allocation81_spill] sm:$0xff] }
 0x243   : > { %v4434_v10 = vadd.f32 %v7879_v62, %v4355_v15  ;;  %5008 = vst.msk [vmem:[%s7581_s12 + $0xcc] sm:$0xf] %vm4956_vm4, %v5778_v8  ;;  %5006 = vst.msk [vmem:[%s7581_s12 + $0xc4] sm:$0xf] %vm4956_vm4, %v5776_v14  ;;  %v4435_v11 = vadd.f32 %v7879_v62, %v4356_v40  ;;  %v4287_v12 = vmax.f32 %v6155_v52, %v6229_v37  ;;  %v3412_v35 = vpop.f32.mrb[129].mxu0  ;;  %v4094_v36 = vpop.f32.mrb[129].mxu1 }
 0x244   : > { %v4354_v6 = vmax.f32 %v8337_v61, %v4282_v58  ;;  %vm4504_vm12 = vcmp.ge.f32.partialorder %v4432_v46, 0.0  ;;  %v4576_v20 = vmul.f32 0.01, %v4432_v46  ;;  %v6156_v7 = vpop.f32.mrb[130].mxu0  ;;  %v6230_v16 = vpop.f32.mrb[130].mxu1  ;;  %v4285_v17 = vmax.f32 %v3412_v35, %v4094_v36  ;;  %v8350_v61 = vld [vmem:[#allocation76_spill] sm:$0xff] }
 0x245   : > { %vm4506_vm11 = vcmp.ge.f32.partialorder %v4434_v10, 0.0  ;;  %v4578_v34 = vmul.f32 0.01, %v4434_v10  ;;  %vm4507_vm13 = vcmp.ge.f32.partialorder %v4435_v11, 0.0  ;;  %v4579_v55 = vmul.f32 0.01, %v4435_v11 }
 0x246   : > { %v4433_v51 = vadd.f32 %v7879_v62, %v4354_v6  ;;  %v4648_v59 = vsel %vm4504_vm12, %v4432_v46, %v4576_v20  ;;  %v4359_v56 = vmax.f32 %v8340_v30, %v4287_v12  ;;  %v3415_v47 = vpop.f32.mrb[131].mxu0  ;;  %v4097_v13 = vpop.f32.mrb[131].mxu1  ;;  %v4288_v39 = vmax.f32 %v6156_v7, %v6230_v16  ;;  %v8351_v6 = vld [vmem:[#allocation77_spill] sm:$0xff]  ;;  %v8354_v7 = vld [vmem:[#allocation79_spill] sm:$0xff] }
 0x247   : > { %v4650_v19 = vsel %vm4506_vm11, %v4434_v10, %v4578_v34  ;;  %v5779_v22 = vpack.c.bf16 %v4648_v59, %v4648_v59  ;;  %v4651_v38 = vsel %vm4507_vm13, %v4435_v11, %v4579_v55  ;;  %v4286_v23 = vmax.f32 %v3415_v47, %v4097_v13  ;;  %v8353_v55 = vld [vmem:[#allocation78_spill] sm:$0xff]  ;;  %v8360_v47 = vld [vmem:[#allocation83_spill] sm:$0xff] }
 0x248   : > { %v5781_v54 = vpack.c.bf16 %v4650_v19, %v4650_v19  ;;  %vm4505_vm14 = vcmp.ge.f32.partialorder %v4433_v51, 0.0  ;;  %v4577_v60 = vmul.f32 0.01, %v4433_v51  ;;  %v5782_v63 = vpack.c.bf16 %v4651_v38, %v4651_v38 }
 0x249   : > { %v4438_v26 = vadd.f32 %v7879_v62, %v4359_v56  ;;  %v4357_v50 = vmax.f32 %v8343_v45, %v4285_v17  ;;  %5009 = vst.msk [vmem:[%s7581_s12 + $0xd0] sm:$0xf] %vm4956_vm4, %v5779_v22  ;;  %v8346_v49 = vmax.f32 %v8344_v48, %v8345_v53  ;;  %v8349_v21 = vmax.f32 %v8347_v27, %v8348_v28  ;;  %v8359_v17 = vld [vmem:[#allocation82_spill] sm:$0xff] }
 0x24a   : > { %5011 = vst.msk [vmem:[%s7581_s12 + $0xd8] sm:$0xf] %vm4956_vm4, %v5781_v54  ;;  %v4649_v2 = vsel %vm4505_vm14, %v4433_v51, %v4577_v60  ;;  %5012 = vst.msk [vmem:[%s7581_s12 + $0xdc] sm:$0xf] %vm4956_vm4, %v5782_v63  ;;  %v6159_v9 = vpop.f32.mrb[132].mxu0  ;;  %v6233_v10 = vpop.f32.mrb[132].mxu1  ;;  %v8352_v34 = vmax.f32 %v8350_v61, %v8351_v6  ;;  %v8355_v16 = vmax.f32 %v8353_v55, %v8354_v7 }
 0x24b   : > { %v5780_v44 = vpack.c.bf16 %v4649_v2, %v4649_v2  ;;  %v4360_v15 = vmax.f32 %v8346_v49, %v4288_v39  ;;  %v4358_v32 = vmax.f32 %v8349_v21, %v4286_v23  ;;  %vm4510_vm15 = vcmp.ge.f32.partialorder %v4438_v26, 0.0  ;;  %v3428_v4 = vpop.f32.mrb[133].mxu0  ;;  %v4110_v14 = vpop.f32.mrb[133].mxu1  ;;  %v8362_v21 = vld [vmem:[#allocation84_spill] sm:$0xff]  ;;  %v8369_v6 = vld [vmem:[#allocation89_spill] sm:$0xff] }
 0x24c   : > { %v4582_v33 = vmul.f32 0.01, %v4438_v26  ;;  %v4436_v31 = vadd.f32 %v7879_v62, %v4357_v50  ;;  %v4291_v3 = vmax.f32 %v6159_v9, %v6233_v10  ;;  %v6160_v18 = vpop.f32.mrb[134].mxu0  ;;  %v6234_v40 = vpop.f32.mrb[134].mxu1  ;;  %v4289_v11 = vmax.f32 %v3428_v4, %v4110_v14  ;;  %v8368_v61 = vld [vmem:[#allocation88_spill] sm:$0xff] }
 0x24d   : > { %5010 = vst.msk [vmem:[%s7581_s12 + $0xd4] sm:$0xf] %vm4956_vm4, %v5780_v44  ;;  %v4439_v58 = vadd.f32 %v7879_v62, %v4360_v15  ;;  %v4437_v8 = vadd.f32 %v7879_v62, %v4358_v32  ;;  %v3431_v51 = vpop.f32.mrb[135].mxu0  ;;  %v4113_v52 = vpop.f32.mrb[135].mxu1  ;;  %v4292_v20 = vmax.f32 %v6160_v18, %v6234_v40  ;;  %v8358_v30 = vmax.f32 %v8356_v0, %v8357_v1  ;;  %v8363_v32 = vld [vmem:[#allocation85_spill] sm:$0xff]  ;;  %v8366_v18 = vld [vmem:[#allocation87_spill] sm:$0xff] }
 0x24e   : > { %v4654_v25 = vsel %vm4510_vm15, %v4438_v26, %v4582_v33  ;;  %vm4508_vm0 = vcmp.ge.f32.partialorder %v4436_v31, 0.0  ;;  %v4580_v42 = vmul.f32 0.01, %v4436_v31  ;;  %v4363_v46 = vmax.f32 %v8352_v34, %v4291_v3 }
 0x24f   : > { %v5785_v24 = vpack.c.bf16 %v4654_v25, %v4654_v25  ;;  %vm4511_vm1 = vcmp.ge.f32.partialorder %v4439_v58, 0.0  ;;  %v4583_v5 = vmul.f32 0.01, %v4439_v58  ;;  %vm4509_vm2 = vcmp.ge.f32.partialorder %v4437_v8, 0.0 }
 0x250   : > { %v4652_v41 = vsel %vm4508_vm0, %v4436_v31, %v4580_v42  ;;  %v4581_v57 = vmul.f32 0.01, %v4437_v8  ;;  %v4290_v12 = vmax.f32 %v3431_v51, %v4113_v52  ;;  %v4442_v54 = vadd.f32 %v7879_v62, %v4363_v46  ;;  %v8372_v51 = vld [vmem:[#allocation91_spill] sm:$0xff] }
 0x251   : > { %5015 = vst.msk [vmem:[%s7581_s12 + $0xe8] sm:$0xf] %vm4956_vm4, %v5785_v24  ;;  %v5783_v37 = vpack.c.bf16 %v4652_v41, %v4652_v41  ;;  %v4655_v19 = vsel %vm4511_vm1, %v4439_v58, %v4583_v5  ;;  %v4361_v59 = vmax.f32 %v8355_v16, %v4289_v11  ;;  %v4364_v56 = vmax.f32 %v8358_v30, %v4292_v20  ;;  %v8365_v5 = vld [vmem:[#allocation86_spill] sm:$0xff] }
 0x252   : > { %v5786_v35 = vpack.c.bf16 %v4655_v19, %v4655_v19  ;;  %v4653_v36 = vsel %vm4509_vm2, %v4437_v8, %v4581_v57  ;;  %v8361_v13 = vmax.f32 %v8359_v17, %v8360_v47  ;;  %vm4514_vm3 = vcmp.ge.f32.partialorder %v4442_v54, 0.0  ;;  %v6163_v2 = vpop.f32.mrb[136].mxu0  ;;  %v6237_v26 = vpop.f32.mrb[136].mxu1  ;;  %v8371_v11 = vld [vmem:[#allocation90_spill] sm:$0xff] }
 0x253   : > { %5013 = vst.msk [vmem:[%s7581_s12 + $0xe0] sm:$0xf] %vm4956_vm4, %v5783_v37  ;;  %v5784_v60 = vpack.c.bf16 %v4653_v36, %v4653_v36  ;;  %v4586_v38 = vmul.f32 0.01, %v4442_v54  ;;  %v4440_v39 = vadd.f32 %v7879_v62, %v4361_v59  ;;  %v4443_v23 = vadd.f32 %v7879_v62, %v4364_v56  ;;  %v3444_v50 = vpop.f32.mrb[137].mxu0  ;;  %v4126_v44 = vpop.f32.mrb[137].mxu1 }
 0x254   : > { %v4362_v22 = vmax.f32 %v8361_v13, %v4290_v12  ;;  %5016 = vst.msk [vmem:[%s7581_s12 + $0xec] sm:$0xf] %vm4956_vm4, %v5786_v35  ;;  %v4295_v45 = vmax.f32 %v6163_v2, %v6237_v26  ;;  %v6164_v49 = vpop.f32.mrb[138].mxu0  ;;  %v6238_v15 = vpop.f32.mrb[138].mxu1  ;;  %v8364_v33 = vmax.f32 %v8362_v21, %v8363_v32  ;;  %v4293_v58 = vmax.f32 %v3444_v50, %v4126_v44  ;;  %v8374_v13 = vld [vmem:[#allocation92_spill] sm:$0xff]  ;;  %v8381_v32 = vld [vmem:[#allocation97_spill] sm:$0xff] }
 0x255   : > { %5014 = vst.msk [vmem:[%s7581_s12 + $0xe4] sm:$0xf] %vm4956_vm4, %v5784_v60  ;;  %v4658_v43 = vsel %vm4514_vm3, %v4442_v54, %v4586_v38  ;;  %vm4512_vm5 = vcmp.ge.f32.partialorder %v4440_v39, 0.0  ;;  %v4584_v29 = vmul.f32 0.01, %v4440_v39  ;;  %vm4515_vm6 = vcmp.ge.f32.partialorder %v4443_v23, 0.0 }
 0x256   : > { %v4441_v63 = vadd.f32 %v7879_v62, %v4362_v22  ;;  %v5789_v48 = vpack.c.bf16 %v4658_v43, %v4658_v43  ;;  %v4587_v53 = vmul.f32 0.01, %v4443_v23  ;;  %v4367_v31 = vmax.f32 %v8364_v33, %v4295_v45  ;;  %v3447_v8 = vpop.f32.mrb[139].mxu0  ;;  %v4129_v9 = vpop.f32.mrb[139].mxu1  ;;  %v8375_v22 = vld [vmem:[#allocation93_spill] sm:$0xff]  ;;  %v8380_v21 = vld [vmem:[#allocation96_spill] sm:$0xff] }
 0x257   : > { %v4656_v27 = vsel %vm4512_vm5, %v4440_v39, %v4584_v29  ;;  %v4296_v42 = vmax.f32 %v6164_v49, %v6238_v15  ;;  %v4294_v3 = vmax.f32 %v3447_v8, %v4129_v9  ;;  %v8367_v40 = vmax.f32 %v8365_v5, %v8366_v18  ;;  %v8378_v49 = vld [vmem:[#allocation95_spill] sm:$0xff] }
 0x258   : > { %vm4513_vm7 = vcmp.ge.f32.partialorder %v4441_v63, 0.0  ;;  %v4585_v28 = vmul.f32 0.01, %v4441_v63  ;;  %5019 = vst.msk [vmem:[%s7581_s12 + $0xf8] sm:$0xf] %vm4956_vm4, %v5789_v48  ;;  %v5787_v10 = vpack.c.bf16 %v4656_v27, %v4656_v27  ;;  %v4659_v25 = vsel %vm4515_vm6, %v4443_v23, %v4587_v53  ;;  %v8377_v53 = vld [vmem:[#allocation94_spill] sm:$0xff] }
 0x259   : > { %v5790_v4 = vpack.c.bf16 %v4659_v25, %v4659_v25  ;;  %v4446_v24 = vadd.f32 %v7879_v62, %v4367_v31  ;;  %v4365_v41 = vmax.f32 %v8367_v40, %v4293_v58  ;;  %v8370_v34 = vmax.f32 %v8368_v61, %v8369_v6  ;;  %v8383_v58 = vld [vmem:[#allocation98_spill] sm:$0xff]  ;;  %v8384_v8 = vld [vmem:[#allocation99_spill] sm:$0xff] }
 0x25a   : > { %v4657_v14 = vsel %vm4513_vm7, %v4441_v63, %v4585_v28  ;;  %5017 = vst.msk [vmem:[%s7581_s12 + $0xf0] sm:$0xf] %vm4956_vm4, %v5787_v10  ;;  %v8373_v52 = vmax.f32 %v8371_v11, %v8372_v51  ;;  %v6167_v36 = vpop.f32.mrb[140].mxu0  ;;  %v6241_v54 = vpop.f32.mrb[140].mxu1  ;;  %v8376_v38 = vmax.f32 %v8374_v13, %v8375_v22  ;;  %v8379_v15 = vmax.f32 %v8377_v53, %v8378_v49 }
 0x25b   : > { %v5788_v57 = vpack.c.bf16 %v4657_v14, %v4657_v14  ;;  %v4368_v46 = vmax.f32 %v8370_v34, %v4296_v42  ;;  %5020 = vst.msk [vmem:[%s7581_s12 + $0xfc] sm:$0xf] %vm4956_vm4, %v5790_v4  ;;  %vm4518_vm8 = vcmp.ge.f32.partialorder %v4446_v24, 0.0  ;;  %v4590_v19 = vmul.f32 0.01, %v4446_v24  ;;  %v3460_v59 = vpop.f32.mrb[141].mxu0 }
 0x25c   : > { %v4366_v37 = vmax.f32 %v8373_v52, %v4294_v3  ;;  %v4444_v20 = vadd.f32 %v7879_v62, %v4365_v41  ;;  %v4299_v16 = vmax.f32 %v6167_v36, %v6241_v54  ;;  %v4142_v60 = vpop.f32.mrb[141].mxu1  ;;  %v6168_v30 = vpop.f32.mrb[142].mxu0  ;;  %v8382_v33 = vmax.f32 %v8380_v21, %v8381_v32 }
 0x25d   : > { %5018 = vst.msk [vmem:[%s7581_s12 + $0xf4] sm:$0xf] %vm4956_vm4, %v5788_v57  ;;  %v4447_v12 = vadd.f32 %v7879_v62, %v4368_v46  ;;  %v4662_v55 = vsel %vm4518_vm8, %v4446_v24, %v4590_v19  ;;  %v6242_v56 = vpop.f32.mrb[142].mxu1  ;;  %v4297_v23 = vmax.f32 %v3460_v59, %v4142_v60  ;;  %v3463_v63 = vpop.f32.mrb[143].mxu0  ;;  %v8385_v9 = vmax.f32 %v8383_v58, %v8384_v8 }
 0x25e   : > { %v4445_v35 = vadd.f32 %v7879_v62, %v4366_v37  ;;  %vm4516_vm9 = vcmp.ge.f32.partialorder %v4444_v20, 0.0  ;;  %v4588_v7 = vmul.f32 0.01, %v4444_v20  ;;  %v5793_v0 = vpack.c.bf16 %v4662_v55, %v4662_v55  ;;  %v4145_v2 = vpop.f32.mrb[143].mxu1 }
 0x25f   : > { %vm4519_vm10 = vcmp.ge.f32.partialorder %v4447_v12, 0.0  ;;  %v4591_v1 = vmul.f32 0.01, %v4447_v12  ;;  %v4371_v39 = vmax.f32 %v8376_v38, %v4299_v16  ;;  %v4300_v29 = vmax.f32 %v6168_v30, %v6242_v56 }
 0x260   : > { %vm4517_vm11 = vcmp.ge.f32.partialorder %v4445_v35, 0.0  ;;  %v4660_v17 = vsel %vm4516_vm9, %v4444_v20, %v4588_v7  ;;  %v4589_v47 = vmul.f32 0.01, %v4445_v35  ;;  %5023 = vst.msk [vmem:[%s7581_s12 + $0x108] sm:$0xf] %vm4956_vm4, %v5793_v0  ;;  %v4298_v45 = vmax.f32 %v3463_v63, %v4145_v2 }
 0x261   : > { %v5791_v26 = vpack.c.bf16 %v4660_v17, %v4660_v17  ;;  %v4663_v43 = vsel %vm4519_vm10, %v4447_v12, %v4591_v1  ;;  %v4450_v48 = vadd.f32 %v7879_v62, %v4371_v39  ;;  %v4369_v27 = vmax.f32 %v8379_v15, %v4297_v23 }
 0x262   : > { %v5794_v50 = vpack.c.bf16 %v4663_v43, %v4663_v43  ;;  %v4661_v44 = vsel %vm4517_vm11, %v4445_v35, %v4589_v47  ;;  %v4372_v31 = vmax.f32 %v8382_v33, %v4300_v29  ;;  %v4370_v10 = vmax.f32 %v8385_v9, %v4298_v45 }
 0x263   : > { %5021 = vst.msk [vmem:[%s7581_s12 + $0x100] sm:$0xf] %vm4956_vm4, %v5791_v26  ;;  %v5792_v28 = vpack.c.bf16 %v4661_v44, %v4661_v44  ;;  %vm4522_vm12 = vcmp.ge.f32.partialorder %v4450_v48, 0.0  ;;  %v4594_v25 = vmul.f32 0.01, %v4450_v48  ;;  %v4448_v42 = vadd.f32 %v7879_v62, %v4369_v27 }
 0x264   : > { %5024 = vst.msk [vmem:[%s7581_s12 + $0x10c] sm:$0xf] %vm4956_vm4, %v5794_v50  ;;  %v4451_v3 = vadd.f32 %v7879_v62, %v4372_v31  ;;  %v4449_v4 = vadd.f32 %v7879_v62, %v4370_v10 }
 0x265   : > { %5022 = vst.msk [vmem:[%s7581_s12 + $0x104] sm:$0xf] %vm4956_vm4, %v5792_v28  ;;  %v4666_v14 = vsel %vm4522_vm12, %v4450_v48, %v4594_v25  ;;  %vm4520_vm13 = vcmp.ge.f32.partialorder %v4448_v42, 0.0  ;;  %v4592_v24 = vmul.f32 0.01, %v4448_v42 }
 0x266   : > { %v5797_v5 = vpack.c.bf16 %v4666_v14, %v4666_v14  ;;  %vm4523_vm14 = vcmp.ge.f32.partialorder %v4451_v3, 0.0  ;;  %v4595_v18 = vmul.f32 0.01, %v4451_v3  ;;  %vm4521_vm15 = vcmp.ge.f32.partialorder %v4449_v4, 0.0 }
 0x267   : > { %v4664_v40 = vsel %vm4520_vm13, %v4448_v42, %v4592_v24  ;;  %v4593_v41 = vmul.f32 0.01, %v4449_v4 }
 0x268   : > { %5027 = vst.msk [vmem:[%s7581_s12 + $0x118] sm:$0xf] %vm4956_vm4, %v5797_v5  ;;  %v5795_v57 = vpack.c.bf16 %v4664_v40, %v4664_v40  ;;  %v4667_v61 = vsel %vm4523_vm14, %v4451_v3, %v4595_v18 }
 0x269   : > { %v5798_v6 = vpack.c.bf16 %v4667_v61, %v4667_v61  ;;  %v4665_v34 = vsel %vm4521_vm15, %v4449_v4, %v4593_v41 }
 0x26a   : > { %5025 = vst.msk [vmem:[%s7581_s12 + $0x110] sm:$0xf] %vm4956_vm4, %v5795_v57  ;;  %v5796_v62 = vpack.c.bf16 %v4665_v34, %v4665_v34 }
 0x26b   : > { %5028 = vst.msk [vmem:[%s7581_s12 + $0x11c] sm:$0xf] %vm4956_vm4, %v5798_v6 }
 0x26c   : > { %5026 = vst.msk [vmem:[%s7581_s12 + $0x114] sm:$0xf] %vm4956_vm4, %v5796_v62 }
 0x26d PF: > { %s13_s16 = sadd.s32 1, %s6470_s16   ;;  %s8386_s12 = smov %s6458_s13 }
 0x26e   : > { %p10_p10 = scmp.ge.s32.totalorder %s13_s16, 4   ;;  %s8387_s13 = smov %s6528_s20 }
 0x26f   : > { %s8388_s14 = smov %s6466_s15  ;;  %s8389_s15 = smov %s8391_s17 }
 0x270   :  { %12 = sbr.rel (!%p10_p10) target bundleno = 3 (0x3), region = 117 }

// kernel: variant2_forward.6
= control target key start
LH: loop header
LB: loop body
LE: loop exit
PB: predicated region body
PF: predicated region fallthrough
CT: control target
= control target key end

     0   :  { %s3877_s12 = smov 0   ;;  %s3879_s13 = smov 0   ;;  %s4972_s0 = inlined_call_operand.vmem [shape: bf16[4,288,288], index: 0, kind: input, shape index: {}]   ;;  %s4973_s1 = inlined_call_operand.vmem [shape: bf16[288,64], index: 1, kind: input, shape index: {}]   ;;  %s4974_s2 = inlined_call_operand.vmem [shape: f32[1,64], index: 2, kind: input, shape index: {}]   ;;  %s4975_s3 = inlined_call_operand.vmem [shape: bf16[288,64], index: 3, kind: output, shape index: {}]  }
   0x1   :  { %s3881_s14 = smov 0   ;;  %s3883_s15 = smov 0  }
   0x2   :  { %s3885_s16 = smov 0  }
   0x3 LB: > { %s25_s17 = sadd.s32 1, %s3849_s15  ;;  %p39_p1 = scmp.ne.s32.totalorder %s3841_s13, %s3837_s12  ;;  %s3853_s16 = sphi %s3885_s16, %s13_s16   ;;  %s3849_s15 = sphi %s3883_s15, %s5031_s15   ;;  %s3845_s14 = sphi %s3881_s14, %s5030_s14   ;;  %s3841_s13 = sphi %s3879_s13, %s5029_s13   ;;  %s3837_s12 = sphi %s3877_s12, %s5028_s12  }
   0x4   : > { %p27_p0 = scmp.ge.s32.totalorder %s25_s17, 2  ;;  %p40_p2 = scmp.eq.s32.totalorder %s3853_s16, 0 }
   0x5   : > { %s32_s19 = sadd.s32 1, %s3841_s13  ;;  %p2662_p5 = scmp.ge.s32.totalorder %s3853_s16, 2 }
   0x6   : > { %s5033_s17 = smov (%p27_p0, %s25_s17), 0  ;;  %p41_p3 = por %p40_p2, %p39_p1 }
   0x7   : > { %s29_s18 = ssub.s32 %s3849_s15, %s5033_s17  ;;  %158 = sbr.rel (%p2662_p5) target bundleno = 104 (0x68), region = 24 }
   0x8   : > { %p30_p4 = scmp.eq.s32.totalorder %s29_s18, 0 }
   0xa   : > { %s3912_s20 = scalar_select %p30_p4, %s3841_s13, %s32_s19  }
   0xe   : > { %161 = sbr.rel (!%p41_p3) target bundleno = 104 (0x68), region = 28  ;;  %s163_s21 = sand.u32 (%p41_p3), 1, %s3841_s13  }
   0xf   : > { %s3607_s22 = smul.u32 (%p41_p3), 864, %s163_s21 }
  0x10   : > { %s3610_s23 = smul.u32 (%p41_p3), 216, %s3849_s15 }
  0x11   : > { %s3925_s27 = scalar_lea.vmem (%p41_p3), [#allocation2], %s3607_s22 }
  0x12   : > { %s3920_s26 = scalar_lea.vmem (%p41_p3), %s4972_s0, %s3610_s23 }
  0x13   : > { %v184_v0 = vld [vmem:[%s3920_s26] sm:$0xff] (%p41_p3)  ;;  %v186_v1 = vld [vmem:[%s3920_s26 + $0xc] sm:$0xff] (%p41_p3)  ;;  %v188_v2 = vld [vmem:[%s3920_s26 + $0x18] sm:$0xff] (%p41_p3) }
  0x14   : > { %185 = vst [vmem:[%s3925_s27] sm:$0xff] (%p41_p3), %v184_v0  ;;  %187 = vst [vmem:[%s3925_s27 + $0xc] sm:$0xff] (%p41_p3), %v186_v1  ;;  %v190_v3 = vld [vmem:[%s3920_s26 + $0x24] sm:$0xff] (%p41_p3)  ;;  %v192_v4 = vld [vmem:[%s3920_s26 + $0x30] sm:$0xff] (%p41_p3) }
  0x15   : > { %189 = vst [vmem:[%s3925_s27 + $0x18] sm:$0xff] %v188_v2  ;;  %v194_v5 = vld [vmem:[%s3920_s26 + $0x3c] sm:$0xff]  ;;  %191 = vst [vmem:[%s3925_s27 + $0x24] sm:$0xff] %v190_v3  ;;  %v196_v6 = vld [vmem:[%s3920_s26 + $0x48] sm:$0xff] }
  0x16   : > { %193 = vst [vmem:[%s3925_s27 + $0x30] sm:$0xff] %v192_v4  ;;  %195 = vst [vmem:[%s3925_s27 + $0x3c] sm:$0xff] %v194_v5  ;;  %v198_v7 = vld [vmem:[%s3920_s26 + $0x54] sm:$0xff]  ;;  %v200_v8 = vld [vmem:[%s3920_s26 + $0x60] sm:$0xff] }
  0x17   : > { %197 = vst [vmem:[%s3925_s27 + $0x48] sm:$0xff] %v196_v6  ;;  %199 = vst [vmem:[%s3925_s27 + $0x54] sm:$0xff] %v198_v7  ;;  %v202_v9 = vld [vmem:[%s3920_s26 + $0x6c] sm:$0xff]  ;;  %v204_v10 = vld [vmem:[%s3920_s26 + $0x78] sm:$0xff] }
  0x18   : > { %201 = vst [vmem:[%s3925_s27 + $0x60] sm:$0xff] %v200_v8  ;;  %v206_v11 = vld [vmem:[%s3920_s26 + $0x84] sm:$0xff]  ;;  %203 = vst [vmem:[%s3925_s27 + $0x6c] sm:$0xff] %v202_v9  ;;  %v208_v12 = vld [vmem:[%s3920_s26 + $0x90] sm:$0xff] }
  0x19   : > { %205 = vst [vmem:[%s3925_s27 + $0x78] sm:$0xff] %v204_v10  ;;  %207 = vst [vmem:[%s3925_s27 + $0x84] sm:$0xff] %v206_v11  ;;  %v210_v13 = vld [vmem:[%s3920_s26 + $0x9c] sm:$0xff]  ;;  %v212_v14 = vld [vmem:[%s3920_s26 + $0xa8] sm:$0xff] }
  0x1a   : > { %209 = vst [vmem:[%s3925_s27 + $0x90] sm:$0xff] %v208_v12  ;;  %211 = vst [vmem:[%s3925_s27 + $0x9c] sm:$0xff] %v210_v13  ;;  %v214_v15 = vld [vmem:[%s3920_s26 + $0xb4] sm:$0xff]  ;;  %v216_v16 = vld [vmem:[%s3920_s26 + $0xc0] sm:$0xff] }
  0x1b   : > { %213 = vst [vmem:[%s3925_s27 + $0xa8] sm:$0xff] %v212_v14  ;;  %v218_v17 = vld [vmem:[%s3920_s26 + $0xcc] sm:$0xff]  ;;  %215 = vst [vmem:[%s3925_s27 + $0xb4] sm:$0xff] %v214_v15  ;;  %v222_v19 = vld [vmem:[%s3920_s26 + $0x1bc] sm:$0xff] }
  0x1c   : > { %217 = vst [vmem:[%s3925_s27 + $0xc0] sm:$0xff] %v216_v16  ;;  %219 = vst [vmem:[%s3925_s27 + $0xcc] sm:$0xff] %v218_v17  ;;  %v220_v18 = vld [vmem:[%s3920_s26 + $0x1b0] sm:$0xff]  ;;  %v224_v20 = vld [vmem:[%s3920_s26 + $0x1c8] sm:$0xff] }
  0x1d   : > { %221 = vst [vmem:[%s3925_s27 + $0xd8] sm:$0xff] %v220_v18  ;;  %223 = vst [vmem:[%s3925_s27 + $0xe4] sm:$0xff] %v222_v19  ;;  %v226_v21 = vld [vmem:[%s3920_s26 + $0x1d4] sm:$0xff]  ;;  %v228_v22 = vld [vmem:[%s3920_s26 + $0x1e0] sm:$0xff] }
  0x1e   : > { %225 = vst [vmem:[%s3925_s27 + $0xf0] sm:$0xff] %v224_v20  ;;  %v230_v23 = vld [vmem:[%s3920_s26 + $0x1ec] sm:$0xff]  ;;  %227 = vst [vmem:[%s3925_s27 + $0xfc] sm:$0xff] %v226_v21  ;;  %v232_v24 = vld [vmem:[%s3920_s26 + $0x1f8] sm:$0xff] }
  0x1f   : > { %229 = vst [vmem:[%s3925_s27 + $0x108] sm:$0xff] %v228_v22  ;;  %231 = vst [vmem:[%s3925_s27 + $0x114] sm:$0xff] %v230_v23  ;;  %v234_v25 = vld [vmem:[%s3920_s26 + $0x204] sm:$0xff]  ;;  %v236_v26 = vld [vmem:[%s3920_s26 + $0x210] sm:$0xff] }
  0x20   : > { %233 = vst [vmem:[%s3925_s27 + $0x120] sm:$0xff] %v232_v24  ;;  %235 = vst [vmem:[%s3925_s27 + $0x12c] sm:$0xff] %v234_v25  ;;  %v238_v27 = vld [vmem:[%s3920_s26 + $0x21c] sm:$0xff]  ;;  %v240_v28 = vld [vmem:[%s3920_s26 + $0x228] sm:$0xff] }
  0x21   : > { %237 = vst [vmem:[%s3925_s27 + $0x138] sm:$0xff] %v236_v26  ;;  %v242_v29 = vld [vmem:[%s3920_s26 + $0x234] sm:$0xff]  ;;  %239 = vst [vmem:[%s3925_s27 + $0x144] sm:$0xff] %v238_v27  ;;  %v244_v30 = vld [vmem:[%s3920_s26 + $0x240] sm:$0xff] }
  0x22   : > { %241 = vst [vmem:[%s3925_s27 + $0x150] sm:$0xff] %v240_v28  ;;  %243 = vst [vmem:[%s3925_s27 + $0x15c] sm:$0xff] %v242_v29  ;;  %v246_v31 = vld [vmem:[%s3920_s26 + $0x24c] sm:$0xff]  ;;  %v248_v32 = vld [vmem:[%s3920_s26 + $0x258] sm:$0xff] }
  0x23   : > { %245 = vst [vmem:[%s3925_s27 + $0x168] sm:$0xff] %v244_v30  ;;  %247 = vst [vmem:[%s3925_s27 + $0x174] sm:$0xff] %v246_v31  ;;  %v250_v33 = vld [vmem:[%s3920_s26 + $0x264] sm:$0xff]  ;;  %v252_v34 = vld [vmem:[%s3920_s26 + $0x270] sm:$0xff] }
  0x24   : > { %249 = vst [vmem:[%s3925_s27 + $0x180] sm:$0xff] %v248_v32  ;;  %v254_v35 = vld [vmem:[%s3920_s26 + $0x27c] sm:$0xff]  ;;  %251 = vst [vmem:[%s3925_s27 + $0x18c] sm:$0xff] %v250_v33  ;;  %v258_v37 = vld [vmem:[%s3920_s26 + $0x36c] sm:$0xff] }
  0x25   : > { %253 = vst [vmem:[%s3925_s27 + $0x198] sm:$0xff] %v252_v34  ;;  %255 = vst [vmem:[%s3925_s27 + $0x1a4] sm:$0xff] %v254_v35  ;;  %v256_v36 = vld [vmem:[%s3920_s26 + $0x360] sm:$0xff]  ;;  %v260_v38 = vld [vmem:[%s3920_s26 + $0x378] sm:$0xff] }
  0x26   : > { %257 = vst [vmem:[%s3925_s27 + $0x1b0] sm:$0xff] %v256_v36  ;;  %259 = vst [vmem:[%s3925_s27 + $0x1bc] sm:$0xff] %v258_v37  ;;  %v262_v39 = vld [vmem:[%s3920_s26 + $0x384] sm:$0xff]  ;;  %v264_v40 = vld [vmem:[%s3920_s26 + $0x390] sm:$0xff] }
  0x27   : > { %261 = vst [vmem:[%s3925_s27 + $0x1c8] sm:$0xff] %v260_v38  ;;  %v266_v41 = vld [vmem:[%s3920_s26 + $0x39c] sm:$0xff]  ;;  %263 = vst [vmem:[%s3925_s27 + $0x1d4] sm:$0xff] %v262_v39  ;;  %v268_v42 = vld [vmem:[%s3920_s26 + $0x3a8] sm:$0xff] }
  0x28   : > { %265 = vst [vmem:[%s3925_s27 + $0x1e0] sm:$0xff] %v264_v40  ;;  %267 = vst [vmem:[%s3925_s27 + $0x1ec] sm:$0xff] %v266_v41  ;;  %v270_v43 = vld [vmem:[%s3920_s26 + $0x3b4] sm:$0xff]  ;;  %v272_v44 = vld [vmem:[%s3920_s26 + $0x3c0] sm:$0xff] }
  0x29   : > { %269 = vst [vmem:[%s3925_s27 + $0x1f8] sm:$0xff] %v268_v42  ;;  %271 = vst [vmem:[%s3925_s27 + $0x204] sm:$0xff] %v270_v43  ;;  %v274_v45 = vld [vmem:[%s3920_s26 + $0x3cc] sm:$0xff]  ;;  %v276_v46 = vld [vmem:[%s3920_s26 + $0x3d8] sm:$0xff] }
  0x2a   : > { %273 = vst [vmem:[%s3925_s27 + $0x210] sm:$0xff] %v272_v44  ;;  %v278_v47 = vld [vmem:[%s3920_s26 + $0x3e4] sm:$0xff]  ;;  %275 = vst [vmem:[%s3925_s27 + $0x21c] sm:$0xff] %v274_v45  ;;  %v280_v48 = vld [vmem:[%s3920_s26 + $0x3f0] sm:$0xff] }
  0x2b   : > { %277 = vst [vmem:[%s3925_s27 + $0x228] sm:$0xff] %v276_v46  ;;  %279 = vst [vmem:[%s3925_s27 + $0x234] sm:$0xff] %v278_v47  ;;  %v282_v49 = vld [vmem:[%s3920_s26 + $0x3fc] sm:$0xff]  ;;  %v284_v50 = vld [vmem:[%s3920_s26 + $0x408] sm:$0xff] }
  0x2c   : > { %281 = vst [vmem:[%s3925_s27 + $0x240] sm:$0xff] %v280_v48  ;;  %283 = vst [vmem:[%s3925_s27 + $0x24c] sm:$0xff] %v282_v49  ;;  %v286_v51 = vld [vmem:[%s3920_s26 + $0x414] sm:$0xff]  ;;  %v288_v52 = vld [vmem:[%s3920_s26 + $0x420] sm:$0xff] }
  0x2d   : > { %285 = vst [vmem:[%s3925_s27 + $0x258] sm:$0xff] %v284_v50  ;;  %v290_v53 = vld [vmem:[%s3920_s26 + $0x42c] sm:$0xff]  ;;  %287 = vst [vmem:[%s3925_s27 + $0x264] sm:$0xff] %v286_v51  ;;  %v294_v55 = vld [vmem:[%s3920_s26 + $0x51c] sm:$0xff] }
  0x2e   : > { %289 = vst [vmem:[%s3925_s27 + $0x270] sm:$0xff] %v288_v52  ;;  %291 = vst [vmem:[%s3925_s27 + $0x27c] sm:$0xff] %v290_v53  ;;  %v292_v54 = vld [vmem:[%s3920_s26 + $0x510] sm:$0xff]  ;;  %v296_v56 = vld [vmem:[%s3920_s26 + $0x528] sm:$0xff] }
  0x2f   : > { %293 = vst [vmem:[%s3925_s27 + $0x288] sm:$0xff] %v292_v54  ;;  %295 = vst [vmem:[%s3925_s27 + $0x294] sm:$0xff] %v294_v55  ;;  %v298_v57 = vld [vmem:[%s3920_s26 + $0x534] sm:$0xff]  ;;  %v300_v58 = vld [vmem:[%s3920_s26 + $0x540] sm:$0xff] }
  0x30   : > { %297 = vst [vmem:[%s3925_s27 + $0x2a0] sm:$0xff] %v296_v56  ;;  %v302_v59 = vld [vmem:[%s3920_s26 + $0x54c] sm:$0xff]  ;;  %299 = vst [vmem:[%s3925_s27 + $0x2ac] sm:$0xff] %v298_v57  ;;  %v304_v60 = vld [vmem:[%s3920_s26 + $0x558] sm:$0xff] }
  0x31   : > { %301 = vst [vmem:[%s3925_s27 + $0x2b8] sm:$0xff] %v300_v58  ;;  %303 = vst [vmem:[%s3925_s27 + $0x2c4] sm:$0xff] %v302_v59  ;;  %v306_v61 = vld [vmem:[%s3920_s26 + $0x564] sm:$0xff]  ;;  %v308_v62 = vld [vmem:[%s3920_s26 + $0x570] sm:$0xff] }
  0x32   : > { %305 = vst [vmem:[%s3925_s27 + $0x2d0] sm:$0xff] %v304_v60  ;;  %307 = vst [vmem:[%s3925_s27 + $0x2dc] sm:$0xff] %v306_v61  ;;  %v310_v63 = vld [vmem:[%s3920_s26 + $0x57c] sm:$0xff]  ;;  %v312_v0 = vld [vmem:[%s3920_s26 + $0x588] sm:$0xff] }
  0x33   : > { %309 = vst [vmem:[%s3925_s27 + $0x2e8] sm:$0xff] %v308_v62  ;;  %v314_v1 = vld [vmem:[%s3920_s26 + $0x594] sm:$0xff]  ;;  %311 = vst [vmem:[%s3925_s27 + $0x2f4] sm:$0xff] %v310_v63  ;;  %v316_v2 = vld [vmem:[%s3920_s26 + $0x5a0] sm:$0xff] }
  0x34   : > { %313 = vst [vmem:[%s3925_s27 + $0x300] sm:$0xff] %v312_v0  ;;  %315 = vst [vmem:[%s3925_s27 + $0x30c] sm:$0xff] %v314_v1  ;;  %v318_v3 = vld [vmem:[%s3920_s26 + $0x5ac] sm:$0xff]  ;;  %v320_v4 = vld [vmem:[%s3920_s26 + $0x5b8] sm:$0xff] }
  0x35   : > { %317 = vst [vmem:[%s3925_s27 + $0x318] sm:$0xff] %v316_v2  ;;  %319 = vst [vmem:[%s3925_s27 + $0x324] sm:$0xff] %v318_v3  ;;  %v322_v5 = vld [vmem:[%s3920_s26 + $0x5c4] sm:$0xff]  ;;  %v324_v6 = vld [vmem:[%s3920_s26 + $0x5d0] sm:$0xff] }
  0x36   : > { %321 = vst [vmem:[%s3925_s27 + $0x330] sm:$0xff] %v320_v4  ;;  %v326_v7 = vld [vmem:[%s3920_s26 + $0x5dc] sm:$0xff]  ;;  %323 = vst [vmem:[%s3925_s27 + $0x33c] sm:$0xff] %v322_v5  ;;  %v2664_v8 = vld [vmem:[%s3920_s26 + $0x8] sm:$0xf] }
  0x37   : > { %325 = vst [vmem:[%s3925_s27 + $0x348] sm:$0xff] %v324_v6  ;;  %327 = vst [vmem:[%s3925_s27 + $0x354] sm:$0xff] %v326_v7  ;;  %v2666_v9 = vld [vmem:[%s3920_s26 + $0x14] sm:$0xf]  ;;  %v2668_v10 = vld [vmem:[%s3920_s26 + $0x20] sm:$0xf] }
  0x38   : > { %2665 = vst [vmem:[%s3925_s27 + $0x8] sm:$0xf] %v2664_v8  ;;  %2667 = vst [vmem:[%s3925_s27 + $0x14] sm:$0xf] %v2666_v9  ;;  %v2670_v11 = vld [vmem:[%s3920_s26 + $0x2c] sm:$0xf] }
  0x39   : > { %2669 = vst [vmem:[%s3925_s27 + $0x20] sm:$0xf] %v2668_v10  ;;  %v2672_v12 = vld [vmem:[%s3920_s26 + $0x38] sm:$0xf]  ;;  %v2674_v13 = vld [vmem:[%s3920_s26 + $0x44] sm:$0xf] }
  0x3a   : > { %2671 = vst [vmem:[%s3925_s27 + $0x2c] sm:$0xf] %v2670_v11  ;;  %2673 = vst [vmem:[%s3925_s27 + $0x38] sm:$0xf] %v2672_v12  ;;  %v2676_v14 = vld [vmem:[%s3920_s26 + $0x50] sm:$0xf] }
  0x3b   : > { %2675 = vst [vmem:[%s3925_s27 + $0x44] sm:$0xf] %v2674_v13  ;;  %v2678_v15 = vld [vmem:[%s3920_s26 + $0x5c] sm:$0xf]  ;;  %v2680_v16 = vld [vmem:[%s3920_s26 + $0x68] sm:$0xf] }
  0x3c   : > { %2677 = vst [vmem:[%s3925_s27 + $0x50] sm:$0xf] %v2676_v14  ;;  %2679 = vst [vmem:[%s3925_s27 + $0x5c] sm:$0xf] %v2678_v15  ;;  %v2682_v17 = vld [vmem:[%s3920_s26 + $0x74] sm:$0xf] }
  0x3d   : > { %2681 = vst [vmem:[%s3925_s27 + $0x68] sm:$0xf] %v2680_v16  ;;  %v2684_v18 = vld [vmem:[%s3920_s26 + $0x80] sm:$0xf]  ;;  %v2686_v19 = vld [vmem:[%s3920_s26 + $0x8c] sm:$0xf] }
  0x3e   : > { %2683 = vst [vmem:[%s3925_s27 + $0x74] sm:$0xf] %v2682_v17  ;;  %2685 = vst [vmem:[%s3925_s27 + $0x80] sm:$0xf] %v2684_v18  ;;  %v2688_v20 = vld [vmem:[%s3920_s26 + $0x98] sm:$0xf] }
  0x3f   : > { %2687 = vst [vmem:[%s3925_s27 + $0x8c] sm:$0xf] %v2686_v19  ;;  %v2690_v21 = vld [vmem:[%s3920_s26 + $0xa4] sm:$0xf]  ;;  %v2692_v22 = vld [vmem:[%s3920_s26 + $0xb0] sm:$0xf] }
  0x40   : > { %2689 = vst [vmem:[%s3925_s27 + $0x98] sm:$0xf] %v2688_v20  ;;  %2691 = vst [vmem:[%s3925_s27 + $0xa4] sm:$0xf] %v2690_v21  ;;  %v2694_v23 = vld [vmem:[%s3920_s26 + $0xbc] sm:$0xf] }
  0x41   : > { %2693 = vst [vmem:[%s3925_s27 + $0xb0] sm:$0xf] %v2692_v22  ;;  %v2696_v24 = vld [vmem:[%s3920_s26 + $0xc8] sm:$0xf]  ;;  %v2698_v25 = vld [vmem:[%s3920_s26 + $0xd4] sm:$0xf] }
  0x42   : > { %2695 = vst [vmem:[%s3925_s27 + $0xbc] sm:$0xf] %v2694_v23  ;;  %2697 = vst [vmem:[%s3925_s27 + $0xc8] sm:$0xf] %v2696_v24  ;;  %v2700_v26 = vld [vmem:[%s3920_s26 + $0x1b8] sm:$0xf] }
  0x43   : > { %2699 = vst [vmem:[%s3925_s27 + $0xd4] sm:$0xf] %v2698_v25  ;;  %v2702_v27 = vld [vmem:[%s3920_s26 + $0x1c4] sm:$0xf]  ;;  %v2704_v28 = vld [vmem:[%s3920_s26 + $0x1d0] sm:$0xf] }
  0x44   : > { %2701 = vst [vmem:[%s3925_s27 + $0xe0] sm:$0xf] %v2700_v26  ;;  %2703 = vst [vmem:[%s3925_s27 + $0xec] sm:$0xf] %v2702_v27  ;;  %v2706_v29 = vld [vmem:[%s3920_s26 + $0x1dc] sm:$0xf] }
  0x45   : > { %2705 = vst [vmem:[%s3925_s27 + $0xf8] sm:$0xf] %v2704_v28  ;;  %v2708_v30 = vld [vmem:[%s3920_s26 + $0x1e8] sm:$0xf]  ;;  %v2710_v31 = vld [vmem:[%s3920_s26 + $0x1f4] sm:$0xf] }
  0x46   : > { %2707 = vst [vmem:[%s3925_s27 + $0x104] sm:$0xf] %v2706_v29  ;;  %2709 = vst [vmem:[%s3925_s27 + $0x110] sm:$0xf] %v2708_v30  ;;  %v2712_v32 = vld [vmem:[%s3920_s26 + $0x200] sm:$0xf] }
  0x47   : > { %2711 = vst [vmem:[%s3925_s27 + $0x11c] sm:$0xf] %v2710_v31  ;;  %v2714_v33 = vld [vmem:[%s3920_s26 + $0x20c] sm:$0xf]  ;;  %v2716_v34 = vld [vmem:[%s3920_s26 + $0x218] sm:$0xf] }
  0x48   : > { %2713 = vst [vmem:[%s3925_s27 + $0x128] sm:$0xf] %v2712_v32  ;;  %2715 = vst [vmem:[%s3925_s27 + $0x134] sm:$0xf] %v2714_v33  ;;  %v2718_v35 = vld [vmem:[%s3920_s26 + $0x224] sm:$0xf] }
  0x49   : > { %2717 = vst [vmem:[%s3925_s27 + $0x140] sm:$0xf] %v2716_v34  ;;  %v2720_v36 = vld [vmem:[%s3920_s26 + $0x230] sm:$0xf]  ;;  %v2722_v37 = vld [vmem:[%s3920_s26 + $0x23c] sm:$0xf] }
  0x4a   : > { %2719 = vst [vmem:[%s3925_s27 + $0x14c] sm:$0xf] %v2718_v35  ;;  %2721 = vst [vmem:[%s3925_s27 + $0x158] sm:$0xf] %v2720_v36  ;;  %v2724_v38 = vld [vmem:[%s3920_s26 + $0x248] sm:$0xf] }
  0x4b   : > { %2723 = vst [vmem:[%s3925_s27 + $0x164] sm:$0xf] %v2722_v37  ;;  %v2726_v39 = vld [vmem:[%s3920_s26 + $0x254] sm:$0xf]  ;;  %v2728_v40 = vld [vmem:[%s3920_s26 + $0x260] sm:$0xf] }
  0x4c   : > { %2725 = vst [vmem:[%s3925_s27 + $0x170] sm:$0xf] %v2724_v38  ;;  %2727 = vst [vmem:[%s3925_s27 + $0x17c] sm:$0xf] %v2726_v39  ;;  %v2730_v41 = vld [vmem:[%s3920_s26 + $0x26c] sm:$0xf] }
  0x4d   : > { %2729 = vst [vmem:[%s3925_s27 + $0x188] sm:$0xf] %v2728_v40  ;;  %v2732_v42 = vld [vmem:[%s3920_s26 + $0x278] sm:$0xf]  ;;  %v2734_v43 = vld [vmem:[%s3920_s26 + $0x284] sm:$0xf] }
  0x4e   : > { %2731 = vst [vmem:[%s3925_s27 + $0x194] sm:$0xf] %v2730_v41  ;;  %2733 = vst [vmem:[%s3925_s27 + $0x1a0] sm:$0xf] %v2732_v42  ;;  %v2736_v44 = vld [vmem:[%s3920_s26 + $0x368] sm:$0xf] }
  0x4f   : > { %2735 = vst [vmem:[%s3925_s27 + $0x1ac] sm:$0xf] %v2734_v43  ;;  %v2738_v45 = vld [vmem:[%s3920_s26 + $0x374] sm:$0xf]  ;;  %v2740_v46 = vld [vmem:[%s3920_s26 + $0x380] sm:$0xf] }
  0x50   : > { %2737 = vst [vmem:[%s3925_s27 + $0x1b8] sm:$0xf] %v2736_v44  ;;  %2739 = vst [vmem:[%s3925_s27 + $0x1c4] sm:$0xf] %v2738_v45  ;;  %v2742_v47 = vld [vmem:[%s3920_s26 + $0x38c] sm:$0xf] }
  0x51   : > { %2741 = vst [vmem:[%s3925_s27 + $0x1d0] sm:$0xf] %v2740_v46  ;;  %v2744_v48 = vld [vmem:[%s3920_s26 + $0x398] sm:$0xf]  ;;  %v2746_v49 = vld [vmem:[%s3920_s26 + $0x3a4] sm:$0xf] }
  0x52   : > { %2743 = vst [vmem:[%s3925_s27 + $0x1dc] sm:$0xf] %v2742_v47  ;;  %2745 = vst [vmem:[%s3925_s27 + $0x1e8] sm:$0xf] %v2744_v48  ;;  %v2748_v50 = vld [vmem:[%s3920_s26 + $0x3b0] sm:$0xf] }
  0x53   : > { %2747 = vst [vmem:[%s3925_s27 + $0x1f4] sm:$0xf] %v2746_v49  ;;  %v2750_v51 = vld [vmem:[%s3920_s26 + $0x3bc] sm:$0xf]  ;;  %v2752_v52 = vld [vmem:[%s3920_s26 + $0x3c8] sm:$0xf] }
  0x54   : > { %2749 = vst [vmem:[%s3925_s27 + $0x200] sm:$0xf] %v2748_v50  ;;  %2751 = vst [vmem:[%s3925_s27 + $0x20c] sm:$0xf] %v2750_v51  ;;  %v2754_v53 = vld [vmem:[%s3920_s26 + $0x3d4] sm:$0xf] }
  0x55   : > { %2753 = vst [vmem:[%s3925_s27 + $0x218] sm:$0xf] %v2752_v52  ;;  %v2756_v54 = vld [vmem:[%s3920_s26 + $0x3e0] sm:$0xf]  ;;  %v2758_v55 = vld [vmem:[%s3920_s26 + $0x3ec] sm:$0xf] }
  0x56   : > { %2755 = vst [vmem:[%s3925_s27 + $0x224] sm:$0xf] %v2754_v53  ;;  %2757 = vst [vmem:[%s3925_s27 + $0x230] sm:$0xf] %v2756_v54  ;;  %v2760_v56 = vld [vmem:[%s3920_s26 + $0x3f8] sm:$0xf] }
  0x57   : > { %2759 = vst [vmem:[%s3925_s27 + $0x23c] sm:$0xf] %v2758_v55  ;;  %v2762_v57 = vld [vmem:[%s3920_s26 + $0x404] sm:$0xf]  ;;  %v2764_v58 = vld [vmem:[%s3920_s26 + $0x410] sm:$0xf] }
  0x58   : > { %2761 = vst [vmem:[%s3925_s27 + $0x248] sm:$0xf] %v2760_v56  ;;  %2763 = vst [vmem:[%s3925_s27 + $0x254] sm:$0xf] %v2762_v57  ;;  %v2766_v59 = vld [vmem:[%s3920_s26 + $0x41c] sm:$0xf] }
  0x59   : > { %2765 = vst [vmem:[%s3925_s27 + $0x260] sm:$0xf] %v2764_v58  ;;  %v2768_v60 = vld [vmem:[%s3920_s26 + $0x428] sm:$0xf]  ;;  %v2770_v61 = vld [vmem:[%s3920_s26 + $0x434] sm:$0xf] }
  0x5a   : > { %2767 = vst [vmem:[%s3925_s27 + $0x26c] sm:$0xf] %v2766_v59  ;;  %2769 = vst [vmem:[%s3925_s27 + $0x278] sm:$0xf] %v2768_v60  ;;  %v2772_v62 = vld [vmem:[%s3920_s26 + $0x518] sm:$0xf] }
  0x5b   : > { %2771 = vst [vmem:[%s3925_s27 + $0x284] sm:$0xf] %v2770_v61  ;;  %v2774_v63 = vld [vmem:[%s3920_s26 + $0x524] sm:$0xf]  ;;  %v2776_v0 = vld [vmem:[%s3920_s26 + $0x530] sm:$0xf] }
  0x5c   : > { %2773 = vst [vmem:[%s3925_s27 + $0x290] sm:$0xf] %v2772_v62  ;;  %2775 = vst [vmem:[%s3925_s27 + $0x29c] sm:$0xf] %v2774_v63  ;;  %v2778_v1 = vld [vmem:[%s3920_s26 + $0x53c] sm:$0xf] }
  0x5d   : > { %2777 = vst [vmem:[%s3925_s27 + $0x2a8] sm:$0xf] %v2776_v0  ;;  %v2780_v2 = vld [vmem:[%s3920_s26 + $0x548] sm:$0xf]  ;;  %v2782_v3 = vld [vmem:[%s3920_s26 + $0x554] sm:$0xf] }
  0x5e   : > { %2779 = vst [vmem:[%s3925_s27 + $0x2b4] sm:$0xf] %v2778_v1  ;;  %2781 = vst [vmem:[%s3925_s27 + $0x2c0] sm:$0xf] %v2780_v2  ;;  %v2784_v4 = vld [vmem:[%s3920_s26 + $0x560] sm:$0xf] }
  0x5f   : > { %2783 = vst [vmem:[%s3925_s27 + $0x2cc] sm:$0xf] %v2782_v3  ;;  %v2786_v5 = vld [vmem:[%s3920_s26 + $0x56c] sm:$0xf]  ;;  %v2788_v6 = vld [vmem:[%s3920_s26 + $0x578] sm:$0xf] }
  0x60   : > { %2785 = vst [vmem:[%s3925_s27 + $0x2d8] sm:$0xf] %v2784_v4  ;;  %2787 = vst [vmem:[%s3925_s27 + $0x2e4] sm:$0xf] %v2786_v5  ;;  %v2790_v7 = vld [vmem:[%s3920_s26 + $0x584] sm:$0xf] }
  0x61   : > { %2789 = vst [vmem:[%s3925_s27 + $0x2f0] sm:$0xf] %v2788_v6  ;;  %v2792_v8 = vld [vmem:[%s3920_s26 + $0x590] sm:$0xf]  ;;  %v2794_v9 = vld [vmem:[%s3920_s26 + $0x59c] sm:$0xf] }
  0x62   : > { %2791 = vst [vmem:[%s3925_s27 + $0x2fc] sm:$0xf] %v2790_v7  ;;  %2793 = vst [vmem:[%s3925_s27 + $0x308] sm:$0xf] %v2792_v8  ;;  %v2796_v10 = vld [vmem:[%s3920_s26 + $0x5a8] sm:$0xf] }
  0x63   : > { %2795 = vst [vmem:[%s3925_s27 + $0x314] sm:$0xf] %v2794_v9  ;;  %v2798_v11 = vld [vmem:[%s3920_s26 + $0x5b4] sm:$0xf]  ;;  %v2800_v12 = vld [vmem:[%s3920_s26 + $0x5c0] sm:$0xf] }
  0x64   : > { %2797 = vst [vmem:[%s3925_s27 + $0x320] sm:$0xf] %v2796_v10  ;;  %2799 = vst [vmem:[%s3925_s27 + $0x32c] sm:$0xf] %v2798_v11  ;;  %v2802_v13 = vld [vmem:[%s3920_s26 + $0x5cc] sm:$0xf] }
  0x65   : > { %2801 = vst [vmem:[%s3925_s27 + $0x338] sm:$0xf] %v2800_v12  ;;  %v2804_v14 = vld [vmem:[%s3920_s26 + $0x5d8] sm:$0xf]  ;;  %v2806_v15 = vld [vmem:[%s3920_s26 + $0x5e4] sm:$0xf] }
  0x66   : > { %2803 = vst [vmem:[%s3925_s27 + $0x344] sm:$0xf] %v2802_v13  ;;  %2805 = vst [vmem:[%s3925_s27 + $0x350] sm:$0xf] %v2804_v14 }
  0x67   : > { %2807 = vst [vmem:[%s3925_s27 + $0x35c] sm:$0xf] %v2806_v15 }
  0x68 PF: > { %p2808_p6 = scmp.ge.s32.totalorder %s3853_s16, 1  ;;  %p483_p7 = scmp.lt.s32.totalorder %s3853_s16, 3 }
  0x6a   : > { %p484_p8 = pnand %p2808_p6, %p483_p7 }
  0x6c   : > { %487 = sbr.rel (%p484_p8) target bundleno = 651 (0x28b), region = 54 }
  0x73   : > { %v4217_v16 = vld [vmem:[%s4973_s1 + $0x40] sm:$0xff]   ;;  %v3855_v17 = vmov 0.0   ;;  %vm3856_vm0 = vmmov 0   ;;  %s490_s7 = sand.u32 1, %s3837_s12   ;;  %v4238_v20 = vld [vmem:[%s4973_s1 + $0x48] sm:$0xff]   ;;  %vm856_vm1 = vcmask 261120  }
  0x74   : > { %3443 = vmatprep.subr.bf16.mxu1 %v3855_v17  ;;  %v4223_v18 = vld [vmem:[%s4973_s1 + $0x80] sm:$0xff]   ;;  %3119 = vmatprep.subr.bf16.mxu0 %v4217_v16  ;;  %s3609_s10 = smul.u32 864, %s490_s7  ;;  %v4245_v21 = vld [vmem:[%s4973_s1 + $0x88] sm:$0xff]   ;;  %v4260_v24 = vld [vmem:[%s4973_s1 + $0x50] sm:$0xff]   ;;  %vm2526_vm3 = vcmask 519168  }
  0x75   : > { %v4229_v19 = vld [vmem:[%s4973_s1] sm:$0xff]   ;;  %3447 = vmatprep.mubr.msk.bf16.mxu1 %vm3856_vm0, %v3855_v17  ;;  %3444 = vmatpush3.bf16.msra.mxu1 %v4223_v18  ;;  %v4251_v22 = vld [vmem:[%s4973_s1 + $0x8] sm:$0xff]   ;;  %v4266_v25 = vld [vmem:[%s4973_s1 + $0x10] sm:$0xff]  }
  0x76   : > { %3120 = vmatpush3.bf16.msra.mxu0 %v4229_v19  ;;  %3445 = vmatprep.subr.bf16.mxu1 %v3855_v17  ;;  %s4253_s21 = scalar_lea.vmem [#allocation2], %s3609_s10  ;;  %v4273_v26 = vld [vmem:[%s4973_s1 + $0x58] sm:$0xff]   ;;  %v4290_v28 = vld [vmem:[%s4973_s1 + $0x60] sm:$0xff]   ;;  %v4305_v31 = vld [vmem:[%s4973_s1 + $0x68] sm:$0xff]  }
  0x77   : > { %3121 = vmatprep.subr.bf16.mxu0 %v4238_v20  ;;  %v3659_v23 = vld [vmem:[%s4253_s21 + $0x8] ss:$12 sps:$4 sm:$0xff]   ;;  %v4283_v27 = vld [vmem:[%s4973_s1 + $0x18] sm:$0xff]   ;;  %v3664_v29 = vld [vmem:[%s4253_s21 + $0x20] ss:$12 sps:$4 sm:$0xff]  }
  0x78   : > { %v4298_v30 = vld [vmem:[%s4973_s1 + $0x20] sm:$0xff]   ;;  %v4311_v32 = vld [vmem:[%s4973_s1 + $0x28] sm:$0xff]   ;;  %v4323_v34 = vld [vmem:[%s4973_s1 + $0x70] sm:$0xff]  }
  0x79   : > { %3446 = vmatpush3.bf16.msra.mxu1 %v4245_v21  ;;  %v3669_v33 = vld [vmem:[%s4253_s21 + $0x38] ss:$12 sps:$4 sm:$0xff]   ;;  %v4331_v36 = vld [vmem:[%s4973_s1 + $0x30] sm:$0xff]   ;;  %v3674_v40 = vld [vmem:[%s4253_s21] ss:$12 sps:$4 sm:$0xff]  }
  0x7a   : > { %3122 = vmatpush3.bf16.msra.mxu0 %v4251_v22  ;;  %3200 = vmatprep.subr.bf16.mxu1 %v4217_v16  ;;  %v3676_v35 = vld [vmem:[%s4253_s21 + $0x4] ss:$12 sps:$4 sm:$0xff]   ;;  %v4337_v37 = vld [vmem:[%s4973_s1 + $0x78] sm:$0xff]   ;;  %v3680_v42 = vld [vmem:[%s4253_s21 + $0x68] ss:$12 sps:$4 sm:$0xff]  }
  0x7b   : > { %3123 = vmatprep.subr.bf16.mxu0 %v4260_v24  ;;  %916 = vmatprep.mubr.bf16.mxu0 %v3676_v35  ;;  %v4348_v38 = vld [vmem:[%s4973_s1 + $0x38] sm:$0xff]   ;;  %v3682_v44 = vld [vmem:[%s4253_s21 + $0x34] ss:$12 sps:$4 sm:$0xff]   ;;  %v3690_v50 = vld [vmem:[%s4253_s21 + $0x64] ss:$12 sps:$4 sm:$0xff]  }
  0x7c   : > { %3448 = vmatmul.mubr.msk.bf16.vlgmr.msra.gmra.mrb[0].mxu1 %vm856_vm1, %v3659_v23  ;;  %v3677_v39 = vld [vmem:[%s4253_s21 + $0x50] ss:$12 sps:$4 sm:$0xff]   ;;  %v3681_v43 = vld [vmem:[%s4253_s21 + $0x18] ss:$12 sps:$4 sm:$0xff]   ;;  %v3684_v45 = vld [vmem:[%s4253_s21 + $0x80] ss:$12 sps:$4 sm:$0xff]  }
  0x7d   : > { %3451 = vmatprep.mubr.msk.bf16.mxu1 %vm3856_vm0, %v3855_v17  ;;  %3201 = vmatpush3.bf16.msra.mxu1 %v4229_v19  ;;  %v3678_v41 = vld [vmem:[%s4253_s21 + $0x1c] ss:$12 sps:$4 sm:$0xff]   ;;  %v3686_v47 = vld [vmem:[%s4253_s21 + $0x4c] ss:$12 sps:$4 sm:$0xff]   ;;  %v3701_v57 = vld [vmem:[%s4253_s21 + $0x94] ss:$12 sps:$4 sm:$0xff]  }
  0x7e   : > { %3124 = vmatpush3.bf16.msra.mxu0 %v4266_v25  ;;  %3202 = vmatprep.subr.bf16.mxu1 %v4238_v20  ;;  %v3685_v46 = vld [vmem:[%s4253_s21 + $0x30] ss:$12 sps:$4 sm:$0xff]   ;;  %v3688_v48 = vld [vmem:[%s4253_s21 + $0x98] ss:$12 sps:$4 sm:$0xff]   ;;  %v3689_v49 = vld [vmem:[%s4253_s21 + $0x48] ss:$12 sps:$4 sm:$0xff]  }
  0x7f   : > { %3125 = vmatprep.subr.bf16.mxu0 %v4273_v26  ;;  %v3692_v51 = vld [vmem:[%s4253_s21 + $0xb0] ss:$12 sps:$4 sm:$0xff]   ;;  %v3693_v52 = vld [vmem:[%s4253_s21 + $0x60] ss:$12 sps:$4 sm:$0xff]   ;;  %v3696_v54 = vld [vmem:[%s4253_s21 + $0xc8] ss:$12 sps:$4 sm:$0xff]  }
  0x80   : > { %v3694_v53 = vld [vmem:[%s4253_s21 + $0x7c] ss:$12 sps:$4 sm:$0xff]   ;;  %v3697_v55 = vld [vmem:[%s4253_s21 + $0x78] ss:$12 sps:$4 sm:$0xff]   ;;  %v3704_v60 = vld [vmem:[%s4253_s21 + $0xf4] ss:$12 sps:$4 sm:$0xff]  }
  0x81   : > { %3203 = vmatpush3.bf16.msra.mxu1 %v4251_v22  ;;  %v3700_v56 = vld [vmem:[%s4253_s21 + $0xdc] ss:$12 sps:$4 sm:$0xff]   ;;  %v3698_v58 = vld [vmem:[%s4253_s21 + $0xd8] ss:$12 sps:$4 sm:$0xff]   ;;  %v3715_v3 = vld [vmem:[%s4253_s21 + $0xc0] ss:$12 sps:$4 sm:$0xff]  }
  0x82   : > { %3126 = vmatpush3.bf16.msra.mxu0 %v4283_v27  ;;  %3204 = vmatprep.subr.bf16.mxu1 %v4260_v24  ;;  %v3703_v59 = vld [vmem:[%s4253_s21 + $0x90] ss:$12 sps:$4 sm:$0xff]   ;;  %v3706_v61 = vld [vmem:[%s4253_s21 + $0xac] ss:$12 sps:$4 sm:$0xff]   ;;  %v3709_v63 = vld [vmem:[%s4253_s21 + $0xa8] ss:$12 sps:$4 sm:$0xff]  }
  0x83   : > { %3127 = vmatprep.subr.bf16.mxu0 %v4290_v28  ;;  %v3708_v62 = vld [vmem:[%s4253_s21 + $0xf0] ss:$12 sps:$4 sm:$0xff]   ;;  %v3710_v0 = vld [vmem:[%s4253_s21 + $0x10c] ss:$12 sps:$4 sm:$0xff]   ;;  %v3714_v2 = vld [vmem:[%s4253_s21 + $0x108] ss:$12 sps:$4 sm:$0xff]  }
  0x84   : > { %3452 = vmatmul.mubr.msk.bf16.gmra.mrb[4].mxu1 %vm856_vm1, %v3664_v29  ;;  %v3712_v1 = vld [vmem:[%s4253_s21 + $0xc4] ss:$12 sps:$4 sm:$0xff]   ;;  %v3718_v5 = vld [vmem:[%s4253_s21 + $0x120] ss:$12 sps:$4 sm:$0xff]   ;;  %v3720_v7 = vld [vmem:[%s4253_s21 + $0x13c] ss:$12 sps:$4 sm:$0xff]  }
  0x85   : > { %3455 = vmatprep.mubr.msk.bf16.mxu1 %vm3856_vm0, %v3855_v17  ;;  %3205 = vmatpush3.bf16.msra.mxu1 %v4266_v25  ;;  %v3716_v4 = vld [vmem:[%s4253_s21 + $0x124] ss:$12 sps:$4 sm:$0xff]   ;;  %v3719_v6 = vld [vmem:[%s4253_s21 + $0xe0] ss:$12 sps:$4 sm:$0xff]   ;;  %v3730_v14 = vld [vmem:[%s4253_s21 + $0x168] ss:$12 sps:$4 sm:$0xff]  }
  0x86   : > { %3128 = vmatpush3.bf16.msra.mxu0 %v4298_v30  ;;  %3206 = vmatprep.subr.bf16.mxu1 %v4273_v26  ;;  %v3722_v8 = vld [vmem:[%s4253_s21 + $0x138] ss:$12 sps:$4 sm:$0xff]   ;;  %v3724_v10 = vld [vmem:[%s4253_s21 + $0x154] ss:$12 sps:$4 sm:$0xff]   ;;  %v3726_v11 = vld [vmem:[%s4253_s21 + $0x150] ss:$12 sps:$4 sm:$0xff]  }
  0x87   : > { %3129 = vmatprep.subr.bf16.mxu0 %v4305_v31  ;;  %v3723_v9 = vld [vmem:[%s4253_s21 + $0xf8] ss:$12 sps:$4 sm:$0xff]   ;;  %v3727_v12 = vld [vmem:[%s4253_s21 + $0x110] ss:$12 sps:$4 sm:$0xff]   ;;  %v3731_v15 = vld [vmem:[%s4253_s21 + $0x128] ss:$12 sps:$4 sm:$0xff]  }
  0x88   : > { %v3728_v13 = vld [vmem:[%s4253_s21 + $0x16c] ss:$12 sps:$4 sm:$0xff]  }
  0x89   : > { %3207 = vmatpush3.bf16.msra.mxu1 %v4283_v27  ;;  %v3734_v23 = vld [vmem:[%s4253_s21 + $0x180] ss:$12 sps:$4 sm:$0xff]   ;;  %v3738_v35 = vld [vmem:[%s4253_s21 + $0x198] ss:$12 sps:$4 sm:$0xff]  }
  0x8a   : > { %3130 = vmatpush3.bf16.msra.mxu0 %v4311_v32  ;;  %3208 = vmatprep.subr.bf16.mxu1 %v4290_v28  ;;  %v3735_v29 = vld [vmem:[%s4253_s21 + $0x140] ss:$12 sps:$4 sm:$0xff]  }
  0x8b   : > { %3131 = vmatprep.subr.bf16.mxu0 %v4323_v34 }
  0x8c   : > { %3456 = vmatmul.mubr.msk.bf16.gmra.mrb[8].mxu1 %vm856_vm1, %v3669_v33  ;;  %v3736_v33 = vld [vmem:[%s4253_s21 + $0x19c] ss:$12 sps:$4 sm:$0xff]  }
  0x8d   : > { %3459 = vmatprep.mubr.msk.bf16.mxu1 %vm3856_vm0, %v3855_v17  ;;  %3209 = vmatpush3.bf16.msra.mxu1 %v4298_v30 }
  0x8e   : > { %3132 = vmatpush3.bf16.msra.mxu0 %v4331_v36  ;;  %3210 = vmatprep.subr.bf16.mxu1 %v4305_v31 }
  0x8f   : > { %3133 = vmatprep.subr.bf16.mxu0 %v4337_v37 }
  0x91   : > { %3211 = vmatpush3.bf16.msra.mxu1 %v4311_v32 }
  0x92   : > { %3134 = vmatpush3.bf16.msra.mxu0 %v4348_v38  ;;  %3212 = vmatprep.subr.bf16.mxu1 %v4323_v34 }
  0x93   : > { %3483 = vmatprep.subr.bf16.mxu0 %v3855_v17 }
  0x94   : > { %3460 = vmatmul.mubr.msk.bf16.gmra.mrb[12].mxu1 %vm856_vm1, %v3677_v39  ;;  %v3739_v39 = vld [vmem:[%s4253_s21 + $0x158] ss:$12 sps:$4 sm:$0xff]  }
  0x95   : > { %917 = vmatmul.mubr.bf16.vlgmr.msra.gmra.mrb[0].mxu0 %v3674_v40  ;;  %3463 = vmatprep.mubr.msk.bf16.mxu1 %vm3856_vm0, %v3855_v17  ;;  %v3742_v40 = vld [vmem:[%s4253_s21 + $0x1b4] ss:$12 sps:$4 sm:$0xff]  }
  0x96   : > { %3484 = vmatpush3.bf16.msra.mxu0 %v4223_v18  ;;  %924 = vmatprep.mubr.bf16.mxu0 %v3678_v41  ;;  %v3740_v41 = vld [vmem:[%s4253_s21 + $0x1b0] ss:$12 sps:$4 sm:$0xff]  }
  0x97   : > { %3485 = vmatprep.subr.bf16.mxu0 %v3855_v17  ;;  %3213 = vmatpush3.bf16.msra.mxu1 %v4331_v36 }
  0x98   : > { %3214 = vmatprep.subr.bf16.mxu1 %v4337_v37 }
  0x9a   : > { %3486 = vmatpush3.bf16.msra.mxu0 %v4245_v21 }
  0x9b   : > { %3215 = vmatpush3.bf16.msra.mxu1 %v4348_v38  ;;  %3523 = vmatprep.subr.bf16.mxu0 %v3855_v17 }
  0x9c   : > { %3464 = vmatmul.mubr.msk.bf16.gmra.mrb[16].mxu1 %vm856_vm1, %v3680_v42  ;;  %3281 = vmatprep.subr.bf16.mxu1 %v4217_v16  ;;  %v3743_v42 = vld [vmem:[%s4253_s21 + $0x170] ss:$12 sps:$4 sm:$0xff]  }
  0x9d   : > { %925 = vmatmul.mubr.bf16.gmra.mrb[4].mxu0 %v3681_v43  ;;  %3467 = vmatprep.mubr.msk.bf16.mxu1 %vm3856_vm0, %v3855_v17  ;;  %v3744_v43 = vld [vmem:[%s4253_s21 + $0x1cc] ss:$12 sps:$4 sm:$0xff]  }
  0x9e   : > { %932 = vmatprep.mubr.bf16.mxu0 %v3682_v44  ;;  %v3746_v44 = vld [vmem:[%s4253_s21 + $0x1c8] ss:$12 sps:$4 sm:$0xff]  }
  0xa4   : > { %3468 = vmatmul.mubr.msk.bf16.gmra.mrb[20].mxu1 %vm856_vm1, %v3684_v45  ;;  %v3747_v45 = vld [vmem:[%s4253_s21 + $0x188] ss:$12 sps:$4 sm:$0xff]  }
  0xa5   : > { %933 = vmatmul.mubr.bf16.gmra.mrb[8].mxu0 %v3685_v46  ;;  %3471 = vmatprep.mubr.msk.bf16.mxu1 %vm3856_vm0, %v3855_v17  ;;  %v3748_v46 = vld [vmem:[%s4253_s21 + $0x1e4] ss:$12 sps:$4 sm:$0xff]  }
  0xa6   : > { %940 = vmatprep.mubr.bf16.mxu0 %v3686_v47  ;;  %v3752_v47 = vld [vmem:[%s4253_s21 + $0x1fc] ss:$12 sps:$4 sm:$0xff]  }
  0xac   : > { %3472 = vmatmul.mubr.msk.bf16.gmra.mrb[24].mxu1 %vm856_vm1, %v3688_v48  ;;  %v3771_v48 = vld [vmem:[%s4253_s21 + $0x218] ss:$12 sps:$4 sm:$0xff]  }
  0xad   : > { %941 = vmatmul.mubr.bf16.gmra.mrb[12].mxu0 %v3689_v49  ;;  %3475 = vmatprep.mubr.msk.bf16.mxu1 %vm3856_vm0, %v3855_v17  ;;  %v3772_v49 = vld [vmem:[%s4253_s21 + $0x274] ss:$12 sps:$4 sm:$0xff]  }
  0xae   : > { %948 = vmatprep.mubr.bf16.mxu0 %v3690_v50  ;;  %v3774_v50 = vld [vmem:[%s4253_s21 + $0x270] ss:$12 sps:$4 sm:$0xff]  }
  0xb4   : > { %3476 = vmatmul.mubr.msk.bf16.gmra.mrb[28].mxu1 %vm856_vm1, %v3692_v51  ;;  %v3775_v51 = vld [vmem:[%s4253_s21 + $0x230] ss:$12 sps:$4 sm:$0xff]  }
  0xb5   : > { %949 = vmatmul.mubr.bf16.gmra.mrb[16].mxu0 %v3693_v52  ;;  %3479 = vmatprep.mubr.msk.bf16.mxu1 %vm3856_vm0, %v3855_v17  ;;  %v3778_v52 = vld [vmem:[%s4253_s21 + $0x28c] ss:$12 sps:$4 sm:$0xff]  }
  0xb6   : > { %956 = vmatprep.mubr.bf16.mxu0 %v3694_v53 }
  0xbc   : > { %3480 = vmatmul.mubr.msk.bf16.gmra.mrb[32].mxu1 %vm856_vm1, %v3696_v54  ;;  %v3776_v54 = vld [vmem:[%s4253_s21 + $0x288] ss:$12 sps:$4 sm:$0xff]  }
  0xbd   : > { %957 = vmatmul.mubr.bf16.gmra.mrb[20].mxu0 %v3697_v55  ;;  %1325 = vmatprep.mubr.bf16.mxu1 %v3700_v56  ;;  %v3779_v56 = vld [vmem:[%s4253_s21 + $0x248] ss:$12 sps:$4 sm:$0xff]  }
  0xbe   : > { %964 = vmatprep.mubr.bf16.mxu0 %v3701_v57 }
  0xc4   : > { %1326 = vmatmul.mubr.bf16.vlgmr.msra.gmra.mrb[36].mxu1 %v3698_v58  ;;  %v3780_v58 = vld [vmem:[%s4253_s21 + $0x2a4] ss:$12 sps:$4 sm:$0xff]  }
  0xc5   : > { %965 = vmatmul.mubr.bf16.gmra.mrb[24].mxu0 %v3703_v59  ;;  %1333 = vmatprep.mubr.bf16.mxu1 %v3704_v60 }
  0xc6   : > { %972 = vmatprep.mubr.bf16.mxu0 %v3706_v61  ;;  %3282 = vmatpush3.bf16.msra.mxu1 %v4229_v19  ;;  %v3782_v61 = vld [vmem:[%s4253_s21 + $0x2a0] ss:$12 sps:$4 sm:$0xff]  }
  0xc7   : > { %3283 = vmatprep.subr.bf16.mxu1 %v4238_v20 }
  0xca   : > { %3284 = vmatpush3.bf16.msra.mxu1 %v4251_v22 }
  0xcb   : > { %3285 = vmatprep.subr.bf16.mxu1 %v4260_v24 }
  0xcc   : > { %1334 = vmatmul.mubr.bf16.gmra.mrb[40].mxu1 %v3708_v62 }
  0xcd   : > { %973 = vmatmul.mubr.bf16.gmra.mrb[28].mxu0 %v3709_v63  ;;  %1341 = vmatprep.mubr.bf16.mxu1 %v3710_v0  ;;  %v3783_v63 = vld [vmem:[%s4253_s21 + $0x260] ss:$12 sps:$4 sm:$0xff]  }
  0xce   : > { %980 = vmatprep.mubr.bf16.mxu0 %v3712_v1  ;;  %3286 = vmatpush3.bf16.msra.mxu1 %v4266_v25  ;;  %v3784_v1 = vld [vmem:[%s4253_s21 + $0x2bc] ss:$12 sps:$4 sm:$0xff]  }
  0xcf   : > { %3287 = vmatprep.subr.bf16.mxu1 %v4273_v26 }
  0xd2   : > { %3288 = vmatpush3.bf16.msra.mxu1 %v4283_v27 }
  0xd3   : > { %3289 = vmatprep.subr.bf16.mxu1 %v4290_v28 }
  0xd4   : > { %1342 = vmatmul.mubr.bf16.gmra.mrb[44].mxu1 %v3714_v2 }
  0xd5   : > { %981 = vmatmul.mubr.bf16.gmra.mrb[32].mxu0 %v3715_v3  ;;  %1349 = vmatprep.mubr.bf16.mxu1 %v3716_v4  ;;  %v3786_v3 = vld [vmem:[%s4253_s21 + $0x2b8] ss:$12 sps:$4 sm:$0xff]  }
  0xd6   : > { %3487 = vmatprep.mubr.msk.bf16.mxu0 %vm3856_vm0, %v3855_v17  ;;  %3290 = vmatpush3.bf16.msra.mxu1 %v4298_v30 }
  0xd7   : > { %3291 = vmatprep.subr.bf16.mxu1 %v4305_v31 }
  0xda   : > { %3292 = vmatpush3.bf16.msra.mxu1 %v4311_v32 }
  0xdb   : > { %3293 = vmatprep.subr.bf16.mxu1 %v4323_v34 }
  0xdc   : > { %1350 = vmatmul.mubr.bf16.gmra.mrb[48].mxu1 %v3718_v5  ;;  %v3787_v5 = vld [vmem:[%s4253_s21 + $0x278] ss:$12 sps:$4 sm:$0xff]  }
  0xdd   : > { %3488 = vmatmul.mubr.msk.bf16.vlgmr.msra.gmra.mrb[36].mxu0 %vm856_vm1, %v3719_v6  ;;  %1357 = vmatprep.mubr.bf16.mxu1 %v3720_v7  ;;  %v3788_v7 = vld [vmem:[%s4253_s21 + $0x2d4] ss:$12 sps:$4 sm:$0xff]  }
  0xde   : > { %3524 = vmatpush3.bf16.msra.mxu0 %v4223_v18  ;;  %3491 = vmatprep.mubr.msk.bf16.mxu0 %vm3856_vm0, %v3855_v17 }
  0xdf   : > { %3525 = vmatprep.subr.bf16.mxu0 %v3855_v17  ;;  %3294 = vmatpush3.bf16.msra.mxu1 %v4331_v36 }
  0xe0   : > { %3295 = vmatprep.subr.bf16.mxu1 %v4337_v37 }
  0xe2   : > { %3526 = vmatpush3.bf16.msra.mxu0 %v4245_v21 }
  0xe3   : > { %3296 = vmatpush3.bf16.msra.mxu1 %v4348_v38  ;;  %3563 = vmatprep.subr.bf16.mxu0 %v3855_v17 }
  0xe4   : > { %1358 = vmatmul.mubr.bf16.gmra.mrb[52].mxu1 %v3722_v8  ;;  %3362 = vmatprep.subr.bf16.mxu1 %v4217_v16  ;;  %v3732_v16 = vld [vmem:[%s4253_s21 + $0x184] ss:$12 sps:$4 sm:$0xff]  }
  0xe5   : > { %3492 = vmatmul.mubr.msk.bf16.gmra.mrb[40].mxu0 %vm856_vm1, %v3723_v9  ;;  %1365 = vmatprep.mubr.bf16.mxu1 %v3724_v10  ;;  %v3790_v10 = vld [vmem:[%s4253_s21 + $0x2d0] ss:$12 sps:$4 sm:$0xff]  }
  0xe6   : > { %3495 = vmatprep.mubr.msk.bf16.mxu0 %vm3856_vm0, %v3855_v17 }
  0xec   : > { %1366 = vmatmul.mubr.bf16.gmra.mrb[56].mxu1 %v3726_v11 }
  0xed   : > { %3496 = vmatmul.mubr.msk.bf16.gmra.mrb[44].mxu0 %vm856_vm1, %v3727_v12  ;;  %1373 = vmatprep.mubr.bf16.mxu1 %v3728_v13  ;;  %v3791_v13 = vld [vmem:[%s4253_s21 + $0x290] ss:$12 sps:$4 sm:$0xff]  }
  0xee   : > { %3499 = vmatprep.mubr.msk.bf16.mxu0 %vm3856_vm0, %v3855_v17 }
  0xf4   : > { %1374 = vmatmul.mubr.bf16.gmra.mrb[60].mxu1 %v3730_v14 }
  0xf5   : > { %3500 = vmatmul.mubr.msk.bf16.gmra.mrb[48].mxu0 %vm856_vm1, %v3731_v15  ;;  %1381 = vmatprep.mubr.bf16.mxu1 %v3732_v16  ;;  %v3792_v15 = vld [vmem:[%s4253_s21 + $0x2ec] ss:$12 sps:$4 sm:$0xff]  }
  0xf6   : > { %3503 = vmatprep.mubr.msk.bf16.mxu0 %vm3856_vm0, %v3855_v17 }
  0xfc   : > { %1382 = vmatmul.mubr.bf16.gmra.mrb[64].mxu1 %v3734_v23 }
  0xfd   : > { %3504 = vmatmul.mubr.msk.bf16.gmra.mrb[52].mxu0 %vm856_vm1, %v3735_v29  ;;  %1389 = vmatprep.mubr.bf16.mxu1 %v3736_v33 }
  0xfe   : > { %3507 = vmatprep.mubr.msk.bf16.mxu0 %vm3856_vm0, %v3855_v17 }
 0x104   : > { %1390 = vmatmul.mubr.bf16.gmra.mrb[68].mxu1 %v3738_v35 }
 0x105   : > { %3508 = vmatmul.mubr.msk.bf16.gmra.mrb[56].mxu0 %vm856_vm1, %v3739_v39  ;;  %1734 = vmatprep.mubr.bf16.mxu1 %v3742_v40 }
 0x106   : > { %3511 = vmatprep.mubr.msk.bf16.mxu0 %vm3856_vm0, %v3855_v17 }
 0x10c   : > { %1735 = vmatmul.mubr.bf16.vlgmr.msra.gmra.mrb[72].mxu1 %v3740_v41 }
 0x10d   : > { %3512 = vmatmul.mubr.msk.bf16.gmra.mrb[60].mxu0 %vm856_vm1, %v3743_v42  ;;  %1742 = vmatprep.mubr.bf16.mxu1 %v3744_v43  ;;  %v3794_v43 = vld [vmem:[%s4253_s21 + $0x2e8] ss:$12 sps:$4 sm:$0xff]  }
 0x10e   : > { %3515 = vmatprep.mubr.msk.bf16.mxu0 %vm3856_vm0, %v3855_v17  ;;  %3363 = vmatpush3.bf16.msra.mxu1 %v4229_v19  ;;  %v3750_v19 = vld [vmem:[%s4253_s21 + $0x1e0] ss:$12 sps:$4 sm:$0xff]  }
 0x10f   : > { %3364 = vmatprep.subr.bf16.mxu1 %v4238_v20  ;;  %v3751_v20 = vld [vmem:[%s4253_s21 + $0x1a0] ss:$12 sps:$4 sm:$0xff]  }
 0x112   : > { %3365 = vmatpush3.bf16.msra.mxu1 %v4251_v22  ;;  %v3754_v22 = vld [vmem:[%s4253_s21 + $0x1f8] ss:$12 sps:$4 sm:$0xff]  }
 0x113   : > { %3366 = vmatprep.subr.bf16.mxu1 %v4260_v24  ;;  %v3755_v24 = vld [vmem:[%s4253_s21 + $0x1b8] ss:$12 sps:$4 sm:$0xff]  }
 0x114   : > { %1743 = vmatmul.mubr.bf16.gmra.mrb[76].mxu1 %v3746_v44 }
 0x115   : > { %3516 = vmatmul.mubr.msk.bf16.gmra.mrb[64].mxu0 %vm856_vm1, %v3747_v45  ;;  %1750 = vmatprep.mubr.bf16.mxu1 %v3748_v46  ;;  %v3795_v46 = vld [vmem:[%s4253_s21 + $0x2a8] ss:$12 sps:$4 sm:$0xff]  }
 0x116   : > { %3519 = vmatprep.mubr.msk.bf16.mxu0 %vm3856_vm0, %v3855_v17  ;;  %3367 = vmatpush3.bf16.msra.mxu1 %v4266_v25  ;;  %v3756_v25 = vld [vmem:[%s4253_s21 + $0x214] ss:$12 sps:$4 sm:$0xff]  }
 0x117   : > { %3368 = vmatprep.subr.bf16.mxu1 %v4273_v26  ;;  %v3758_v26 = vld [vmem:[%s4253_s21 + $0x210] ss:$12 sps:$4 sm:$0xff]  }
 0x11a   : > { %3369 = vmatpush3.bf16.msra.mxu1 %v4283_v27  ;;  %v3759_v27 = vld [vmem:[%s4253_s21 + $0x1d0] ss:$12 sps:$4 sm:$0xff]  }
 0x11b   : > { %3370 = vmatprep.subr.bf16.mxu1 %v4290_v28  ;;  %v3760_v28 = vld [vmem:[%s4253_s21 + $0x22c] ss:$12 sps:$4 sm:$0xff]  }
 0x11c   : > { %1751 = vmatmul.mubr.bf16.gmra.mrb[80].mxu1 %v3750_v19 }
 0x11d   : > { %3520 = vmatmul.mubr.msk.bf16.gmra.mrb[68].mxu0 %vm856_vm1, %v3751_v20  ;;  %1758 = vmatprep.mubr.bf16.mxu1 %v3752_v47  ;;  %v3796_v20 = vld [vmem:[%s4253_s21 + $0x304] ss:$12 sps:$4 sm:$0xff]  }
 0x11e   : > { %3527 = vmatprep.mubr.msk.bf16.mxu0 %vm3856_vm0, %v3855_v17  ;;  %3371 = vmatpush3.bf16.msra.mxu1 %v4298_v30  ;;  %v3762_v30 = vld [vmem:[%s4253_s21 + $0x228] ss:$12 sps:$4 sm:$0xff]  }
 0x11f   : > { %3372 = vmatprep.subr.bf16.mxu1 %v4305_v31  ;;  %v3763_v31 = vld [vmem:[%s4253_s21 + $0x1e8] ss:$12 sps:$4 sm:$0xff]  }
 0x122   : > { %3373 = vmatpush3.bf16.msra.mxu1 %v4311_v32  ;;  %v3764_v32 = vld [vmem:[%s4253_s21 + $0x244] ss:$12 sps:$4 sm:$0xff]  }
 0x123   : > { %3374 = vmatprep.subr.bf16.mxu1 %v4323_v34  ;;  %v3766_v34 = vld [vmem:[%s4253_s21 + $0x240] ss:$12 sps:$4 sm:$0xff]  }
 0x124   : > { %1759 = vmatmul.mubr.bf16.gmra.mrb[84].mxu1 %v3754_v22 }
 0x125   : > { %3528 = vmatmul.mubr.msk.bf16.vlgmr.msra.gmra.mrb[72].mxu0 %vm856_vm1, %v3755_v24  ;;  %1766 = vmatprep.mubr.bf16.mxu1 %v3756_v25 }
 0x126   : > { %3564 = vmatpush3.bf16.msra.mxu0 %v4223_v18  ;;  %3531 = vmatprep.mubr.msk.bf16.mxu0 %vm3856_vm0, %v3855_v17 }
 0x127   : > { %3565 = vmatprep.subr.bf16.mxu0 %v3855_v17  ;;  %3375 = vmatpush3.bf16.msra.mxu1 %v4331_v36  ;;  %v3767_v36 = vld [vmem:[%s4253_s21 + $0x200] ss:$12 sps:$4 sm:$0xff]  }
 0x128   : > { %3376 = vmatprep.subr.bf16.mxu1 %v4337_v37  ;;  %v3768_v37 = vld [vmem:[%s4253_s21 + $0x25c] ss:$12 sps:$4 sm:$0xff]  }
 0x12a   : > { %3566 = vmatpush3.bf16.msra.mxu0 %v4245_v21 }
 0x12b   : > { %3377 = vmatpush3.bf16.msra.mxu1 %v4348_v38  ;;  %v3770_v38 = vld [vmem:[%s4253_s21 + $0x258] ss:$12 sps:$4 sm:$0xff]  }
 0x12c   : > { %1767 = vmatmul.mubr.bf16.gmra.mrb[88].mxu1 %v3758_v26  ;;  %3603 = vmatprep.subr.bf16.mxu1 %v3855_v17 }
 0x12d   : > { %3532 = vmatmul.mubr.msk.bf16.gmra.mrb[76].mxu0 %vm856_vm1, %v3759_v27  ;;  %1774 = vmatprep.mubr.bf16.mxu1 %v3760_v28 }
 0x12e   : > { %3535 = vmatprep.mubr.msk.bf16.mxu0 %vm3856_vm0, %v3855_v17 }
 0x134   : > { %1775 = vmatmul.mubr.bf16.gmra.mrb[92].mxu1 %v3762_v30 }
 0x135   : > { %3536 = vmatmul.mubr.msk.bf16.gmra.mrb[80].mxu0 %vm856_vm1, %v3763_v31  ;;  %1782 = vmatprep.mubr.bf16.mxu1 %v3764_v32  ;;  %v3798_v32 = vld [vmem:[%s4253_s21 + $0x300] ss:$12 sps:$4 sm:$0xff]  }
 0x136   : > { %3539 = vmatprep.mubr.msk.bf16.mxu0 %vm3856_vm0, %v3855_v17 }
 0x13c   : > { %1783 = vmatmul.mubr.bf16.gmra.mrb[96].mxu1 %v3766_v34 }
 0x13d   : > { %3540 = vmatmul.mubr.msk.bf16.gmra.mrb[84].mxu0 %vm856_vm1, %v3767_v36  ;;  %1790 = vmatprep.mubr.bf16.mxu1 %v3768_v37  ;;  %v3799_v37 = vld [vmem:[%s4253_s21 + $0x2c0] ss:$12 sps:$4 sm:$0xff]  }
 0x13e   : > { %3543 = vmatprep.mubr.msk.bf16.mxu0 %vm3856_vm0, %v3855_v17 }
 0x144   : > { %1791 = vmatmul.mubr.bf16.gmra.mrb[100].mxu1 %v3770_v38 }
 0x145   : > { %3544 = vmatmul.mubr.msk.bf16.gmra.mrb[88].mxu0 %vm856_vm1, %v3771_v48  ;;  %1798 = vmatprep.mubr.bf16.mxu1 %v3772_v49  ;;  %v3800_v48 = vld [vmem:[%s4253_s21 + $0x31c] ss:$12 sps:$4 sm:$0xff]  }
 0x146   : > { %3547 = vmatprep.mubr.msk.bf16.mxu0 %vm3856_vm0, %v3855_v17 }
 0x14c   : > { %1799 = vmatmul.mubr.bf16.gmra.mrb[104].mxu1 %v3774_v50 }
 0x14d   : > { %3548 = vmatmul.mubr.msk.bf16.gmra.mrb[92].mxu0 %vm856_vm1, %v3775_v51  ;;  %2143 = vmatprep.mubr.bf16.mxu1 %v3778_v52 }
 0x14e   : > { %3551 = vmatprep.mubr.msk.bf16.mxu0 %vm3856_vm0, %v3855_v17 }
 0x14f   : > { %v1023_v53 = vpop.f32.mrb[0].mxu1 }
 0x150   : > { %v3449_v55 = vpop.f32.mrb[1].mxu1 }
 0x151   : > { %v1026_v57 = vpop.f32.mrb[2].mxu1 }
 0x152   : > { %v3450_v59 = vpop.f32.mrb[3].mxu1 }
 0x154   : > { %2144 = vmatmul.mubr.bf16.vlgmr.msra.gmra.mrb[108].mxu1 %v3776_v54 }
 0x155   : > { %3552 = vmatmul.mubr.msk.bf16.gmra.mrb[96].mxu0 %vm856_vm1, %v3779_v56  ;;  %2151 = vmatprep.mubr.bf16.mxu1 %v3780_v58  ;;  %v3802_v58 = vld [vmem:[%s4253_s21 + $0x318] ss:$12 sps:$4 sm:$0xff]  }
 0x156   : > { %3555 = vmatprep.mubr.msk.bf16.mxu0 %vm3856_vm0, %v3855_v17  ;;  %3605 = vmatpush3.bf16.msra.mxu1 %v4223_v18 }
 0x157   : > { %v1031_v60 = vpop.f32.mrb[4].mxu1  ;;  %3604 = vmatprep.subr.bf16.mxu1 %v3855_v17 }
 0x158   : > { %v3453_v62 = vpop.f32.mrb[5].mxu1 }
 0x159   : > { %v1034_v0 = vpop.f32.mrb[6].mxu1 }
 0x15a   : > { %v3454_v2 = vpop.f32.mrb[7].mxu1  ;;  %3606 = vmatpush3.bf16.msra.mxu1 %v4245_v21 }
 0x15c   : > { %2152 = vmatmul.mubr.bf16.gmra.mrb[112].mxu1 %v3782_v61  ;;  %v3803_v61 = vld [vmem:[%s4253_s21 + $0x2d8] ss:$12 sps:$4 sm:$0xff]  }
 0x15d   : > { %3556 = vmatmul.mubr.msk.bf16.gmra.mrb[100].mxu0 %vm856_vm1, %v3783_v63  ;;  %2159 = vmatprep.mubr.bf16.mxu1 %v3784_v1  ;;  %v3804_v63 = vld [vmem:[%s4253_s21 + $0x334] ss:$12 sps:$4 sm:$0xff]  }
 0x15e   : > { %3559 = vmatprep.mubr.msk.bf16.mxu0 %vm3856_vm0, %v3855_v17 }
 0x15f   : > { %v1039_v18 = vpop.f32.mrb[8].mxu1 }
 0x160   : > { %v3457_v4 = vpop.f32.mrb[9].mxu1 }
 0x161   : > { %v1042_v6 = vpop.f32.mrb[10].mxu1 }
 0x162   : > { %v3458_v8 = vpop.f32.mrb[11].mxu1 }
 0x163   : > { %v3806_v8 = vld [vmem:[%s4253_s21 + $0x330] ss:$12 sps:$4 sm:$0xff]  }
 0x164   : > { %2160 = vmatmul.mubr.bf16.gmra.mrb[116].mxu1 %v3786_v3 }
 0x165   : > { %3560 = vmatmul.mubr.msk.bf16.gmra.mrb[104].mxu0 %vm856_vm1, %v3787_v5  ;;  %2167 = vmatprep.mubr.bf16.mxu1 %v3788_v7 }
 0x166   : > { %3567 = vmatprep.mubr.msk.bf16.mxu0 %vm3856_vm0, %v3855_v17 }
 0x167   : > { %v4562_v21 = vpop.f32.mrb[12].mxu1 }
 0x168   : > { %v3135_v9 = vpop.f32.mrb[0].mxu0  ;;  %v3461_v11 = vpop.f32.mrb[13].mxu1 }
 0x169   : > { %v3136_v12 = vpop.f32.mrb[1].mxu0  ;;  %v4566_v14 = vpop.f32.mrb[14].mxu1  ;;  %v3807_v11 = vld [vmem:[%s4253_s21 + $0x2f0] ss:$12 sps:$4 sm:$0xff]  }
 0x16a   : > { %v3137_v16 = vadd.f32 %v3136_v12, %v3135_v9  ;;  %v3138_v23 = vpop.f32.mrb[2].mxu0  ;;  %v3462_v29 = vpop.f32.mrb[15].mxu1  ;;  %v3808_v12 = vld [vmem:[%s4253_s21 + $0x34c] ss:$12 sps:$4 sm:$0xff]  }
 0x16b   : > { %v3139_v33 = vpop.f32.mrb[3].mxu0 }
 0x16c   : > { %v4569_v35 = vadd.f32 %v3137_v16, %v1023_v53  ;;  %v3140_v39 = vadd.f32 %v3139_v33, %v3138_v23  ;;  %2168 = vmatmul.mubr.bf16.gmra.mrb[120].mxu1 %v3790_v10 }
 0x16d   : > { %3568 = vmatmul.mubr.msk.bf16.vlgmr.msra.gmra.mrb[108].mxu0 %vm856_vm1, %v3791_v13  ;;  %2175 = vmatprep.mubr.bf16.mxu1 %v3792_v15 }
 0x16e   : > { %v4572_v40 = vadd.f32 %v3140_v39, %v1026_v57  ;;  %3571 = vmatprep.mubr.msk.bf16.mxu0 %vm3856_vm0, %v3855_v17 }
 0x16f   : > { %v4576_v41 = vpop.f32.mrb[16].mxu1 }
 0x170   : > { %v3141_v42 = vpop.f32.mrb[4].mxu0  ;;  %v3465_v44 = vpop.f32.mrb[17].mxu1 }
 0x171   : > { %v3142_v45 = vpop.f32.mrb[5].mxu0  ;;  %v4580_v19 = vpop.f32.mrb[18].mxu1 }
 0x172   : > { %v3143_v47 = vadd.f32 %v3142_v45, %v3141_v42  ;;  %v3144_v22 = vpop.f32.mrb[6].mxu0  ;;  %v3466_v24 = vpop.f32.mrb[19].mxu1 }
 0x173   : > { %v3145_v25 = vpop.f32.mrb[7].mxu0 }
 0x174   : > { %v4583_v26 = vadd.f32 %v3143_v47, %v1031_v60  ;;  %v3146_v27 = vadd.f32 %v3145_v25, %v3144_v22  ;;  %2176 = vmatmul.mubr.bf16.gmra.mrb[124].mxu1 %v3794_v43  ;;  %v3810_v43 = vld [vmem:[%s4253_s21 + $0x348] ss:$12 sps:$4 sm:$0xff]  }
 0x175   : > { %3572 = vmatmul.mubr.msk.bf16.gmra.mrb[112].mxu0 %vm856_vm1, %v3795_v46  ;;  %2183 = vmatprep.mubr.bf16.mxu1 %v3796_v20 }
 0x176   : > { %v4586_v28 = vadd.f32 %v3146_v27, %v1034_v0  ;;  %3575 = vmatprep.mubr.msk.bf16.mxu0 %vm3856_vm0, %v3855_v17 }
 0x177   : > { %v4590_v30 = vpop.f32.mrb[20].mxu1 }
 0x178   : > { %v3147_v31 = vpop.f32.mrb[8].mxu0  ;;  %v3469_v34 = vpop.f32.mrb[21].mxu1 }
 0x179   : > { %v3148_v36 = vpop.f32.mrb[9].mxu0  ;;  %v4594_v38 = vpop.f32.mrb[22].mxu1  ;;  %v3812_v34 = vld [vmem:[%s4253_s21 + $0x350] ss:$12 sps:$4 sm:$0xff]  }
 0x17a   : > { %v3149_v49 = vadd.f32 %v3148_v36, %v3147_v31  ;;  %v3150_v50 = vpop.f32.mrb[10].mxu0  ;;  %v3470_v51 = vpop.f32.mrb[23].mxu1 }
 0x17b   : > { %v3151_v52 = vpop.f32.mrb[11].mxu0 }
 0x17c   : > { %v4597_v53 = vadd.f32 %v3149_v49, %v1039_v18  ;;  %v3152_v54 = vadd.f32 %v3151_v52, %v3150_v50  ;;  %2184 = vmatmul.mubr.bf16.gmra.mrb[128].mxu1 %v3798_v32 }
 0x17d   : > { %3576 = vmatmul.mubr.msk.bf16.gmra.mrb[116].mxu0 %vm856_vm1, %v3799_v37  ;;  %2191 = vmatprep.mubr.bf16.mxu1 %v3800_v48 }
 0x17e   : > { %v4600_v55 = vadd.f32 %v3152_v54, %v1042_v6  ;;  %3579 = vmatprep.mubr.msk.bf16.mxu0 %vm3856_vm0, %v3855_v17 }
 0x17f   : > { %v4604_v56 = vpop.f32.mrb[24].mxu1 }
 0x180   : > { %v3153_v57 = vpop.f32.mrb[12].mxu0  ;;  %v3473_v59 = vpop.f32.mrb[25].mxu1 }
 0x181   : > { %v3154_v60 = vpop.f32.mrb[13].mxu0  ;;  %v4608_v62 = vpop.f32.mrb[26].mxu1 }
 0x182   : > { %v3155_v0 = vadd.f32 %v3154_v60, %v3153_v57  ;;  %v3156_v1 = vpop.f32.mrb[14].mxu0  ;;  %v3474_v2 = vpop.f32.mrb[27].mxu1 }
 0x183   : > { %v3157_v18 = vpop.f32.mrb[15].mxu0 }
 0x184   : > { %v4612_v3 = vadd.f32 %v3155_v0, %v4562_v21  ;;  %v3158_v4 = vadd.f32 %v3157_v18, %v3156_v1  ;;  %2192 = vmatmul.mubr.bf16.gmra.mrb[132].mxu1 %v3802_v58  ;;  %v3814_v1 = vld [vmem:[%s4253_s21 + $0x338] ss:$12 sps:$4 sm:$0xff]  }
 0x185   : > { %3580 = vmatmul.mubr.msk.bf16.gmra.mrb[120].mxu0 %vm856_vm1, %v3803_v61  ;;  %2199 = vmatprep.mubr.bf16.mxu1 %v3804_v63 }
 0x186   : > { %v4616_v5 = vadd.f32 %v3158_v4, %v4566_v14  ;;  %3583 = vmatprep.mubr.msk.bf16.mxu0 %vm3856_vm0, %v3855_v17 }
 0x187   : > { %v4620_v6 = vpop.f32.mrb[28].mxu1 }
 0x188   : > { %v3159_v7 = vpop.f32.mrb[16].mxu0  ;;  %v3477_v9 = vpop.f32.mrb[29].mxu1 }
 0x189   : > { %v3160_v10 = vpop.f32.mrb[17].mxu0  ;;  %v4624_v21 = vpop.f32.mrb[30].mxu1 }
 0x18a   : > { %v3161_v13 = vadd.f32 %v3160_v10, %v3159_v7  ;;  %v3162_v15 = vpop.f32.mrb[18].mxu0  ;;  %v3478_v16 = vpop.f32.mrb[31].mxu1 }
 0x18b   : > { %v3163_v14 = vpop.f32.mrb[19].mxu0 }
 0x18c   : > { %v4628_v23 = vadd.f32 %v3161_v13, %v4576_v41  ;;  %v3164_v29 = vadd.f32 %v3163_v14, %v3162_v15  ;;  %2200 = vmatmul.mubr.bf16.gmra.mrb[136].mxu1 %v3806_v8  ;;  %v3811_v41 = vld [vmem:[%s4253_s21 + $0x308] ss:$12 sps:$4 sm:$0xff]  }
 0x18d   : > { %3584 = vmatmul.mubr.msk.bf16.gmra.mrb[124].mxu0 %vm856_vm1, %v3807_v11  ;;  %2207 = vmatprep.mubr.bf16.mxu1 %v3808_v12 }
 0x18e   : > { %v4632_v33 = vadd.f32 %v3164_v29, %v4580_v19  ;;  %3587 = vmatprep.mubr.msk.bf16.mxu0 %vm3856_vm0, %v3855_v17 }
 0x18f   : > { %v4636_v39 = vpop.f32.mrb[32].mxu1 }
 0x190   : > { %v3165_v42 = vpop.f32.mrb[20].mxu0  ;;  %v3481_v44 = vpop.f32.mrb[33].mxu1 }
 0x191   : > { %v3166_v45 = vpop.f32.mrb[21].mxu0  ;;  %v1090_v46 = vpop.f32.mrb[34].mxu1 }
 0x192   : > { %v3167_v20 = vadd.f32 %v3166_v45, %v3165_v42  ;;  %v3168_v47 = vpop.f32.mrb[22].mxu0  ;;  %v3482_v22 = vpop.f32.mrb[35].mxu1 }
 0x193   : > { %v3169_v24 = vpop.f32.mrb[23].mxu0 }
 0x194   : > { %v4641_v19 = vadd.f32 %v3167_v20, %v4590_v30  ;;  %v3170_v25 = vadd.f32 %v3169_v24, %v3168_v47  ;;  %2208 = vmatmul.mubr.bf16.gmra.mrb[140].mxu1 %v3810_v43  ;;  %v3813_v30 = vld [vmem:[%s4253_s21 + $0x320] ss:$12 sps:$4 sm:$0xff]   ;;  %s531_s21 = smul.u32 18, %s3845_s14 }
 0x195   : > { %3588 = vmatmul.mubr.msk.bf16.gmra.mrb[128].mxu0 %vm856_vm1, %v3811_v41  ;;  %3599 = vmatprep.mubr.msk.bf16.mxu1 %vm3856_vm0, %v3855_v17 }
 0x196   : > { %v4647_v27 = vadd.f32 %v3170_v25, %v4594_v38  ;;  %3591 = vmatprep.mubr.msk.bf16.mxu0 %vm3856_vm0, %v3855_v17  ;;  %p532_p9 = scmp.lt.s32.totalorder %s531_s21, 35 }
 0x197   : > { %v3216_v31 = vpop.f32.mrb[36].mxu1 }
 0x198   : > { %v3171_v32 = vpop.f32.mrb[24].mxu0  ;;  %v3217_v36 = vpop.f32.mrb[37].mxu1  ;;  %s5035_s21 = smov (!%p532_p9, %s531_s21), 35 }
 0x199   : > { %v3172_v37 = vpop.f32.mrb[25].mxu0  ;;  %v3218_v48 = vadd.f32 %v3217_v36, %v3216_v31  ;;  %v3219_v49 = vpop.f32.mrb[38].mxu1  ;;  %s2809_s27 = sshll.u32 %s5035_s21, 2 }
 0x19a   : > { %v3173_v50 = vadd.f32 %v3172_v37, %v3171_v32  ;;  %v3174_v51 = vpop.f32.mrb[26].mxu0  ;;  %v3220_v52 = vpop.f32.mrb[39].mxu1  ;;  %s4813_s30 = scalar_lea.vmem %s4975_s3, %s2809_s27 }
 0x19b   : > { %v3175_v54 = vpop.f32.mrb[27].mxu0  ;;  %v3221_v57 = vadd.f32 %v3220_v52, %v3219_v49 }
 0x19c   : > { %v4654_v38 = vadd.f32 %v3173_v50, %v4604_v56  ;;  %v3176_v58 = vadd.f32 %v3175_v54, %v3174_v51  ;;  %3600 = vmatmul.mubr.msk.bf16.vlgmr.msra.gmra.mrb[144].mxu1 %vm856_vm1, %v3812_v34 }
 0x19d   : > { %3592 = vmatmul.mubr.msk.bf16.gmra.mrb[132].mxu0 %vm856_vm1, %v3813_v30 }
 0x19e   : > { %4986 = vst [vmem:[#allocation3_spill] sm:$0xff] %v4654_v38  ;;  %v4659_v59 = vadd.f32 %v3176_v58, %v4608_v62  ;;  %3595 = vmatprep.mubr.msk.bf16.mxu0 %vm3856_vm0, %v3855_v17 }
 0x19f   : > { %v3222_v60 = vpop.f32.mrb[40].mxu1 }
 0x1a0   : > { %4987 = vst [vmem:[#allocation4_spill] sm:$0xff] %v4659_v59  ;;  %v3177_v61 = vpop.f32.mrb[28].mxu0  ;;  %v3223_v63 = vpop.f32.mrb[41].mxu1 }
 0x1a1   : > { %v3178_v0 = vpop.f32.mrb[29].mxu0  ;;  %v3224_v2 = vadd.f32 %v3223_v63, %v3222_v60  ;;  %v3225_v18 = vpop.f32.mrb[42].mxu1 }
 0x1a2   : > { %v3179_v56 = vadd.f32 %v3178_v0, %v3177_v61  ;;  %v3180_v4 = vpop.f32.mrb[30].mxu0  ;;  %v3226_v7 = vpop.f32.mrb[43].mxu1 }
 0x1a3   : > { %v3181_v8 = vpop.f32.mrb[31].mxu0  ;;  %v3227_v9 = vadd.f32 %v3226_v7, %v3225_v18 }
 0x1a4   : > { %v4665_v10 = vadd.f32 %v3179_v56, %v4620_v6  ;;  %v3182_v62 = vadd.f32 %v3181_v8, %v3180_v4 }
 0x1a5   : > { %3596 = vmatmul.mubr.msk.bf16.gmra.mrb[136].mxu0 %vm856_vm1, %v3814_v1 }
 0x1a6   : > { %4988 = vst [vmem:[#allocation5_spill] sm:$0xff] %v4665_v10  ;;  %v4669_v17 = vadd.f32 %v3182_v62, %v4624_v21 }
 0x1a7   : > { %v3228_v11 = vpop.f32.mrb[44].mxu1 }
 0x1a8   : > { %4989 = vst [vmem:[#allocation6_spill] sm:$0xff] %v4669_v17  ;;  %v3183_v12 = vpop.f32.mrb[32].mxu0  ;;  %v3229_v13 = vpop.f32.mrb[45].mxu1 }
 0x1a9   : > { %v3184_v15 = vpop.f32.mrb[33].mxu0  ;;  %v3230_v16 = vadd.f32 %v3229_v13, %v3228_v11  ;;  %v3231_v14 = vpop.f32.mrb[46].mxu1 }
 0x1aa   : > { %v3185_v29 = vadd.f32 %v3184_v15, %v3183_v12  ;;  %v3186_v42 = vpop.f32.mrb[34].mxu0  ;;  %v3232_v43 = vpop.f32.mrb[47].mxu1 }
 0x1ab   : > { %v3187_v44 = vpop.f32.mrb[35].mxu0  ;;  %v3233_v45 = vadd.f32 %v3232_v43, %v3231_v14 }
 0x1ac   : > { %v4672_v6 = vadd.f32 %v3185_v29, %v4636_v39  ;;  %v3188_v41 = vadd.f32 %v3187_v44, %v3186_v42 }
 0x1ae   : > { %v4674_v20 = vadd.f32 %v3188_v41, %v1090_v46 }
 0x1af   : > { %v3234_v47 = vpop.f32.mrb[48].mxu1 }
 0x1b0   : > { %4990 = vst [vmem:[#allocation7_spill] sm:$0xff] %v4674_v20  ;;  %v1432_v21 = vpop.f32.mrb[36].mxu0  ;;  %v3235_v22 = vpop.f32.mrb[49].mxu1 }
 0x1b1   : > { %v4676_v24 = vadd.f32 %v3218_v48, %v1432_v21  ;;  %v3489_v25 = vpop.f32.mrb[37].mxu0  ;;  %v3236_v31 = vadd.f32 %v3235_v22, %v3234_v47  ;;  %v3237_v32 = vpop.f32.mrb[50].mxu1 }
 0x1b2   : > { %v1435_v34 = vpop.f32.mrb[38].mxu0  ;;  %v3238_v36 = vpop.f32.mrb[51].mxu1 }
 0x1b3   : > { %v4680_v30 = vadd.f32 %v3221_v57, %v1435_v34  ;;  %v3490_v39 = vpop.f32.mrb[39].mxu0  ;;  %v3239_v49 = vadd.f32 %v3238_v36, %v3237_v32 }
 0x1b7   : > { %v3240_v50 = vpop.f32.mrb[52].mxu1 }
 0x1b8   : > { %v1440_v51 = vpop.f32.mrb[40].mxu0  ;;  %v3241_v52 = vpop.f32.mrb[53].mxu1 }
 0x1b9   : > { %v4684_v48 = vadd.f32 %v3224_v2, %v1440_v51  ;;  %v3493_v54 = vpop.f32.mrb[41].mxu0  ;;  %v3242_v58 = vadd.f32 %v3241_v52, %v3240_v50  ;;  %v3243_v60 = vpop.f32.mrb[54].mxu1 }
 0x1ba   : > { %v1443_v61 = vpop.f32.mrb[42].mxu0  ;;  %v3244_v63 = vpop.f32.mrb[55].mxu1 }
 0x1bb   : > { %v4688_v57 = vadd.f32 %v3227_v9, %v1443_v61  ;;  %v3494_v1 = vpop.f32.mrb[43].mxu0  ;;  %v3245_v18 = vadd.f32 %v3244_v63, %v3243_v60 }
 0x1bf   : > { %v3246_v4 = vpop.f32.mrb[56].mxu1 }
 0x1c0   : > { %v1448_v7 = vpop.f32.mrb[44].mxu0  ;;  %v3247_v8 = vpop.f32.mrb[57].mxu1 }
 0x1c1   : > { %v4692_v2 = vadd.f32 %v3230_v16, %v1448_v7  ;;  %v3497_v62 = vpop.f32.mrb[45].mxu0  ;;  %v3248_v11 = vadd.f32 %v3247_v8, %v3246_v4  ;;  %v3249_v12 = vpop.f32.mrb[58].mxu1 }
 0x1c2   : > { %v1451_v13 = vpop.f32.mrb[46].mxu0  ;;  %v3250_v15 = vpop.f32.mrb[59].mxu1 }
 0x1c3   : > { %v4696_v9 = vadd.f32 %v3233_v45, %v1451_v13  ;;  %v3498_v29 = vpop.f32.mrb[47].mxu0  ;;  %v3251_v42 = vadd.f32 %v3250_v15, %v3249_v12 }
 0x1c7   : > { %v3252_v44 = vpop.f32.mrb[60].mxu1 }
 0x1c8   : > { %v1456_v41 = vpop.f32.mrb[48].mxu0  ;;  %v3253_v47 = vpop.f32.mrb[61].mxu1 }
 0x1c9   : > { %v4700_v16 = vadd.f32 %v3236_v31, %v1456_v41  ;;  %v3501_v21 = vpop.f32.mrb[49].mxu0  ;;  %v3254_v22 = vadd.f32 %v3253_v47, %v3252_v44  ;;  %v3255_v25 = vpop.f32.mrb[62].mxu1 }
 0x1ca   : > { %v1459_v32 = vpop.f32.mrb[50].mxu0  ;;  %v3256_v34 = vpop.f32.mrb[63].mxu1 }
 0x1cb   : > { %v4704_v45 = vadd.f32 %v3239_v49, %v1459_v32  ;;  %v3502_v39 = vpop.f32.mrb[51].mxu0  ;;  %v3257_v50 = vadd.f32 %v3256_v34, %v3255_v25 }
 0x1cf   : > { %v3258_v52 = vpop.f32.mrb[64].mxu1 }
 0x1d0   : > { %v1464_v54 = vpop.f32.mrb[52].mxu0  ;;  %v3259_v60 = vpop.f32.mrb[65].mxu1 }
 0x1d1   : > { %v4708_v31 = vadd.f32 %v3242_v58, %v1464_v54  ;;  %v3505_v61 = vpop.f32.mrb[53].mxu0  ;;  %v3260_v63 = vadd.f32 %v3259_v60, %v3258_v52  ;;  %v3261_v1 = vpop.f32.mrb[66].mxu1 }
 0x1d2   : > { %v1467_v4 = vpop.f32.mrb[54].mxu0  ;;  %v3262_v7 = vpop.f32.mrb[67].mxu1 }
 0x1d3   : > { %v4712_v49 = vadd.f32 %v3245_v18, %v1467_v4  ;;  %v3506_v62 = vpop.f32.mrb[55].mxu0  ;;  %v3263_v12 = vadd.f32 %v3262_v7, %v3261_v1 }
 0x1d7   : > { %v3264_v15 = vpop.f32.mrb[68].mxu1 }
 0x1d8   : > { %v1472_v29 = vpop.f32.mrb[56].mxu0  ;;  %v3265_v44 = vpop.f32.mrb[69].mxu1 }
 0x1d9   : > { %v4716_v58 = vadd.f32 %v3248_v11, %v1472_v29  ;;  %v3509_v41 = vpop.f32.mrb[57].mxu0  ;;  %v3266_v47 = vadd.f32 %v3265_v44, %v3264_v15  ;;  %v3267_v21 = vpop.f32.mrb[70].mxu1 }
 0x1da   : > { %v1475_v25 = vpop.f32.mrb[58].mxu0  ;;  %v3268_v32 = vpop.f32.mrb[71].mxu1 }
 0x1db   : > { %v4720_v18 = vadd.f32 %v3251_v42, %v1475_v25  ;;  %v3510_v39 = vpop.f32.mrb[59].mxu0  ;;  %v3269_v52 = vadd.f32 %v3268_v32, %v3267_v21 }
 0x1df   : > { %v3297_v60 = vpop.f32.mrb[72].mxu1 }
 0x1e0   : > { %v1480_v61 = vpop.f32.mrb[60].mxu0  ;;  %v3298_v1 = vpop.f32.mrb[73].mxu1 }
 0x1e1   : > { %v4724_v11 = vadd.f32 %v3254_v22, %v1480_v61  ;;  %v3513_v4 = vpop.f32.mrb[61].mxu0  ;;  %v3299_v7 = vadd.f32 %v3298_v1, %v3297_v60  ;;  %v3300_v62 = vpop.f32.mrb[74].mxu1 }
 0x1e2   : > { %v1483_v15 = vpop.f32.mrb[62].mxu0  ;;  %v3301_v29 = vpop.f32.mrb[75].mxu1 }
 0x1e3   : > { %4991 = vst [vmem:[#allocation8_spill] sm:$0xff] %v4724_v11  ;;  %v4728_v42 = vadd.f32 %v3257_v50, %v1483_v15  ;;  %v3514_v41 = vpop.f32.mrb[63].mxu0  ;;  %v3302_v21 = vadd.f32 %v3301_v29, %v3300_v62 }
 0x1e5   : > { %4992 = vst [vmem:[#allocation9_spill] sm:$0xff] %v4728_v42 }
 0x1e7   : > { %v3303_v32 = vpop.f32.mrb[76].mxu1 }
 0x1e8   : > { %v1488_v39 = vpop.f32.mrb[64].mxu0  ;;  %v3304_v54 = vpop.f32.mrb[77].mxu1 }
 0x1e9   : > { %v4732_v22 = vadd.f32 %v3260_v63, %v1488_v39  ;;  %v3517_v61 = vpop.f32.mrb[65].mxu0  ;;  %v3305_v60 = vadd.f32 %v3304_v54, %v3303_v32  ;;  %v3306_v1 = vpop.f32.mrb[78].mxu1 }
 0x1ea   : > { %v1491_v4 = vpop.f32.mrb[66].mxu0  ;;  %v3307_v34 = vpop.f32.mrb[79].mxu1 }
 0x1eb   : > { %4993 = vst [vmem:[#allocation10_spill] sm:$0xff] %v4732_v22  ;;  %v4736_v50 = vadd.f32 %v3263_v12, %v1491_v4  ;;  %v3518_v15 = vpop.f32.mrb[67].mxu0  ;;  %v3308_v62 = vadd.f32 %v3307_v34, %v3306_v1 }
 0x1ed   : > { %4994 = vst [vmem:[#allocation11_spill] sm:$0xff] %v4736_v50 }
 0x1ef   : > { %v3309_v41 = vpop.f32.mrb[80].mxu1 }
 0x1f0   : > { %v1496_v25 = vpop.f32.mrb[68].mxu0  ;;  %v3310_v13 = vpop.f32.mrb[81].mxu1 }
 0x1f1   : > { %v4740_v63 = vadd.f32 %v3266_v47, %v1496_v25  ;;  %v3521_v39 = vpop.f32.mrb[69].mxu0  ;;  %v3311_v54 = vadd.f32 %v3310_v13, %v3309_v41  ;;  %v3312_v32 = vpop.f32.mrb[82].mxu1 }
 0x1f2   : > { %v1499_v61 = vpop.f32.mrb[70].mxu0  ;;  %v3313_v8 = vpop.f32.mrb[83].mxu1 }
 0x1f3   : > { %v4744_v12 = vadd.f32 %v3269_v52, %v1499_v61  ;;  %v3522_v4 = vpop.f32.mrb[71].mxu0  ;;  %v3314_v34 = vadd.f32 %v3313_v8, %v3312_v32 }
 0x1f5   : > { %4995 = vst [vmem:[#allocation12_spill] sm:$0xff] %v4744_v12 }
 0x1f7   : > { %v3315_v15 = vpop.f32.mrb[84].mxu1 }
 0x1f8   : > { %v1841_v29 = vpop.f32.mrb[72].mxu0  ;;  %v3316_v51 = vpop.f32.mrb[85].mxu1 }
 0x1f9   : > { %v4748_v47 = vadd.f32 %v3299_v7, %v1841_v29  ;;  %v3529_v25 = vpop.f32.mrb[73].mxu0  ;;  %v3317_v13 = vadd.f32 %v3316_v51, %v3315_v15  ;;  %v3318_v41 = vpop.f32.mrb[86].mxu1 }
 0x1fa   : > { %v1844_v39 = vpop.f32.mrb[74].mxu0  ;;  %v3319_v36 = vpop.f32.mrb[87].mxu1 }
 0x1fb   : > { %v4750_v43 = vadd.f32 %v3302_v21, %v1844_v39  ;;  %v3530_v44 = vpop.f32.mrb[75].mxu0  ;;  %v3320_v52 = vadd.f32 %v3319_v36, %v3318_v41 }
 0x1ff   : > { %v3321_v61 = vpop.f32.mrb[88].mxu1 }
 0x200   : > { %v1849_v4 = vpop.f32.mrb[76].mxu0  ;;  %v3322_v8 = vpop.f32.mrb[89].mxu1 }
 0x201   : > { %v4752_v32 = vadd.f32 %v3305_v60, %v1849_v4  ;;  %v3533_v1 = vpop.f32.mrb[77].mxu0  ;;  %v3323_v14 = vadd.f32 %v3322_v8, %v3321_v61  ;;  %v3324_v56 = vpop.f32.mrb[90].mxu1 }
 0x202   : > { %v1852_v0 = vpop.f32.mrb[78].mxu0  ;;  %v3325_v7 = vpop.f32.mrb[91].mxu1 }
 0x203   : > { %v4754_v29 = vadd.f32 %v3308_v62, %v1852_v0  ;;  %v3534_v51 = vpop.f32.mrb[79].mxu0  ;;  %v3326_v15 = vadd.f32 %v3325_v7, %v3324_v56 }
 0x207   : > { %v3327_v25 = vpop.f32.mrb[92].mxu1 }
 0x208   : > { %v1857_v46 = vpop.f32.mrb[80].mxu0  ;;  %v3328_v21 = vpop.f32.mrb[93].mxu1 }
 0x209   : > { %v4756_v39 = vadd.f32 %v3311_v54, %v1857_v46  ;;  %v3537_v36 = vpop.f32.mrb[81].mxu0  ;;  %v3329_v44 = vadd.f32 %v3328_v21, %v3327_v25  ;;  %v3330_v41 = vpop.f32.mrb[94].mxu1 }
 0x20a   : > { %v1860_v37 = vpop.f32.mrb[82].mxu0  ;;  %v3331_v60 = vpop.f32.mrb[95].mxu1 }
 0x20b   : > { %v4758_v4 = vadd.f32 %v3314_v34, %v1860_v37  ;;  %v3538_v1 = vpop.f32.mrb[83].mxu0  ;;  %v3332_v61 = vadd.f32 %v3331_v60, %v3330_v41 }
 0x20f   : > { %v3333_v8 = vpop.f32.mrb[96].mxu1 }
 0x210   : > { %v1865_v50 = vpop.f32.mrb[84].mxu0  ;;  %v3334_v0 = vpop.f32.mrb[97].mxu1 }
 0x211   : > { %v4760_v62 = vadd.f32 %v3317_v13, %v1865_v50  ;;  %v3541_v56 = vpop.f32.mrb[85].mxu0  ;;  %v3335_v7 = vadd.f32 %v3334_v0, %v3333_v8  ;;  %v3336_v51 = vpop.f32.mrb[98].mxu1 }
 0x212   : > { %v1868_v17 = vpop.f32.mrb[86].mxu0  ;;  %v3337_v46 = vpop.f32.mrb[99].mxu1 }
 0x213   : > { %v4762_v54 = vadd.f32 %v3320_v52, %v1868_v17  ;;  %v3542_v25 = vpop.f32.mrb[87].mxu0  ;;  %v3338_v21 = vadd.f32 %v3337_v46, %v3336_v51 }
 0x217   : > { %v3339_v36 = vpop.f32.mrb[100].mxu1 }
 0x218   : > { %v1873_v22 = vpop.f32.mrb[88].mxu0  ;;  %v3340_v37 = vpop.f32.mrb[101].mxu1 }
 0x219   : > { %v4764_v34 = vadd.f32 %v3323_v14, %v1873_v22  ;;  %v3545_v41 = vpop.f32.mrb[89].mxu0  ;;  %v3341_v60 = vadd.f32 %v3340_v37, %v3339_v36  ;;  %v3342_v1 = vpop.f32.mrb[102].mxu1 }
 0x21a   : > { %v1876_v10 = vpop.f32.mrb[90].mxu0  ;;  %v3343_v50 = vpop.f32.mrb[103].mxu1 }
 0x21b   : > { %v4766_v13 = vadd.f32 %v3326_v15, %v1876_v10  ;;  %v3546_v8 = vpop.f32.mrb[91].mxu0  ;;  %v3344_v0 = vadd.f32 %v3343_v50, %v3342_v1 }
 0x21f   : > { %v3345_v56 = vpop.f32.mrb[104].mxu1 }
 0x220   : > { %v1881_v42 = vpop.f32.mrb[92].mxu0  ;;  %v3346_v17 = vpop.f32.mrb[105].mxu1 }
 0x221   : > { %v4768_v52 = vadd.f32 %v3329_v44, %v1881_v42  ;;  %v3549_v51 = vpop.f32.mrb[93].mxu0  ;;  %v3347_v46 = vadd.f32 %v3346_v17, %v3345_v56  ;;  %v3348_v25 = vpop.f32.mrb[106].mxu1 }
 0x222   : > { %v1884_v59 = vpop.f32.mrb[94].mxu0  ;;  %v3349_v14 = vpop.f32.mrb[107].mxu1 }
 0x223   : > { %v4770_v22 = vadd.f32 %v3332_v61, %v1884_v59  ;;  %v3550_v36 = vpop.f32.mrb[95].mxu0  ;;  %v3350_v37 = vadd.f32 %v3349_v14, %v3348_v25 }
 0x227   : > { %v3378_v41 = vpop.f32.mrb[108].mxu1 }
 0x228   : > { %v1889_v12 = vpop.f32.mrb[96].mxu0  ;;  %v3379_v10 = vpop.f32.mrb[109].mxu1 }
 0x229   : > { %v4772_v15 = vadd.f32 %v3335_v7, %v1889_v12  ;;  %v3553_v1 = vpop.f32.mrb[97].mxu0  ;;  %v3380_v50 = vadd.f32 %v3379_v10, %v3378_v41  ;;  %v3381_v8 = vpop.f32.mrb[110].mxu1 }
 0x22a   : > { %v1892_v20 = vpop.f32.mrb[98].mxu0  ;;  %v3382_v42 = vpop.f32.mrb[111].mxu1 }
 0x22b   : > { %v4774_v44 = vadd.f32 %v3338_v21, %v1892_v20  ;;  %v3554_v56 = vpop.f32.mrb[99].mxu0  ;;  %v3383_v17 = vadd.f32 %v3382_v42, %v3381_v8 }
 0x22f   : > { %v3384_v51 = vpop.f32.mrb[112].mxu1 }
 0x230   : > { %v1897_v11 = vpop.f32.mrb[100].mxu0  ;;  %v3385_v59 = vpop.f32.mrb[113].mxu1 }
 0x231   : > { %v4776_v61 = vadd.f32 %v3341_v60, %v1897_v11  ;;  %v3557_v25 = vpop.f32.mrb[101].mxu0  ;;  %v3386_v14 = vadd.f32 %v3385_v59, %v3384_v51  ;;  %v3387_v36 = vpop.f32.mrb[114].mxu1 }
 0x232   : > { %v1900_v38 = vpop.f32.mrb[102].mxu0  ;;  %v3388_v12 = vpop.f32.mrb[115].mxu1 }
 0x233   : > { %4996 = vst [vmem:[#allocation13_spill] sm:$0xff] %v4776_v61  ;;  %v4778_v7 = vadd.f32 %v3344_v0, %v1900_v38  ;;  %v3558_v41 = vpop.f32.mrb[103].mxu0  ;;  %v3389_v10 = vadd.f32 %v3388_v12, %v3387_v36 }
 0x235   : > { %4997 = vst [vmem:[#allocation14_spill] sm:$0xff] %v4778_v7 }
 0x237   : > { %v3390_v1 = vpop.f32.mrb[116].mxu1 }
 0x238   : > { %v1905_v20 = vpop.f32.mrb[104].mxu0  ;;  %v3391_v21 = vpop.f32.mrb[117].mxu1 }
 0x239   : > { %v4780_v56 = vadd.f32 %v3347_v46, %v1905_v20  ;;  %v3561_v8 = vpop.f32.mrb[105].mxu0  ;;  %v4782_v42 = vadd.f32 %v3391_v21, %v3390_v1  ;;  %v3393_v11 = vpop.f32.mrb[118].mxu1 }
 0x23a   : > { %v1908_v60 = vpop.f32.mrb[106].mxu0  ;;  %v3394_v25 = vpop.f32.mrb[119].mxu1 }
 0x23b   : > { %v4784_v51 = vadd.f32 %v3350_v37, %v1908_v60  ;;  %v3562_v59 = vpop.f32.mrb[107].mxu0  ;;  %v4786_v61 = vadd.f32 %v3394_v25, %v3393_v11  ;;  %v4797_v11 = vld [vmem:[%s4974_s2] ss:$0 sm:$0xff] }
 0x23f   : > { %v3396_v38 = vpop.f32.mrb[120].mxu1 }
 0x240   : > { %v2250_v0 = vpop.f32.mrb[108].mxu0  ;;  %v3397_v36 = vpop.f32.mrb[121].mxu1 }
 0x241   : > { %v2251_v12 = vadd.f32 %v3380_v50, %v2250_v0  ;;  %v3569_v41 = vpop.f32.mrb[109].mxu0  ;;  %v4789_v46 = vadd.f32 %v3397_v36, %v3396_v38  ;;  %v3399_v20 = vpop.f32.mrb[122].mxu1  ;;  %v4998_v50 = vmax.f32 %v4569_v35, %v4676_v24 }
 0x242   : > { %v2253_v1 = vpop.f32.mrb[110].mxu0  ;;  %v3400_v21 = vpop.f32.mrb[123].mxu1 }
 0x243   : > { %v2339_v8 = vmax.f32 %v4748_v47, %v2251_v12  ;;  %v2254_v7 = vadd.f32 %v3383_v17, %v2253_v1  ;;  %v3570_v37 = vpop.f32.mrb[111].mxu0  ;;  %v4792_v60 = vadd.f32 %v3400_v21, %v3399_v20  ;;  %v4999_v47 = vmax.f32 %v4572_v40, %v4680_v30 }
 0x245   : > { %v2357_v25 = vmax.f32 %v4998_v50, %v2339_v8  ;;  %v2340_v59 = vmax.f32 %v4750_v43, %v2254_v7 }
 0x247   : > { %v2382_v38 = vadd.f32 %v4797_v11, %v2357_v25  ;;  %v2358_v17 = vmax.f32 %v4999_v47, %v2340_v59  ;;  %v3402_v0 = vpop.f32.mrb[124].mxu1  ;;  %v5000_v47 = vmax.f32 %v4583_v26, %v4684_v48 }
 0x248   : > { %v2258_v36 = vpop.f32.mrb[112].mxu0  ;;  %v3403_v12 = vpop.f32.mrb[125].mxu1 }
 0x249   : > { %vm2400_vm2 = vcmp.ge.f32.partialorder %v2382_v38, 0.0  ;;  %v2418_v41 = vmul.f32 0.01, %v2382_v38  ;;  %v2383_v20 = vadd.f32 %v4797_v11, %v2358_v17  ;;  %v2259_v1 = vadd.f32 %v3386_v14, %v2258_v36  ;;  %v3573_v21 = vpop.f32.mrb[113].mxu0  ;;  %v3405_v35 = vpop.f32.mrb[126].mxu1 }
 0x24a   : > { %v2261_v24 = vpop.f32.mrb[114].mxu0  ;;  %v4808_v43 = vadd.f32 %v3403_v12, %v3402_v0  ;;  %v3406_v7 = vpop.f32.mrb[127].mxu1 }
 0x24b   : > { %v2436_v40 = vsel %vm2400_vm2, %v2382_v38, %v2418_v41  ;;  %vm2401_vm4 = vcmp.ge.f32.partialorder %v2383_v20, 0.0  ;;  %v2419_v30 = vmul.f32 0.01, %v2383_v20  ;;  %v2341_v8 = vmax.f32 %v4752_v32, %v2259_v1  ;;  %v3574_v14 = vpop.f32.mrb[115].mxu0 }
 0x24c   : > { %v3101_v37 = vpack.c.bf16 %v2436_v40, %v2436_v40  ;;  %v2262_v50 = vadd.f32 %v3389_v10, %v2261_v24  ;;  %v4816_v25 = vadd.f32 %v3406_v7, %v3405_v35  ;;  %v5001_v32 = vmax.f32 %v4586_v28, %v4688_v57 }
 0x24d   : > { %v2437_v59 = vsel %vm2401_vm4, %v2383_v20, %v2419_v30  ;;  %v2359_v17 = vmax.f32 %v5000_v47, %v2341_v8 }
 0x24e   : > { %2527 = vst.msk [vmem:[%s4813_s30] sm:$0xf] %vm2526_vm3, %v3101_v37  ;;  %v3102_v0 = vpack.c.bf16 %v2437_v59, %v2437_v59  ;;  %v2342_v36 = vmax.f32 %v4754_v29, %v2262_v50  ;;  %v5002_v37 = vmax.f32 %v4597_v53, %v4692_v2 }
 0x24f   : > { %v2384_v38 = vadd.f32 %v4797_v11, %v2359_v17  ;;  %v3408_v12 = vpop.f32.mrb[128].mxu1 }
 0x250   : > { %2528 = vst.msk [vmem:[%s4813_s30 + $0x4] sm:$0xf] %vm2526_vm3, %v3102_v0  ;;  %v2360_v10 = vmax.f32 %v5001_v32, %v2342_v36  ;;  %v2266_v41 = vpop.f32.mrb[116].mxu0  ;;  %v3409_v20 = vpop.f32.mrb[129].mxu1 }
 0x251   : > { %vm2402_vm5 = vcmp.ge.f32.partialorder %v2384_v38, 0.0  ;;  %v2420_v1 = vmul.f32 0.01, %v2384_v38  ;;  %v2267_v26 = vadd.f32 %v4782_v42, %v2266_v41  ;;  %v3577_v48 = vpop.f32.mrb[117].mxu0  ;;  %v4831_v21 = vadd.f32 %v3409_v20, %v3408_v12  ;;  %v3411_v29 = vpop.f32.mrb[130].mxu1 }
 0x252   : > { %v2385_v35 = vadd.f32 %v4797_v11, %v2360_v10  ;;  %v2269_v24 = vpop.f32.mrb[118].mxu0  ;;  %v3412_v7 = vpop.f32.mrb[131].mxu1 }
 0x253   : > { %v2438_v40 = vsel %vm2402_vm5, %v2384_v38, %v2420_v1  ;;  %v2343_v30 = vmax.f32 %v4756_v39, %v2267_v26  ;;  %v2270_v28 = vadd.f32 %v4786_v61, %v2269_v24  ;;  %v3578_v57 = vpop.f32.mrb[119].mxu0  ;;  %v4836_v8 = vadd.f32 %v3412_v7, %v3411_v29 }
 0x254   : > { %v3103_v14 = vpack.c.bf16 %v2438_v40, %v2438_v40  ;;  %vm2403_vm6 = vcmp.ge.f32.partialorder %v2385_v35, 0.0  ;;  %v2421_v42 = vmul.f32 0.01, %v2385_v35  ;;  %v5003_v61 = vmax.f32 %v4600_v55, %v4696_v9 }
 0x255   : > { %v2361_v50 = vmax.f32 %v5002_v37, %v2343_v30  ;;  %v2344_v59 = vmax.f32 %v4758_v4, %v2270_v28  ;;  %v5004_v7 = vmax.f32 %v4612_v3, %v4700_v16 }
 0x256   : > { %2529 = vst.msk [vmem:[%s4813_s30 + $0x8] sm:$0xf] %vm2526_vm3, %v3103_v14  ;;  %v2439_v47 = vsel %vm2403_vm6, %v2385_v35, %v2421_v42 }
 0x257   : > { %v3104_v17 = vpack.c.bf16 %v2439_v47, %v2439_v47  ;;  %v2386_v39 = vadd.f32 %v4797_v11, %v2361_v50  ;;  %v2362_v0 = vmax.f32 %v5003_v61, %v2344_v59  ;;  %v3414_v36 = vpop.f32.mrb[132].mxu1 }
 0x258   : > { %v2274_v38 = vpop.f32.mrb[120].mxu0  ;;  %v3415_v12 = vpop.f32.mrb[133].mxu1 }
 0x259   : > { %2530 = vst.msk [vmem:[%s4813_s30 + $0xc] sm:$0xf] %vm2526_vm3, %v3104_v17  ;;  %vm2404_vm7 = vcmp.ge.f32.partialorder %v2386_v39, 0.0  ;;  %v2422_v53 = vmul.f32 0.01, %v2386_v39  ;;  %v2387_v2 = vadd.f32 %v4797_v11, %v2362_v0  ;;  %v2275_v4 = vadd.f32 %v4789_v46, %v2274_v38  ;;  %v3581_v32 = vpop.f32.mrb[121].mxu0 }
 0x25a   : > { %v3417_v10 = vpop.f32.mrb[134].mxu1  ;;  %v2277_v41 = vpop.f32.mrb[122].mxu0  ;;  %v4852_v20 = vadd.f32 %v3415_v12, %v3414_v36  ;;  %v5006_v12 = vmax.f32 %v4628_v23, %v4708_v31 }
 0x25b   : > { %v3418_v1 = vpop.f32.mrb[135].mxu1  ;;  %v2440_v55 = vsel %vm2404_vm7, %v2386_v39, %v2422_v53  ;;  %vm2405_vm8 = vcmp.ge.f32.partialorder %v2387_v2, 0.0  ;;  %v2423_v9 = vmul.f32 0.01, %v2387_v2  ;;  %v2345_v26 = vmax.f32 %v4760_v62, %v2275_v4  ;;  %v3582_v48 = vpop.f32.mrb[123].mxu0 }
 0x25c   : > { %v3105_v29 = vpack.c.bf16 %v2440_v55, %v2440_v55  ;;  %v2278_v35 = vadd.f32 %v4792_v60, %v2277_v41  ;;  %v4856_v24 = vadd.f32 %v3418_v1, %v3417_v10  ;;  %v5005_v62 = vmax.f32 %v4616_v5, %v4704_v45 }
 0x25d   : > { %v2441_v46 = vsel %vm2405_vm8, %v2387_v2, %v2423_v9  ;;  %v2363_v40 = vmax.f32 %v5004_v7, %v2345_v26 }
 0x25e   : > { %2531 = vst.msk [vmem:[%s4813_s30 + $0x10] sm:$0xf] %vm2526_vm3, %v3105_v29  ;;  %v3106_v30 = vpack.c.bf16 %v2441_v46, %v2441_v46  ;;  %v2346_v28 = vmax.f32 %v4762_v54, %v2278_v35 }
 0x25f   : > { %v2388_v57 = vadd.f32 %v4797_v11, %v2363_v40  ;;  %v3420_v14 = vpop.f32.mrb[136].mxu1 }
 0x260   : > { %2532 = vst.msk [vmem:[%s4813_s30 + $0x14] sm:$0xf] %vm2526_vm3, %v3106_v30  ;;  %v2364_v60 = vmax.f32 %v5005_v62, %v2346_v28  ;;  %v2282_v42 = vpop.f32.mrb[124].mxu0  ;;  %v3421_v37 = vpop.f32.mrb[137].mxu1 }
 0x261   : > { %vm2406_vm9 = vcmp.ge.f32.partialorder %v2388_v57, 0.0  ;;  %v2424_v50 = vmul.f32 0.01, %v2388_v57  ;;  %v2283_v3 = vadd.f32 %v4808_v43, %v2282_v42  ;;  %v3585_v16 = vpop.f32.mrb[125].mxu0  ;;  %v4871_v59 = vadd.f32 %v3421_v37, %v3420_v14  ;;  %v3423_v54 = vpop.f32.mrb[138].mxu1 }
 0x262   : > { %v2389_v47 = vadd.f32 %v4797_v11, %v2364_v60  ;;  %v2285_v17 = vpop.f32.mrb[126].mxu0  ;;  %v3424_v39 = vpop.f32.mrb[139].mxu1 }
 0x263   : > { %v2442_v61 = vsel %vm2406_vm9, %v2388_v57, %v2424_v50  ;;  %v2347_v0 = vmax.f32 %v4764_v34, %v2283_v3  ;;  %v2286_v5 = vadd.f32 %v4816_v25, %v2285_v17  ;;  %v3586_v45 = vpop.f32.mrb[127].mxu0  ;;  %v4876_v36 = vadd.f32 %v3424_v39, %v3423_v54 }
 0x264   : > { %v3107_v38 = vpack.c.bf16 %v2442_v61, %v2442_v61  ;;  %vm2407_vm10 = vcmp.ge.f32.partialorder %v2389_v47, 0.0  ;;  %v2425_v43 = vmul.f32 0.01, %v2389_v47  ;;  %v5007_v25 = vmax.f32 %v4632_v33, %v4712_v49 }
 0x265   : > { %v2365_v53 = vmax.f32 %v5006_v12, %v2347_v0  ;;  %v2348_v2 = vmax.f32 %v4766_v13, %v2286_v5 }
 0x266   : > { %2533 = vst.msk [vmem:[%s4813_s30 + $0x18] sm:$0xf] %vm2526_vm3, %v3107_v38  ;;  %v2443_v4 = vsel %vm2407_vm10, %v2389_v47, %v2425_v43  ;;  %v5010_v43 = vmax.f32 %v4672_v6, %v4740_v63 }
 0x267   : > { %v3108_v32 = vpack.c.bf16 %v2443_v4, %v2443_v4  ;;  %v2390_v34 = vadd.f32 %v4797_v11, %v2365_v53  ;;  %v2366_v10 = vmax.f32 %v5007_v25, %v2348_v2  ;;  %v3426_v41 = vpop.f32.mrb[140].mxu1  ;;  %v5011_v53 = vld [vmem:[#allocation3_spill] sm:$0xff]  ;;  %v5012_v2 = vld [vmem:[#allocation8_spill] sm:$0xff] }
 0x268   : > { %v2290_v1 = vpop.f32.mrb[128].mxu0  ;;  %v3427_v55 = vpop.f32.mrb[141].mxu1 }
 0x269   : > { %2534 = vst.msk [vmem:[%s4813_s30 + $0x1c] sm:$0xf] %vm2526_vm3, %v3108_v32  ;;  %vm2408_vm11 = vcmp.ge.f32.partialorder %v2390_v34, 0.0  ;;  %v2426_v23 = vmul.f32 0.01, %v2390_v34  ;;  %v2391_v31 = vadd.f32 %v4797_v11, %v2366_v10  ;;  %v2291_v13 = vadd.f32 %v4831_v21, %v2290_v1  ;;  %v3589_v9 = vpop.f32.mrb[129].mxu0 }
 0x26a   : > { %v3429_v26 = vpop.f32.mrb[142].mxu1  ;;  %v2293_v48 = vpop.f32.mrb[130].mxu0  ;;  %v3428_v29 = vadd.f32 %v3427_v55, %v3426_v41  ;;  %v5008_v21 = vmax.f32 %v4641_v19, %v4716_v58  ;;  %v5014_v41 = vld [vmem:[#allocation7_spill] sm:$0xff]  ;;  %v5015_v1 = vld [vmem:[#allocation12_spill] sm:$0xff] }
 0x26b   : > { %v3430_v35 = vpop.f32.mrb[143].mxu1  ;;  %v2444_v33 = vsel %vm2408_vm11, %v2390_v34, %v2426_v23  ;;  %vm2409_vm12 = vcmp.ge.f32.partialorder %v2391_v31, 0.0  ;;  %v2427_v49 = vmul.f32 0.01, %v2391_v31  ;;  %v2349_v46 = vmax.f32 %v4768_v52, %v2291_v13  ;;  %v3590_v7 = vpop.f32.mrb[131].mxu0  ;;  %v5017_v55 = vld [vmem:[#allocation4_spill] sm:$0xff] }
 0x26c   : > { %v3109_v40 = vpack.c.bf16 %v2444_v33, %v2444_v33  ;;  %v2294_v30 = vadd.f32 %v4836_v8, %v2293_v48  ;;  %v3431_v28 = vadd.f32 %v3430_v35, %v3429_v26  ;;  %v5009_v52 = vmax.f32 %v4647_v27, %v4720_v18  ;;  %v5018_v23 = vld [vmem:[#allocation9_spill] sm:$0xff] }
 0x26d   : > { %v2445_v57 = vsel %vm2409_vm12, %v2391_v31, %v2427_v49  ;;  %v2367_v14 = vmax.f32 %v5008_v21, %v2349_v46  ;;  %v5016_v6 = vmax.f32 %v5014_v41, %v5015_v1  ;;  %v5019_v31 = vmax.f32 %v5017_v55, %v5018_v23  ;;  %v5020_v21 = vld [vmem:[#allocation13_spill] sm:$0xff] }
 0x26e   : > { %2535 = vst.msk [vmem:[%s4813_s30 + $0x20] sm:$0xf] %vm2526_vm3, %v3109_v40  ;;  %v3110_v62 = vpack.c.bf16 %v2445_v57, %v2445_v57  ;;  %v2350_v60 = vmax.f32 %v4770_v22, %v2294_v30 }
 0x26f   : > { %v2392_v42 = vadd.f32 %v4797_v11, %v2367_v14  ;;  %v2314_v37 = vpop.f32.mrb[144].mxu1 }
 0x270   : > { %2536 = vst.msk [vmem:[%s4813_s30 + $0x24] sm:$0xf] %vm2526_vm3, %v3110_v62  ;;  %v2368_v8 = vmax.f32 %v5009_v52, %v2350_v60  ;;  %v2315_v50 = vadd.f32 %v3428_v29, %v2314_v37  ;;  %v2298_v3 = vpop.f32.mrb[132].mxu0  ;;  %v3601_v16 = vpop.f32.mrb[145].mxu1  ;;  %v5021_v37 = vld [vmem:[#allocation5_spill] sm:$0xff]  ;;  %v5022_v52 = vld [vmem:[#allocation10_spill] sm:$0xff] }
 0x271   : > { %vm2410_vm13 = vcmp.ge.f32.partialorder %v2392_v42, 0.0  ;;  %v2428_v19 = vmul.f32 0.01, %v2392_v42  ;;  %v2299_v58 = vadd.f32 %v4852_v20, %v2298_v3  ;;  %v3593_v54 = vpop.f32.mrb[133].mxu0  ;;  %v2317_v47 = vpop.f32.mrb[146].mxu1  ;;  %v5024_v16 = vld [vmem:[#allocation14_spill] sm:$0xff] }
 0x272   : > { %v2393_v22 = vadd.f32 %v4797_v11, %v2368_v8  ;;  %v2355_v17 = vmax.f32 %v4780_v56, %v2315_v50  ;;  %v2318_v39 = vadd.f32 %v3431_v28, %v2317_v47  ;;  %v2301_v61 = vpop.f32.mrb[134].mxu0  ;;  %v3602_v0 = vpop.f32.mrb[147].mxu1  ;;  %v5013_v56 = vmax.f32 %v5011_v53, %v5012_v2  ;;  %v5026_v54 = vld [vmem:[#allocation11_spill] sm:$0xff] }
 0x273   : > { %v2446_v5 = vsel %vm2410_vm13, %v2392_v42, %v2428_v19  ;;  %v2351_v27 = vmax.f32 %v4772_v15, %v2299_v58  ;;  %v2302_v18 = vadd.f32 %v4856_v24, %v2301_v61  ;;  %v3594_v45 = vpop.f32.mrb[135].mxu0  ;;  %v5023_v8 = vmax.f32 %v5021_v37, %v5022_v52 }
 0x274   : > { %v3111_v38 = vpack.c.bf16 %v2446_v5, %v2446_v5  ;;  %vm2411_vm14 = vcmp.ge.f32.partialorder %v2393_v22, 0.0  ;;  %v2429_v20 = vmul.f32 0.01, %v2393_v22  ;;  %v2373_v12 = vmax.f32 %v5010_v43, %v2355_v17 }
 0x275   : > { %v2369_v4 = vmax.f32 %v5013_v56, %v2351_v27  ;;  %v2356_v32 = vmax.f32 %v4784_v51, %v2318_v39  ;;  %v2352_v34 = vmax.f32 %v4774_v44, %v2302_v18 }
 0x276   : > { %2537 = vst.msk [vmem:[%s4813_s30 + $0x28] sm:$0xf] %vm2526_vm3, %v3111_v38  ;;  %v2447_v15 = vsel %vm2411_vm14, %v2393_v22, %v2429_v20  ;;  %v2398_v24 = vadd.f32 %v4797_v11, %v2373_v12 }
 0x277   : > { %v3112_v25 = vpack.c.bf16 %v2447_v15, %v2447_v15  ;;  %v2394_v10 = vadd.f32 %v4797_v11, %v2369_v4  ;;  %v2374_v63 = vmax.f32 %v5016_v6, %v2356_v32  ;;  %v2370_v13 = vmax.f32 %v5019_v31, %v2352_v34 }
 0x278   : > { %vm2416_vm15 = vcmp.ge.f32.partialorder %v2398_v24, 0.0  ;;  %v2434_v51 = vmul.f32 0.01, %v2398_v24  ;;  %v2306_v9 = vpop.f32.mrb[136].mxu0 }
 0x279   : > { %2538 = vst.msk [vmem:[%s4813_s30 + $0x2c] sm:$0xf] %vm2526_vm3, %v3112_v25  ;;  %vm2412_vm0 = vcmp.ge.f32.partialorder %v2394_v10, 0.0  ;;  %v2430_v44 = vmul.f32 0.01, %v2394_v10  ;;  %v2399_v26 = vadd.f32 %v4797_v11, %v2374_v63  ;;  %v2395_v48 = vadd.f32 %v4797_v11, %v2370_v13  ;;  %v3597_v29 = vpop.f32.mrb[137].mxu0 }
 0x27a   : > { %v2452_v35 = vsel %vm2416_vm15, %v2398_v24, %v2434_v51  ;;  %v2307_v33 = vadd.f32 %v4871_v59, %v2306_v9  ;;  %v2309_v49 = vpop.f32.mrb[138].mxu0 }
 0x27b   : > { %v3117_v46 = vpack.c.bf16 %v2452_v35, %v2452_v35  ;;  %v2448_v7 = vsel %vm2412_vm0, %v2394_v10, %v2430_v44  ;;  %vm2417_vm1 = vcmp.ge.f32.partialorder %v2399_v26, 0.0  ;;  %v2435_v40 = vmul.f32 0.01, %v2399_v26  ;;  %v3598_v30 = vpop.f32.mrb[139].mxu0 }
 0x27c   : > { %v3113_v28 = vpack.c.bf16 %v2448_v7, %v2448_v7  ;;  %vm2413_vm2 = vcmp.ge.f32.partialorder %v2395_v48, 0.0  ;;  %v2431_v57 = vmul.f32 0.01, %v2395_v48  ;;  %v2353_v14 = vmax.f32 %v5020_v21, %v2307_v33 }
 0x27d   : > { %2543 = vst.msk [vmem:[%s4813_s30 + $0x40] sm:$0xf] %vm2526_vm3, %v3117_v46  ;;  %v2453_v62 = vsel %vm2417_vm1, %v2399_v26, %v2435_v40  ;;  %v2310_v60 = vadd.f32 %v4876_v36, %v2309_v49  ;;  %v5025_v36 = vld [vmem:[#allocation6_spill] sm:$0xff] }
 0x27e   : > { %2539 = vst.msk [vmem:[%s4813_s30 + $0x30] sm:$0xf] %vm2526_vm3, %v3113_v28  ;;  %v3118_v59 = vpack.c.bf16 %v2453_v62, %v2453_v62  ;;  %v2449_v42 = vsel %vm2413_vm2, %v2395_v48, %v2431_v57  ;;  %v2371_v50 = vmax.f32 %v5023_v8, %v2353_v14  ;;  %v5027_v47 = vmax.f32 %v5025_v36, %v5026_v54 }
 0x27f   : > { %v3114_v3 = vpack.c.bf16 %v2449_v42, %v2449_v42  ;;  %v2354_v19 = vmax.f32 %v5024_v16, %v2310_v60 }
 0x280   : > { %2544 = vst.msk [vmem:[%s4813_s30 + $0x44] sm:$0xf] %vm2526_vm3, %v3118_v59  ;;  %v2396_v58 = vadd.f32 %v4797_v11, %v2371_v50 }
 0x281   : > { %2540 = vst.msk [vmem:[%s4813_s30 + $0x34] sm:$0xf] %vm2526_vm3, %v3114_v3  ;;  %v2372_v22 = vmax.f32 %v5027_v47, %v2354_v19 }
 0x282   : > { %vm2414_vm4 = vcmp.ge.f32.partialorder %v2396_v58, 0.0  ;;  %v2432_v17 = vmul.f32 0.01, %v2396_v58 }
 0x283   : > { %v2397_v39 = vadd.f32 %v4797_v11, %v2372_v22 }
 0x284   : > { %v2450_v61 = vsel %vm2414_vm4, %v2396_v58, %v2432_v17 }
 0x285   : > { %v3115_v0 = vpack.c.bf16 %v2450_v61, %v2450_v61  ;;  %vm2415_vm5 = vcmp.ge.f32.partialorder %v2397_v39, 0.0  ;;  %v2433_v5 = vmul.f32 0.01, %v2397_v39 }
 0x287   : > { %2541 = vst.msk [vmem:[%s4813_s30 + $0x38] sm:$0xf] %vm2526_vm3, %v3115_v0  ;;  %v2451_v27 = vsel %vm2415_vm5, %v2397_v39, %v2433_v5 }
 0x288   : > { %v3116_v18 = vpack.c.bf16 %v2451_v27, %v2451_v27 }
 0x28a   : > { %2542 = vst.msk [vmem:[%s4813_s30 + $0x3c] sm:$0xf] %vm2526_vm3, %v3116_v18 }
 0x28b PF: > { %s13_s16 = sadd.s32 1, %s3853_s16   ;;  %s5028_s12 = smov %s3841_s13 }
 0x28c   : > { %p10_p10 = scmp.ge.s32.totalorder %s13_s16, 4   ;;  %s5029_s13 = smov %s3912_s20 }
 0x28d   : > { %s5030_s14 = smov %s3849_s15  ;;  %s5031_s15 = smov %s5033_s17 }
 0x28e   :  { %12 = sbr.rel (!%p10_p10) target bundleno = 3 (0x3), region = 108 }

// kernel: variant2_forward.7
= control target key start
LH: loop header
LB: loop body
LE: loop exit
PB: predicated region body
PF: predicated region fallthrough
CT: control target
= control target key end

     0   :  { %v2985_v34 = vmov 0.0   ;;  %vm2986_vm0 = vmmov 0   ;;  %vm458_vm1 = vcmask 523264   ;;  %s3922_s1 = inlined_call_operand.vmem [shape: bf16[576,128], index: 1, kind: input, shape index: {}]   ;;  %s3923_s0 = inlined_call_operand.vmem [shape: bf16[4,80,576], index: 0, kind: input, shape index: {}]   ;;  %s3924_s2 = inlined_call_operand.vmem [shape: f32[1,128], index: 2, kind: input, shape index: {}]   ;;  %s3925_s3 = inlined_call_operand.vmem [shape: bf16[80,128], index: 3, kind: output, shape index: {}]  }
   0x1   :  { %v3010_v0 = vld [vmem:[%s3922_s1 + $0x40] sm:$0xff]   ;;  %v3033_v4 = vld [vmem:[%s3922_s1 + $0x48] sm:$0xff]   ;;  %v3057_v8 = vld [vmem:[%s3922_s1 + $0x50] sm:$0xff]  }
   0x2   :  { %v3015_v1 = vld [vmem:[%s3922_s1 + $0xc0] sm:$0xff]   ;;  %2290 = vmatprep.subr.bf16.mxu0 %v3010_v0  ;;  %v3039_v5 = vld [vmem:[%s3922_s1 + $0xc8] sm:$0xff]   ;;  %v3063_v9 = vld [vmem:[%s3922_s1 + $0xd0] sm:$0xff]  }
   0x3   :  { %v3021_v2 = vld [vmem:[%s3922_s1] sm:$0xff]   ;;  %2336 = vmatprep.subr.bf16.mxu1 %v3015_v1  ;;  %v3045_v6 = vld [vmem:[%s3922_s1 + $0x8] sm:$0xff]   ;;  %v3069_v10 = vld [vmem:[%s3922_s1 + $0x10] sm:$0xff]  }
   0x4   :  { %v3027_v3 = vld [vmem:[%s3922_s1 + $0x80] sm:$0xff]   ;;  %2291 = vmatpush3.bf16.msra.mxu0 %v3021_v2  ;;  %v3051_v7 = vld [vmem:[%s3922_s1 + $0x88] sm:$0xff]   ;;  %v3075_v11 = vld [vmem:[%s3922_s1 + $0x90] sm:$0xff]  }
   0x5   :  { %2337 = vmatpush3.bf16.msra.mxu1 %v3027_v3  ;;  %2292 = vmatprep.subr.bf16.mxu0 %v3033_v4  ;;  %v3081_v12 = vld [vmem:[%s3922_s1 + $0x58] sm:$0xff]   ;;  %v3105_v16 = vld [vmem:[%s3922_s1 + $0x60] sm:$0xff]   ;;  %v3129_v20 = vld [vmem:[%s3922_s1 + $0x68] sm:$0xff]  }
   0x6   :  { %2338 = vmatprep.subr.bf16.mxu1 %v3039_v5  ;;  %v3087_v13 = vld [vmem:[%s3922_s1 + $0xd8] sm:$0xff]   ;;  %v3111_v17 = vld [vmem:[%s3922_s1 + $0xe0] sm:$0xff]   ;;  %v3135_v21 = vld [vmem:[%s3922_s1 + $0xe8] sm:$0xff]  }
   0x7   :  { %v3093_v14 = vld [vmem:[%s3922_s1 + $0x18] sm:$0xff]   ;;  %v3117_v18 = vld [vmem:[%s3922_s1 + $0x20] sm:$0xff]   ;;  %v3141_v22 = vld [vmem:[%s3922_s1 + $0x28] sm:$0xff]  }
   0x8   :  { %2293 = vmatpush3.bf16.msra.mxu0 %v3045_v6  ;;  %v3099_v15 = vld [vmem:[%s3922_s1 + $0x98] sm:$0xff]   ;;  %v3123_v19 = vld [vmem:[%s3922_s1 + $0xa0] sm:$0xff]   ;;  %v3147_v23 = vld [vmem:[%s3922_s1 + $0xa8] sm:$0xff]  }
   0x9   :  { %2339 = vmatpush3.bf16.msra.mxu1 %v3051_v7  ;;  %2294 = vmatprep.subr.bf16.mxu0 %v3057_v8  ;;  %v3153_v24 = vld [vmem:[%s3922_s1 + $0x70] sm:$0xff]   ;;  %v3177_v28 = vld [vmem:[%s3922_s1 + $0x78] sm:$0xff]   ;;  %v2845_v36 = vld [vmem:[%s3923_s0 + $0xc] ss:$20 sps:$4 sm:$0xff]  }
   0xa   :  { %2340 = vmatprep.subr.bf16.mxu1 %v3063_v9  ;;  %v3159_v25 = vld [vmem:[%s3922_s1 + $0xf0] sm:$0xff]   ;;  %v3183_v29 = vld [vmem:[%s3922_s1 + $0xf8] sm:$0xff]   ;;  %v3216_v37 = vld [vmem:[%s3922_s1 + $0x100] sm:$0xff]   ;;  %579 = vmatprep.mubr.bf16.mxu1 %v2845_v36 }
   0xb   :  { %v3165_v26 = vld [vmem:[%s3922_s1 + $0x30] sm:$0xff]   ;;  %v3189_v30 = vld [vmem:[%s3922_s1 + $0x38] sm:$0xff]   ;;  %v2847_v38 = vld [vmem:[%s3923_s0 + $0x2c] ss:$20 sps:$4 sm:$0xff]  }
   0xc   :  { %2295 = vmatpush3.bf16.msra.mxu0 %v3069_v10  ;;  %v3171_v27 = vld [vmem:[%s3922_s1 + $0xb0] sm:$0xff]   ;;  %v3195_v31 = vld [vmem:[%s3922_s1 + $0xb8] sm:$0xff]   ;;  %v3230_v40 = vld [vmem:[%s3922_s1 + $0x108] sm:$0xff]  }
   0xd   :  { %2341 = vmatpush3.bf16.msra.mxu1 %v3075_v11  ;;  %2296 = vmatprep.subr.bf16.mxu0 %v3081_v12  ;;  %v2840_v32 = vld [vmem:[%s3923_s0] ss:$20 sps:$4 sm:$0xff]   ;;  %v2842_v33 = vld [vmem:[%s3923_s0 + $0x4] ss:$20 sps:$4 sm:$0xff]   ;;  %v2843_v35 = vld [vmem:[%s3923_s0 + $0x8] ss:$20 sps:$4 sm:$0xff]  }
   0xe   :  { %2342 = vmatprep.subr.bf16.mxu1 %v3087_v13  ;;  %506 = vmatprep.mubr.bf16.mxu0 %v2842_v33  ;;  %v2849_v39 = vld [vmem:[%s3923_s0 + $0x34] ss:$20 sps:$4 sm:$0xff]   ;;  %v2852_v42 = vld [vmem:[%s3923_s0 + $0x30] ss:$20 sps:$4 sm:$0xff]   ;;  %v2859_v47 = vld [vmem:[%s3923_s0 + $0x58] ss:$20 sps:$4 sm:$0xff]  }
   0xf   :  { %v2851_v41 = vld [vmem:[%s3923_s0 + $0x28] ss:$20 sps:$4 sm:$0xff]   ;;  %v3252_v45 = vld [vmem:[%s3922_s1 + $0x110] sm:$0xff]   ;;  %v2863_v50 = vld [vmem:[%s3923_s0 + $0x84] ss:$20 sps:$4 sm:$0xff]  }
  0x10   :  { %2297 = vmatpush3.bf16.msra.mxu0 %v3093_v14  ;;  %v2854_v43 = vld [vmem:[%s3923_s0 + $0x54] ss:$20 sps:$4 sm:$0xff]   ;;  %v2856_v44 = vld [vmem:[%s3923_s0 + $0x5c] ss:$20 sps:$4 sm:$0xff]   ;;  %v2865_v51 = vld [vmem:[%s3923_s0 + $0x78] ss:$20 sps:$4 sm:$0xff]  }
  0x11   :  { %2343 = vmatpush3.bf16.msra.mxu1 %v3099_v15  ;;  %2298 = vmatprep.subr.bf16.mxu0 %v3105_v16  ;;  %v2858_v46 = vld [vmem:[%s3923_s0 + $0x50] ss:$20 sps:$4 sm:$0xff]   ;;  %v3267_v48 = vld [vmem:[%s3922_s1 + $0x118] sm:$0xff]   ;;  %v2866_v52 = vld [vmem:[%s3923_s0 + $0x80] ss:$20 sps:$4 sm:$0xff]  }
  0x12   :  { %2344 = vmatprep.subr.bf16.mxu1 %v3111_v17  ;;  %v2861_v49 = vld [vmem:[%s3923_s0 + $0x7c] ss:$20 sps:$4 sm:$0xff]   ;;  %v2867_v53 = vld [vmem:[%s3923_s0 + $0xa4] ss:$20 sps:$4 sm:$0xff]   ;;  %v2869_v54 = vld [vmem:[%s3923_s0 + $0xac] ss:$20 sps:$4 sm:$0xff]  }
  0x13   :  { %v2872_v55 = vld [vmem:[%s3923_s0 + $0xa0] ss:$20 sps:$4 sm:$0xff]   ;;  %v2873_v56 = vld [vmem:[%s3923_s0 + $0xa8] ss:$20 sps:$4 sm:$0xff]   ;;  %v2877_v58 = vld [vmem:[%s3923_s0 + $0x10] ss:$20 sps:$4 sm:$0xff]  }
  0x14   :  { %2299 = vmatpush3.bf16.msra.mxu0 %v3117_v18  ;;  %v2876_v57 = vld [vmem:[%s3923_s0 + $0xcc] ss:$20 sps:$4 sm:$0xff]   ;;  %v2874_v59 = vld [vmem:[%s3923_s0 + $0xc8] ss:$20 sps:$4 sm:$0xff]   ;;  %v2881_v62 = vld [vmem:[%s3923_s0 + $0xf0] ss:$20 sps:$4 sm:$0xff]  }
  0x15   :  { %2345 = vmatpush3.bf16.msra.mxu1 %v3123_v19  ;;  %2300 = vmatprep.subr.bf16.mxu0 %v3129_v20  ;;  %v2878_v60 = vld [vmem:[%s3923_s0 + $0xf4] ss:$20 sps:$4 sm:$0xff]   ;;  %v2880_v61 = vld [vmem:[%s3923_s0 + $0x38] ss:$20 sps:$4 sm:$0xff]   ;;  %v2882_v63 = vld [vmem:[%s3923_s0 + $0x11c] ss:$20 sps:$4 sm:$0xff]  }
  0x16   :  { %2346 = vmatprep.subr.bf16.mxu1 %v3135_v21  ;;  %v2885_v33 = vld [vmem:[%s3923_s0 + $0x118] ss:$20 sps:$4 sm:$0xff]   ;;  %v2888_v36 = vld [vmem:[%s3923_s0 + $0x88] ss:$20 sps:$4 sm:$0xff]  }
  0x18   :  { %2301 = vmatpush3.bf16.msra.mxu0 %v3141_v22 }
  0x19   :  { %2347 = vmatpush3.bf16.msra.mxu1 %v3147_v23  ;;  %2302 = vmatprep.subr.bf16.mxu0 %v3153_v24 }
  0x1a   :  { %2348 = vmatprep.subr.bf16.mxu1 %v3159_v25 }
  0x1c   :  { %2303 = vmatpush3.bf16.msra.mxu0 %v3165_v26 }
  0x1d   :  { %2349 = vmatpush3.bf16.msra.mxu1 %v3171_v27  ;;  %2304 = vmatprep.subr.bf16.mxu0 %v3177_v28 }
  0x1e   :  { %2350 = vmatprep.subr.bf16.mxu1 %v3183_v29 }
  0x20   :  { %2305 = vmatpush3.bf16.msra.mxu0 %v3189_v30 }
  0x21   :  { %2351 = vmatpush3.bf16.msra.mxu1 %v3195_v31  ;;  %2694 = vmatprep.subr.bf16.mxu0 %v2985_v34 }
  0x22   :  { %2391 = vmatprep.subr.bf16.mxu1 %v3010_v0 }
  0x23   :  { %507 = vmatmul.mubr.bf16.vlgmr.msra.gmra.mrb[0].mxu0 %v2840_v32  ;;  %v2884_v32 = vld [vmem:[%s3923_s0 + $0x60] ss:$20 sps:$4 sm:$0xff]  }
  0x24   :  { %580 = vmatmul.mubr.bf16.vlgmr.msra.gmra.mrb[0].mxu1 %v2843_v35  ;;  %2695 = vmatpush3.bf16.msra.mxu0 %v3216_v37  ;;  %v2886_v35 = vld [vmem:[%s3923_s0 + $0x144] ss:$20 sps:$4 sm:$0xff]  }
  0x25   :  { %2392 = vmatpush3.bf16.msra.mxu1 %v3021_v2  ;;  %514 = vmatprep.mubr.bf16.mxu0 %v2847_v38  ;;  %v2889_v38 = vld [vmem:[%s3923_s0 + $0x140] ss:$20 sps:$4 sm:$0xff]  }
  0x26   :  { %587 = vmatprep.mubr.bf16.mxu1 %v2849_v39  ;;  %2696 = vmatprep.subr.bf16.mxu0 %v2985_v34  ;;  %v2890_v39 = vld [vmem:[%s3923_s0 + $0x16c] ss:$20 sps:$4 sm:$0xff]  }
  0x27   :  { %2393 = vmatprep.subr.bf16.mxu1 %v3033_v4 }
  0x28   :  { %2697 = vmatpush3.bf16.msra.mxu0 %v3230_v40 }
  0x29   :  { %2394 = vmatpush3.bf16.msra.mxu1 %v3045_v6  ;;  %2698 = vmatprep.subr.bf16.mxu0 %v2985_v34 }
  0x2a   :  { %2395 = vmatprep.subr.bf16.mxu1 %v3057_v8 }
  0x2b   :  { %515 = vmatmul.mubr.bf16.gmra.mrb[4].mxu0 %v2851_v41  ;;  %v2892_v41 = vld [vmem:[%s3923_s0 + $0xb0] ss:$20 sps:$4 sm:$0xff]  }
  0x2c   :  { %588 = vmatmul.mubr.bf16.gmra.mrb[4].mxu1 %v2852_v42  ;;  %522 = vmatprep.mubr.bf16.mxu0 %v2854_v43  ;;  %v2893_v42 = vld [vmem:[%s3923_s0 + $0x168] ss:$20 sps:$4 sm:$0xff]  }
  0x2d   :  { %595 = vmatprep.mubr.bf16.mxu1 %v2856_v44  ;;  %2396 = vmatpush3.bf16.msra.mxu1 %v3069_v10  ;;  %v2896_v43 = vld [vmem:[%s3923_s0 + $0xd4] ss:$20 sps:$4 sm:$0xff]   ;;  %v2894_v44 = vld [vmem:[%s3923_s0 + $0xd0] ss:$20 sps:$4 sm:$0xff]  }
  0x2e   :  { %2397 = vmatprep.subr.bf16.mxu1 %v3081_v12  ;;  %2699 = vmatpush3.bf16.msra.mxu0 %v3252_v45 }
  0x2f   :  { %2700 = vmatprep.subr.bf16.mxu0 %v2985_v34 }
  0x31   :  { %2398 = vmatpush3.bf16.msra.mxu1 %v3093_v14 }
  0x32   :  { %2399 = vmatprep.subr.bf16.mxu1 %v3105_v16  ;;  %2701 = vmatpush3.bf16.msra.mxu0 %v3267_v48 }
  0x33   :  { %523 = vmatmul.mubr.bf16.gmra.mrb[8].mxu0 %v2858_v46  ;;  %2437 = vmatprep.subr.bf16.mxu0 %v3015_v1  ;;  %v2897_v46 = vld [vmem:[%s3923_s0 + $0xd8] ss:$20 sps:$4 sm:$0xff]  }
  0x34   :  { %596 = vmatmul.mubr.bf16.gmra.mrb[8].mxu1 %v2859_v47  ;;  %530 = vmatprep.mubr.bf16.mxu0 %v2861_v49  ;;  %v2898_v47 = vld [vmem:[%s3923_s0 + $0xfc] ss:$20 sps:$4 sm:$0xff]   ;;  %v2900_v49 = vld [vmem:[%s3923_s0 + $0xf8] ss:$20 sps:$4 sm:$0xff]  }
  0x35   :  { %603 = vmatprep.mubr.bf16.mxu1 %v2863_v50  ;;  %2400 = vmatpush3.bf16.msra.mxu1 %v3117_v18  ;;  %v2901_v50 = vld [vmem:[%s3923_s0 + $0x100] ss:$20 sps:$4 sm:$0xff]  }
  0x36   :  { %2401 = vmatprep.subr.bf16.mxu1 %v3129_v20 }
  0x39   :  { %2402 = vmatpush3.bf16.msra.mxu1 %v3141_v22 }
  0x3a   :  { %2403 = vmatprep.subr.bf16.mxu1 %v3153_v24 }
  0x3b   :  { %531 = vmatmul.mubr.bf16.gmra.mrb[12].mxu0 %v2865_v51  ;;  %v2904_v51 = vld [vmem:[%s3923_s0 + $0x120] ss:$20 sps:$4 sm:$0xff]  }
  0x3c   :  { %604 = vmatmul.mubr.bf16.gmra.mrb[12].mxu1 %v2866_v52  ;;  %538 = vmatprep.mubr.bf16.mxu0 %v2867_v53  ;;  %v2905_v52 = vld [vmem:[%s3923_s0 + $0x128] ss:$20 sps:$4 sm:$0xff]   ;;  %v2906_v53 = vld [vmem:[%s3923_s0 + $0x14c] ss:$20 sps:$4 sm:$0xff]  }
  0x3d   :  { %611 = vmatprep.mubr.bf16.mxu1 %v2869_v54  ;;  %2404 = vmatpush3.bf16.msra.mxu1 %v3165_v26  ;;  %v2908_v54 = vld [vmem:[%s3923_s0 + $0x148] ss:$20 sps:$4 sm:$0xff]  }
  0x3e   :  { %2405 = vmatprep.subr.bf16.mxu1 %v3177_v28 }
  0x41   :  { %2406 = vmatpush3.bf16.msra.mxu1 %v3189_v30 }
  0x42   :  { %2722 = vmatprep.subr.bf16.mxu1 %v2985_v34 }
  0x43   :  { %539 = vmatmul.mubr.bf16.gmra.mrb[16].mxu0 %v2872_v55  ;;  %v2909_v55 = vld [vmem:[%s3923_s0 + $0x150] ss:$20 sps:$4 sm:$0xff]  }
  0x44   :  { %612 = vmatmul.mubr.bf16.gmra.mrb[16].mxu1 %v2873_v56  ;;  %2702 = vmatprep.mubr.msk.bf16.mxu0 %vm2986_vm0, %v2985_v34  ;;  %v2910_v56 = vld [vmem:[%s3923_s0 + $0x174] ss:$20 sps:$4 sm:$0xff]  }
  0x45   :  { %896 = vmatprep.mubr.bf16.mxu1 %v2876_v57  ;;  %v2912_v57 = vld [vmem:[%s3923_s0 + $0x170] ss:$20 sps:$4 sm:$0xff]  }
  0x4b   :  { %2703 = vmatmul.mubr.msk.bf16.vlgmr.msra.gmra.mrb[20].mxu0 %vm458_vm1, %v2877_v58  ;;  %v2913_v58 = vld [vmem:[%s3923_s0 + $0x178] ss:$20 sps:$4 sm:$0xff]  }
  0x4c   :  { %897 = vmatmul.mubr.bf16.vlgmr.msra.gmra.mrb[20].mxu1 %v2874_v59  ;;  %2438 = vmatpush3.bf16.msra.mxu0 %v3027_v3  ;;  %v2916_v59 = vld [vmem:[%s3923_s0 + $0x194] ss:$20 sps:$4 sm:$0xff]  }
  0x4d   :  { %2439 = vmatprep.subr.bf16.mxu0 %v3039_v5  ;;  %2723 = vmatpush3.bf16.msra.mxu1 %v3216_v37 }
  0x4e   :  { %2706 = vmatprep.mubr.msk.bf16.mxu0 %vm2986_vm0, %v2985_v34  ;;  %904 = vmatprep.mubr.bf16.mxu1 %v2878_v60  ;;  %v2919_v60 = vld [vmem:[%s3923_s0 + $0x19c] ss:$20 sps:$4 sm:$0xff]  }
  0x4f   :  { %2724 = vmatprep.subr.bf16.mxu1 %v2985_v34 }
  0x50   :  { %2440 = vmatpush3.bf16.msra.mxu0 %v3051_v7 }
  0x51   :  { %2441 = vmatprep.subr.bf16.mxu0 %v3063_v9  ;;  %2725 = vmatpush3.bf16.msra.mxu1 %v3230_v40 }
  0x52   :  { %2726 = vmatprep.subr.bf16.mxu1 %v2985_v34 }
  0x53   :  { %2707 = vmatmul.mubr.msk.bf16.gmra.mrb[24].mxu0 %vm458_vm1, %v2880_v61  ;;  %v2914_v61 = vld [vmem:[%s3923_s0 + $0x190] ss:$20 sps:$4 sm:$0xff]  }
  0x54   :  { %905 = vmatmul.mubr.bf16.gmra.mrb[24].mxu1 %v2881_v62  ;;  %2442 = vmatpush3.bf16.msra.mxu0 %v3075_v11  ;;  %v2917_v62 = vld [vmem:[%s3923_s0 + $0x198] ss:$20 sps:$4 sm:$0xff]  }
  0x55   :  { %2710 = vmatprep.mubr.msk.bf16.mxu0 %vm2986_vm0, %v2985_v34  ;;  %912 = vmatprep.mubr.bf16.mxu1 %v2882_v63  ;;  %v2920_v63 = vld [vmem:[%s3923_s0 + $0x1bc] ss:$20 sps:$4 sm:$0xff]  }
  0x56   :  { %2443 = vmatprep.subr.bf16.mxu0 %v3087_v13  ;;  %2727 = vmatpush3.bf16.msra.mxu1 %v3252_v45 }
  0x57   :  { %2728 = vmatprep.subr.bf16.mxu1 %v2985_v34 }
  0x58   :  { %2444 = vmatpush3.bf16.msra.mxu0 %v3099_v15 }
  0x59   :  { %2445 = vmatprep.subr.bf16.mxu0 %v3111_v17 }
  0x5a   :  { %2729 = vmatpush3.bf16.msra.mxu1 %v3267_v48 }
  0x5b   :  { %2711 = vmatmul.mubr.msk.bf16.gmra.mrb[28].mxu0 %vm458_vm1, %v2884_v32  ;;  %2538 = vmatprep.subr.bf16.mxu1 %v3015_v1  ;;  %v2924_v32 = vld [vmem:[%s3923_s0 + $0x1b8] ss:$20 sps:$4 sm:$0xff]  }
  0x5c   :  { %913 = vmatmul.mubr.bf16.gmra.mrb[28].mxu1 %v2885_v33  ;;  %2446 = vmatpush3.bf16.msra.mxu0 %v3123_v19  ;;  %v2925_v33 = vld [vmem:[%s3923_s0 + $0x1c0] ss:$20 sps:$4 sm:$0xff]  }
  0x5d   :  { %2714 = vmatprep.mubr.msk.bf16.mxu0 %vm2986_vm0, %v2985_v34  ;;  %920 = vmatprep.mubr.bf16.mxu1 %v2886_v35  ;;  %v2928_v35 = vld [vmem:[%s3923_s0 + $0x1ec] ss:$20 sps:$4 sm:$0xff]  }
  0x5e   :  { %2447 = vmatprep.subr.bf16.mxu0 %v3135_v21 }
  0x60   :  { %2448 = vmatpush3.bf16.msra.mxu0 %v3147_v23 }
  0x61   :  { %2449 = vmatprep.subr.bf16.mxu0 %v3159_v25 }
  0x63   :  { %2715 = vmatmul.mubr.msk.bf16.gmra.mrb[32].mxu0 %vm458_vm1, %v2888_v36  ;;  %v2948_v36 = vld [vmem:[%s3923_s0 + $0x1c8] ss:$20 sps:$4 sm:$0xff]  }
  0x64   :  { %921 = vmatmul.mubr.bf16.gmra.mrb[32].mxu1 %v2889_v38  ;;  %2718 = vmatprep.mubr.msk.bf16.mxu0 %vm2986_vm0, %v2985_v34  ;;  %v2951_v38 = vld [vmem:[%s3923_s0 + $0x280] ss:$20 sps:$4 sm:$0xff]  }
  0x65   :  { %928 = vmatprep.mubr.bf16.mxu1 %v2890_v39  ;;  %2450 = vmatpush3.bf16.msra.mxu0 %v3171_v27 }
  0x66   :  { %2451 = vmatprep.subr.bf16.mxu0 %v3183_v29 }
  0x69   :  { %2452 = vmatpush3.bf16.msra.mxu0 %v3195_v31 }
  0x6a   :  { %2492 = vmatprep.subr.bf16.mxu0 %v3010_v0 }
  0x6b   :  { %2719 = vmatmul.mubr.msk.bf16.gmra.mrb[36].mxu0 %vm458_vm1, %v2892_v41  ;;  %v2974_v41 = vld [vmem:[%s3923_s0 + $0x2b0] ss:$20 sps:$4 sm:$0xff]  }
  0x6c   :  { %929 = vmatmul.mubr.bf16.gmra.mrb[36].mxu1 %v2893_v42  ;;  %969 = vmatprep.mubr.bf16.mxu0 %v2896_v43 }
  0x6d   :  { %2730 = vmatprep.mubr.msk.bf16.mxu1 %vm2986_vm0, %v2985_v34 }
  0x73   :  { %970 = vmatmul.mubr.bf16.vlgmr.msra.gmra.mrb[40].mxu0 %v2894_v44 }
  0x74   :  { %2731 = vmatmul.mubr.msk.bf16.vlgmr.msra.gmra.mrb[40].mxu1 %vm458_vm1, %v2897_v46  ;;  %2493 = vmatpush3.bf16.msra.mxu0 %v3021_v2  ;;  %v2975_v46 = vld [vmem:[%s3923_s0 + $0x2b8] ss:$20 sps:$4 sm:$0xff]  }
  0x75   :  { %2494 = vmatprep.subr.bf16.mxu0 %v3033_v4  ;;  %2539 = vmatpush3.bf16.msra.mxu1 %v3027_v3  ;;  %v2902_v3 = vld [vmem:[%s3923_s0 + $0x124] ss:$20 sps:$4 sm:$0xff]  }
  0x76   :  { %977 = vmatprep.mubr.bf16.mxu0 %v2898_v47  ;;  %2734 = vmatprep.mubr.msk.bf16.mxu1 %vm2986_vm0, %v2985_v34  ;;  %v2976_v47 = vld [vmem:[%s3923_s0 + $0x2dc] ss:$20 sps:$4 sm:$0xff]  }
  0x77   :  { %2540 = vmatprep.subr.bf16.mxu1 %v3039_v5 }
  0x78   :  { %2495 = vmatpush3.bf16.msra.mxu0 %v3045_v6 }
  0x79   :  { %2496 = vmatprep.subr.bf16.mxu0 %v3057_v8  ;;  %2541 = vmatpush3.bf16.msra.mxu1 %v3051_v7 }
  0x7a   :  { %2542 = vmatprep.subr.bf16.mxu1 %v3063_v9 }
  0x7b   :  { %978 = vmatmul.mubr.bf16.gmra.mrb[44].mxu0 %v2900_v49 }
  0x7c   :  { %2735 = vmatmul.mubr.msk.bf16.gmra.mrb[44].mxu1 %vm458_vm1, %v2901_v50  ;;  %2497 = vmatpush3.bf16.msra.mxu0 %v3069_v10 }
  0x7d   :  { %985 = vmatprep.mubr.bf16.mxu0 %v2902_v3  ;;  %2738 = vmatprep.mubr.msk.bf16.mxu1 %vm2986_vm0, %v2985_v34 }
  0x7e   :  { %2498 = vmatprep.subr.bf16.mxu0 %v3081_v12  ;;  %2543 = vmatpush3.bf16.msra.mxu1 %v3075_v11 }
  0x7f   :  { %2544 = vmatprep.subr.bf16.mxu1 %v3087_v13 }
  0x80   :  { %2499 = vmatpush3.bf16.msra.mxu0 %v3093_v14 }
  0x81   :  { %2500 = vmatprep.subr.bf16.mxu0 %v3105_v16 }
  0x82   :  { %2545 = vmatpush3.bf16.msra.mxu1 %v3099_v15 }
  0x83   :  { %986 = vmatmul.mubr.bf16.gmra.mrb[48].mxu0 %v2904_v51  ;;  %2546 = vmatprep.subr.bf16.mxu1 %v3111_v17 }
  0x84   :  { %2739 = vmatmul.mubr.msk.bf16.gmra.mrb[48].mxu1 %vm458_vm1, %v2905_v52  ;;  %2501 = vmatpush3.bf16.msra.mxu0 %v3117_v18 }
  0x85   :  { %993 = vmatprep.mubr.bf16.mxu0 %v2906_v53  ;;  %2742 = vmatprep.mubr.msk.bf16.mxu1 %vm2986_vm0, %v2985_v34 }
  0x86   :  { %2502 = vmatprep.subr.bf16.mxu0 %v3129_v20  ;;  %2547 = vmatpush3.bf16.msra.mxu1 %v3123_v19 }
  0x87   :  { %2548 = vmatprep.subr.bf16.mxu1 %v3135_v21 }
  0x88   :  { %2503 = vmatpush3.bf16.msra.mxu0 %v3141_v22 }
  0x89   :  { %2504 = vmatprep.subr.bf16.mxu0 %v3153_v24 }
  0x8a   :  { %2549 = vmatpush3.bf16.msra.mxu1 %v3147_v23 }
  0x8b   :  { %994 = vmatmul.mubr.bf16.gmra.mrb[52].mxu0 %v2908_v54  ;;  %2550 = vmatprep.subr.bf16.mxu1 %v3159_v25 }
  0x8c   :  { %2743 = vmatmul.mubr.msk.bf16.gmra.mrb[52].mxu1 %vm458_vm1, %v2909_v55  ;;  %1001 = vmatprep.mubr.bf16.mxu0 %v2910_v56 }
  0x8d   :  { %2746 = vmatprep.mubr.msk.bf16.mxu1 %vm2986_vm0, %v2985_v34  ;;  %2505 = vmatpush3.bf16.msra.mxu0 %v3165_v26 }
  0x8e   :  { %2551 = vmatpush3.bf16.msra.mxu1 %v3171_v27  ;;  %2506 = vmatprep.subr.bf16.mxu0 %v3177_v28 }
  0x8f   :  { %2552 = vmatprep.subr.bf16.mxu1 %v3183_v29 }
  0x91   :  { %2507 = vmatpush3.bf16.msra.mxu0 %v3189_v30 }
  0x92   :  { %2553 = vmatpush3.bf16.msra.mxu1 %v3195_v31  ;;  %2750 = vmatprep.subr.bf16.mxu0 %v2985_v34 }
  0x93   :  { %1002 = vmatmul.mubr.bf16.gmra.mrb[56].mxu0 %v2912_v57  ;;  %2593 = vmatprep.subr.bf16.mxu1 %v3010_v0  ;;  %v2922_v0 = vld [vmem:[%s3923_s0 + $0x1c4] ss:$20 sps:$4 sm:$0xff]  }
  0x94   :  { %2747 = vmatmul.mubr.msk.bf16.gmra.mrb[56].mxu1 %vm458_vm1, %v2913_v58  ;;  %1286 = vmatprep.mubr.bf16.mxu0 %v2916_v59  ;;  %v2978_v59 = vld [vmem:[%s3923_s0 + $0x2d8] ss:$20 sps:$4 sm:$0xff]  }
  0x95   :  { %1359 = vmatprep.mubr.bf16.mxu1 %v2919_v60 }
  0x9b   :  { %1287 = vmatmul.mubr.bf16.vlgmr.msra.gmra.mrb[60].mxu0 %v2914_v61 }
  0x9c   :  { %1360 = vmatmul.mubr.bf16.vlgmr.msra.gmra.mrb[60].mxu1 %v2917_v62  ;;  %2751 = vmatpush3.bf16.msra.mxu0 %v3216_v37 }
  0x9d   :  { %2594 = vmatpush3.bf16.msra.mxu1 %v3021_v2  ;;  %1294 = vmatprep.mubr.bf16.mxu0 %v2920_v63  ;;  %v2926_v2 = vld [vmem:[%s3923_s0 + $0x1e4] ss:$20 sps:$4 sm:$0xff]   ;;  %v2979_v63 = vld [vmem:[%s3923_s0 + $0x2e0] ss:$20 sps:$4 sm:$0xff]  }
  0x9e   :  { %1367 = vmatprep.mubr.bf16.mxu1 %v2922_v0  ;;  %2752 = vmatprep.subr.bf16.mxu0 %v2985_v34  ;;  %v2980_v0 = vld [vmem:[%s3923_s0 + $0x304] ss:$20 sps:$4 sm:$0xff]  }
  0x9f   :  { %2595 = vmatprep.subr.bf16.mxu1 %v3033_v4  ;;  %v2930_v4 = vld [vmem:[%s3923_s0 + $0x1e0] ss:$20 sps:$4 sm:$0xff]  }
  0xa0   :  { %2753 = vmatpush3.bf16.msra.mxu0 %v3230_v40 }
  0xa1   :  { %2596 = vmatpush3.bf16.msra.mxu1 %v3045_v6  ;;  %2754 = vmatprep.subr.bf16.mxu0 %v2985_v34  ;;  %v2931_v6 = vld [vmem:[%s3923_s0 + $0x1e8] ss:$20 sps:$4 sm:$0xff]  }
  0xa2   :  { %2597 = vmatprep.subr.bf16.mxu1 %v3057_v8  ;;  %v2932_v8 = vld [vmem:[%s3923_s0 + $0x20c] ss:$20 sps:$4 sm:$0xff]  }
  0xa3   :  { %1295 = vmatmul.mubr.bf16.gmra.mrb[64].mxu0 %v2924_v32 }
  0xa4   :  { %1368 = vmatmul.mubr.bf16.gmra.mrb[64].mxu1 %v2925_v33  ;;  %1302 = vmatprep.mubr.bf16.mxu0 %v2926_v2 }
  0xa5   :  { %1375 = vmatprep.mubr.bf16.mxu1 %v2928_v35  ;;  %2598 = vmatpush3.bf16.msra.mxu1 %v3069_v10  ;;  %v2934_v10 = vld [vmem:[%s3923_s0 + $0x214] ss:$20 sps:$4 sm:$0xff]  }
  0xa6   :  { %2599 = vmatprep.subr.bf16.mxu1 %v3081_v12  ;;  %2755 = vmatpush3.bf16.msra.mxu0 %v3252_v45  ;;  %v2936_v12 = vld [vmem:[%s3923_s0 + $0x208] ss:$20 sps:$4 sm:$0xff]  }
  0xa7   :  { %2756 = vmatprep.subr.bf16.mxu0 %v2985_v34 }
  0xa9   :  { %2600 = vmatpush3.bf16.msra.mxu1 %v3093_v14  ;;  %v2937_v14 = vld [vmem:[%s3923_s0 + $0x210] ss:$20 sps:$4 sm:$0xff]  }
  0xaa   :  { %2601 = vmatprep.subr.bf16.mxu1 %v3105_v16  ;;  %2757 = vmatpush3.bf16.msra.mxu0 %v3267_v48  ;;  %v2938_v16 = vld [vmem:[%s3923_s0 + $0x234] ss:$20 sps:$4 sm:$0xff]  }
  0xab   :  { %1303 = vmatmul.mubr.bf16.gmra.mrb[68].mxu0 %v2930_v4  ;;  %2639 = vmatprep.subr.bf16.mxu0 %v3015_v1  ;;  %v2940_v1 = vld [vmem:[%s3923_s0 + $0x23c] ss:$20 sps:$4 sm:$0xff]  }
  0xac   :  { %1376 = vmatmul.mubr.bf16.gmra.mrb[68].mxu1 %v2931_v6  ;;  %1310 = vmatprep.mubr.bf16.mxu0 %v2932_v8 }
  0xad   :  { %1383 = vmatprep.mubr.bf16.mxu1 %v2934_v10  ;;  %2602 = vmatpush3.bf16.msra.mxu1 %v3117_v18  ;;  %v2942_v18 = vld [vmem:[%s3923_s0 + $0x230] ss:$20 sps:$4 sm:$0xff]  }
  0xae   :  { %2603 = vmatprep.subr.bf16.mxu1 %v3129_v20  ;;  %v2943_v20 = vld [vmem:[%s3923_s0 + $0x238] ss:$20 sps:$4 sm:$0xff]  }
  0xb1   :  { %2604 = vmatpush3.bf16.msra.mxu1 %v3141_v22  ;;  %v2947_v22 = vld [vmem:[%s3923_s0 + $0x25c] ss:$20 sps:$4 sm:$0xff]  }
  0xb2   :  { %2605 = vmatprep.subr.bf16.mxu1 %v3153_v24  ;;  %v2944_v24 = vld [vmem:[%s3923_s0 + $0x1a0] ss:$20 sps:$4 sm:$0xff]  }
  0xb3   :  { %1311 = vmatmul.mubr.bf16.gmra.mrb[72].mxu0 %v2936_v12 }
  0xb4   :  { %1384 = vmatmul.mubr.bf16.gmra.mrb[72].mxu1 %v2937_v14  ;;  %1318 = vmatprep.mubr.bf16.mxu0 %v2938_v16 }
  0xb5   :  { %1391 = vmatprep.mubr.bf16.mxu1 %v2940_v1  ;;  %2606 = vmatpush3.bf16.msra.mxu1 %v3165_v26  ;;  %v2945_v26 = vld [vmem:[%s3923_s0 + $0x258] ss:$20 sps:$4 sm:$0xff]   ;;  %v2982_v1 = vld [vmem:[%s3923_s0 + $0x300] ss:$20 sps:$4 sm:$0xff]  }
  0xb6   :  { %2607 = vmatprep.subr.bf16.mxu1 %v3177_v28  ;;  %v2949_v28 = vld [vmem:[%s3923_s0 + $0x284] ss:$20 sps:$4 sm:$0xff]  }
  0xb9   :  { %2608 = vmatpush3.bf16.msra.mxu1 %v3189_v30  ;;  %v2984_v30 = vld [vmem:[%s3922_s1 + $0x80] sm:$0xff]  }
  0xba   :  { %2778 = vmatprep.subr.bf16.mxu1 %v2985_v34 }
  0xbb   :  { %1319 = vmatmul.mubr.bf16.gmra.mrb[76].mxu0 %v2942_v18 }
  0xbc   :  { %1392 = vmatmul.mubr.bf16.gmra.mrb[76].mxu1 %v2943_v20  ;;  %2758 = vmatprep.mubr.msk.bf16.mxu0 %vm2986_vm0, %v2985_v34 }
  0xbd   :  { %1676 = vmatprep.mubr.bf16.mxu1 %v2947_v22 }
  0xc3   :  { %2759 = vmatmul.mubr.msk.bf16.vlgmr.msra.gmra.mrb[80].mxu0 %vm458_vm1, %v2944_v24  ;;  %v2983_v24 = vld [vmem:[%s3923_s0 + $0x308] ss:$20 sps:$4 sm:$0xff]  }
  0xc4   :  { %2640 = vmatpush3.bf16.msra.mxu0 %v2984_v30  ;;  %1677 = vmatmul.mubr.bf16.vlgmr.msra.gmra.mrb[80].mxu1 %v2945_v26 }
  0xc5   :  { %2641 = vmatprep.subr.bf16.mxu0 %v3039_v5  ;;  %2779 = vmatpush3.bf16.msra.mxu1 %v3216_v37  ;;  %v2953_v5 = vld [vmem:[%s3923_s0 + $0x2ac] ss:$20 sps:$4 sm:$0xff]   ;;  %v2971_v37 = vld [vmem:[%s3923_s0 + $0x290] ss:$20 sps:$4 sm:$0xff]  }
  0xc6   :  { %2762 = vmatprep.mubr.msk.bf16.mxu0 %vm2986_vm0, %v2985_v34  ;;  %1684 = vmatprep.mubr.bf16.mxu1 %v2949_v28 }
  0xc7   :  { %2780 = vmatprep.subr.bf16.mxu1 %v2985_v34 }
  0xc8   :  { %2642 = vmatpush3.bf16.msra.mxu0 %v3051_v7  ;;  %v2952_v7 = vld [vmem:[%s3923_s0 + $0x1f0] ss:$20 sps:$4 sm:$0xff]  }
  0xc9   :  { %2643 = vmatprep.subr.bf16.mxu0 %v3063_v9  ;;  %2781 = vmatpush3.bf16.msra.mxu1 %v3230_v40  ;;  %v2955_v9 = vld [vmem:[%s3923_s0 + $0x2a8] ss:$20 sps:$4 sm:$0xff]  }
  0xca   :  { %2782 = vmatprep.subr.bf16.mxu1 %v2985_v34  ;;  %v2972_v40 = vld [vmem:[%s3923_s0 + $0x2b4] ss:$20 sps:$4 sm:$0xff]  }
  0xcb   :  { %2763 = vmatmul.mubr.msk.bf16.gmra.mrb[84].mxu0 %vm458_vm1, %v2948_v36 }
  0xcc   :  { %1685 = vmatmul.mubr.bf16.gmra.mrb[84].mxu1 %v2951_v38  ;;  %2644 = vmatpush3.bf16.msra.mxu0 %v3075_v11  ;;  %v2957_v11 = vld [vmem:[%s3923_s0 + $0x2d4] ss:$20 sps:$4 sm:$0xff]  }
  0xcd   :  { %2766 = vmatprep.mubr.msk.bf16.mxu0 %vm2986_vm0, %v2985_v34  ;;  %2645 = vmatprep.subr.bf16.mxu0 %v3087_v13  ;;  %v2956_v13 = vld [vmem:[%s3923_s0 + $0x218] ss:$20 sps:$4 sm:$0xff]  }
  0xce   :  { %1692 = vmatprep.mubr.bf16.mxu1 %v2953_v5  ;;  %2783 = vmatpush3.bf16.msra.mxu1 %v3252_v45 }
  0xcf   :  { %2784 = vmatprep.subr.bf16.mxu1 %v2985_v34 }
  0xd0   :  { %2646 = vmatpush3.bf16.msra.mxu0 %v3099_v15  ;;  %v2959_v15 = vld [vmem:[%s3923_s0 + $0x2d0] ss:$20 sps:$4 sm:$0xff]  }
  0xd1   :  { %2647 = vmatprep.subr.bf16.mxu0 %v3111_v17  ;;  %v2961_v17 = vld [vmem:[%s3923_s0 + $0x2fc] ss:$20 sps:$4 sm:$0xff]  }
  0xd2   :  { %2785 = vmatpush3.bf16.msra.mxu1 %v3267_v48 }
  0xd3   :  { %2767 = vmatmul.mubr.msk.bf16.gmra.mrb[88].mxu0 %vm458_vm1, %v2952_v7 }
  0xd4   :  { %1693 = vmatmul.mubr.bf16.gmra.mrb[88].mxu1 %v2955_v9  ;;  %2648 = vmatpush3.bf16.msra.mxu0 %v3123_v19  ;;  %v2960_v19 = vld [vmem:[%s3923_s0 + $0x240] ss:$20 sps:$4 sm:$0xff]  }
  0xd5   :  { %2770 = vmatprep.mubr.msk.bf16.mxu0 %vm2986_vm0, %v2985_v34  ;;  %2649 = vmatprep.subr.bf16.mxu0 %v3135_v21  ;;  %v2963_v21 = vld [vmem:[%s3923_s0 + $0x2f8] ss:$20 sps:$4 sm:$0xff]  }
  0xd6   :  { %1700 = vmatprep.mubr.bf16.mxu1 %v2957_v11 }
  0xd8   :  { %2650 = vmatpush3.bf16.msra.mxu0 %v3147_v23  ;;  %v2966_v23 = vld [vmem:[%s3923_s0 + $0x264] ss:$20 sps:$4 sm:$0xff]  }
  0xd9   :  { %2651 = vmatprep.subr.bf16.mxu0 %v3159_v25  ;;  %v2964_v25 = vld [vmem:[%s3923_s0 + $0x260] ss:$20 sps:$4 sm:$0xff]  }
  0xdb   :  { %2771 = vmatmul.mubr.msk.bf16.gmra.mrb[92].mxu0 %vm458_vm1, %v2956_v13 }
  0xdc   :  { %1701 = vmatmul.mubr.bf16.gmra.mrb[92].mxu1 %v2959_v15  ;;  %2774 = vmatprep.mubr.msk.bf16.mxu0 %vm2986_vm0, %v2985_v34 }
  0xdd   :  { %2652 = vmatpush3.bf16.msra.mxu0 %v3171_v27  ;;  %1708 = vmatprep.mubr.bf16.mxu1 %v2961_v17  ;;  %v2967_v27 = vld [vmem:[%s3923_s0 + $0x268] ss:$20 sps:$4 sm:$0xff]  }
  0xde   :  { %2653 = vmatprep.subr.bf16.mxu0 %v3183_v29  ;;  %v2968_v29 = vld [vmem:[%s3923_s0 + $0x28c] ss:$20 sps:$4 sm:$0xff]  }
  0xe1   :  { %2654 = vmatpush3.bf16.msra.mxu0 %v3195_v31  ;;  %v2970_v31 = vld [vmem:[%s3923_s0 + $0x288] ss:$20 sps:$4 sm:$0xff]  }
  0xe3   :  { %2775 = vmatmul.mubr.msk.bf16.gmra.mrb[96].mxu0 %vm458_vm1, %v2960_v19 }
  0xe4   :  { %1709 = vmatmul.mubr.bf16.gmra.mrb[96].mxu1 %v2963_v21  ;;  %1749 = vmatprep.mubr.bf16.mxu0 %v2966_v23 }
  0xe5   :  { %2786 = vmatprep.mubr.msk.bf16.mxu1 %vm2986_vm0, %v2985_v34 }
  0xeb   :  { %1750 = vmatmul.mubr.bf16.vlgmr.msra.gmra.mrb[100].mxu0 %v2964_v25 }
  0xec   :  { %2787 = vmatmul.mubr.msk.bf16.vlgmr.msra.gmra.mrb[100].mxu1 %vm458_vm1, %v2967_v27  ;;  %1757 = vmatprep.mubr.bf16.mxu0 %v2968_v29 }
  0xed   :  { %2790 = vmatprep.mubr.msk.bf16.mxu1 %vm2986_vm0, %v2985_v34 }
  0xf3   :  { %1758 = vmatmul.mubr.bf16.gmra.mrb[104].mxu0 %v2970_v31 }
  0xf4   :  { %2791 = vmatmul.mubr.msk.bf16.gmra.mrb[104].mxu1 %vm458_vm1, %v2971_v37  ;;  %1765 = vmatprep.mubr.bf16.mxu0 %v2972_v40 }
  0xf5   :  { %2794 = vmatprep.mubr.msk.bf16.mxu1 %vm2986_vm0, %v2985_v34 }
  0xf6   :  { %v2306_v45 = vpop.f32.mrb[0].mxu0 }
  0xf7   :  { %v2352_v48 = vpop.f32.mrb[0].mxu1  ;;  %v2307_v39 = vpop.f32.mrb[1].mxu0 }
  0xf8   :  { %v2308_v42 = vadd.f32 %v2307_v39, %v2306_v45  ;;  %v2353_v43 = vpop.f32.mrb[1].mxu1  ;;  %v2309_v44 = vpop.f32.mrb[2].mxu0 }
  0xf9   :  { %v2354_v49 = vadd.f32 %v2353_v43, %v2352_v48  ;;  %v2355_v50 = vpop.f32.mrb[2].mxu1  ;;  %v2310_v3 = vpop.f32.mrb[3].mxu0 }
  0xfa   :  { %v2311_v51 = vadd.f32 %v2310_v3, %v2309_v44  ;;  %v2356_v52 = vpop.f32.mrb[3].mxu1 }
  0xfb   :  { %v2357_v53 = vadd.f32 %v2356_v52, %v2355_v50  ;;  %1766 = vmatmul.mubr.bf16.gmra.mrb[108].mxu0 %v2974_v41  ;;  %v3687_v54 = vadd.f32 %v2354_v49, %v2308_v42 }
  0xfc   :  { %2795 = vmatmul.mubr.msk.bf16.gmra.mrb[108].mxu1 %vm458_vm1, %v2975_v46  ;;  %1773 = vmatprep.mubr.bf16.mxu0 %v2976_v47 }
  0xfd   :  { %2798 = vmatprep.mubr.msk.bf16.mxu1 %vm2986_vm0, %v2985_v34  ;;  %v3692_v55 = vadd.f32 %v2357_v53, %v2311_v51 }
  0xfe   :  { %v2312_v56 = vpop.f32.mrb[4].mxu0 }
  0xff   :  { %v2358_v57 = vpop.f32.mrb[4].mxu1  ;;  %v2313_v58 = vpop.f32.mrb[5].mxu0 }
 0x100   :  { %v2314_v60 = vadd.f32 %v2313_v58, %v2312_v56  ;;  %v2359_v61 = vpop.f32.mrb[5].mxu1  ;;  %v2315_v62 = vpop.f32.mrb[6].mxu0 }
 0x101   :  { %v2360_v32 = vadd.f32 %v2359_v61, %v2358_v57  ;;  %v2361_v33 = vpop.f32.mrb[6].mxu1  ;;  %v2316_v2 = vpop.f32.mrb[7].mxu0 }
 0x102   :  { %v2317_v35 = vadd.f32 %v2316_v2, %v2315_v62  ;;  %v2362_v4 = vpop.f32.mrb[7].mxu1 }
 0x103   :  { %v2363_v6 = vadd.f32 %v2362_v4, %v2361_v33  ;;  %1774 = vmatmul.mubr.bf16.gmra.mrb[112].mxu0 %v2978_v59  ;;  %v3703_v8 = vadd.f32 %v2360_v32, %v2314_v60 }
 0x104   :  { %2799 = vmatmul.mubr.msk.bf16.gmra.mrb[112].mxu1 %vm458_vm1, %v2979_v63  ;;  %1781 = vmatprep.mubr.bf16.mxu0 %v2980_v0 }
 0x105   :  { %2802 = vmatprep.mubr.msk.bf16.mxu1 %vm2986_vm0, %v2985_v34  ;;  %v3708_v10 = vadd.f32 %v2363_v6, %v2317_v35 }
 0x106   :  { %v2318_v12 = vpop.f32.mrb[8].mxu0 }
 0x107   :  { %v2364_v14 = vpop.f32.mrb[8].mxu1  ;;  %v2319_v16 = vpop.f32.mrb[9].mxu0 }
 0x108   :  { %v2320_v18 = vadd.f32 %v2319_v16, %v2318_v12  ;;  %v2365_v20 = vpop.f32.mrb[9].mxu1  ;;  %v2321_v22 = vpop.f32.mrb[10].mxu0 }
 0x109   :  { %v2366_v26 = vadd.f32 %v2365_v20, %v2364_v14  ;;  %v2367_v28 = vpop.f32.mrb[10].mxu1  ;;  %v2322_v30 = vpop.f32.mrb[11].mxu0 }
 0x10a   :  { %v2323_v34 = vadd.f32 %v2322_v30, %v2321_v22  ;;  %v2368_v36 = vpop.f32.mrb[11].mxu1 }
 0x10b   :  { %v2369_v38 = vadd.f32 %v2368_v36, %v2367_v28  ;;  %1782 = vmatmul.mubr.bf16.gmra.mrb[116].mxu0 %v2982_v1  ;;  %v598_v5 = vadd.f32 %v2366_v26, %v2320_v18 }
 0x10c   :  { %2803 = vmatmul.mubr.msk.bf16.gmra.mrb[116].mxu1 %vm458_vm1, %v2983_v24 }
 0x10d   :  { %v601_v7 = vadd.f32 %v2369_v38, %v2323_v34 }
 0x10e   :  { %v2324_v9 = vpop.f32.mrb[12].mxu0 }
 0x10f   :  { %v2370_v11 = vpop.f32.mrb[12].mxu1  ;;  %v2325_v13 = vpop.f32.mrb[13].mxu0 }
 0x110   :  { %v2326_v15 = vadd.f32 %v2325_v13, %v2324_v9  ;;  %v2371_v17 = vpop.f32.mrb[13].mxu1  ;;  %v2327_v19 = vpop.f32.mrb[14].mxu0 }
 0x111   :  { %v2372_v21 = vadd.f32 %v2371_v17, %v2370_v11  ;;  %v2373_v23 = vpop.f32.mrb[14].mxu1  ;;  %v2328_v25 = vpop.f32.mrb[15].mxu0 }
 0x112   :  { %v2329_v27 = vadd.f32 %v2328_v25, %v2327_v19  ;;  %v2374_v29 = vpop.f32.mrb[15].mxu1 }
 0x113   :  { %v2375_v31 = vadd.f32 %v2374_v29, %v2373_v23  ;;  %v606_v37 = vadd.f32 %v2372_v21, %v2326_v15 }
 0x115   :  { %v609_v40 = vadd.f32 %v2375_v31, %v2329_v27 }
 0x116   :  { %v2330_v45 = vpop.f32.mrb[16].mxu0 }
 0x117   :  { %v2376_v48 = vpop.f32.mrb[16].mxu1  ;;  %v2331_v39 = vpop.f32.mrb[17].mxu0 }
 0x118   :  { %v2332_v41 = vadd.f32 %v2331_v39, %v2330_v45  ;;  %v2377_v42 = vpop.f32.mrb[17].mxu1  ;;  %v2333_v43 = vpop.f32.mrb[18].mxu0 }
 0x119   :  { %v2378_v44 = vadd.f32 %v2377_v42, %v2376_v48  ;;  %v2379_v46 = vpop.f32.mrb[18].mxu1  ;;  %v2334_v47 = vpop.f32.mrb[19].mxu0 }
 0x11a   :  { %v2335_v49 = vadd.f32 %v2334_v47, %v2333_v43  ;;  %v2380_v50 = vpop.f32.mrb[19].mxu1 }
 0x11b   :  { %v2381_v3 = vadd.f32 %v2380_v50, %v2379_v46  ;;  %v614_v51 = vadd.f32 %v2378_v44, %v2332_v41 }
 0x11d   :  { %v617_v52 = vadd.f32 %v2381_v3, %v2335_v49 }
 0x11e   :  { %v654_v53 = vpop.f32.mrb[20].mxu0 }
 0x11f   :  { %v3718_v56 = vadd.f32 %v654_v53, %v3687_v54  ;;  %v2704_v57 = vpop.f32.mrb[21].mxu0  ;;  %v2407_v58 = vpop.f32.mrb[20].mxu1 }
 0x120   :  { %v657_v59 = vpop.f32.mrb[22].mxu0  ;;  %v2408_v60 = vpop.f32.mrb[21].mxu1 }
 0x121   :  { %v3721_v61 = vadd.f32 %v657_v59, %v3692_v55  ;;  %v2705_v62 = vpop.f32.mrb[23].mxu0  ;;  %v2409_v63 = vadd.f32 %v2408_v60, %v2407_v58  ;;  %v2410_v0 = vpop.f32.mrb[22].mxu1 }
 0x122   :  { %v2411_v32 = vpop.f32.mrb[23].mxu1 }
 0x123   :  { %v2412_v33 = vadd.f32 %v2411_v32, %v2410_v0 }
 0x126   :  { %v662_v2 = vpop.f32.mrb[24].mxu0 }
 0x127   :  { %v3724_v35 = vadd.f32 %v662_v2, %v3703_v8  ;;  %v2708_v4 = vpop.f32.mrb[25].mxu0  ;;  %v2413_v6 = vpop.f32.mrb[24].mxu1 }
 0x128   :  { %v665_v54 = vpop.f32.mrb[26].mxu0  ;;  %v2414_v12 = vpop.f32.mrb[25].mxu1 }
 0x129   :  { %v3727_v14 = vadd.f32 %v665_v54, %v3708_v10  ;;  %v2709_v16 = vpop.f32.mrb[27].mxu0  ;;  %v3729_v1 = vadd.f32 %v2414_v12, %v2413_v6  ;;  %v2416_v55 = vpop.f32.mrb[26].mxu1 }
 0x12a   :  { %v2417_v18 = vpop.f32.mrb[27].mxu1 }
 0x12b   :  { %v3731_v20 = vadd.f32 %v2417_v18, %v2416_v55 }
 0x12e   :  { %v670_v22 = vpop.f32.mrb[28].mxu0 }
 0x12f   :  { %v3733_v24 = vadd.f32 %v670_v22, %v598_v5  ;;  %v2712_v26 = vpop.f32.mrb[29].mxu0  ;;  %v2419_v8 = vpop.f32.mrb[28].mxu1 }
 0x130   :  { %v673_v28 = vpop.f32.mrb[30].mxu0  ;;  %v2420_v30 = vpop.f32.mrb[29].mxu1 }
 0x131   :  { %v3735_v34 = vadd.f32 %v673_v28, %v601_v7  ;;  %v2713_v36 = vpop.f32.mrb[31].mxu0  ;;  %v3737_v38 = vadd.f32 %v2420_v30, %v2419_v8  ;;  %v2422_v10 = vpop.f32.mrb[30].mxu1 }
 0x132   :  { %v2423_v9 = vpop.f32.mrb[31].mxu1 }
 0x133   :  { %v3739_v11 = vadd.f32 %v2423_v9, %v2422_v10 }
 0x136   :  { %v678_v13 = vpop.f32.mrb[32].mxu0 }
 0x137   :  { %v3741_v15 = vadd.f32 %v678_v13, %v606_v37  ;;  %v2716_v17 = vpop.f32.mrb[33].mxu0  ;;  %v2425_v19 = vpop.f32.mrb[32].mxu1 }
 0x138   :  { %v681_v5 = vpop.f32.mrb[34].mxu0  ;;  %v2426_v21 = vpop.f32.mrb[33].mxu1 }
 0x139   :  { %v3743_v23 = vadd.f32 %v681_v5, %v609_v40  ;;  %v2717_v25 = vpop.f32.mrb[35].mxu0  ;;  %v3745_v27 = vadd.f32 %v2426_v21, %v2425_v19  ;;  %v2428_v7 = vpop.f32.mrb[34].mxu1 }
 0x13a   :  { %v2429_v29 = vpop.f32.mrb[35].mxu1 }
 0x13b   :  { %v3747_v31 = vadd.f32 %v2429_v29, %v2428_v7 }
 0x13e   :  { %v686_v45 = vpop.f32.mrb[36].mxu0 }
 0x13f   :  { %v3749_v48 = vadd.f32 %v686_v45, %v614_v51  ;;  %v2720_v39 = vpop.f32.mrb[37].mxu0  ;;  %v2431_v41 = vpop.f32.mrb[36].mxu1 }
 0x140   :  { %v689_v37 = vpop.f32.mrb[38].mxu0  ;;  %v2432_v42 = vpop.f32.mrb[37].mxu1 }
 0x141   :  { %v3751_v43 = vadd.f32 %v689_v37, %v617_v52  ;;  %v2721_v44 = vpop.f32.mrb[39].mxu0  ;;  %v3753_v46 = vadd.f32 %v2432_v42, %v2431_v41  ;;  %v2434_v40 = vpop.f32.mrb[38].mxu1 }
 0x142   :  { %v2435_v47 = vpop.f32.mrb[39].mxu1 }
 0x143   :  { %v3755_v49 = vadd.f32 %v2435_v47, %v2434_v40 }
 0x146   :  { %v2453_v50 = vpop.f32.mrb[40].mxu0 }
 0x147   :  { %v2454_v3 = vpop.f32.mrb[41].mxu0  ;;  %v1044_v53 = vpop.f32.mrb[40].mxu1 }
 0x148   :  { %v2455_v57 = vadd.f32 %v2454_v3, %v2453_v50  ;;  %v2456_v58 = vpop.f32.mrb[42].mxu0  ;;  %v2732_v51 = vpop.f32.mrb[41].mxu1 }
 0x149   :  { %v2457_v59 = vpop.f32.mrb[43].mxu0  ;;  %v1047_v60 = vpop.f32.mrb[42].mxu1 }
 0x14a   :  { %v2458_v62 = vadd.f32 %v2457_v59, %v2456_v58  ;;  %v972_v0 = vadd.f32 %v2455_v57, %v2409_v63  ;;  %v2733_v32 = vpop.f32.mrb[43].mxu1 }
 0x14c   :  { %v3757_v52 = vadd.f32 %v1044_v53, %v972_v0  ;;  %v975_v2 = vadd.f32 %v2458_v62, %v2412_v33 }
 0x14e   :  { %v1863_v4 = vmax.f32 %v3718_v56, %v3757_v52  ;;  %v3761_v6 = vadd.f32 %v1047_v60, %v975_v2  ;;  %v2459_v54 = vpop.f32.mrb[44].mxu0 }
 0x14f   :  { %v2460_v12 = vpop.f32.mrb[45].mxu0  ;;  %v1052_v16 = vpop.f32.mrb[44].mxu1 }
 0x150   :  { %v1864_v55 = vmax.f32 %v3721_v61, %v3761_v6  ;;  %v2461_v18 = vadd.f32 %v2460_v12, %v2459_v54  ;;  %v2462_v22 = vpop.f32.mrb[46].mxu0  ;;  %v2736_v26 = vpop.f32.mrb[45].mxu1 }
 0x151   :  { %v2463_v8 = vpop.f32.mrb[47].mxu0  ;;  %v1055_v63 = vpop.f32.mrb[46].mxu1 }
 0x152   :  { %v2464_v28 = vadd.f32 %v2463_v8, %v2462_v22  ;;  %v980_v30 = vadd.f32 %v2461_v18, %v3729_v1  ;;  %v2737_v33 = vpop.f32.mrb[47].mxu1 }
 0x154   :  { %v3766_v36 = vadd.f32 %v1052_v16, %v980_v30  ;;  %v983_v10 = vadd.f32 %v2464_v28, %v3731_v20 }
 0x156   :  { %v1865_v9 = vmax.f32 %v3724_v35, %v3766_v36  ;;  %v3771_v13 = vadd.f32 %v1055_v63, %v983_v10  ;;  %v2465_v17 = vpop.f32.mrb[48].mxu0 }
 0x157   :  { %v2466_v19 = vpop.f32.mrb[49].mxu0  ;;  %v1060_v5 = vpop.f32.mrb[48].mxu1 }
 0x158   :  { %v1866_v21 = vmax.f32 %v3727_v14, %v3771_v13  ;;  %v2467_v25 = vadd.f32 %v2466_v19, %v2465_v17  ;;  %v2468_v7 = vpop.f32.mrb[50].mxu0  ;;  %v2740_v29 = vpop.f32.mrb[49].mxu1 }
 0x159   :  { %v2469_v1 = vpop.f32.mrb[51].mxu0  ;;  %v1063_v45 = vpop.f32.mrb[50].mxu1 }
 0x15a   :  { %v2470_v39 = vadd.f32 %v2469_v1, %v2468_v7  ;;  %v988_v41 = vadd.f32 %v2467_v25, %v3737_v38  ;;  %v2741_v20 = vpop.f32.mrb[51].mxu1 }
 0x15c   :  { %v3776_v37 = vadd.f32 %v1060_v5, %v988_v41  ;;  %v991_v42 = vadd.f32 %v2470_v39, %v3739_v11 }
 0x15e   :  { %v1867_v44 = vmax.f32 %v3733_v24, %v3776_v37  ;;  %v3781_v40 = vadd.f32 %v1063_v45, %v991_v42  ;;  %v2471_v47 = vpop.f32.mrb[52].mxu0 }
 0x15f   :  { %v2472_v50 = vpop.f32.mrb[53].mxu0  ;;  %v1068_v3 = vpop.f32.mrb[52].mxu1 }
 0x160   :  { %v1868_v53 = vmax.f32 %v3735_v34, %v3781_v40  ;;  %v2473_v57 = vadd.f32 %v2472_v50, %v2471_v47  ;;  %v2474_v58 = vpop.f32.mrb[54].mxu0  ;;  %v2744_v51 = vpop.f32.mrb[53].mxu1 }
 0x161   :  { %v2475_v38 = vpop.f32.mrb[55].mxu0  ;;  %v1071_v59 = vpop.f32.mrb[54].mxu1 }
 0x162   :  { %v2476_v60 = vadd.f32 %v2475_v38, %v2474_v58  ;;  %v996_v62 = vadd.f32 %v2473_v57, %v3745_v27  ;;  %v2745_v11 = vpop.f32.mrb[55].mxu1 }
 0x164   :  { %v3786_v0 = vadd.f32 %v1068_v3, %v996_v62  ;;  %v999_v32 = vadd.f32 %v2476_v60, %v3747_v31 }
 0x166   :  { %v3791_v54 = vadd.f32 %v1071_v59, %v999_v32  ;;  %v2477_v12 = vpop.f32.mrb[56].mxu0 }
 0x167   :  { %v2478_v16 = vpop.f32.mrb[57].mxu0  ;;  %v1076_v18 = vpop.f32.mrb[56].mxu1 }
 0x168   :  { %v2479_v26 = vadd.f32 %v2478_v16, %v2477_v12  ;;  %v2480_v8 = vpop.f32.mrb[58].mxu0  ;;  %v2748_v63 = vpop.f32.mrb[57].mxu1 }
 0x169   :  { %v2481_v27 = vpop.f32.mrb[59].mxu0  ;;  %v1079_v28 = vpop.f32.mrb[58].mxu1 }
 0x16a   :  { %v2482_v30 = vadd.f32 %v2481_v27, %v2480_v8  ;;  %v1004_v33 = vadd.f32 %v2479_v26, %v3753_v46  ;;  %v2749_v31 = vpop.f32.mrb[59].mxu1 }
 0x16c   :  { %v3796_v10 = vadd.f32 %v1076_v18, %v1004_v33  ;;  %v1007_v17 = vadd.f32 %v2482_v30, %v3755_v49 }
 0x16e   :  { %v3801_v5 = vadd.f32 %v1079_v28, %v1007_v17  ;;  %v2508_v25 = vpop.f32.mrb[60].mxu0 }
 0x16f   :  { %v2554_v7 = vpop.f32.mrb[60].mxu1  ;;  %v2509_v29 = vpop.f32.mrb[61].mxu0 }
 0x170   :  { %v2510_v45 = vadd.f32 %v2509_v29, %v2508_v25  ;;  %v2555_v39 = vpop.f32.mrb[61].mxu1  ;;  %v2511_v41 = vpop.f32.mrb[62].mxu0 }
 0x171   :  { %v2556_v46 = vadd.f32 %v2555_v39, %v2554_v7  ;;  %v2557_v20 = vpop.f32.mrb[62].mxu1  ;;  %v2512_v42 = vpop.f32.mrb[63].mxu0 }
 0x172   :  { %v2513_v47 = vadd.f32 %v2512_v42, %v2511_v41  ;;  %v2558_v50 = vpop.f32.mrb[63].mxu1 }
 0x173   :  { %v2559_v49 = vadd.f32 %v2558_v50, %v2557_v20  ;;  %v1362_v3 = vadd.f32 %v2556_v46, %v2510_v45 }
 0x175   :  { %v3805_v57 = vadd.f32 %v2559_v49, %v2513_v47 }
 0x176   :  { %v2514_v58 = vpop.f32.mrb[64].mxu0 }
 0x177   :  { %v2560_v51 = vpop.f32.mrb[64].mxu1  ;;  %v2515_v38 = vpop.f32.mrb[65].mxu0 }
 0x178   :  { %v2516_v59 = vadd.f32 %v2515_v38, %v2514_v58  ;;  %v2561_v60 = vpop.f32.mrb[65].mxu1  ;;  %v2517_v62 = vpop.f32.mrb[66].mxu0 }
 0x179   :  { %v2562_v11 = vadd.f32 %v2561_v60, %v2560_v51  ;;  %v2563_v32 = vpop.f32.mrb[66].mxu1  ;;  %v2518_v12 = vpop.f32.mrb[67].mxu0 }
 0x17a   :  { %v2519_v16 = vadd.f32 %v2518_v12, %v2517_v62  ;;  %v2564_v18 = vpop.f32.mrb[67].mxu1 }
 0x17b   :  { %v2565_v26 = vadd.f32 %v2564_v18, %v2563_v32  ;;  %v1370_v8 = vadd.f32 %v2562_v11, %v2516_v59 }
 0x17d   :  { %v1373_v63 = vadd.f32 %v2565_v26, %v2519_v16 }
 0x17e   :  { %v2520_v27 = vpop.f32.mrb[68].mxu0 }
 0x17f   :  { %v2566_v28 = vpop.f32.mrb[68].mxu1  ;;  %v2521_v30 = vpop.f32.mrb[69].mxu0 }
 0x180   :  { %v2522_v33 = vadd.f32 %v2521_v30, %v2520_v27  ;;  %v2567_v31 = vpop.f32.mrb[69].mxu1  ;;  %v2523_v17 = vpop.f32.mrb[70].mxu0 }
 0x181   :  { %v2568_v25 = vadd.f32 %v2567_v31, %v2566_v28  ;;  %v2569_v7 = vpop.f32.mrb[70].mxu1  ;;  %v2524_v29 = vpop.f32.mrb[71].mxu0 }
 0x182   :  { %v2525_v45 = vadd.f32 %v2524_v29, %v2523_v17  ;;  %v2570_v39 = vpop.f32.mrb[71].mxu1 }
 0x183   :  { %v2571_v41 = vadd.f32 %v2570_v39, %v2569_v7  ;;  %v1378_v46 = vadd.f32 %v2568_v25, %v2522_v33 }
 0x185   :  { %v1381_v20 = vadd.f32 %v2571_v41, %v2525_v45 }
 0x186   :  { %v2526_v42 = vpop.f32.mrb[72].mxu0 }
 0x187   :  { %v2572_v47 = vpop.f32.mrb[72].mxu1  ;;  %v2527_v50 = vpop.f32.mrb[73].mxu0 }
 0x188   :  { %v2528_v49 = vadd.f32 %v2527_v50, %v2526_v42  ;;  %v2573_v58 = vpop.f32.mrb[73].mxu1  ;;  %v2529_v51 = vpop.f32.mrb[74].mxu0 }
 0x189   :  { %v2574_v38 = vadd.f32 %v2573_v58, %v2572_v47  ;;  %v2575_v59 = vpop.f32.mrb[74].mxu1  ;;  %v2530_v60 = vpop.f32.mrb[75].mxu0 }
 0x18a   :  { %v2531_v62 = vadd.f32 %v2530_v60, %v2529_v51  ;;  %v2576_v11 = vpop.f32.mrb[75].mxu1 }
 0x18b   :  { %v2577_v32 = vadd.f32 %v2576_v11, %v2575_v59  ;;  %v1386_v12 = vadd.f32 %v2574_v38, %v2528_v49 }
 0x18d   :  { %v1389_v16 = vadd.f32 %v2577_v32, %v2531_v62 }
 0x18e   :  { %v2532_v18 = vpop.f32.mrb[76].mxu0 }
 0x18f   :  { %v2578_v26 = vpop.f32.mrb[76].mxu1  ;;  %v2533_v27 = vpop.f32.mrb[77].mxu0 }
 0x190   :  { %v2534_v28 = vadd.f32 %v2533_v27, %v2532_v18  ;;  %v2579_v30 = vpop.f32.mrb[77].mxu1  ;;  %v2535_v33 = vpop.f32.mrb[78].mxu0 }
 0x191   :  { %v2580_v31 = vadd.f32 %v2579_v30, %v2578_v26  ;;  %v2581_v17 = vpop.f32.mrb[78].mxu1  ;;  %v2536_v25 = vpop.f32.mrb[79].mxu0 }
 0x192   :  { %v2537_v7 = vadd.f32 %v2536_v25, %v2535_v33  ;;  %v2582_v29 = vpop.f32.mrb[79].mxu1 }
 0x193   :  { %v2583_v45 = vadd.f32 %v2582_v29, %v2581_v17  ;;  %v1394_v39 = vadd.f32 %v2580_v31, %v2534_v28 }
 0x195   :  { %v1397_v41 = vadd.f32 %v2583_v45, %v2537_v7 }
 0x196   :  { %v1434_v42 = vpop.f32.mrb[80].mxu0 }
 0x197   :  { %v3807_v47 = vadd.f32 %v1434_v42, %v1362_v3  ;;  %v2760_v50 = vpop.f32.mrb[81].mxu0  ;;  %v2609_v49 = vpop.f32.mrb[80].mxu1 }
 0x198   :  { %v1437_v58 = vpop.f32.mrb[82].mxu0  ;;  %v2610_v51 = vpop.f32.mrb[81].mxu1 }
 0x199   :  { %v3810_v38 = vadd.f32 %v1437_v58, %v3805_v57  ;;  %v2761_v59 = vpop.f32.mrb[83].mxu0  ;;  %v2611_v60 = vadd.f32 %v2610_v51, %v2609_v49  ;;  %v2612_v62 = vpop.f32.mrb[82].mxu1 }
 0x19a   :  { %v2613_v11 = vpop.f32.mrb[83].mxu1 }
 0x19b   :  { %v2614_v32 = vadd.f32 %v2613_v11, %v2612_v62 }
 0x19e   :  { %v1442_v18 = vpop.f32.mrb[84].mxu0 }
 0x19f   :  { %v3812_v26 = vadd.f32 %v1442_v18, %v1370_v8  ;;  %v2764_v27 = vpop.f32.mrb[85].mxu0  ;;  %v2615_v28 = vpop.f32.mrb[84].mxu1 }
 0x1a0   :  { %v1445_v30 = vpop.f32.mrb[86].mxu0  ;;  %v2616_v3 = vpop.f32.mrb[85].mxu1 }
 0x1a1   :  { %v3814_v33 = vadd.f32 %v1445_v30, %v1373_v63  ;;  %v2765_v31 = vpop.f32.mrb[87].mxu0  ;;  %v3816_v17 = vadd.f32 %v2616_v3, %v2615_v28  ;;  %v2618_v25 = vpop.f32.mrb[86].mxu1 }
 0x1a2   :  { %v2619_v57 = vpop.f32.mrb[87].mxu1 }
 0x1a3   :  { %v3818_v7 = vadd.f32 %v2619_v57, %v2618_v25 }
 0x1a6   :  { %v1450_v29 = vpop.f32.mrb[88].mxu0 }
 0x1a7   :  { %v3820_v45 = vadd.f32 %v1450_v29, %v1378_v46  ;;  %v2768_v42 = vpop.f32.mrb[89].mxu0  ;;  %v2621_v50 = vpop.f32.mrb[88].mxu1 }
 0x1a8   :  { %v1453_v8 = vpop.f32.mrb[90].mxu0  ;;  %v2622_v49 = vpop.f32.mrb[89].mxu1 }
 0x1a9   :  { %v3822_v58 = vadd.f32 %v1453_v8, %v1381_v20  ;;  %v2769_v51 = vpop.f32.mrb[91].mxu0  ;;  %v3824_v59 = vadd.f32 %v2622_v49, %v2621_v50  ;;  %v2624_v63 = vpop.f32.mrb[90].mxu1 }
 0x1aa   :  { %v2625_v62 = vpop.f32.mrb[91].mxu1 }
 0x1ab   :  { %v3826_v11 = vadd.f32 %v2625_v62, %v2624_v63 }
 0x1ae   :  { %v1458_v18 = vpop.f32.mrb[92].mxu0 }
 0x1af   :  { %v3828_v27 = vadd.f32 %v1458_v18, %v1386_v12  ;;  %v2772_v28 = vpop.f32.mrb[93].mxu0  ;;  %v2627_v30 = vpop.f32.mrb[92].mxu1 }
 0x1b0   :  { %v1461_v46 = vpop.f32.mrb[94].mxu0  ;;  %v2628_v3 = vpop.f32.mrb[93].mxu1 }
 0x1b1   :  { %v3830_v31 = vadd.f32 %v1461_v46, %v1389_v16  ;;  %v2773_v25 = vpop.f32.mrb[95].mxu0  ;;  %v3832_v57 = vadd.f32 %v2628_v3, %v2627_v30  ;;  %v2630_v20 = vpop.f32.mrb[94].mxu1 }
 0x1b2   :  { %v2631_v29 = vpop.f32.mrb[95].mxu1 }
 0x1b3   :  { %v3834_v42 = vadd.f32 %v2631_v29, %v2630_v20 }
 0x1b6   :  { %v1466_v50 = vpop.f32.mrb[96].mxu0 }
 0x1b7   :  { %v3836_v8 = vadd.f32 %v1466_v50, %v1394_v39  ;;  %v2776_v49 = vpop.f32.mrb[97].mxu0  ;;  %v2633_v51 = vpop.f32.mrb[96].mxu1 }
 0x1b8   :  { %v1469_v12 = vpop.f32.mrb[98].mxu0  ;;  %v2634_v63 = vpop.f32.mrb[97].mxu1 }
 0x1b9   :  { %v3838_v62 = vadd.f32 %v1469_v12, %v1397_v41  ;;  %v2777_v18 = vpop.f32.mrb[99].mxu0  ;;  %v3840_v28 = vadd.f32 %v2634_v63, %v2633_v51  ;;  %v2636_v16 = vpop.f32.mrb[98].mxu1 }
 0x1ba   :  { %v2637_v46 = vpop.f32.mrb[99].mxu1 }
 0x1bb   :  { %v3842_v30 = vadd.f32 %v2637_v46, %v2636_v16  ;;  %v3848_v16 = vld [vmem:[%s3924_s2] ss:$0 sm:$0xff] }
 0x1be   :  { %v2655_v3 = vpop.f32.mrb[100].mxu0 }
 0x1bf   :  { %v2656_v25 = vpop.f32.mrb[101].mxu0  ;;  %v1824_v20 = vpop.f32.mrb[100].mxu1 }
 0x1c0   :  { %v2657_v29 = vadd.f32 %v2656_v25, %v2655_v3  ;;  %v2658_v1 = vpop.f32.mrb[102].mxu0  ;;  %v2788_v39 = vpop.f32.mrb[101].mxu1 }
 0x1c1   :  { %v2659_v50 = vpop.f32.mrb[103].mxu0  ;;  %v1827_v49 = vpop.f32.mrb[102].mxu1 }
 0x1c2   :  { %v2660_v19 = vadd.f32 %v2659_v50, %v2658_v1  ;;  %v1752_v22 = vadd.f32 %v2657_v29, %v2611_v60  ;;  %v2789_v2 = vpop.f32.mrb[103].mxu1 }
 0x1c4   :  { %v1825_v41 = vadd.f32 %v1824_v20, %v1752_v22  ;;  %v1755_v12 = vadd.f32 %v2660_v19, %v2614_v32 }
 0x1c6   :  { %v1873_v51 = vmax.f32 %v3807_v47, %v1825_v41  ;;  %v1828_v63 = vadd.f32 %v1827_v49, %v1755_v12  ;;  %v2661_v18 = vpop.f32.mrb[104].mxu0 }
 0x1c7   :  { %v2662_v46 = vpop.f32.mrb[105].mxu0  ;;  %v1832_v3 = vpop.f32.mrb[104].mxu1 }
 0x1c8   :  { %v1883_v25 = vmax.f32 %v1863_v4, %v1873_v51  ;;  %v1874_v1 = vmax.f32 %v3810_v38, %v1828_v63  ;;  %v2663_v2 = vadd.f32 %v2662_v46, %v2661_v18  ;;  %v2664_v22 = vpop.f32.mrb[106].mxu0  ;;  %v2792_v19 = vpop.f32.mrb[105].mxu1 }
 0x1c9   :  { %v2665_v60 = vpop.f32.mrb[107].mxu0  ;;  %v1835_v47 = vpop.f32.mrb[106].mxu1 }
 0x1ca   :  { %v1900_v32 = vadd.f32 %v3848_v16, %v1883_v25  ;;  %v1884_v20 = vmax.f32 %v1864_v55, %v1874_v1  ;;  %v2666_v29 = vadd.f32 %v2665_v60, %v2664_v22  ;;  %v1760_v39 = vadd.f32 %v2663_v2, %v3816_v17  ;;  %v2793_v50 = vpop.f32.mrb[107].mxu1 }
 0x1cc   :  { %v1920_v49 = vmul.f32 0.01, %v1900_v32  ;;  %v1901_v56 = vadd.f32 %v3848_v16, %v1884_v20  ;;  %v1833_v52 = vadd.f32 %v1832_v3, %v1760_v39  ;;  %vm1910_vm2 = vcmp.ge.f32.partialorder %v1900_v32, 0.0 }
 0x1cd   :  { %v1763_v4 = vadd.f32 %v2666_v29, %v3818_v7 }
 0x1ce   :  { %vm1911_vm3 = vcmp.ge.f32.partialorder %v1901_v56, 0.0  ;;  %v1921_v38 = vmul.f32 0.01, %v1901_v56  ;;  %v1875_v41 = vmax.f32 %v3812_v26, %v1833_v52  ;;  %v2667_v12 = vpop.f32.mrb[108].mxu0  ;;  %v1930_v6 = vsel %vm1910_vm2, %v1900_v32, %v1920_v49 }
 0x1cf   :  { %v1836_v51 = vadd.f32 %v1835_v47, %v1763_v4  ;;  %v2668_v63 = vpop.f32.mrb[109].mxu0  ;;  %v1840_v61 = vpop.f32.mrb[108].mxu1 }
 0x1d0   :  { %v1931_v55 = vsel %vm1911_vm3, %v1901_v56, %v1921_v38  ;;  %v1885_v17 = vmax.f32 %v1865_v9, %v1875_v41  ;;  %v2669_v18 = vadd.f32 %v2668_v63, %v2667_v12  ;;  %v2670_v46 = vpop.f32.mrb[110].mxu0  ;;  %v2796_v3 = vpop.f32.mrb[109].mxu1 }
 0x1d1   :  { %v2264_v25 = vpack.c.bf16 %v1931_v55, %v1930_v6  ;;  %v1876_v7 = vmax.f32 %v3814_v33, %v1836_v51  ;;  %v2671_v1 = vpop.f32.mrb[111].mxu0  ;;  %v1843_v2 = vpop.f32.mrb[110].mxu1 }
 0x1d2   :  { %v1902_v26 = vadd.f32 %v3848_v16, %v1885_v17  ;;  %v2672_v22 = vadd.f32 %v2671_v1, %v2670_v46  ;;  %v1768_v19 = vadd.f32 %v2669_v18, %v3824_v59  ;;  %v2797_v60 = vpop.f32.mrb[111].mxu1 }
 0x1d3   :  { %2265 = vst [vmem:[%s3925_s3] sm:$0xff] %v2264_v25   ;;  %v1886_v35 = vmax.f32 %v1866_v21, %v1876_v7 }
 0x1d4   :  { %v1841_v36 = vadd.f32 %v1840_v61, %v1768_v19  ;;  %v1771_v9 = vadd.f32 %v2672_v22, %v3826_v11  ;;  %v1922_v33 = vmul.f32 0.01, %v1902_v26  ;;  %vm1912_vm4 = vcmp.ge.f32.partialorder %v1902_v26, 0.0 }
 0x1d5   :  { %v1903_v47 = vadd.f32 %v3848_v16, %v1886_v35  ;;  %v3927_v19 = vmax.f32 %v3743_v23, %v3791_v54 }
 0x1d6   :  { %v1877_v32 = vmax.f32 %v3820_v45, %v1841_v36  ;;  %v1844_v20 = vadd.f32 %v1843_v2, %v1771_v9  ;;  %v2673_v59 = vpop.f32.mrb[112].mxu0  ;;  %v1932_v56 = vsel %vm1912_vm4, %v1902_v26, %v1922_v33 }
 0x1d7   :  { %vm1913_vm5 = vcmp.ge.f32.partialorder %v1903_v47, 0.0  ;;  %v1923_v29 = vmul.f32 0.01, %v1903_v47  ;;  %v2674_v39 = vpop.f32.mrb[113].mxu0  ;;  %v1848_v50 = vpop.f32.mrb[112].mxu1 }
 0x1d8   :  { %v1887_v14 = vmax.f32 %v1867_v44, %v1877_v32  ;;  %v1878_v13 = vmax.f32 %v3822_v58, %v1844_v20  ;;  %v2675_v21 = vadd.f32 %v2674_v39, %v2673_v59  ;;  %v2676_v11 = vpop.f32.mrb[114].mxu0  ;;  %v2800_v49 = vpop.f32.mrb[113].mxu1  ;;  %v3928_v20 = vmax.f32 %v3749_v48, %v3796_v10 }
 0x1d9   :  { %v1933_v52 = vsel %vm1913_vm5, %v1903_v47, %v1923_v29  ;;  %v2677_v4 = vpop.f32.mrb[115].mxu0  ;;  %v1851_v38 = vpop.f32.mrb[114].mxu1 }
 0x1da   :  { %v2269_v45 = vpack.c.bf16 %v1933_v52, %v1932_v56  ;;  %v1904_v41 = vadd.f32 %v3848_v16, %v1887_v14  ;;  %v1888_v12 = vmax.f32 %v1868_v53, %v1878_v13  ;;  %v2678_v51 = vadd.f32 %v2677_v4, %v2676_v11  ;;  %v2801_v63 = vpop.f32.mrb[115].mxu1 }
 0x1db   :  { %v1776_v24 = vadd.f32 %v2675_v21, %v3832_v57 }
 0x1dc   :  { %2286 = vst [vmem:[%s3925_s3 + $0x8] sm:$0xff] %v2269_v45   ;;  %v1924_v37 = vmul.f32 0.01, %v1904_v41  ;;  %v1905_v44 = vadd.f32 %v3848_v16, %v1888_v12  ;;  %v1779_v58 = vadd.f32 %v2678_v51, %v3834_v42  ;;  %vm1914_vm6 = vcmp.ge.f32.partialorder %v1904_v41, 0.0 }
 0x1dd   :  { %v1849_v61 = vadd.f32 %v1848_v50, %v1776_v24  ;;  %v3926_v42 = vmax.f32 %v3741_v15, %v3786_v0 }
 0x1de   :  { %vm1915_vm7 = vcmp.ge.f32.partialorder %v1905_v44, 0.0  ;;  %v1925_v6 = vmul.f32 0.01, %v1905_v44  ;;  %v1852_v55 = vadd.f32 %v1851_v38, %v1779_v58  ;;  %v2679_v34 = vpop.f32.mrb[116].mxu0  ;;  %v1934_v57 = vsel %vm1914_vm6, %v1904_v41, %v1924_v37 }
 0x1df   :  { %v1879_v40 = vmax.f32 %v3828_v27, %v1849_v61  ;;  %v2680_v53 = vpop.f32.mrb[117].mxu0  ;;  %v1856_v17 = vpop.f32.mrb[116].mxu1 }
 0x1e0   :  { %v1935_v18 = vsel %vm1915_vm7, %v1905_v44, %v1925_v6  ;;  %v1880_v46 = vmax.f32 %v3830_v31, %v1852_v55  ;;  %v2681_v3 = vadd.f32 %v2680_v53, %v2679_v34  ;;  %v2682_v25 = vpop.f32.mrb[118].mxu0  ;;  %v2804_v7 = vpop.f32.mrb[117].mxu1 }
 0x1e1   :  { %v2274_v1 = vpack.c.bf16 %v1935_v18, %v1934_v57  ;;  %v1889_v2 = vmax.f32 %v3926_v42, %v1879_v40  ;;  %v2683_v26 = vpop.f32.mrb[119].mxu0  ;;  %v1859_v22 = vpop.f32.mrb[118].mxu1 }
 0x1e2   :  { %v1890_v27 = vmax.f32 %v3927_v19, %v1880_v46  ;;  %v2684_v60 = vadd.f32 %v2683_v26, %v2682_v25  ;;  %v1784_v35 = vadd.f32 %v2681_v3, %v3840_v28  ;;  %v2805_v36 = vpop.f32.mrb[119].mxu1 }
 0x1e3   :  { %2287 = vst [vmem:[%s3925_s3 + $0x10] sm:$0xff] %v2274_v1   ;;  %v1906_v31 = vadd.f32 %v3848_v16, %v1889_v2 }
 0x1e4   :  { %v1907_v9 = vadd.f32 %v3848_v16, %v1890_v27  ;;  %v1857_v15 = vadd.f32 %v1856_v17, %v1784_v35  ;;  %v1787_v0 = vadd.f32 %v2684_v60, %v3842_v30  ;;  %v3929_v30 = vmax.f32 %v3751_v43, %v3801_v5 }
 0x1e5   :  { %vm1916_vm8 = vcmp.ge.f32.partialorder %v1906_v31, 0.0  ;;  %v1926_v33 = vmul.f32 0.01, %v1906_v31 }
 0x1e6   :  { %vm1917_vm9 = vcmp.ge.f32.partialorder %v1907_v9, 0.0  ;;  %v1927_v23 = vmul.f32 0.01, %v1907_v9  ;;  %v1881_v54 = vmax.f32 %v3836_v8, %v1857_v15  ;;  %v1860_v47 = vadd.f32 %v1859_v22, %v1787_v0 }
 0x1e7   :  { %v1936_v28 = vsel %vm1916_vm8, %v1906_v31, %v1926_v33 }
 0x1e8   :  { %v1937_v32 = vsel %vm1917_vm9, %v1907_v9, %v1927_v23  ;;  %v1891_v59 = vmax.f32 %v3928_v20, %v1881_v54  ;;  %v1882_v29 = vmax.f32 %v3838_v62, %v1860_v47 }
 0x1e9   :  { %v2279_v39 = vpack.c.bf16 %v1937_v32, %v1936_v28 }
 0x1ea   :  { %v1908_v50 = vadd.f32 %v3848_v16, %v1891_v59  ;;  %v1892_v14 = vmax.f32 %v3929_v30, %v1882_v29 }
 0x1eb   :  { %2288 = vst [vmem:[%s3925_s3 + $0x18] sm:$0xff] %v2279_v39  }
 0x1ec   :  { %v1928_v8 = vmul.f32 0.01, %v1908_v50  ;;  %v1909_v13 = vadd.f32 %v3848_v16, %v1892_v14  ;;  %vm1918_vm10 = vcmp.ge.f32.partialorder %v1908_v50, 0.0 }
 0x1ee   :  { %vm1919_vm11 = vcmp.ge.f32.partialorder %v1909_v13, 0.0  ;;  %v1929_v48 = vmul.f32 0.01, %v1909_v13  ;;  %v1938_v10 = vsel %vm1918_vm10, %v1908_v50, %v1928_v8 }
 0x1f0   :  { %v1939_v21 = vsel %vm1919_vm11, %v1909_v13, %v1929_v48 }
 0x1f1   :  { %v2284_v62 = vpack.c.bf16 %v1939_v21, %v1938_v10 }
 0x1f3   :  { %2289 = vst [vmem:[%s3925_s3 + $0x20] sm:$0xff] %v2284_v62  }

// kernel: variant2_forward.8
= control target key start
LH: loop header
LB: loop body
LE: loop exit
PB: predicated region body
PF: predicated region fallthrough
CT: control target
= control target key end

     0   :  { %s4187_s12 = smov 0   ;;  %s4189_s13 = smov 0   ;;  %s5374_s0 = inlined_call_operand.vmem [shape: bf16[4,32,1152], index: 0, kind: input, shape index: {}]   ;;  %s5375_s1 = inlined_call_operand.vmem [shape: bf16[1152,256], index: 1, kind: input, shape index: {}]   ;;  %s5376_s2 = inlined_call_operand.vmem [shape: f32[1,256], index: 2, kind: input, shape index: {}]   ;;  %s5377_s3 = inlined_call_operand.vmem [shape: bf16[32,256], index: 3, kind: output, shape index: {}]  }
   0x1   :  { %s4191_s14 = smov 0   ;;  %s4193_s15 = smov 0  }
   0x2   :  { %s4195_s16 = smov 0  }
   0x3 LB: > { %s22_s17 = sadd.s32 1, %s4161_s15  ;;  %s3049_s18 = sadd.s32 4294967295, %s4165_s16   ;;  %s4165_s16 = sphi %s4195_s16, %s13_s16   ;;  %s4161_s15 = sphi %s4193_s15, %s5456_s15   ;;  %s4157_s14 = sphi %s4191_s14, %s5455_s14   ;;  %s4153_s13 = sphi %s4189_s13, %s5454_s13   ;;  %s4149_s12 = sphi %s4187_s12, %s5453_s12  }
   0x4   : > { %p23_p0 = scmp.ge.s32.totalorder %s22_s17, 2  ;;  %p65_p1 = scmp.ne.s32.totalorder %s4153_s13, %s4149_s12 }
   0x5   : > { %p66_p2 = scmp.eq.s32.totalorder %s4165_s16, 0  ;;  %p123_p4 = scmp.eq.s32.totalorder %s3049_s18, 1 }
   0x6   : > { %s5458_s17 = smov (%p23_p0, %s22_s17), 0  ;;  %s58_s20 = sadd.s32 1, %s4153_s13 }
   0x7   : > { %p67_p3 = por %p66_p2, %p65_p1  ;;  %s55_s19 = ssub.s32 %s4161_s15, %s5458_s17 }
   0x8   : > { %p56_p5 = scmp.eq.s32.totalorder %s55_s19, 0  ;;  %p4222_p6 = por %p123_p4, %p65_p1 }
   0x9   : > { %p3053_p7 = scmp.ge.s32.totalorder %s4165_s16, 2 }
   0xa   : > { %s4227_s22 = scalar_select %p56_p5, %s4153_s13, %s58_s20  }
   0xb   : > { %155 = sbr.rel (%p3053_p7) target bundleno = 118 (0x76), region = 20 }
  0x12   : > { %158 = sbr.rel (!%p67_p3) target bundleno = 118 (0x76), region = 24  ;;  %s160_s23 = sand.u32 (%p67_p3), 1, %s4153_s13  }
  0x13   : > { %s3054_s24 = sshll.u32 (%p67_p3), %s4161_s15, 2  ;;  %s3853_s25 = smul.u32 (%p67_p3), 576, %s160_s23 }
  0x14   : > { %s4235_s28 = scalar_lea.vmem (%p67_p3), %s5375_s1, %s3054_s24 }
  0x15   : > { %v180_v0 = vld [vmem:[%s4235_s28] sm:$0xf] (%p67_p3)  ;;  %v182_v1 = vld [vmem:[%s4235_s28 + $0x8] sm:$0xf] (%p67_p3)  ;;  %v184_v2 = vld [vmem:[%s4235_s28 + $0x10] sm:$0xf] (%p67_p3) }
  0x16   : > { %v186_v3 = vld [vmem:[%s4235_s28 + $0x18] sm:$0xf] (%p67_p3)  ;;  %v188_v4 = vld [vmem:[%s4235_s28 + $0x20] sm:$0xf] (%p67_p3)  ;;  %s4242_s29 = scalar_lea.vmem (%p67_p3), [#allocation2], %s3853_s25 }
  0x17   : > { %181 = vst [vmem:[%s4242_s29] sm:$0xf] (%p67_p3), %v180_v0  ;;  %183 = vst [vmem:[%s4242_s29 + $0x4] sm:$0xf] (%p67_p3), %v182_v1  ;;  %v190_v5 = vld [vmem:[%s4235_s28 + $0x28] sm:$0xf] (%p67_p3) }
  0x18   : > { %185 = vst [vmem:[%s4242_s29 + $0x8] sm:$0xf] (%p67_p3), %v184_v2  ;;  %187 = vst [vmem:[%s4242_s29 + $0xc] sm:$0xf] (%p67_p3), %v186_v3  ;;  %v192_v6 = vld [vmem:[%s4235_s28 + $0x30] sm:$0xf] (%p67_p3) }
  0x19   : > { %189 = vst [vmem:[%s4242_s29 + $0x10] sm:$0xf] %v188_v4  ;;  %v194_v7 = vld [vmem:[%s4235_s28 + $0x38] sm:$0xf]  ;;  %191 = vst [vmem:[%s4242_s29 + $0x14] sm:$0xf] %v190_v5 }
  0x1a   : > { %193 = vst [vmem:[%s4242_s29 + $0x18] sm:$0xf] %v192_v6  ;;  %195 = vst [vmem:[%s4242_s29 + $0x1c] sm:$0xf] %v194_v7  ;;  %v196_v8 = vld [vmem:[%s4235_s28 + $0x40] sm:$0xf] }
  0x1b   : > { %v198_v9 = vld [vmem:[%s4235_s28 + $0x48] sm:$0xf]  ;;  %v200_v10 = vld [vmem:[%s4235_s28 + $0x50] sm:$0xf]  ;;  %197 = vst [vmem:[%s4242_s29 + $0x20] sm:$0xf] %v196_v8 }
  0x1c   : > { %199 = vst [vmem:[%s4242_s29 + $0x24] sm:$0xf] %v198_v9  ;;  %201 = vst [vmem:[%s4242_s29 + $0x28] sm:$0xf] %v200_v10  ;;  %v202_v11 = vld [vmem:[%s4235_s28 + $0x58] sm:$0xf] }
  0x1d   : > { %v204_v12 = vld [vmem:[%s4235_s28 + $0x60] sm:$0xf]  ;;  %v206_v13 = vld [vmem:[%s4235_s28 + $0x68] sm:$0xf]  ;;  %203 = vst [vmem:[%s4242_s29 + $0x2c] sm:$0xf] %v202_v11 }
  0x1e   : > { %205 = vst [vmem:[%s4242_s29 + $0x30] sm:$0xf] %v204_v12  ;;  %207 = vst [vmem:[%s4242_s29 + $0x34] sm:$0xf] %v206_v13  ;;  %v208_v14 = vld [vmem:[%s4235_s28 + $0x70] sm:$0xf] }
  0x1f   : > { %v210_v15 = vld [vmem:[%s4235_s28 + $0x78] sm:$0xf]  ;;  %v212_v16 = vld [vmem:[%s4235_s28 + $0x80] sm:$0xf]  ;;  %209 = vst [vmem:[%s4242_s29 + $0x38] sm:$0xf] %v208_v14 }
  0x20   : > { %211 = vst [vmem:[%s4242_s29 + $0x3c] sm:$0xf] %v210_v15  ;;  %213 = vst [vmem:[%s4242_s29 + $0x40] sm:$0xf] %v212_v16  ;;  %v214_v17 = vld [vmem:[%s4235_s28 + $0x88] sm:$0xf] }
  0x21   : > { %v216_v18 = vld [vmem:[%s4235_s28 + $0x90] sm:$0xf]  ;;  %v218_v19 = vld [vmem:[%s4235_s28 + $0x98] sm:$0xf]  ;;  %215 = vst [vmem:[%s4242_s29 + $0x44] sm:$0xf] %v214_v17 }
  0x22   : > { %217 = vst [vmem:[%s4242_s29 + $0x48] sm:$0xf] %v216_v18  ;;  %219 = vst [vmem:[%s4242_s29 + $0x4c] sm:$0xf] %v218_v19  ;;  %v220_v20 = vld [vmem:[%s4235_s28 + $0xa0] sm:$0xf] }
  0x23   : > { %v222_v21 = vld [vmem:[%s4235_s28 + $0xa8] sm:$0xf]  ;;  %v224_v22 = vld [vmem:[%s4235_s28 + $0xb0] sm:$0xf]  ;;  %221 = vst [vmem:[%s4242_s29 + $0x50] sm:$0xf] %v220_v20 }
  0x24   : > { %223 = vst [vmem:[%s4242_s29 + $0x54] sm:$0xf] %v222_v21  ;;  %225 = vst [vmem:[%s4242_s29 + $0x58] sm:$0xf] %v224_v22  ;;  %v226_v23 = vld [vmem:[%s4235_s28 + $0xb8] sm:$0xf] }
  0x25   : > { %v228_v24 = vld [vmem:[%s4235_s28 + $0xc0] sm:$0xf]  ;;  %v230_v25 = vld [vmem:[%s4235_s28 + $0xc8] sm:$0xf]  ;;  %227 = vst [vmem:[%s4242_s29 + $0x5c] sm:$0xf] %v226_v23 }
  0x26   : > { %229 = vst [vmem:[%s4242_s29 + $0x60] sm:$0xf] %v228_v24  ;;  %231 = vst [vmem:[%s4242_s29 + $0x64] sm:$0xf] %v230_v25  ;;  %v232_v26 = vld [vmem:[%s4235_s28 + $0xd0] sm:$0xf] }
  0x27   : > { %v234_v27 = vld [vmem:[%s4235_s28 + $0xd8] sm:$0xf]  ;;  %v236_v28 = vld [vmem:[%s4235_s28 + $0xe0] sm:$0xf]  ;;  %233 = vst [vmem:[%s4242_s29 + $0x68] sm:$0xf] %v232_v26 }
  0x28   : > { %235 = vst [vmem:[%s4242_s29 + $0x6c] sm:$0xf] %v234_v27  ;;  %237 = vst [vmem:[%s4242_s29 + $0x70] sm:$0xf] %v236_v28  ;;  %v238_v29 = vld [vmem:[%s4235_s28 + $0xe8] sm:$0xf] }
  0x29   : > { %v240_v30 = vld [vmem:[%s4235_s28 + $0xf0] sm:$0xf]  ;;  %v242_v31 = vld [vmem:[%s4235_s28 + $0xf8] sm:$0xf]  ;;  %239 = vst [vmem:[%s4242_s29 + $0x74] sm:$0xf] %v238_v29 }
  0x2a   : > { %241 = vst [vmem:[%s4242_s29 + $0x78] sm:$0xf] %v240_v30  ;;  %243 = vst [vmem:[%s4242_s29 + $0x7c] sm:$0xf] %v242_v31  ;;  %v244_v32 = vld [vmem:[%s4235_s28 + $0x100] sm:$0xf] }
  0x2b   : > { %v246_v33 = vld [vmem:[%s4235_s28 + $0x108] sm:$0xf]  ;;  %v248_v34 = vld [vmem:[%s4235_s28 + $0x110] sm:$0xf]  ;;  %245 = vst [vmem:[%s4242_s29 + $0x80] sm:$0xf] %v244_v32 }
  0x2c   : > { %247 = vst [vmem:[%s4242_s29 + $0x84] sm:$0xf] %v246_v33  ;;  %249 = vst [vmem:[%s4242_s29 + $0x88] sm:$0xf] %v248_v34  ;;  %v250_v35 = vld [vmem:[%s4235_s28 + $0x118] sm:$0xf] }
  0x2d   : > { %v252_v36 = vld [vmem:[%s4235_s28 + $0x120] sm:$0xf]  ;;  %v254_v37 = vld [vmem:[%s4235_s28 + $0x128] sm:$0xf]  ;;  %251 = vst [vmem:[%s4242_s29 + $0x8c] sm:$0xf] %v250_v35 }
  0x2e   : > { %253 = vst [vmem:[%s4242_s29 + $0x90] sm:$0xf] %v252_v36  ;;  %255 = vst [vmem:[%s4242_s29 + $0x94] sm:$0xf] %v254_v37  ;;  %v256_v38 = vld [vmem:[%s4235_s28 + $0x130] sm:$0xf] }
  0x2f   : > { %v258_v39 = vld [vmem:[%s4235_s28 + $0x138] sm:$0xf]  ;;  %v260_v40 = vld [vmem:[%s4235_s28 + $0x140] sm:$0xf]  ;;  %257 = vst [vmem:[%s4242_s29 + $0x98] sm:$0xf] %v256_v38 }
  0x30   : > { %259 = vst [vmem:[%s4242_s29 + $0x9c] sm:$0xf] %v258_v39  ;;  %261 = vst [vmem:[%s4242_s29 + $0xa0] sm:$0xf] %v260_v40  ;;  %v262_v41 = vld [vmem:[%s4235_s28 + $0x148] sm:$0xf] }
  0x31   : > { %v264_v42 = vld [vmem:[%s4235_s28 + $0x150] sm:$0xf]  ;;  %v266_v43 = vld [vmem:[%s4235_s28 + $0x158] sm:$0xf]  ;;  %263 = vst [vmem:[%s4242_s29 + $0xa4] sm:$0xf] %v262_v41 }
  0x32   : > { %265 = vst [vmem:[%s4242_s29 + $0xa8] sm:$0xf] %v264_v42  ;;  %267 = vst [vmem:[%s4242_s29 + $0xac] sm:$0xf] %v266_v43  ;;  %v268_v44 = vld [vmem:[%s4235_s28 + $0x160] sm:$0xf] }
  0x33   : > { %v270_v45 = vld [vmem:[%s4235_s28 + $0x168] sm:$0xf]  ;;  %v272_v46 = vld [vmem:[%s4235_s28 + $0x170] sm:$0xf]  ;;  %269 = vst [vmem:[%s4242_s29 + $0xb0] sm:$0xf] %v268_v44 }
  0x34   : > { %271 = vst [vmem:[%s4242_s29 + $0xb4] sm:$0xf] %v270_v45  ;;  %273 = vst [vmem:[%s4242_s29 + $0xb8] sm:$0xf] %v272_v46  ;;  %v274_v47 = vld [vmem:[%s4235_s28 + $0x178] sm:$0xf] }
  0x35   : > { %v276_v48 = vld [vmem:[%s4235_s28 + $0x180] sm:$0xf]  ;;  %v278_v49 = vld [vmem:[%s4235_s28 + $0x188] sm:$0xf]  ;;  %275 = vst [vmem:[%s4242_s29 + $0xbc] sm:$0xf] %v274_v47 }
  0x36   : > { %277 = vst [vmem:[%s4242_s29 + $0xc0] sm:$0xf] %v276_v48  ;;  %279 = vst [vmem:[%s4242_s29 + $0xc4] sm:$0xf] %v278_v49  ;;  %v280_v50 = vld [vmem:[%s4235_s28 + $0x190] sm:$0xf] }
  0x37   : > { %v282_v51 = vld [vmem:[%s4235_s28 + $0x198] sm:$0xf]  ;;  %v284_v52 = vld [vmem:[%s4235_s28 + $0x1a0] sm:$0xf]  ;;  %281 = vst [vmem:[%s4242_s29 + $0xc8] sm:$0xf] %v280_v50 }
  0x38   : > { %283 = vst [vmem:[%s4242_s29 + $0xcc] sm:$0xf] %v282_v51  ;;  %285 = vst [vmem:[%s4242_s29 + $0xd0] sm:$0xf] %v284_v52  ;;  %v286_v53 = vld [vmem:[%s4235_s28 + $0x1a8] sm:$0xf] }
  0x39   : > { %v288_v54 = vld [vmem:[%s4235_s28 + $0x1b0] sm:$0xf]  ;;  %v290_v55 = vld [vmem:[%s4235_s28 + $0x1b8] sm:$0xf]  ;;  %287 = vst [vmem:[%s4242_s29 + $0xd4] sm:$0xf] %v286_v53 }
  0x3a   : > { %289 = vst [vmem:[%s4242_s29 + $0xd8] sm:$0xf] %v288_v54  ;;  %291 = vst [vmem:[%s4242_s29 + $0xdc] sm:$0xf] %v290_v55  ;;  %v292_v56 = vld [vmem:[%s4235_s28 + $0x1c0] sm:$0xf] }
  0x3b   : > { %v294_v57 = vld [vmem:[%s4235_s28 + $0x1c8] sm:$0xf]  ;;  %v296_v58 = vld [vmem:[%s4235_s28 + $0x1d0] sm:$0xf]  ;;  %293 = vst [vmem:[%s4242_s29 + $0xe0] sm:$0xf] %v292_v56 }
  0x3c   : > { %295 = vst [vmem:[%s4242_s29 + $0xe4] sm:$0xf] %v294_v57  ;;  %297 = vst [vmem:[%s4242_s29 + $0xe8] sm:$0xf] %v296_v58  ;;  %v298_v59 = vld [vmem:[%s4235_s28 + $0x1d8] sm:$0xf] }
  0x3d   : > { %v300_v60 = vld [vmem:[%s4235_s28 + $0x1e0] sm:$0xf]  ;;  %v302_v61 = vld [vmem:[%s4235_s28 + $0x1e8] sm:$0xf]  ;;  %299 = vst [vmem:[%s4242_s29 + $0xec] sm:$0xf] %v298_v59 }
  0x3e   : > { %301 = vst [vmem:[%s4242_s29 + $0xf0] sm:$0xf] %v300_v60  ;;  %303 = vst [vmem:[%s4242_s29 + $0xf4] sm:$0xf] %v302_v61  ;;  %v304_v62 = vld [vmem:[%s4235_s28 + $0x1f0] sm:$0xf] }
  0x3f   : > { %v306_v63 = vld [vmem:[%s4235_s28 + $0x1f8] sm:$0xf]  ;;  %v308_v0 = vld [vmem:[%s4235_s28 + $0x200] sm:$0xf]  ;;  %305 = vst [vmem:[%s4242_s29 + $0xf8] sm:$0xf] %v304_v62 }
  0x40   : > { %307 = vst [vmem:[%s4242_s29 + $0xfc] sm:$0xf] %v306_v63  ;;  %309 = vst [vmem:[%s4242_s29 + $0x100] sm:$0xf] %v308_v0  ;;  %v310_v1 = vld [vmem:[%s4235_s28 + $0x208] sm:$0xf] }
  0x41   : > { %v312_v2 = vld [vmem:[%s4235_s28 + $0x210] sm:$0xf]  ;;  %v314_v3 = vld [vmem:[%s4235_s28 + $0x218] sm:$0xf]  ;;  %311 = vst [vmem:[%s4242_s29 + $0x104] sm:$0xf] %v310_v1 }
  0x42   : > { %313 = vst [vmem:[%s4242_s29 + $0x108] sm:$0xf] %v312_v2  ;;  %315 = vst [vmem:[%s4242_s29 + $0x10c] sm:$0xf] %v314_v3  ;;  %v316_v4 = vld [vmem:[%s4235_s28 + $0x220] sm:$0xf] }
  0x43   : > { %v318_v5 = vld [vmem:[%s4235_s28 + $0x228] sm:$0xf]  ;;  %v320_v6 = vld [vmem:[%s4235_s28 + $0x230] sm:$0xf]  ;;  %317 = vst [vmem:[%s4242_s29 + $0x110] sm:$0xf] %v316_v4 }
  0x44   : > { %319 = vst [vmem:[%s4242_s29 + $0x114] sm:$0xf] %v318_v5  ;;  %321 = vst [vmem:[%s4242_s29 + $0x118] sm:$0xf] %v320_v6  ;;  %v322_v7 = vld [vmem:[%s4235_s28 + $0x238] sm:$0xf] }
  0x45   : > { %v324_v8 = vld [vmem:[%s4235_s28 + $0x240] sm:$0xf]  ;;  %v326_v9 = vld [vmem:[%s4235_s28 + $0x248] sm:$0xf]  ;;  %323 = vst [vmem:[%s4242_s29 + $0x11c] sm:$0xf] %v322_v7 }
  0x46   : > { %325 = vst [vmem:[%s4242_s29 + $0x120] sm:$0xf] %v324_v8  ;;  %327 = vst [vmem:[%s4242_s29 + $0x124] sm:$0xf] %v326_v9  ;;  %v328_v10 = vld [vmem:[%s4235_s28 + $0x250] sm:$0xf] }
  0x47   : > { %v330_v11 = vld [vmem:[%s4235_s28 + $0x258] sm:$0xf]  ;;  %v332_v12 = vld [vmem:[%s4235_s28 + $0x260] sm:$0xf]  ;;  %329 = vst [vmem:[%s4242_s29 + $0x128] sm:$0xf] %v328_v10 }
  0x48   : > { %331 = vst [vmem:[%s4242_s29 + $0x12c] sm:$0xf] %v330_v11  ;;  %333 = vst [vmem:[%s4242_s29 + $0x130] sm:$0xf] %v332_v12  ;;  %v334_v13 = vld [vmem:[%s4235_s28 + $0x268] sm:$0xf] }
  0x49   : > { %v336_v14 = vld [vmem:[%s4235_s28 + $0x270] sm:$0xf]  ;;  %v338_v15 = vld [vmem:[%s4235_s28 + $0x278] sm:$0xf]  ;;  %335 = vst [vmem:[%s4242_s29 + $0x134] sm:$0xf] %v334_v13 }
  0x4a   : > { %337 = vst [vmem:[%s4242_s29 + $0x138] sm:$0xf] %v336_v14  ;;  %339 = vst [vmem:[%s4242_s29 + $0x13c] sm:$0xf] %v338_v15  ;;  %v340_v16 = vld [vmem:[%s4235_s28 + $0x280] sm:$0xf] }
  0x4b   : > { %v342_v17 = vld [vmem:[%s4235_s28 + $0x288] sm:$0xf]  ;;  %v344_v18 = vld [vmem:[%s4235_s28 + $0x290] sm:$0xf]  ;;  %341 = vst [vmem:[%s4242_s29 + $0x140] sm:$0xf] %v340_v16 }
  0x4c   : > { %343 = vst [vmem:[%s4242_s29 + $0x144] sm:$0xf] %v342_v17  ;;  %345 = vst [vmem:[%s4242_s29 + $0x148] sm:$0xf] %v344_v18  ;;  %v346_v19 = vld [vmem:[%s4235_s28 + $0x298] sm:$0xf] }
  0x4d   : > { %v348_v20 = vld [vmem:[%s4235_s28 + $0x2a0] sm:$0xf]  ;;  %v350_v21 = vld [vmem:[%s4235_s28 + $0x2a8] sm:$0xf]  ;;  %347 = vst [vmem:[%s4242_s29 + $0x14c] sm:$0xf] %v346_v19 }
  0x4e   : > { %349 = vst [vmem:[%s4242_s29 + $0x150] sm:$0xf] %v348_v20  ;;  %351 = vst [vmem:[%s4242_s29 + $0x154] sm:$0xf] %v350_v21  ;;  %v352_v22 = vld [vmem:[%s4235_s28 + $0x2b0] sm:$0xf] }
  0x4f   : > { %v354_v23 = vld [vmem:[%s4235_s28 + $0x2b8] sm:$0xf]  ;;  %v356_v24 = vld [vmem:[%s4235_s28 + $0x2c0] sm:$0xf]  ;;  %353 = vst [vmem:[%s4242_s29 + $0x158] sm:$0xf] %v352_v22 }
  0x50   : > { %355 = vst [vmem:[%s4242_s29 + $0x15c] sm:$0xf] %v354_v23  ;;  %357 = vst [vmem:[%s4242_s29 + $0x160] sm:$0xf] %v356_v24  ;;  %v358_v25 = vld [vmem:[%s4235_s28 + $0x2c8] sm:$0xf] }
  0x51   : > { %v360_v26 = vld [vmem:[%s4235_s28 + $0x2d0] sm:$0xf]  ;;  %v362_v27 = vld [vmem:[%s4235_s28 + $0x2d8] sm:$0xf]  ;;  %359 = vst [vmem:[%s4242_s29 + $0x164] sm:$0xf] %v358_v25 }
  0x52   : > { %361 = vst [vmem:[%s4242_s29 + $0x168] sm:$0xf] %v360_v26  ;;  %363 = vst [vmem:[%s4242_s29 + $0x16c] sm:$0xf] %v362_v27  ;;  %v364_v28 = vld [vmem:[%s4235_s28 + $0x2e0] sm:$0xf] }
  0x53   : > { %v366_v29 = vld [vmem:[%s4235_s28 + $0x2e8] sm:$0xf]  ;;  %v368_v30 = vld [vmem:[%s4235_s28 + $0x2f0] sm:$0xf]  ;;  %365 = vst [vmem:[%s4242_s29 + $0x170] sm:$0xf] %v364_v28 }
  0x54   : > { %367 = vst [vmem:[%s4242_s29 + $0x174] sm:$0xf] %v366_v29  ;;  %369 = vst [vmem:[%s4242_s29 + $0x178] sm:$0xf] %v368_v30  ;;  %v370_v31 = vld [vmem:[%s4235_s28 + $0x2f8] sm:$0xf] }
  0x55   : > { %v372_v32 = vld [vmem:[%s4235_s28 + $0x300] sm:$0xf]  ;;  %v374_v33 = vld [vmem:[%s4235_s28 + $0x308] sm:$0xf]  ;;  %371 = vst [vmem:[%s4242_s29 + $0x17c] sm:$0xf] %v370_v31 }
  0x56   : > { %373 = vst [vmem:[%s4242_s29 + $0x180] sm:$0xf] %v372_v32  ;;  %375 = vst [vmem:[%s4242_s29 + $0x184] sm:$0xf] %v374_v33  ;;  %v376_v34 = vld [vmem:[%s4235_s28 + $0x310] sm:$0xf] }
  0x57   : > { %v378_v35 = vld [vmem:[%s4235_s28 + $0x318] sm:$0xf]  ;;  %v380_v36 = vld [vmem:[%s4235_s28 + $0x320] sm:$0xf]  ;;  %377 = vst [vmem:[%s4242_s29 + $0x188] sm:$0xf] %v376_v34 }
  0x58   : > { %379 = vst [vmem:[%s4242_s29 + $0x18c] sm:$0xf] %v378_v35  ;;  %381 = vst [vmem:[%s4242_s29 + $0x190] sm:$0xf] %v380_v36  ;;  %v382_v37 = vld [vmem:[%s4235_s28 + $0x328] sm:$0xf] }
  0x59   : > { %v384_v38 = vld [vmem:[%s4235_s28 + $0x330] sm:$0xf]  ;;  %v386_v39 = vld [vmem:[%s4235_s28 + $0x338] sm:$0xf]  ;;  %383 = vst [vmem:[%s4242_s29 + $0x194] sm:$0xf] %v382_v37 }
  0x5a   : > { %385 = vst [vmem:[%s4242_s29 + $0x198] sm:$0xf] %v384_v38  ;;  %387 = vst [vmem:[%s4242_s29 + $0x19c] sm:$0xf] %v386_v39  ;;  %v388_v40 = vld [vmem:[%s4235_s28 + $0x340] sm:$0xf] }
  0x5b   : > { %v390_v41 = vld [vmem:[%s4235_s28 + $0x348] sm:$0xf]  ;;  %v392_v42 = vld [vmem:[%s4235_s28 + $0x350] sm:$0xf]  ;;  %389 = vst [vmem:[%s4242_s29 + $0x1a0] sm:$0xf] %v388_v40 }
  0x5c   : > { %391 = vst [vmem:[%s4242_s29 + $0x1a4] sm:$0xf] %v390_v41  ;;  %393 = vst [vmem:[%s4242_s29 + $0x1a8] sm:$0xf] %v392_v42  ;;  %v394_v43 = vld [vmem:[%s4235_s28 + $0x358] sm:$0xf] }
  0x5d   : > { %v396_v44 = vld [vmem:[%s4235_s28 + $0x360] sm:$0xf]  ;;  %v398_v45 = vld [vmem:[%s4235_s28 + $0x368] sm:$0xf]  ;;  %395 = vst [vmem:[%s4242_s29 + $0x1ac] sm:$0xf] %v394_v43 }
  0x5e   : > { %397 = vst [vmem:[%s4242_s29 + $0x1b0] sm:$0xf] %v396_v44  ;;  %399 = vst [vmem:[%s4242_s29 + $0x1b4] sm:$0xf] %v398_v45  ;;  %v400_v46 = vld [vmem:[%s4235_s28 + $0x370] sm:$0xf] }
  0x5f   : > { %v402_v47 = vld [vmem:[%s4235_s28 + $0x378] sm:$0xf]  ;;  %v404_v48 = vld [vmem:[%s4235_s28 + $0x380] sm:$0xf]  ;;  %401 = vst [vmem:[%s4242_s29 + $0x1b8] sm:$0xf] %v400_v46 }
  0x60   : > { %403 = vst [vmem:[%s4242_s29 + $0x1bc] sm:$0xf] %v402_v47  ;;  %405 = vst [vmem:[%s4242_s29 + $0x1c0] sm:$0xf] %v404_v48  ;;  %v406_v49 = vld [vmem:[%s4235_s28 + $0x388] sm:$0xf] }
  0x61   : > { %v408_v50 = vld [vmem:[%s4235_s28 + $0x390] sm:$0xf]  ;;  %v410_v51 = vld [vmem:[%s4235_s28 + $0x398] sm:$0xf]  ;;  %407 = vst [vmem:[%s4242_s29 + $0x1c4] sm:$0xf] %v406_v49 }
  0x62   : > { %409 = vst [vmem:[%s4242_s29 + $0x1c8] sm:$0xf] %v408_v50  ;;  %411 = vst [vmem:[%s4242_s29 + $0x1cc] sm:$0xf] %v410_v51  ;;  %v412_v52 = vld [vmem:[%s4235_s28 + $0x3a0] sm:$0xf] }
  0x63   : > { %v414_v53 = vld [vmem:[%s4235_s28 + $0x3a8] sm:$0xf]  ;;  %v416_v54 = vld [vmem:[%s4235_s28 + $0x3b0] sm:$0xf]  ;;  %413 = vst [vmem:[%s4242_s29 + $0x1d0] sm:$0xf] %v412_v52 }
  0x64   : > { %415 = vst [vmem:[%s4242_s29 + $0x1d4] sm:$0xf] %v414_v53  ;;  %417 = vst [vmem:[%s4242_s29 + $0x1d8] sm:$0xf] %v416_v54  ;;  %v418_v55 = vld [vmem:[%s4235_s28 + $0x3b8] sm:$0xf] }
  0x65   : > { %v420_v56 = vld [vmem:[%s4235_s28 + $0x3c0] sm:$0xf]  ;;  %v422_v57 = vld [vmem:[%s4235_s28 + $0x3c8] sm:$0xf]  ;;  %419 = vst [vmem:[%s4242_s29 + $0x1dc] sm:$0xf] %v418_v55 }
  0x66   : > { %421 = vst [vmem:[%s4242_s29 + $0x1e0] sm:$0xf] %v420_v56  ;;  %423 = vst [vmem:[%s4242_s29 + $0x1e4] sm:$0xf] %v422_v57  ;;  %v424_v58 = vld [vmem:[%s4235_s28 + $0x3d0] sm:$0xf] }
  0x67   : > { %v426_v59 = vld [vmem:[%s4235_s28 + $0x3d8] sm:$0xf]  ;;  %v428_v60 = vld [vmem:[%s4235_s28 + $0x3e0] sm:$0xf]  ;;  %425 = vst [vmem:[%s4242_s29 + $0x1e8] sm:$0xf] %v424_v58 }
  0x68   : > { %427 = vst [vmem:[%s4242_s29 + $0x1ec] sm:$0xf] %v426_v59  ;;  %429 = vst [vmem:[%s4242_s29 + $0x1f0] sm:$0xf] %v428_v60  ;;  %v430_v61 = vld [vmem:[%s4235_s28 + $0x3e8] sm:$0xf] }
  0x69   : > { %v432_v62 = vld [vmem:[%s4235_s28 + $0x3f0] sm:$0xf]  ;;  %v434_v63 = vld [vmem:[%s4235_s28 + $0x3f8] sm:$0xf]  ;;  %431 = vst [vmem:[%s4242_s29 + $0x1f4] sm:$0xf] %v430_v61 }
  0x6a   : > { %433 = vst [vmem:[%s4242_s29 + $0x1f8] sm:$0xf] %v432_v62  ;;  %435 = vst [vmem:[%s4242_s29 + $0x1fc] sm:$0xf] %v434_v63  ;;  %v436_v0 = vld [vmem:[%s4235_s28 + $0x400] sm:$0xf] }
  0x6b   : > { %v438_v1 = vld [vmem:[%s4235_s28 + $0x408] sm:$0xf]  ;;  %v440_v2 = vld [vmem:[%s4235_s28 + $0x410] sm:$0xf]  ;;  %437 = vst [vmem:[%s4242_s29 + $0x200] sm:$0xf] %v436_v0 }
  0x6c   : > { %439 = vst [vmem:[%s4242_s29 + $0x204] sm:$0xf] %v438_v1  ;;  %441 = vst [vmem:[%s4242_s29 + $0x208] sm:$0xf] %v440_v2  ;;  %v442_v3 = vld [vmem:[%s4235_s28 + $0x418] sm:$0xf] }
  0x6d   : > { %v444_v4 = vld [vmem:[%s4235_s28 + $0x420] sm:$0xf]  ;;  %v446_v5 = vld [vmem:[%s4235_s28 + $0x428] sm:$0xf]  ;;  %443 = vst [vmem:[%s4242_s29 + $0x20c] sm:$0xf] %v442_v3 }
  0x6e   : > { %445 = vst [vmem:[%s4242_s29 + $0x210] sm:$0xf] %v444_v4  ;;  %447 = vst [vmem:[%s4242_s29 + $0x214] sm:$0xf] %v446_v5  ;;  %v448_v6 = vld [vmem:[%s4235_s28 + $0x430] sm:$0xf] }
  0x6f   : > { %v450_v7 = vld [vmem:[%s4235_s28 + $0x438] sm:$0xf]  ;;  %v452_v8 = vld [vmem:[%s4235_s28 + $0x440] sm:$0xf]  ;;  %449 = vst [vmem:[%s4242_s29 + $0x218] sm:$0xf] %v448_v6 }
  0x70   : > { %451 = vst [vmem:[%s4242_s29 + $0x21c] sm:$0xf] %v450_v7  ;;  %453 = vst [vmem:[%s4242_s29 + $0x220] sm:$0xf] %v452_v8  ;;  %v454_v9 = vld [vmem:[%s4235_s28 + $0x448] sm:$0xf] }
  0x71   : > { %v456_v10 = vld [vmem:[%s4235_s28 + $0x450] sm:$0xf]  ;;  %v458_v11 = vld [vmem:[%s4235_s28 + $0x458] sm:$0xf]  ;;  %455 = vst [vmem:[%s4242_s29 + $0x224] sm:$0xf] %v454_v9 }
  0x72   : > { %457 = vst [vmem:[%s4242_s29 + $0x228] sm:$0xf] %v456_v10  ;;  %459 = vst [vmem:[%s4242_s29 + $0x22c] sm:$0xf] %v458_v11  ;;  %v460_v12 = vld [vmem:[%s4235_s28 + $0x460] sm:$0xf] }
  0x73   : > { %v462_v13 = vld [vmem:[%s4235_s28 + $0x468] sm:$0xf]  ;;  %v464_v14 = vld [vmem:[%s4235_s28 + $0x470] sm:$0xf]  ;;  %461 = vst [vmem:[%s4242_s29 + $0x230] sm:$0xf] %v460_v12 }
  0x74   : > { %463 = vst [vmem:[%s4242_s29 + $0x234] sm:$0xf] %v462_v13  ;;  %465 = vst [vmem:[%s4242_s29 + $0x238] sm:$0xf] %v464_v14  ;;  %v466_v15 = vld [vmem:[%s4235_s28 + $0x478] sm:$0xf] }
  0x75   : > { %467 = vst [vmem:[%s4242_s29 + $0x23c] sm:$0xf] %v466_v15 }
  0x76 PF: > { %p3055_p8 = scmp.ge.s32.totalorder %s4165_s16, 1  ;;  %p783_p9 = scmp.lt.s32.totalorder %s4165_s16, 3 }
  0x78   : > { %p784_p10 = pnand %p3055_p8, %p783_p9 }
  0x7a   : > { %787 = sbr.rel (%p784_p10) target bundleno = 705 (0x2c1), region = 69 }
  0x81   : > { %s790_s30 = sand.u32 1, %s4149_s12   ;;  %v3929_v16 = vld [vmem:[%s5374_s0 + $0x4] ss:$36 sps:$4 sm:$0xff]   ;;  %v3932_v17 = vld [vmem:[%s5374_s0 + $0xc] ss:$36 sps:$4 sm:$0xff]   ;;  %p828_p11 = scmp.lt.s32.totalorder %s4157_s14, 1 }
  0x82   : > { %s3854_s4 = smul.u32 576, %s790_s30  ;;  %1553 = vmatprep.mubr.bf16.mxu0 %v3929_v16  ;;  %1602 = vmatprep.mubr.bf16.mxu1 %v3932_v17  ;;  %v3927_v48 = vld [vmem:[%s5374_s0] ss:$36 sps:$4 sm:$0xff]   ;;  %v3930_v50 = vld [vmem:[%s5374_s0 + $0x8] ss:$36 sps:$4 sm:$0xff]   ;;  %s3056_s25 = sshll.u32 %s790_s30, 4 }
  0x83   : > { %v3955_v52 = vld [vmem:[%s5374_s0 + $0x4c] ss:$36 sps:$4 sm:$0xff]   ;;  %v3957_v11 = vld [vmem:[%s5374_s0 + $0x54] ss:$36 sps:$4 sm:$0xff]   ;;  %s820_s26 = scalar_lea.vmem [#allocation3], %s3056_s25  ;;  %s3267_s12 = sshll.u32 (%p4222_p6), %s4157_s14, 2 }
  0x84   : > { %s4538_s9 = scalar_lea.vmem [#allocation2], %s3854_s4  ;;  %v3961_v14 = vld [vmem:[%s5374_s0 + $0x48] ss:$36 sps:$4 sm:$0xff]   ;;  %v3962_v15 = vld [vmem:[%s5374_s0 + $0x50] ss:$36 sps:$4 sm:$0xff]   ;;  %s2906_s28 = scalar_lea.vmem (%p4222_p6), %s5377_s3, %s3267_s12 }
  0x85   : > { %v4541_v18 = vld [vmem:[%s4538_s9 + $0x40] sm:$0xff]   ;;  %v4556_v22 = vld [vmem:[%s4538_s9 + $0x48] sm:$0xff]   ;;  %v4572_v26 = vld [vmem:[%s4538_s9 + $0x50] sm:$0xff]  }
  0x86   : > { %v4544_v19 = vld [vmem:[%s4538_s9 + $0xc0] sm:$0xff]   ;;  %3285 = vmatprep.subr.bf16.mxu0 %v4541_v18  ;;  %5413 = vst [vmem:[#allocation4_spill] sm:$0xff] %v4556_v22  ;;  %v4560_v23 = vld [vmem:[%s4538_s9 + $0xc8] sm:$0xff]   ;;  %5414 = vst [vmem:[#allocation5_spill] sm:$0xff] %v4572_v26 }
  0x87   : > { %v4548_v20 = vld [vmem:[%s4538_s9] sm:$0xff]   ;;  %3313 = vmatprep.subr.bf16.mxu1 %v4544_v19  ;;  %v4564_v24 = vld [vmem:[%s4538_s9 + $0x8] sm:$0xff]   ;;  %v4576_v27 = vld [vmem:[%s4538_s9 + $0xd0] sm:$0xff]  }
  0x88   : > { %v4552_v21 = vld [vmem:[%s4538_s9 + $0x80] sm:$0xff]   ;;  %3286 = vmatpush3.bf16.msra.mxu0 %v4548_v20  ;;  %v4568_v25 = vld [vmem:[%s4538_s9 + $0x88] sm:$0xff]   ;;  %v4580_v28 = vld [vmem:[%s4538_s9 + $0x10] sm:$0xff]  }
  0x89   : > { %3314 = vmatpush3.bf16.msra.mxu1 %v4552_v21  ;;  %3287 = vmatprep.subr.bf16.mxu0 %v4556_v22  ;;  %v4584_v29 = vld [vmem:[%s4538_s9 + $0x90] sm:$0xff]   ;;  %v4588_v30 = vld [vmem:[%s4538_s9 + $0x58] sm:$0xff]   ;;  %v4604_v34 = vld [vmem:[%s4538_s9 + $0x60] sm:$0xff]  }
  0x8a   : > { %3315 = vmatprep.subr.bf16.mxu1 %v4560_v23  ;;  %v4592_v31 = vld [vmem:[%s4538_s9 + $0xd8] sm:$0xff]   ;;  %v4608_v35 = vld [vmem:[%s4538_s9 + $0xe0] sm:$0xff]   ;;  %v4620_v38 = vld [vmem:[%s4538_s9 + $0x68] sm:$0xff]  }
  0x8b   : > { %v4596_v32 = vld [vmem:[%s4538_s9 + $0x18] sm:$0xff]   ;;  %v4612_v36 = vld [vmem:[%s4538_s9 + $0x20] sm:$0xff]   ;;  %v4624_v39 = vld [vmem:[%s4538_s9 + $0xe8] sm:$0xff]  }
  0x8c   : > { %3288 = vmatpush3.bf16.msra.mxu0 %v4564_v24  ;;  %v4600_v33 = vld [vmem:[%s4538_s9 + $0x98] sm:$0xff]   ;;  %v4616_v37 = vld [vmem:[%s4538_s9 + $0xa0] sm:$0xff]   ;;  %v4628_v40 = vld [vmem:[%s4538_s9 + $0x28] sm:$0xff]  }
  0x8d   : > { %3316 = vmatpush3.bf16.msra.mxu1 %v4568_v25  ;;  %3289 = vmatprep.subr.bf16.mxu0 %v4572_v26  ;;  %5415 = vst [vmem:[#allocation6_spill] sm:$0xff] %v4628_v40  ;;  %v4632_v41 = vld [vmem:[%s4538_s9 + $0xa8] sm:$0xff]   ;;  %v4636_v42 = vld [vmem:[%s4538_s9 + $0x70] sm:$0xff]   ;;  %v4652_v46 = vld [vmem:[%s4538_s9 + $0x78] sm:$0xff]  }
  0x8e   : > { %3317 = vmatprep.subr.bf16.mxu1 %v4576_v27  ;;  %v4640_v43 = vld [vmem:[%s4538_s9 + $0xf0] sm:$0xff]   ;;  %5417 = vst [vmem:[#allocation8_spill] sm:$0xff] %v4652_v46  ;;  %v4656_v47 = vld [vmem:[%s4538_s9 + $0xf8] sm:$0xff]   ;;  %v4677_v53 = vld [vmem:[%s4538_s9 + $0x140] sm:$0xff]  }
  0x8f   : > { %v4644_v44 = vld [vmem:[%s4538_s9 + $0x30] sm:$0xff]   ;;  %v4663_v49 = vld [vmem:[%s4538_s9 + $0x38] sm:$0xff]   ;;  %v4681_v54 = vld [vmem:[%s4538_s9 + $0x1c0] sm:$0xff]  }
  0x90   : > { %3290 = vmatpush3.bf16.msra.mxu0 %v4580_v28  ;;  %5416 = vst [vmem:[#allocation7_spill] sm:$0xff] %v4644_v44  ;;  %v4648_v45 = vld [vmem:[%s4538_s9 + $0xb0] sm:$0xff]   ;;  %5418 = vst [vmem:[#allocation9_spill] sm:$0xff] %v4663_v49  ;;  %v4670_v51 = vld [vmem:[%s4538_s9 + $0xb8] sm:$0xff]  }
  0x91   : > { %3318 = vmatpush3.bf16.msra.mxu1 %v4584_v29  ;;  %3291 = vmatprep.subr.bf16.mxu0 %v4588_v30  ;;  %v4685_v55 = vld [vmem:[%s4538_s9 + $0x100] sm:$0xff]   ;;  %v4693_v57 = vld [vmem:[%s4538_s9 + $0x148] sm:$0xff]   ;;  %v4709_v61 = vld [vmem:[%s4538_s9 + $0x150] sm:$0xff]  }
  0x92   : > { %3319 = vmatprep.subr.bf16.mxu1 %v4592_v31  ;;  %v4689_v56 = vld [vmem:[%s4538_s9 + $0x180] sm:$0xff]   ;;  %v4697_v58 = vld [vmem:[%s4538_s9 + $0x1c8] sm:$0xff]   ;;  %v4713_v62 = vld [vmem:[%s4538_s9 + $0x1d0] sm:$0xff]  }
  0x93   : > { %v4701_v59 = vld [vmem:[%s4538_s9 + $0x108] sm:$0xff]   ;;  %v4717_v63 = vld [vmem:[%s4538_s9 + $0x110] sm:$0xff]   ;;  %v4725_v1 = vld [vmem:[%s4538_s9 + $0x158] sm:$0xff]  }
  0x94   : > { %3292 = vmatpush3.bf16.msra.mxu0 %v4596_v32  ;;  %v4705_v60 = vld [vmem:[%s4538_s9 + $0x188] sm:$0xff]   ;;  %v4721_v0 = vld [vmem:[%s4538_s9 + $0x190] sm:$0xff]   ;;  %v4729_v2 = vld [vmem:[%s4538_s9 + $0x1d8] sm:$0xff]  }
  0x95   : > { %3320 = vmatpush3.bf16.msra.mxu1 %v4600_v33  ;;  %3293 = vmatprep.subr.bf16.mxu0 %v4604_v34  ;;  %v4733_v3 = vld [vmem:[%s4538_s9 + $0x118] sm:$0xff]   ;;  %v4741_v5 = vld [vmem:[%s4538_s9 + $0x160] sm:$0xff]   ;;  %v4757_v9 = vld [vmem:[%s4538_s9 + $0x168] sm:$0xff]  }
  0x96   : > { %3321 = vmatprep.subr.bf16.mxu1 %v4608_v35  ;;  %v4737_v4 = vld [vmem:[%s4538_s9 + $0x198] sm:$0xff]   ;;  %v4745_v6 = vld [vmem:[%s4538_s9 + $0x1e0] sm:$0xff]   ;;  %v4761_v10 = vld [vmem:[%s4538_s9 + $0x1e8] sm:$0xff]  }
  0x97   : > { %v4749_v7 = vld [vmem:[%s4538_s9 + $0x120] sm:$0xff]   ;;  %5420 = vst [vmem:[#allocation11_spill] sm:$0xff] %v4761_v10  ;;  %v4769_v12 = vld [vmem:[%s4538_s9 + $0x128] sm:$0xff]   ;;  %v4783_v16 = vld [vmem:[%s4538_s9 + $0x170] sm:$0xff]  }
  0x98   : > { %3294 = vmatpush3.bf16.msra.mxu0 %v4612_v36  ;;  %v4753_v8 = vld [vmem:[%s4538_s9 + $0x1a0] sm:$0xff]   ;;  %v4772_v13 = vld [vmem:[%s4538_s9 + $0x1a8] sm:$0xff]   ;;  %v4786_v17 = vld [vmem:[%s4538_s9 + $0x1f0] sm:$0xff]  }
  0x99   : > { %3322 = vmatpush3.bf16.msra.mxu1 %v4616_v37  ;;  %3295 = vmatprep.subr.bf16.mxu0 %v4620_v38  ;;  %5419 = vst [vmem:[#allocation10_spill] sm:$0xff] %v4753_v8  ;;  %5421 = vst [vmem:[#allocation12_spill] sm:$0xff] %v4772_v13 }
  0x9a   : > { %3323 = vmatprep.subr.bf16.mxu1 %v4624_v39  ;;  %5422 = vst [vmem:[#allocation13_spill] sm:$0xff] %v4786_v17 }
  0x9c   : > { %3296 = vmatpush3.bf16.msra.mxu0 %v4628_v40 }
  0x9d   : > { %3324 = vmatpush3.bf16.msra.mxu1 %v4632_v41  ;;  %3297 = vmatprep.subr.bf16.mxu0 %v4636_v42 }
  0x9e   : > { %3325 = vmatprep.subr.bf16.mxu1 %v4640_v43 }
  0xa0   : > { %3298 = vmatpush3.bf16.msra.mxu0 %v4644_v44 }
  0xa1   : > { %3326 = vmatpush3.bf16.msra.mxu1 %v4648_v45  ;;  %3299 = vmatprep.subr.bf16.mxu0 %v4652_v46 }
  0xa2   : > { %3327 = vmatprep.subr.bf16.mxu1 %v4656_v47 }
  0xa4   : > { %3300 = vmatpush3.bf16.msra.mxu0 %v4663_v49 }
  0xa5   : > { %3328 = vmatpush3.bf16.msra.mxu1 %v4670_v51  ;;  %3341 = vmatprep.subr.bf16.mxu0 %v4677_v53 }
  0xa6   : > { %3369 = vmatprep.subr.bf16.mxu1 %v4681_v54 }
  0xa7   : > { %1554 = vmatmul.mubr.bf16.vlgmr.msra.gmra.mrb[0].mxu0 %v3927_v48  ;;  %v4790_v48 = vld [vmem:[%s4538_s9 + $0x130] sm:$0xff]  }
  0xa8   : > { %1603 = vmatmul.mubr.bf16.vlgmr.msra.gmra.mrb[0].mxu1 %v3930_v50  ;;  %3342 = vmatpush3.bf16.msra.mxu0 %v4685_v55  ;;  %v4794_v50 = vld [vmem:[%s4538_s9 + $0x1b0] sm:$0xff]  }
  0xa9   : > { %3370 = vmatpush3.bf16.msra.mxu1 %v4689_v56  ;;  %1561 = vmatprep.mubr.bf16.mxu0 %v3955_v52  ;;  %5423 = vst [vmem:[#allocation14_spill] sm:$0xff] %v4794_v50  ;;  %v4798_v52 = vld [vmem:[%s4538_s9 + $0x178] sm:$0xff]  }
  0xaa   : > { %3343 = vmatprep.subr.bf16.mxu0 %v4693_v57  ;;  %3371 = vmatprep.subr.bf16.mxu1 %v4697_v58 }
  0xab   : > { %1610 = vmatprep.mubr.bf16.mxu1 %v3957_v11  ;;  %v4802_v11 = vld [vmem:[%s4538_s9 + $0x1f8] sm:$0xff]  }
  0xac   : > { %3344 = vmatpush3.bf16.msra.mxu0 %v4701_v59  ;;  %5424 = vst [vmem:[#allocation15_spill] sm:$0xff] %v4802_v11 }
  0xad   : > { %3372 = vmatpush3.bf16.msra.mxu1 %v4705_v60  ;;  %3345 = vmatprep.subr.bf16.mxu0 %v4709_v61 }
  0xae   : > { %3373 = vmatprep.subr.bf16.mxu1 %v4713_v62 }
  0xaf   : > { %1562 = vmatmul.mubr.bf16.gmra.mrb[4].mxu0 %v3961_v14  ;;  %v4806_v14 = vld [vmem:[%s4538_s9 + $0x138] sm:$0xff]  }
  0xb0   : > { %3346 = vmatpush3.bf16.msra.mxu0 %v4717_v63  ;;  %1611 = vmatmul.mubr.bf16.gmra.mrb[4].mxu1 %v3962_v15  ;;  %5425 = vst [vmem:[#allocation16_spill] sm:$0xff] %v4806_v14  ;;  %v4810_v15 = vld [vmem:[%s4538_s9 + $0x1b8] sm:$0xff]  }
  0xb1   : > { %3374 = vmatpush3.bf16.msra.mxu1 %v4721_v0  ;;  %3347 = vmatprep.subr.bf16.mxu0 %v4725_v1  ;;  %5426 = vst [vmem:[#allocation17_spill] sm:$0xff] %v4810_v15 }
  0xb2   : > { %3375 = vmatprep.subr.bf16.mxu1 %v4729_v2 }
  0xb4   : > { %3348 = vmatpush3.bf16.msra.mxu0 %v4733_v3 }
  0xb5   : > { %3376 = vmatpush3.bf16.msra.mxu1 %v4737_v4  ;;  %3349 = vmatprep.subr.bf16.mxu0 %v4741_v5 }
  0xb6   : > { %3377 = vmatprep.subr.bf16.mxu1 %v4745_v6 }
  0xb8   : > { %3350 = vmatpush3.bf16.msra.mxu0 %v4749_v7 }
  0xb9   : > { %3378 = vmatpush3.bf16.msra.mxu1 %v4753_v8  ;;  %3351 = vmatprep.subr.bf16.mxu0 %v4757_v9  ;;  %v4831_v8 = vld [vmem:[%s4538_s9 + $0x208] sm:$0xff]  }
  0xba   : > { %3379 = vmatprep.subr.bf16.mxu1 %v4761_v10  ;;  %v4827_v10 = vld [vmem:[%s4538_s9 + $0x200] sm:$0xff]   ;;  %5427 = vst [vmem:[#allocation18_spill] sm:$0xff] %v4831_v8 }
  0xbc   : > { %3352 = vmatpush3.bf16.msra.mxu0 %v4769_v12 }
  0xbd   : > { %3380 = vmatpush3.bf16.msra.mxu1 %v4772_v13  ;;  %3353 = vmatprep.subr.bf16.mxu0 %v4783_v16  ;;  %v3974_v13 = vld [vmem:[%s5374_s0 + $0x18] ss:$36 sps:$4 sm:$0xff]  }
  0xbe   : > { %3381 = vmatprep.subr.bf16.mxu1 %v4786_v17  ;;  %v3971_v17 = vld [vmem:[%s5374_s0 + $0x10] ss:$36 sps:$4 sm:$0xff]  }
  0xc0   : > { %3354 = vmatpush3.bf16.msra.mxu0 %v4790_v48 }
  0xc1   : > { %3382 = vmatpush3.bf16.msra.mxu1 %v4794_v50  ;;  %3355 = vmatprep.subr.bf16.mxu0 %v4798_v52  ;;  %v3973_v50 = vld [vmem:[%s5374_s0 + $0x14] ss:$36 sps:$4 sm:$0xff]  }
  0xc2   : > { %3383 = vmatprep.subr.bf16.mxu1 %v4802_v11  ;;  %v3976_v11 = vld [vmem:[%s5374_s0 + $0x1c] ss:$36 sps:$4 sm:$0xff]   ;;  %1651 = vmatprep.mubr.bf16.mxu0 %v3973_v50 }
  0xc3   : > { %1700 = vmatprep.mubr.bf16.mxu1 %v3976_v11  ;;  %v3981_v50 = vld [vmem:[%s5374_s0 + $0x58] ss:$36 sps:$4 sm:$0xff]   ;;  %v3985_v11 = vld [vmem:[%s5374_s0 + $0x60] ss:$36 sps:$4 sm:$0xff]  }
  0xc4   : > { %3356 = vmatpush3.bf16.msra.mxu0 %v4806_v14 }
  0xc5   : > { %3384 = vmatpush3.bf16.msra.mxu1 %v4810_v15  ;;  %3773 = vmatprep.subr.bf16.mxu0 %v4827_v10  ;;  %v3979_v15 = vld [vmem:[%s5374_s0 + $0x5c] ss:$36 sps:$4 sm:$0xff]  }
  0xc6   : > { %3407 = vmatprep.subr.bf16.mxu1 %v4541_v18 }
  0xc7   : > { %1652 = vmatmul.mubr.bf16.vlgmr.msra.gmra.mrb[8].mxu0 %v3971_v17  ;;  %v4842_v17 = vld [vmem:[%s4538_s9 + $0x210] sm:$0xff]  }
  0xc8   : > { %1701 = vmatmul.mubr.bf16.vlgmr.msra.gmra.mrb[8].mxu1 %v3974_v13  ;;  %3774 = vmatpush3.bf16.msra.mxu0 %v4827_v10  ;;  %5428 = vst [vmem:[#allocation19_spill] sm:$0xff] %v4842_v17  ;;  %v3983_v13 = vld [vmem:[%s5374_s0 + $0x64] ss:$36 sps:$4 sm:$0xff]  }
  0xc9   : > { %3408 = vmatpush3.bf16.msra.mxu1 %v4548_v20  ;;  %3775 = vmatprep.subr.bf16.mxu0 %v4831_v8 }
  0xca   : > { %3409 = vmatprep.subr.bf16.mxu1 %v4556_v22  ;;  %1659 = vmatprep.mubr.bf16.mxu0 %v3979_v15  ;;  %v4858_v15 = vld [vmem:[%s4538_s9 + $0x218] sm:$0xff]   ;;  %v3991_v22 = vld [vmem:[%s5374_s0 + $0x20] ss:$36 sps:$4 sm:$0xff]  }
  0xcb   : > { %5429 = vst [vmem:[#allocation20_spill] sm:$0xff] %v4858_v15  ;;  %1708 = vmatprep.mubr.bf16.mxu1 %v3983_v13  ;;  %v4878_v13 = vld [vmem:[%s4538_s9 + $0x228] sm:$0xff]  }
  0xcc   : > { %3776 = vmatpush3.bf16.msra.mxu0 %v4831_v8  ;;  %5431 = vst [vmem:[#allocation22_spill] sm:$0xff] %v4878_v13 }
  0xcd   : > { %3410 = vmatpush3.bf16.msra.mxu1 %v4564_v24  ;;  %3777 = vmatprep.subr.bf16.mxu0 %v4842_v17 }
  0xce   : > { %3411 = vmatprep.subr.bf16.mxu1 %v4572_v26  ;;  %v4868_v26 = vld [vmem:[%s4538_s9 + $0x220] sm:$0xff]  }
  0xcf   : > { %1660 = vmatmul.mubr.bf16.gmra.mrb[12].mxu0 %v3981_v50  ;;  %5430 = vst [vmem:[#allocation21_spill] sm:$0xff] %v4868_v26  ;;  %v3995_v50 = vld [vmem:[%s5374_s0 + $0x94] ss:$36 sps:$4 sm:$0xff]  }
  0xd0   : > { %1709 = vmatmul.mubr.bf16.gmra.mrb[12].mxu1 %v3985_v11  ;;  %3778 = vmatpush3.bf16.msra.mxu0 %v4842_v17  ;;  %v4892_v11 = vld [vmem:[%s4538_s9 + $0x238] sm:$0xff]  }
  0xd1   : > { %3412 = vmatpush3.bf16.msra.mxu1 %v4580_v28  ;;  %3779 = vmatprep.subr.bf16.mxu0 %v4858_v15 }
  0xd2   : > { %3413 = vmatprep.subr.bf16.mxu1 %v4588_v30  ;;  %3789 = vmatprep.mubr.bf16.mxu0 %v3991_v22  ;;  %v4885_v22 = vld [vmem:[%s4538_s9 + $0x230] sm:$0xff]  }
  0xd3   : > { %1911 = vmatprep.mubr.bf16.mxu1 %v3995_v50  ;;  %5432 = vst [vmem:[#allocation23_spill] sm:$0xff] %v4885_v22  ;;  %v3992_v50 = vld [vmem:[%s5374_s0 + $0x68] ss:$36 sps:$4 sm:$0xff]  }
  0xd4   : > { %3780 = vmatpush3.bf16.msra.mxu0 %v4858_v15 }
  0xd5   : > { %3414 = vmatpush3.bf16.msra.mxu1 %v4596_v32  ;;  %3781 = vmatprep.subr.bf16.mxu0 %v4868_v26 }
  0xd6   : > { %3415 = vmatprep.subr.bf16.mxu1 %v4604_v34 }
  0xd8   : > { %3782 = vmatpush3.bf16.msra.mxu0 %v4868_v26 }
  0xd9   : > { %3416 = vmatpush3.bf16.msra.mxu1 %v4612_v36  ;;  %3783 = vmatprep.subr.bf16.mxu0 %v4878_v13 }
  0xda   : > { %3417 = vmatprep.subr.bf16.mxu1 %v4620_v38 }
  0xdc   : > { %3784 = vmatpush3.bf16.msra.mxu0 %v4878_v13 }
  0xdd   : > { %3418 = vmatpush3.bf16.msra.mxu1 %v4628_v40  ;;  %3785 = vmatprep.subr.bf16.mxu0 %v4885_v22  ;;  %v3993_v40 = vld [vmem:[%s5374_s0 + $0x90] ss:$36 sps:$4 sm:$0xff]  }
  0xde   : > { %3419 = vmatprep.subr.bf16.mxu1 %v4636_v42 }
  0xe0   : > { %3786 = vmatpush3.bf16.msra.mxu0 %v4885_v22 }
  0xe1   : > { %3420 = vmatpush3.bf16.msra.mxu1 %v4644_v44  ;;  %3787 = vmatprep.subr.bf16.mxu0 %v4892_v11  ;;  %v3996_v44 = vld [vmem:[%s5374_s0 + $0xdc] ss:$36 sps:$4 sm:$0xff]  }
  0xe2   : > { %3421 = vmatprep.subr.bf16.mxu1 %v4652_v46  ;;  %v4001_v46 = vld [vmem:[%s5374_s0 + $0x9c] ss:$36 sps:$4 sm:$0xff]  }
  0xe4   : > { %3788 = vmatpush3.bf16.msra.mxu0 %v4892_v11 }
  0xe5   : > { %3422 = vmatpush3.bf16.msra.mxu1 %v4663_v49  ;;  %3435 = vmatprep.subr.bf16.mxu0 %v4544_v19  ;;  %v3998_v49 = vld [vmem:[%s5374_s0 + $0xd8] ss:$36 sps:$4 sm:$0xff]  }
  0xe6   : > { %3463 = vmatprep.subr.bf16.mxu1 %v4677_v53 }
  0xe7   : > { %3790 = vmatmul.mubr.bf16.vlgmr.msra.gmra.mrb[16].mxu0 %v3992_v50  ;;  %v4008_v50 = vld [vmem:[%s5374_s0 + $0xec] ss:$36 sps:$4 sm:$0xff]  }
  0xe8   : > { %1912 = vmatmul.mubr.bf16.vlgmr.msra.gmra.mrb[16].mxu1 %v3993_v40  ;;  %3436 = vmatpush3.bf16.msra.mxu0 %v4552_v21  ;;  %v4004_v40 = vld [vmem:[%s5374_s0 + $0xa4] ss:$36 sps:$4 sm:$0xff]  }
  0xe9   : > { %3464 = vmatpush3.bf16.msra.mxu1 %v4685_v55  ;;  %3437 = vmatprep.subr.bf16.mxu0 %v4560_v23 }
  0xea   : > { %3465 = vmatprep.subr.bf16.mxu1 %v4693_v57  ;;  %1919 = vmatprep.mubr.bf16.mxu1 %v3996_v44  ;;  %v3999_v44 = vld [vmem:[%s5374_s0 + $0x98] ss:$36 sps:$4 sm:$0xff]  }
  0xeb   : > { %1960 = vmatprep.mubr.bf16.mxu0 %v4001_v46  ;;  %v4002_v46 = vld [vmem:[%s5374_s0 + $0xa0] ss:$36 sps:$4 sm:$0xff]  }
  0xec   : > { %3438 = vmatpush3.bf16.msra.mxu0 %v4568_v25 }
  0xed   : > { %3466 = vmatpush3.bf16.msra.mxu1 %v4701_v59  ;;  %3439 = vmatprep.subr.bf16.mxu0 %v4576_v27 }
  0xee   : > { %3467 = vmatprep.subr.bf16.mxu1 %v4709_v61 }
  0xf0   : > { %1920 = vmatmul.mubr.bf16.gmra.mrb[20].mxu1 %v3998_v49  ;;  %3440 = vmatpush3.bf16.msra.mxu0 %v4584_v29  ;;  %v4005_v49 = vld [vmem:[%s5374_s0 + $0xe4] ss:$36 sps:$4 sm:$0xff]  }
  0xf1   : > { %3468 = vmatpush3.bf16.msra.mxu1 %v4717_v63  ;;  %3441 = vmatprep.subr.bf16.mxu0 %v4592_v31 }
  0xf2   : > { %3469 = vmatprep.subr.bf16.mxu1 %v4725_v1  ;;  %2009 = vmatprep.mubr.bf16.mxu1 %v4004_v40  ;;  %v4007_v40 = vld [vmem:[%s5374_s0 + $0xe0] ss:$36 sps:$4 sm:$0xff]  }
  0xf4   : > { %3442 = vmatpush3.bf16.msra.mxu0 %v4600_v33 }
  0xf5   : > { %3470 = vmatpush3.bf16.msra.mxu1 %v4733_v3  ;;  %3443 = vmatprep.subr.bf16.mxu0 %v4608_v35 }
  0xf6   : > { %3471 = vmatprep.subr.bf16.mxu1 %v4741_v5 }
  0xf8   : > { %3444 = vmatpush3.bf16.msra.mxu0 %v4616_v37 }
  0xf9   : > { %3472 = vmatpush3.bf16.msra.mxu1 %v4749_v7  ;;  %3445 = vmatprep.subr.bf16.mxu0 %v4624_v39 }
  0xfa   : > { %3473 = vmatprep.subr.bf16.mxu1 %v4757_v9 }
  0xfc   : > { %3446 = vmatpush3.bf16.msra.mxu0 %v4632_v41 }
  0xfd   : > { %3474 = vmatpush3.bf16.msra.mxu1 %v4769_v12  ;;  %3447 = vmatprep.subr.bf16.mxu0 %v4640_v43 }
  0xfe   : > { %3475 = vmatprep.subr.bf16.mxu1 %v4783_v16 }
 0x100   : > { %3448 = vmatpush3.bf16.msra.mxu0 %v4648_v45 }
 0x101   : > { %3476 = vmatpush3.bf16.msra.mxu1 %v4790_v48  ;;  %3449 = vmatprep.subr.bf16.mxu0 %v4656_v47 }
 0x102   : > { %3477 = vmatprep.subr.bf16.mxu1 %v4798_v52 }
 0x104   : > { %3450 = vmatpush3.bf16.msra.mxu0 %v4670_v51 }
 0x105   : > { %3478 = vmatpush3.bf16.msra.mxu1 %v4806_v14  ;;  %3491 = vmatprep.subr.bf16.mxu0 %v4681_v54  ;;  %v4010_v14 = vld [vmem:[%s5374_s0 + $0xe8] ss:$36 sps:$4 sm:$0xff]  }
 0x106   : > { %3793 = vmatprep.subr.bf16.mxu1 %v4827_v10 }
 0x107   : > { %1961 = vmatmul.mubr.bf16.vlgmr.msra.gmra.mrb[20].mxu0 %v3999_v44  ;;  %v4013_v44 = vld [vmem:[%s5374_s0 + $0xac] ss:$36 sps:$4 sm:$0xff]  }
 0x108   : > { %2010 = vmatmul.mubr.bf16.vlgmr.msra.gmra.mrb[24].mxu1 %v4002_v46  ;;  %3492 = vmatpush3.bf16.msra.mxu0 %v4689_v56  ;;  %v4014_v46 = vld [vmem:[%s5374_s0 + $0xb0] ss:$36 sps:$4 sm:$0xff]  }
 0x109   : > { %3794 = vmatpush3.bf16.msra.mxu1 %v4827_v10  ;;  %3493 = vmatprep.subr.bf16.mxu0 %v4697_v58 }
 0x10a   : > { %3795 = vmatprep.subr.bf16.mxu1 %v4831_v8  ;;  %1968 = vmatprep.mubr.bf16.mxu0 %v4005_v49  ;;  %v5433_v49 = vld [vmem:[#allocation10_spill] sm:$0xff] }
 0x10b   : > { %2017 = vmatprep.mubr.bf16.mxu1 %v4008_v50  ;;  %v5435_v50 = vld [vmem:[#allocation12_spill] sm:$0xff] }
 0x10c   : > { %3494 = vmatpush3.bf16.msra.mxu0 %v4705_v60 }
 0x10d   : > { %3796 = vmatpush3.bf16.msra.mxu1 %v4831_v8  ;;  %3495 = vmatprep.subr.bf16.mxu0 %v4713_v62  ;;  %v5440_v8 = vld [vmem:[#allocation4_spill] sm:$0xff] }
 0x10e   : > { %3797 = vmatprep.subr.bf16.mxu1 %v4842_v17 }
 0x10f   : > { %1969 = vmatmul.mubr.bf16.gmra.mrb[24].mxu0 %v4007_v40  ;;  %v5436_v40 = vld [vmem:[#allocation13_spill] sm:$0xff] }
 0x110   : > { %2018 = vmatmul.mubr.bf16.gmra.mrb[28].mxu1 %v4010_v14  ;;  %3496 = vmatpush3.bf16.msra.mxu0 %v4721_v0  ;;  %v5434_v14 = vld [vmem:[#allocation11_spill] sm:$0xff] }
 0x111   : > { %3798 = vmatpush3.bf16.msra.mxu1 %v4842_v17  ;;  %3497 = vmatprep.subr.bf16.mxu0 %v4729_v2  ;;  %v4024_v17 = vld [vmem:[%s5374_s0 + $0x12c] ss:$36 sps:$4 sm:$0xff]  }
 0x112   : > { %3799 = vmatprep.subr.bf16.mxu1 %v4858_v15  ;;  %2058 = vmatprep.mubr.bf16.mxu0 %v4013_v44  ;;  %v5437_v44 = vld [vmem:[#allocation14_spill] sm:$0xff] }
 0x113   : > { %3809 = vmatprep.mubr.bf16.mxu1 %v4014_v46  ;;  %v5438_v46 = vld [vmem:[#allocation15_spill] sm:$0xff] }
 0x114   : > { %3498 = vmatpush3.bf16.msra.mxu0 %v4737_v4 }
 0x115   : > { %3800 = vmatpush3.bf16.msra.mxu1 %v4858_v15  ;;  %3499 = vmatprep.subr.bf16.mxu0 %v4745_v6  ;;  %v5439_v15 = vld [vmem:[#allocation17_spill] sm:$0xff] }
 0x116   : > { %3801 = vmatprep.subr.bf16.mxu1 %v4868_v26 }
 0x118   : > { %3500 = vmatpush3.bf16.msra.mxu0 %v5433_v49 }
 0x119   : > { %3802 = vmatpush3.bf16.msra.mxu1 %v4868_v26  ;;  %3501 = vmatprep.subr.bf16.mxu0 %v5434_v14  ;;  %v4011_v26 = vld [vmem:[%s5374_s0 + $0xa8] ss:$36 sps:$4 sm:$0xff]  }
 0x11a   : > { %3803 = vmatprep.subr.bf16.mxu1 %v4878_v13 }
 0x11c   : > { %3502 = vmatpush3.bf16.msra.mxu0 %v5435_v50 }
 0x11d   : > { %3804 = vmatpush3.bf16.msra.mxu1 %v4878_v13  ;;  %3503 = vmatprep.subr.bf16.mxu0 %v5436_v40  ;;  %v4015_v13 = vld [vmem:[%s5374_s0 + $0xf8] ss:$36 sps:$4 sm:$0xff]  }
 0x11e   : > { %3805 = vmatprep.subr.bf16.mxu1 %v4885_v22 }
 0x120   : > { %3504 = vmatpush3.bf16.msra.mxu0 %v5437_v44 }
 0x121   : > { %3806 = vmatpush3.bf16.msra.mxu1 %v4885_v22  ;;  %3505 = vmatprep.subr.bf16.mxu0 %v5438_v46  ;;  %v4016_v22 = vld [vmem:[%s5374_s0 + $0xf4] ss:$36 sps:$4 sm:$0xff]  }
 0x122   : > { %3807 = vmatprep.subr.bf16.mxu1 %v4892_v11 }
 0x124   : > { %3506 = vmatpush3.bf16.msra.mxu0 %v5439_v15 }
 0x125   : > { %3808 = vmatpush3.bf16.msra.mxu1 %v4892_v11  ;;  %3529 = vmatprep.subr.bf16.mxu0 %v4541_v18  ;;  %v4018_v18 = vld [vmem:[%s5374_s0 + $0xf0] ss:$36 sps:$4 sm:$0xff]  }
 0x126   : > { %3557 = vmatprep.subr.bf16.mxu1 %v4544_v19  ;;  %v5441_v19 = vld [vmem:[#allocation5_spill] sm:$0xff] }
 0x127   : > { %2059 = vmatmul.mubr.bf16.vlgmr.msra.gmra.mrb[28].mxu0 %v4011_v26  ;;  %v4022_v26 = vld [vmem:[%s5374_s0 + $0x128] ss:$36 sps:$4 sm:$0xff]  }
 0x128   : > { %3810 = vmatmul.mubr.bf16.vlgmr.msra.gmra.mrb[32].mxu1 %v4015_v13  ;;  %3530 = vmatpush3.bf16.msra.mxu0 %v4548_v20  ;;  %v4021_v20 = vld [vmem:[%s5374_s0 + $0x124] ss:$36 sps:$4 sm:$0xff]  }
 0x129   : > { %3558 = vmatpush3.bf16.msra.mxu1 %v4552_v21  ;;  %3531 = vmatprep.subr.bf16.mxu0 %v5440_v8  ;;  %v5442_v21 = vld [vmem:[#allocation6_spill] sm:$0xff] }
 0x12a   : > { %3559 = vmatprep.subr.bf16.mxu1 %v4560_v23  ;;  %2066 = vmatprep.mubr.bf16.mxu0 %v4016_v22  ;;  %v5443_v23 = vld [vmem:[#allocation7_spill] sm:$0xff] }
 0x12b   : > { %2318 = vmatprep.mubr.bf16.mxu1 %v4024_v17  ;;  %v4081_v17 = vld [vmem:[%s4538_s9 + $0x68] sm:$0xff]  }
 0x12c   : > { %3532 = vmatpush3.bf16.msra.mxu0 %v4564_v24  ;;  %v5444_v24 = vld [vmem:[#allocation8_spill] sm:$0xff] }
 0x12d   : > { %3560 = vmatpush3.bf16.msra.mxu1 %v4568_v25  ;;  %3533 = vmatprep.subr.bf16.mxu0 %v5441_v19  ;;  %v4019_v25 = vld [vmem:[%s5374_s0 + $0x120] ss:$36 sps:$4 sm:$0xff]  }
 0x12e   : > { %3561 = vmatprep.subr.bf16.mxu1 %v4576_v27  ;;  %v5445_v27 = vld [vmem:[#allocation9_spill] sm:$0xff] }
 0x12f   : > { %2067 = vmatmul.mubr.bf16.gmra.mrb[32].mxu0 %v4018_v18  ;;  %v4083_v18 = vld [vmem:[%s4538_s9 + $0x70] sm:$0xff]  }
 0x130   : > { %3534 = vmatpush3.bf16.msra.mxu0 %v4580_v28  ;;  %2269 = vmatprep.mubr.bf16.mxu0 %v4021_v20  ;;  %v4025_v28 = vld [vmem:[%s5374_s0 + $0x16c] ss:$36 sps:$4 sm:$0xff]  }
 0x131   : > { %3562 = vmatpush3.bf16.msra.mxu1 %v4584_v29  ;;  %3535 = vmatprep.subr.bf16.mxu0 %v4588_v30  ;;  %v4027_v29 = vld [vmem:[%s5374_s0 + $0x174] ss:$36 sps:$4 sm:$0xff]   ;;  %v4029_v30 = vld [vmem:[%s5374_s0 + $0x168] ss:$36 sps:$4 sm:$0xff]  }
 0x132   : > { %3563 = vmatprep.subr.bf16.mxu1 %v4592_v31  ;;  %v4030_v31 = vld [vmem:[%s5374_s0 + $0x170] ss:$36 sps:$4 sm:$0xff]  }
 0x133   : > { %v4084_v20 = vld [vmem:[%s4538_s9 + $0x30] sm:$0xff]  }
 0x134   : > { %3536 = vmatpush3.bf16.msra.mxu0 %v4596_v32  ;;  %v4033_v32 = vld [vmem:[%s5374_s0 + $0x134] ss:$36 sps:$4 sm:$0xff]  }
 0x135   : > { %3564 = vmatpush3.bf16.msra.mxu1 %v4600_v33  ;;  %3537 = vmatprep.subr.bf16.mxu0 %v4604_v34  ;;  %v4036_v33 = vld [vmem:[%s5374_s0 + $0x13c] ss:$36 sps:$4 sm:$0xff]   ;;  %v4031_v34 = vld [vmem:[%s5374_s0 + $0x130] ss:$36 sps:$4 sm:$0xff]  }
 0x136   : > { %3565 = vmatprep.subr.bf16.mxu1 %v4608_v35  ;;  %v4034_v35 = vld [vmem:[%s5374_s0 + $0x138] ss:$36 sps:$4 sm:$0xff]  }
 0x138   : > { %3538 = vmatpush3.bf16.msra.mxu0 %v4612_v36  ;;  %v5446_v36 = vld [vmem:[#allocation16_spill] sm:$0xff] }
 0x139   : > { %3566 = vmatpush3.bf16.msra.mxu1 %v4616_v37  ;;  %3539 = vmatprep.subr.bf16.mxu0 %v4620_v38  ;;  %v4071_v37 = vld [vmem:[%s4538_s9 + $0x40] sm:$0xff]  }
 0x13a   : > { %3567 = vmatprep.subr.bf16.mxu1 %v4624_v39  ;;  %v4037_v38 = vld [vmem:[%s5374_s0 + $0x17c] ss:$36 sps:$4 sm:$0xff]   ;;  %v4040_v39 = vld [vmem:[%s5374_s0 + $0x184] ss:$36 sps:$4 sm:$0xff]  }
 0x13c   : > { %3540 = vmatpush3.bf16.msra.mxu0 %v5442_v21  ;;  %v4085_v21 = vld [vmem:[%s4538_s9 + $0x78] sm:$0xff]  }
 0x13d   : > { %3568 = vmatpush3.bf16.msra.mxu1 %v4632_v41  ;;  %3541 = vmatprep.subr.bf16.mxu0 %v4636_v42  ;;  %v4072_v41 = vld [vmem:[%s4538_s9] sm:$0xff]   ;;  %v5447_v42 = vld [vmem:[#allocation18_spill] sm:$0xff] }
 0x13e   : > { %3569 = vmatprep.subr.bf16.mxu1 %v4640_v43  ;;  %v4073_v43 = vld [vmem:[%s4538_s9 + $0x48] sm:$0xff]  }
 0x140   : > { %3542 = vmatpush3.bf16.msra.mxu0 %v5443_v23  ;;  %v4044_v23 = vld [vmem:[%s5374_s0 + $0x188] ss:$36 sps:$4 sm:$0xff]  }
 0x141   : > { %3570 = vmatpush3.bf16.msra.mxu1 %v4648_v45  ;;  %3543 = vmatprep.subr.bf16.mxu0 %v5444_v24  ;;  %v4039_v45 = vld [vmem:[%s5374_s0 + $0x178] ss:$36 sps:$4 sm:$0xff]   ;;  %v4045_v24 = vld [vmem:[%s5374_s0 + $0x1b0] ss:$36 sps:$4 sm:$0xff]  }
 0x142   : > { %3571 = vmatprep.subr.bf16.mxu1 %v4656_v47  ;;  %v4042_v47 = vld [vmem:[%s5374_s0 + $0x180] ss:$36 sps:$4 sm:$0xff]  }
 0x144   : > { %3544 = vmatpush3.bf16.msra.mxu0 %v5445_v27  ;;  %v4088_v27 = vld [vmem:[%s4538_s9 + $0x140] sm:$0xff]  }
 0x145   : > { %3572 = vmatpush3.bf16.msra.mxu1 %v4670_v51  ;;  %3585 = vmatprep.subr.bf16.mxu0 %v4677_v53  ;;  %v4074_v51 = vld [vmem:[%s4538_s9 + $0x8] sm:$0xff]   ;;  %v5448_v53 = vld [vmem:[#allocation19_spill] sm:$0xff] }
 0x146   : > { %3613 = vmatprep.subr.bf16.mxu1 %v4681_v54  ;;  %v4075_v54 = vld [vmem:[%s4538_s9 + $0x50] sm:$0xff]  }
 0x147   : > { %2270 = vmatmul.mubr.bf16.vlgmr.msra.gmra.mrb[36].mxu0 %v4019_v25  ;;  %v4086_v25 = vld [vmem:[%s4538_s9 + $0x38] sm:$0xff]  }
 0x148   : > { %2319 = vmatmul.mubr.bf16.vlgmr.msra.gmra.mrb[36].mxu1 %v4022_v26  ;;  %3586 = vmatpush3.bf16.msra.mxu0 %v4685_v55  ;;  %v4043_v55 = vld [vmem:[%s5374_s0 + $0x140] ss:$36 sps:$4 sm:$0xff]  }
 0x149   : > { %3614 = vmatpush3.bf16.msra.mxu1 %v4689_v56  ;;  %3587 = vmatprep.subr.bf16.mxu0 %v4693_v57  ;;  %v4047_v56 = vld [vmem:[%s5374_s0 + $0x1b4] ss:$36 sps:$4 sm:$0xff]   ;;  %v4087_v26 = vld [vmem:[%s4538_s9 + $0xc0] sm:$0xff]  }
 0x14a   : > { %3615 = vmatprep.subr.bf16.mxu1 %v4697_v58  ;;  %2277 = vmatprep.mubr.bf16.mxu0 %v4025_v28  ;;  %v4076_v57 = vld [vmem:[%s4538_s9 + $0x10] sm:$0xff]   ;;  %v5449_v58 = vld [vmem:[#allocation20_spill] sm:$0xff] }
 0x14b   : > { %2326 = vmatprep.mubr.bf16.mxu1 %v4027_v29  ;;  %v4048_v28 = vld [vmem:[%s5374_s0 + $0x1fc] ss:$36 sps:$4 sm:$0xff]  }
 0x14c   : > { %3588 = vmatpush3.bf16.msra.mxu0 %v4701_v59  ;;  %v4077_v59 = vld [vmem:[%s4538_s9 + $0x58] sm:$0xff]  }
 0x14d   : > { %3616 = vmatpush3.bf16.msra.mxu1 %v4705_v60  ;;  %3589 = vmatprep.subr.bf16.mxu0 %v4709_v61  ;;  %v4078_v60 = vld [vmem:[%s4538_s9 + $0x18] sm:$0xff]   ;;  %v5450_v61 = vld [vmem:[#allocation21_spill] sm:$0xff] }
 0x14e   : > { %3617 = vmatprep.subr.bf16.mxu1 %v4713_v62  ;;  %v4079_v62 = vld [vmem:[%s4538_s9 + $0x60] sm:$0xff]  }
 0x14f   : > { %2278 = vmatmul.mubr.bf16.gmra.mrb[40].mxu0 %v4029_v30  ;;  %v4053_v29 = vld [vmem:[%s5374_s0 + $0x1bc] ss:$36 sps:$4 sm:$0xff]  }
 0x150   : > { %2327 = vmatmul.mubr.bf16.gmra.mrb[40].mxu1 %v4030_v31  ;;  %3590 = vmatpush3.bf16.msra.mxu0 %v4717_v63  ;;  %v4089_v30 = vld [vmem:[%s4538_s9 + $0x80] sm:$0xff]  }
 0x151   : > { %3618 = vmatpush3.bf16.msra.mxu1 %v4721_v0  ;;  %3591 = vmatprep.subr.bf16.mxu0 %v4725_v1  ;;  %v4080_v1 = vld [vmem:[%s4538_s9 + $0x20] sm:$0xff]  }
 0x152   : > { %3619 = vmatprep.subr.bf16.mxu1 %v4729_v2  ;;  %2367 = vmatprep.mubr.bf16.mxu0 %v4033_v32  ;;  %v4090_v31 = vld [vmem:[%s4538_s9 + $0x100] sm:$0xff]   ;;  %v4091_v32 = vld [vmem:[%s4538_s9 + $0xc8] sm:$0xff]  }
 0x153   : > { %2416 = vmatprep.mubr.bf16.mxu1 %v4036_v33  ;;  %v4092_v33 = vld [vmem:[%s4538_s9 + $0x148] sm:$0xff]  }
 0x154   : > { %3592 = vmatpush3.bf16.msra.mxu0 %v4733_v3 }
 0x155   : > { %3620 = vmatpush3.bf16.msra.mxu1 %v4737_v4  ;;  %3593 = vmatprep.subr.bf16.mxu0 %v4741_v5 }
 0x156   : > { %3621 = vmatprep.subr.bf16.mxu1 %v4745_v6  ;;  %v5451_v6 = vld [vmem:[#allocation22_spill] sm:$0xff] }
 0x158   : > { %3594 = vmatpush3.bf16.msra.mxu0 %v4749_v7 }
 0x159   : > { %3622 = vmatpush3.bf16.msra.mxu1 %v5433_v49  ;;  %3595 = vmatprep.subr.bf16.mxu0 %v4757_v9 }
 0x15a   : > { %3623 = vmatprep.subr.bf16.mxu1 %v5434_v14 }
 0x15c   : > { %3596 = vmatpush3.bf16.msra.mxu0 %v4769_v12 }
 0x15d   : > { %3624 = vmatpush3.bf16.msra.mxu1 %v5435_v50  ;;  %3597 = vmatprep.subr.bf16.mxu0 %v4783_v16 }
 0x15e   : > { %3625 = vmatprep.subr.bf16.mxu1 %v5436_v40 }
 0x160   : > { %3598 = vmatpush3.bf16.msra.mxu0 %v4790_v48 }
 0x161   : > { %3626 = vmatpush3.bf16.msra.mxu1 %v5437_v44  ;;  %3599 = vmatprep.subr.bf16.mxu0 %v4798_v52  ;;  %v4082_v44 = vld [vmem:[%s4538_s9 + $0x28] sm:$0xff]  }
 0x162   : > { %3627 = vmatprep.subr.bf16.mxu1 %v5438_v46  ;;  %v5452_v46 = vld [vmem:[#allocation23_spill] sm:$0xff] }
 0x164   : > { %3600 = vmatpush3.bf16.msra.mxu0 %v5446_v36 }
 0x165   : > { %3628 = vmatpush3.bf16.msra.mxu1 %v5439_v15  ;;  %3813 = vmatprep.subr.bf16.mxu0 %v4827_v10 }
 0x166   : > { %3651 = vmatprep.subr.bf16.mxu1 %v4071_v37  ;;  %v4094_v37 = vld [vmem:[%s4538_s9 + $0x108] sm:$0xff]  }
 0x167   : > { %2368 = vmatmul.mubr.bf16.vlgmr.msra.gmra.mrb[44].mxu0 %v4031_v34  ;;  %v4050_v34 = vld [vmem:[%s5374_s0 + $0x1f8] ss:$36 sps:$4 sm:$0xff]  }
 0x168   : > { %2417 = vmatmul.mubr.bf16.vlgmr.msra.gmra.mrb[44].mxu1 %v4034_v35  ;;  %3814 = vmatpush3.bf16.msra.mxu0 %v4827_v10  ;;  %v4093_v35 = vld [vmem:[%s4538_s9 + $0x88] sm:$0xff]  }
 0x169   : > { %3652 = vmatpush3.bf16.msra.mxu1 %v4072_v41  ;;  %3815 = vmatprep.subr.bf16.mxu0 %v5447_v42 }
 0x16a   : > { %3653 = vmatprep.subr.bf16.mxu1 %v4073_v43  ;;  %2375 = vmatprep.mubr.bf16.mxu0 %v4037_v38  ;;  %v4095_v38 = vld [vmem:[%s4538_s9 + $0xd0] sm:$0xff]   ;;  %v4056_v43 = vld [vmem:[%s5374_s0 + $0x1c4] ss:$36 sps:$4 sm:$0xff]  }
 0x16b   : > { %2424 = vmatprep.mubr.bf16.mxu1 %v4040_v39  ;;  %v4096_v39 = vld [vmem:[%s4538_s9 + $0x150] sm:$0xff]  }
 0x16c   : > { %3816 = vmatpush3.bf16.msra.mxu0 %v5447_v42 }
 0x16d   : > { %3654 = vmatpush3.bf16.msra.mxu1 %v4074_v51  ;;  %3817 = vmatprep.subr.bf16.mxu0 %v5448_v53  ;;  %v4097_v51 = vld [vmem:[%s4538_s9 + $0x90] sm:$0xff]  }
 0x16e   : > { %3655 = vmatprep.subr.bf16.mxu1 %v4075_v54 }
 0x16f   : > { %2376 = vmatmul.mubr.bf16.gmra.mrb[48].mxu0 %v4039_v45 }
 0x170   : > { %2425 = vmatmul.mubr.bf16.gmra.mrb[48].mxu1 %v4042_v47  ;;  %3818 = vmatpush3.bf16.msra.mxu0 %v5448_v53 }
 0x171   : > { %3656 = vmatpush3.bf16.msra.mxu1 %v4076_v57  ;;  %3819 = vmatprep.subr.bf16.mxu0 %v5449_v58  ;;  %v4098_v57 = vld [vmem:[%s4538_s9 + $0x110] sm:$0xff]  }
 0x172   : > { %3657 = vmatprep.subr.bf16.mxu1 %v4077_v59  ;;  %3829 = vmatprep.mubr.bf16.mxu0 %v4043_v55 }
 0x173   : > { %2627 = vmatprep.mubr.bf16.mxu1 %v4047_v56 }
 0x174   : > { %3820 = vmatpush3.bf16.msra.mxu0 %v5449_v58 }
 0x175   : > { %3658 = vmatpush3.bf16.msra.mxu1 %v4078_v60  ;;  %3821 = vmatprep.subr.bf16.mxu0 %v5450_v61 }
 0x176   : > { %3659 = vmatprep.subr.bf16.mxu1 %v4079_v62 }
 0x178   : > { %3822 = vmatpush3.bf16.msra.mxu0 %v5450_v61 }
 0x179   : > { %3660 = vmatpush3.bf16.msra.mxu1 %v4080_v1  ;;  %3823 = vmatprep.subr.bf16.mxu0 %v5451_v6 }
 0x17a   : > { %v3301_v63 = vpop.f32.mrb[0].mxu0  ;;  %3661 = vmatprep.subr.bf16.mxu1 %v4081_v17  ;;  %v4102_v17 = vld [vmem:[%s4538_s9 + $0x118] sm:$0xff]  }
 0x17b   : > { %v3329_v0 = vpop.f32.mrb[0].mxu1  ;;  %v3302_v2 = vpop.f32.mrb[1].mxu0 }
 0x17c   : > { %v3303_v3 = vadd.f32 %v3302_v2, %v3301_v63  ;;  %v3330_v4 = vpop.f32.mrb[1].mxu1  ;;  %v3304_v8 = vpop.f32.mrb[2].mxu0  ;;  %3824 = vmatpush3.bf16.msra.mxu0 %v5451_v6  ;;  %v4099_v63 = vld [vmem:[%s4538_s9 + $0xd8] sm:$0xff]  }
 0x17d   : > { %v3331_v15 = vadd.f32 %v3330_v4, %v3329_v0  ;;  %v3332_v13 = vpop.f32.mrb[2].mxu1  ;;  %v3305_v22 = vpop.f32.mrb[3].mxu0  ;;  %3662 = vmatpush3.bf16.msra.mxu1 %v4082_v44  ;;  %3825 = vmatprep.subr.bf16.mxu0 %v5452_v46  ;;  %v4100_v0 = vld [vmem:[%s4538_s9 + $0x158] sm:$0xff]  }
 0x17e   : > { %v3306_v49 = vadd.f32 %v3305_v22, %v3304_v8  ;;  %v3333_v14 = vpop.f32.mrb[3].mxu1  ;;  %3663 = vmatprep.subr.bf16.mxu1 %v4083_v18  ;;  %v4101_v8 = vld [vmem:[%s4538_s9 + $0x98] sm:$0xff]   ;;  %v4104_v22 = vld [vmem:[%s4538_s9 + $0xa0] sm:$0xff]  }
 0x17f   : > { %v5158_v50 = vadd.f32 %v3331_v15, %v3303_v3  ;;  %v3334_v40 = vadd.f32 %v3333_v14, %v3332_v13  ;;  %v4103_v13 = vld [vmem:[%s4538_s9 + $0xe0] sm:$0xff]   ;;  %v4105_v14 = vld [vmem:[%s4538_s9 + $0xe8] sm:$0xff]  }
 0x180   : > { %3826 = vmatpush3.bf16.msra.mxu0 %v5452_v46 }
 0x181   : > { %v5164_v19 = vadd.f32 %v3334_v40, %v3306_v49  ;;  %3664 = vmatpush3.bf16.msra.mxu1 %v4084_v20  ;;  %3827 = vmatprep.subr.bf16.mxu0 %v4892_v11 }
 0x182   : > { %3665 = vmatprep.subr.bf16.mxu1 %v4085_v21  ;;  %v3307_v41 = vpop.f32.mrb[4].mxu0 }
 0x183   : > { %v3335_v45 = vpop.f32.mrb[4].mxu1  ;;  %v3308_v47 = vpop.f32.mrb[5].mxu0 }
 0x184   : > { %3828 = vmatpush3.bf16.msra.mxu0 %v4892_v11  ;;  %v3309_v54 = vadd.f32 %v3308_v47, %v3307_v41  ;;  %v3336_v55 = vpop.f32.mrb[5].mxu1  ;;  %v3310_v56 = vpop.f32.mrb[6].mxu0 }
 0x185   : > { %3666 = vmatpush3.bf16.msra.mxu1 %v4086_v25  ;;  %3679 = vmatprep.subr.bf16.mxu0 %v4087_v26  ;;  %v3337_v59 = vadd.f32 %v3336_v55, %v3335_v45  ;;  %v3338_v60 = vpop.f32.mrb[6].mxu1  ;;  %v3311_v62 = vpop.f32.mrb[7].mxu0 }
 0x186   : > { %3707 = vmatprep.subr.bf16.mxu1 %v4088_v27  ;;  %v3312_v1 = vadd.f32 %v3311_v62, %v3310_v56  ;;  %v3339_v2 = vpop.f32.mrb[7].mxu1  ;;  %v4060_v56 = vld [vmem:[%s5374_s0 + $0x20c] ss:$36 sps:$4 sm:$0xff]  }
 0x187   : > { %3830 = vmatmul.mubr.bf16.vlgmr.msra.gmra.mrb[52].mxu0 %v4044_v23  ;;  %v1613_v3 = vadd.f32 %v3337_v59, %v3309_v54  ;;  %v3340_v4 = vadd.f32 %v3339_v2, %v3338_v60  ;;  %v4106_v23 = vld [vmem:[%s4538_s9 + $0xa8] sm:$0xff]   ;;  %v4112_v59 = vld [vmem:[%s4538_s9 + $0x180] sm:$0xff]  }
 0x188   : > { %2628 = vmatmul.mubr.bf16.vlgmr.msra.gmra.mrb[52].mxu1 %v4045_v24  ;;  %3680 = vmatpush3.bf16.msra.mxu0 %v4089_v30  ;;  %v4057_v54 = vld [vmem:[%s5374_s0 + $0x204] ss:$36 sps:$4 sm:$0xff]   ;;  %v4065_v2 = vld [vmem:[%s5374_s0 + $0x1cc] ss:$36 sps:$4 sm:$0xff]  }
 0x189   : > { %3708 = vmatpush3.bf16.msra.mxu1 %v4090_v31  ;;  %3681 = vmatprep.subr.bf16.mxu0 %v4091_v32  ;;  %v1616_v15 = vadd.f32 %v3340_v4, %v3312_v1  ;;  %v4108_v31 = vld [vmem:[%s4538_s9 + $0xb0] sm:$0xff]   ;;  %v4113_v60 = vld [vmem:[%s4538_s9 + $0x1c8] sm:$0xff]  }
 0x18a   : > { %3709 = vmatprep.subr.bf16.mxu1 %v4092_v33  ;;  %2635 = vmatprep.mubr.bf16.mxu1 %v4048_v28  ;;  %v4107_v28 = vld [vmem:[%s4538_s9 + $0xf0] sm:$0xff]   ;;  %v4114_v1 = vld [vmem:[%s4538_s9 + $0x188] sm:$0xff]  }
 0x18b   : > { %2676 = vmatprep.mubr.bf16.mxu0 %v4053_v29  ;;  %v4116_v4 = vld [vmem:[%s4538_s9 + $0x190] sm:$0xff]  }
 0x18c   : > { %3682 = vmatpush3.bf16.msra.mxu0 %v4093_v35 }
 0x18d   : > { %3710 = vmatpush3.bf16.msra.mxu1 %v4094_v37  ;;  %3683 = vmatprep.subr.bf16.mxu0 %v4095_v38  ;;  %v4051_v37 = vld [vmem:[%s5374_s0 + $0x1b8] ss:$36 sps:$4 sm:$0xff]  }
 0x18e   : > { %3711 = vmatprep.subr.bf16.mxu1 %v4096_v39  ;;  %v4110_v38 = vld [vmem:[%s4538_s9 + $0xb8] sm:$0xff]  }
 0x190   : > { %2636 = vmatmul.mubr.bf16.gmra.mrb[56].mxu1 %v4050_v34  ;;  %3684 = vmatpush3.bf16.msra.mxu0 %v4097_v51  ;;  %v4111_v51 = vld [vmem:[%s4538_s9 + $0x1c0] sm:$0xff]  }
 0x191   : > { %3712 = vmatpush3.bf16.msra.mxu1 %v4098_v57  ;;  %3685 = vmatprep.subr.bf16.mxu0 %v4099_v63  ;;  %v4059_v63 = vld [vmem:[%s5374_s0 + $0x200] ss:$36 sps:$4 sm:$0xff]  }
 0x192   : > { %3713 = vmatprep.subr.bf16.mxu1 %v4100_v0  ;;  %2725 = vmatprep.mubr.bf16.mxu1 %v4056_v43  ;;  %v4062_v0 = vld [vmem:[%s5374_s0 + $0x208] ss:$36 sps:$4 sm:$0xff]  }
 0x194   : > { %3686 = vmatpush3.bf16.msra.mxu0 %v4101_v8  ;;  %v4118_v8 = vld [vmem:[%s4538_s9 + $0x198] sm:$0xff]  }
 0x195   : > { %3714 = vmatpush3.bf16.msra.mxu1 %v4102_v17  ;;  %3687 = vmatprep.subr.bf16.mxu0 %v4103_v13  ;;  %v4119_v17 = vld [vmem:[%s4538_s9 + $0x1e0] sm:$0xff]  }
 0x196   : > { %3715 = vmatprep.subr.bf16.mxu1 %v4741_v5 }
 0x198   : > { %3688 = vmatpush3.bf16.msra.mxu0 %v4104_v22 }
 0x199   : > { %3716 = vmatpush3.bf16.msra.mxu1 %v4749_v7  ;;  %3689 = vmatprep.subr.bf16.mxu0 %v4105_v14 }
 0x19a   : > { %v3357_v49 = vpop.f32.mrb[8].mxu0  ;;  %3717 = vmatprep.subr.bf16.mxu1 %v4757_v9 }
 0x19b   : > { %v3358_v40 = vpop.f32.mrb[9].mxu0  ;;  %v3385_v44 = vpop.f32.mrb[8].mxu1 }
 0x19c   : > { %v3359_v18 = vadd.f32 %v3358_v40, %v3357_v49  ;;  %v3360_v20 = vpop.f32.mrb[10].mxu0  ;;  %v3386_v21 = vpop.f32.mrb[9].mxu1  ;;  %3690 = vmatpush3.bf16.msra.mxu0 %v4106_v23 }
 0x19d   : > { %v3361_v24 = vpop.f32.mrb[11].mxu0  ;;  %v3387_v5 = vadd.f32 %v3386_v21, %v3385_v44  ;;  %v3388_v25 = vpop.f32.mrb[10].mxu1  ;;  %3718 = vmatpush3.bf16.msra.mxu1 %v4769_v12  ;;  %3691 = vmatprep.subr.bf16.mxu0 %v4107_v28  ;;  %v4109_v12 = vld [vmem:[%s4538_s9 + $0xf8] sm:$0xff]   ;;  %v4063_v28 = vld [vmem:[%s5374_s0 + $0x1c8] ss:$36 sps:$4 sm:$0xff]  }
 0x19e   : > { %v1654_v7 = vadd.f32 %v3359_v18, %v5158_v50  ;;  %v3362_v26 = vadd.f32 %v3361_v24, %v3360_v20  ;;  %v3389_v27 = vpop.f32.mrb[11].mxu1  ;;  %3719 = vmatprep.subr.bf16.mxu1 %v4783_v16  ;;  %v4122_v18 = vld [vmem:[%s4538_s9 + $0x1a8] sm:$0xff]   ;;  %v4123_v24 = vld [vmem:[%s4538_s9 + $0x1f0] sm:$0xff]  }
 0x19f   : > { %v3390_v9 = vadd.f32 %v3389_v27, %v3388_v25 }
 0x1a0   : > { %v1657_v29 = vadd.f32 %v3362_v26, %v5164_v19  ;;  %v5218_v30 = vadd.f32 %v3387_v5, %v1654_v7  ;;  %3692 = vmatpush3.bf16.msra.mxu0 %v4108_v31  ;;  %v4124_v26 = vld [vmem:[%s4538_s9 + $0x1b0] sm:$0xff]  }
 0x1a1   : > { %3720 = vmatpush3.bf16.msra.mxu1 %v4790_v48  ;;  %3693 = vmatprep.subr.bf16.mxu0 %v4109_v12  ;;  %v4054_v48 = vld [vmem:[%s5374_s0 + $0x1c0] ss:$36 sps:$4 sm:$0xff]  }
 0x1a2   : > { %v3363_v32 = vpop.f32.mrb[12].mxu0  ;;  %3721 = vmatprep.subr.bf16.mxu1 %v4798_v52  ;;  %v5224_v50 = vadd.f32 %v3390_v9, %v1657_v29  ;;  %v4067_v9 = vld [vmem:[%s5374_s0 + $0x218] ss:$36 sps:$4 sm:$0xff]  }
 0x1a3   : > { %v3364_v33 = vpop.f32.mrb[13].mxu0  ;;  %v3391_v16 = vpop.f32.mrb[12].mxu1 }
 0x1a4   : > { %v3365_v34 = vadd.f32 %v3364_v33, %v3363_v32  ;;  %v3366_v35 = vpop.f32.mrb[14].mxu0  ;;  %v3392_v19 = vpop.f32.mrb[13].mxu1  ;;  %3694 = vmatpush3.bf16.msra.mxu0 %v4110_v38  ;;  %v4070_v33 = vld [vmem:[%s5374_s0 + $0x210] ss:$36 sps:$4 sm:$0xff]  }
 0x1a5   : > { %v3367_v39 = vpop.f32.mrb[15].mxu0  ;;  %v3393_v52 = vadd.f32 %v3392_v19, %v3391_v16  ;;  %v3394_v41 = vpop.f32.mrb[14].mxu1  ;;  %3722 = vmatpush3.bf16.msra.mxu1 %v5446_v36  ;;  %3735 = vmatprep.subr.bf16.mxu0 %v4111_v51 }
 0x1a6   : > { %v1662_v43 = vadd.f32 %v3365_v34, %v1613_v3  ;;  %v3368_v45 = vadd.f32 %v3367_v39, %v3366_v35  ;;  %v3395_v47 = vpop.f32.mrb[15].mxu1  ;;  %3833 = vmatprep.subr.bf16.mxu1 %v4827_v10  ;;  %v4066_v3 = vld [vmem:[%s5374_s0 + $0x1d0] ss:$36 sps:$4 sm:$0xff]  }
 0x1a7   : > { %v3396_v55 = vadd.f32 %v3395_v47, %v3394_v41  ;;  %2677 = vmatmul.mubr.bf16.vlgmr.msra.gmra.mrb[56].mxu0 %v4051_v37 }
 0x1a8   : > { %v1665_v57 = vadd.f32 %v3368_v45, %v1616_v15  ;;  %2726 = vmatmul.mubr.bf16.vlgmr.msra.gmra.mrb[60].mxu1 %v4054_v48  ;;  %v1711_v36 = vadd.f32 %v3393_v52, %v1662_v43  ;;  %3736 = vmatpush3.bf16.msra.mxu0 %v4112_v59  ;;  %v4120_v15 = vld [vmem:[%s4538_s9 + $0x1a0] sm:$0xff]  }
 0x1a9   : > { %3834 = vmatpush3.bf16.msra.mxu1 %v4827_v10  ;;  %3737 = vmatprep.subr.bf16.mxu0 %v4113_v60  ;;  %v4115_v10 = vld [vmem:[%s4538_s9 + $0x1d0] sm:$0xff]  }
 0x1aa   : > { %2684 = vmatprep.mubr.bf16.mxu0 %v4057_v54  ;;  %v1714_v62 = vadd.f32 %v3396_v55, %v1665_v57  ;;  %3835 = vmatprep.subr.bf16.mxu1 %v5447_v42 }
 0x1ab   : > { %2733 = vmatprep.mubr.bf16.mxu1 %v4060_v56 }
 0x1ac   : > { %3738 = vmatpush3.bf16.msra.mxu0 %v4114_v1 }
 0x1ad   : > { %3836 = vmatpush3.bf16.msra.mxu1 %v5447_v42  ;;  %3739 = vmatprep.subr.bf16.mxu0 %v4115_v10  ;;  %v4117_v42 = vld [vmem:[%s4538_s9 + $0x1d8] sm:$0xff]  }
 0x1ae   : > { %3837 = vmatprep.subr.bf16.mxu1 %v5448_v53 }
 0x1af   : > { %2685 = vmatmul.mubr.bf16.gmra.mrb[60].mxu0 %v4059_v63 }
 0x1b0   : > { %2734 = vmatmul.mubr.bf16.gmra.mrb[64].mxu1 %v4062_v0  ;;  %3740 = vmatpush3.bf16.msra.mxu0 %v4116_v4 }
 0x1b1   : > { %3838 = vmatpush3.bf16.msra.mxu1 %v5448_v53  ;;  %3741 = vmatprep.subr.bf16.mxu0 %v4117_v42  ;;  %v4121_v53 = vld [vmem:[%s4538_s9 + $0x1e8] sm:$0xff]  }
 0x1b2   : > { %3839 = vmatprep.subr.bf16.mxu1 %v5449_v58  ;;  %2774 = vmatprep.mubr.bf16.mxu0 %v4065_v2 }
 0x1b3   : > { %3849 = vmatprep.mubr.bf16.mxu1 %v4066_v3 }
 0x1b4   : > { %3742 = vmatpush3.bf16.msra.mxu0 %v4118_v8 }
 0x1b5   : > { %3840 = vmatpush3.bf16.msra.mxu1 %v5449_v58  ;;  %3743 = vmatprep.subr.bf16.mxu0 %v4119_v17 }
 0x1b6   : > { %3841 = vmatprep.subr.bf16.mxu1 %v5450_v61 }
 0x1b8   : > { %3744 = vmatpush3.bf16.msra.mxu0 %v4120_v15 }
 0x1b9   : > { %3842 = vmatpush3.bf16.msra.mxu1 %v5450_v61  ;;  %3745 = vmatprep.subr.bf16.mxu0 %v4121_v53 }
 0x1ba   : > { %3843 = vmatprep.subr.bf16.mxu1 %v5451_v6  ;;  %v3791_v13 = vpop.f32.mrb[16].mxu0 }
 0x1bb   : > { %v3423_v22 = vpop.f32.mrb[16].mxu1  ;;  %v5274_v49 = vadd.f32 %v3791_v13, %v1711_v36  ;;  %v1751_v14 = vpop.f32.mrb[17].mxu0 }
 0x1bc   : > { %v3424_v58 = vpop.f32.mrb[17].mxu1  ;;  %v5277_v40 = vadd.f32 %v1751_v14, %v5218_v30  ;;  %v3792_v44 = vpop.f32.mrb[18].mxu0  ;;  %3746 = vmatpush3.bf16.msra.mxu0 %v4122_v18  ;;  %v4126_v30 = vld [vmem:[%s4538_s9 + $0x1b8] sm:$0xff]  }
 0x1bd   : > { %3844 = vmatpush3.bf16.msra.mxu1 %v5451_v6  ;;  %v3425_v61 = vadd.f32 %v3424_v58, %v3423_v22  ;;  %v3426_v20 = vpop.f32.mrb[18].mxu1  ;;  %v5281_v21 = vadd.f32 %v3792_v44, %v1714_v62  ;;  %v1754_v23 = vpop.f32.mrb[19].mxu0  ;;  %3747 = vmatprep.subr.bf16.mxu0 %v4123_v24  ;;  %v4125_v6 = vld [vmem:[%s4538_s9 + $0x1f8] sm:$0xff]   ;;  %s829_s9 = scalar_select %p828_p11, %s4157_s14, 1 }
 0x1be   : > { %3845 = vmatprep.subr.bf16.mxu1 %v5452_v46  ;;  %v3427_v5 = vpop.f32.mrb[19].mxu1  ;;  %v5286_v25 = vadd.f32 %v1754_v23, %v5224_v50 }
 0x1bf   : > { %v3428_v7 = vadd.f32 %v3427_v5, %v3426_v20  ;;  %s830_s24 = scalar_lea.vmem %s5376_s2, %s829_s9 }
 0x1c0   : > { %3748 = vmatpush3.bf16.msra.mxu0 %v4124_v26 }
 0x1c1   : > { %3846 = vmatpush3.bf16.msra.mxu1 %v5452_v46  ;;  %3749 = vmatprep.subr.bf16.mxu0 %v4125_v6  ;;  %v4068_v46 = vld [vmem:[%s5374_s0 + $0x214] ss:$36 sps:$4 sm:$0xff]  }
 0x1c2   : > { %3847 = vmatprep.subr.bf16.mxu1 %v4892_v11 }
 0x1c3   : > { %v3429_v27 = vpop.f32.mrb[20].mxu1 }
 0x1c4   : > { %v3430_v29 = vpop.f32.mrb[21].mxu1  ;;  %3750 = vmatpush3.bf16.msra.mxu0 %v4126_v30 }
 0x1c5   : > { %3848 = vmatpush3.bf16.msra.mxu1 %v4892_v11  ;;  %v3431_v31 = vadd.f32 %v3430_v29, %v3429_v27  ;;  %v3432_v32 = vpop.f32.mrb[22].mxu1 }
 0x1c6   : > { %v3433_v12 = vpop.f32.mrb[23].mxu1 }
 0x1c7   : > { %v3434_v50 = vadd.f32 %v3433_v12, %v3432_v32  ;;  %2775 = vmatmul.mubr.bf16.vlgmr.msra.gmra.mrb[64].mxu0 %v4063_v28 }
 0x1c8   : > { %3850 = vmatmul.mubr.bf16.vlgmr.msra.gmra.mrb[68].mxu1 %v4067_v9  ;;  %2782 = vmatprep.mubr.bf16.mxu0 %v4068_v46 }
 0x1cf   : > { %2783 = vmatmul.mubr.bf16.gmra.mrb[68].mxu0 %v4070_v33 }
 0x1da   : > { %v3451_v16 = vpop.f32.mrb[20].mxu0 }
 0x1db   : > { %v3479_v34 = vpop.f32.mrb[24].mxu1  ;;  %v3452_v35 = vpop.f32.mrb[21].mxu0 }
 0x1dc   : > { %v3480_v11 = vpop.f32.mrb[25].mxu1  ;;  %v3453_v19 = vadd.f32 %v3452_v35, %v3451_v16  ;;  %v3454_v37 = vpop.f32.mrb[22].mxu0 }
 0x1dd   : > { %v3481_v48 = vadd.f32 %v3480_v11, %v3479_v34  ;;  %v3482_v38 = vpop.f32.mrb[26].mxu1  ;;  %v3455_v39 = vpop.f32.mrb[23].mxu0 }
 0x1de   : > { %v3483_v52 = vpop.f32.mrb[27].mxu1  ;;  %v1963_v41 = vadd.f32 %v3453_v19, %v3425_v61  ;;  %v3456_v43 = vadd.f32 %v3455_v39, %v3454_v37 }
 0x1df   : > { %v3484_v45 = vadd.f32 %v3483_v52, %v3482_v38 }
 0x1e0   : > { %v1966_v47 = vadd.f32 %v3456_v43, %v3428_v7  ;;  %v2012_v51 = vadd.f32 %v3481_v48, %v1963_v41 }
 0x1e2   : > { %v2015_v54 = vadd.f32 %v3484_v45, %v1966_v47  ;;  %v3457_v55 = vpop.f32.mrb[24].mxu0 }
 0x1e3   : > { %v3485_v56 = vpop.f32.mrb[28].mxu1  ;;  %v3458_v57 = vpop.f32.mrb[25].mxu0 }
 0x1e4   : > { %v3486_v36 = vpop.f32.mrb[29].mxu1  ;;  %v3459_v59 = vadd.f32 %v3458_v57, %v3457_v55  ;;  %v3460_v60 = vpop.f32.mrb[26].mxu0 }
 0x1e5   : > { %v3487_v62 = vadd.f32 %v3486_v36, %v3485_v56  ;;  %v3488_v63 = vpop.f32.mrb[30].mxu1  ;;  %v3461_v0 = vpop.f32.mrb[27].mxu0 }
 0x1e6   : > { %v3489_v1 = vpop.f32.mrb[31].mxu1  ;;  %v1971_v10 = vadd.f32 %v3459_v59, %v3431_v31  ;;  %v3462_v2 = vadd.f32 %v3461_v0, %v3460_v60 }
 0x1e7   : > { %v3490_v3 = vadd.f32 %v3489_v1, %v3488_v63 }
 0x1e8   : > { %v1974_v4 = vadd.f32 %v3462_v2, %v3434_v50  ;;  %v2020_v42 = vadd.f32 %v3487_v62, %v1971_v10 }
 0x1ea   : > { %v2023_v8 = vadd.f32 %v3490_v3, %v1974_v4 }
 0x1fa   : > { %v3507_v17 = vpop.f32.mrb[28].mxu0 }
 0x1fb   : > { %v3811_v15 = vpop.f32.mrb[32].mxu1  ;;  %v3508_v53 = vpop.f32.mrb[29].mxu0 }
 0x1fc   : > { %v2109_v13 = vpop.f32.mrb[33].mxu1  ;;  %v3509_v22 = vadd.f32 %v3508_v53, %v3507_v17  ;;  %v3510_v14 = vpop.f32.mrb[30].mxu0 }
 0x1fd   : > { %v3812_v58 = vpop.f32.mrb[34].mxu1  ;;  %v3511_v44 = vpop.f32.mrb[31].mxu0 }
 0x1fe   : > { %v2112_v18 = vpop.f32.mrb[35].mxu1  ;;  %v3512_v61 = vadd.f32 %v3511_v44, %v3510_v14  ;;  %v2061_v20 = vadd.f32 %v3509_v22, %v2012_v51 }
 0x200   : > { %v5306_v23 = vadd.f32 %v2109_v13, %v2061_v20  ;;  %v2064_v24 = vadd.f32 %v3512_v61, %v2015_v54 }
 0x202   : > { %v2840_v5 = vmax.f32 %v5277_v40, %v5306_v23  ;;  %v5310_v7 = vadd.f32 %v2112_v18, %v2064_v24  ;;  %v3513_v26 = vpop.f32.mrb[32].mxu0 }
 0x203   : > { %v3514_v6 = vpop.f32.mrb[33].mxu0 }
 0x204   : > { %v2841_v27 = vmax.f32 %v5286_v25, %v5310_v7  ;;  %v3515_v28 = vadd.f32 %v3514_v6, %v3513_v26  ;;  %v3516_v9 = vpop.f32.mrb[34].mxu0 }
 0x205   : > { %v3517_v29 = vpop.f32.mrb[35].mxu0 }
 0x206   : > { %v2069_v30 = vadd.f32 %v3515_v28, %v2020_v42  ;;  %v3518_v46 = vadd.f32 %v3517_v29, %v3516_v9 }
 0x208   : > { %v5314_v31 = vadd.f32 %v3811_v15, %v2069_v30  ;;  %v2072_v32 = vadd.f32 %v3518_v46, %v2023_v8 }
 0x20a   : > { %v2842_v12 = vmax.f32 %v5274_v49, %v5314_v31  ;;  %v5318_v50 = vadd.f32 %v3812_v58, %v2072_v32 }
 0x20c   : > { %v2843_v33 = vmax.f32 %v5281_v21, %v5318_v50 }
 0x21a   : > { %v3545_v16 = vpop.f32.mrb[36].mxu0 }
 0x21b   : > { %v3573_v34 = vpop.f32.mrb[36].mxu1  ;;  %v3546_v35 = vpop.f32.mrb[37].mxu0 }
 0x21c   : > { %v3574_v11 = vpop.f32.mrb[37].mxu1  ;;  %v3547_v19 = vadd.f32 %v3546_v35, %v3545_v16  ;;  %v3548_v48 = vpop.f32.mrb[38].mxu0 }
 0x21d   : > { %v3575_v37 = vadd.f32 %v3574_v11, %v3573_v34  ;;  %v3576_v38 = vpop.f32.mrb[38].mxu1  ;;  %v3549_v39 = vpop.f32.mrb[39].mxu0 }
 0x21e   : > { %v3577_v52 = vpop.f32.mrb[39].mxu1  ;;  %v3550_v43 = vadd.f32 %v3549_v39, %v3548_v48 }
 0x21f   : > { %v2321_v41 = vadd.f32 %v3575_v37, %v3547_v19  ;;  %v3578_v45 = vadd.f32 %v3577_v52, %v3576_v38 }
 0x221   : > { %v2324_v47 = vadd.f32 %v3578_v45, %v3550_v43 }
 0x222   : > { %v3551_v51 = vpop.f32.mrb[40].mxu0 }
 0x223   : > { %v3579_v54 = vpop.f32.mrb[40].mxu1  ;;  %v3552_v55 = vpop.f32.mrb[41].mxu0 }
 0x224   : > { %v3580_v56 = vpop.f32.mrb[41].mxu1  ;;  %v3553_v57 = vadd.f32 %v3552_v55, %v3551_v51  ;;  %v3554_v59 = vpop.f32.mrb[42].mxu0 }
 0x225   : > { %v3581_v36 = vadd.f32 %v3580_v56, %v3579_v54  ;;  %v3582_v60 = vpop.f32.mrb[42].mxu1  ;;  %v3555_v62 = vpop.f32.mrb[43].mxu0 }
 0x226   : > { %v3583_v63 = vpop.f32.mrb[43].mxu1  ;;  %v3556_v1 = vadd.f32 %v3555_v62, %v3554_v59 }
 0x227   : > { %v2329_v0 = vadd.f32 %v3581_v36, %v3553_v57  ;;  %v3584_v10 = vadd.f32 %v3583_v63, %v3582_v60 }
 0x229   : > { %v2332_v2 = vadd.f32 %v3584_v10, %v3556_v1 }
 0x23a   : > { %v3601_v3 = vpop.f32.mrb[44].mxu0 }
 0x23b   : > { %v3629_v4 = vpop.f32.mrb[44].mxu1  ;;  %v3602_v42 = vpop.f32.mrb[45].mxu0 }
 0x23c   : > { %v3630_v8 = vpop.f32.mrb[45].mxu1  ;;  %v3603_v17 = vadd.f32 %v3602_v42, %v3601_v3  ;;  %v3604_v15 = vpop.f32.mrb[46].mxu0 }
 0x23d   : > { %v3631_v53 = vadd.f32 %v3630_v8, %v3629_v4  ;;  %v3632_v13 = vpop.f32.mrb[46].mxu1  ;;  %v3605_v22 = vpop.f32.mrb[47].mxu0 }
 0x23e   : > { %v3633_v14 = vpop.f32.mrb[47].mxu1  ;;  %v2370_v58 = vadd.f32 %v3603_v17, %v2321_v41  ;;  %v3606_v44 = vadd.f32 %v3605_v22, %v3604_v15 }
 0x23f   : > { %v3634_v18 = vadd.f32 %v3633_v14, %v3632_v13 }
 0x240   : > { %v2373_v61 = vadd.f32 %v3606_v44, %v2324_v47  ;;  %v2419_v20 = vadd.f32 %v3631_v53, %v2370_v58 }
 0x242   : > { %v3607_v24 = vpop.f32.mrb[48].mxu0  ;;  %v2422_v6 = vadd.f32 %v3634_v18, %v2373_v61 }
 0x243   : > { %v3635_v26 = vpop.f32.mrb[48].mxu1  ;;  %v3608_v28 = vpop.f32.mrb[49].mxu0 }
 0x244   : > { %v3636_v9 = vpop.f32.mrb[49].mxu1  ;;  %v3609_v29 = vadd.f32 %v3608_v28, %v3607_v24  ;;  %v3610_v30 = vpop.f32.mrb[50].mxu0 }
 0x245   : > { %v3637_v46 = vadd.f32 %v3636_v9, %v3635_v26  ;;  %v3638_v32 = vpop.f32.mrb[50].mxu1  ;;  %v3611_v16 = vpop.f32.mrb[51].mxu0 }
 0x246   : > { %v3639_v34 = vpop.f32.mrb[51].mxu1  ;;  %v2378_v35 = vadd.f32 %v3609_v29, %v2329_v0  ;;  %v3612_v11 = vadd.f32 %v3611_v16, %v3610_v30 }
 0x247   : > { %v3640_v19 = vadd.f32 %v3639_v34, %v3638_v32 }
 0x248   : > { %v2381_v37 = vadd.f32 %v3612_v11, %v2332_v2  ;;  %v2427_v48 = vadd.f32 %v3637_v46, %v2378_v35 }
 0x24a   : > { %v2430_v38 = vadd.f32 %v3640_v19, %v2381_v37 }
 0x25a   : > { %v3831_v39 = vpop.f32.mrb[52].mxu0 }
 0x25b   : > { %v3667_v52 = vpop.f32.mrb[52].mxu1  ;;  %v5322_v41 = vadd.f32 %v3831_v39, %v2427_v48  ;;  %v2467_v43 = vpop.f32.mrb[53].mxu0 }
 0x25c   : > { %v3668_v45 = vpop.f32.mrb[53].mxu1  ;;  %v5324_v47 = vadd.f32 %v2467_v43, %v2419_v20  ;;  %v3832_v51 = vpop.f32.mrb[54].mxu0 }
 0x25d   : > { %v3669_v54 = vadd.f32 %v3668_v45, %v3667_v52  ;;  %v3670_v55 = vpop.f32.mrb[54].mxu1  ;;  %v5326_v56 = vadd.f32 %v3832_v51, %v2430_v38  ;;  %v2470_v57 = vpop.f32.mrb[55].mxu0 }
 0x25e   : > { %v3671_v36 = vpop.f32.mrb[55].mxu1  ;;  %v5328_v59 = vadd.f32 %v2470_v57, %v2422_v6 }
 0x25f   : > { %v3672_v60 = vadd.f32 %v3671_v36, %v3670_v55 }
 0x263   : > { %v3673_v62 = vpop.f32.mrb[56].mxu1 }
 0x264   : > { %v3674_v63 = vpop.f32.mrb[57].mxu1 }
 0x265   : > { %v3675_v0 = vadd.f32 %v3674_v63, %v3673_v62  ;;  %v3676_v1 = vpop.f32.mrb[58].mxu1 }
 0x266   : > { %v3677_v10 = vpop.f32.mrb[59].mxu1 }
 0x267   : > { %v3678_v2 = vadd.f32 %v3677_v10, %v3676_v1 }
 0x27a   : > { %v3695_v3 = vpop.f32.mrb[56].mxu0 }
 0x27b   : > { %v3723_v4 = vpop.f32.mrb[60].mxu1  ;;  %v3696_v42 = vpop.f32.mrb[57].mxu0 }
 0x27c   : > { %v3724_v8 = vpop.f32.mrb[61].mxu1  ;;  %v3697_v17 = vadd.f32 %v3696_v42, %v3695_v3  ;;  %v3698_v15 = vpop.f32.mrb[58].mxu0  ;;  %v3261_v3 = vld [vmem:[%s830_s24] ss:$0 sm:$0xff] }
 0x27d   : > { %v3725_v53 = vadd.f32 %v3724_v8, %v3723_v4  ;;  %v3726_v13 = vpop.f32.mrb[62].mxu1  ;;  %v3699_v22 = vpop.f32.mrb[59].mxu0 }
 0x27e   : > { %v3727_v14 = vpop.f32.mrb[63].mxu1  ;;  %v2679_v58 = vadd.f32 %v3697_v17, %v3669_v54  ;;  %v3700_v44 = vadd.f32 %v3699_v22, %v3698_v15 }
 0x27f   : > { %v3728_v18 = vadd.f32 %v3727_v14, %v3726_v13 }
 0x280   : > { %v2682_v61 = vadd.f32 %v3700_v44, %v3672_v60  ;;  %v2728_v20 = vadd.f32 %v3725_v53, %v2679_v58 }
 0x282   : > { %v2731_v24 = vadd.f32 %v3728_v18, %v2682_v61  ;;  %v3701_v26 = vpop.f32.mrb[60].mxu0 }
 0x283   : > { %v3729_v6 = vpop.f32.mrb[64].mxu1  ;;  %v3702_v28 = vpop.f32.mrb[61].mxu0 }
 0x284   : > { %v3730_v9 = vpop.f32.mrb[65].mxu1  ;;  %v3703_v29 = vadd.f32 %v3702_v28, %v3701_v26  ;;  %v3704_v30 = vpop.f32.mrb[62].mxu0 }
 0x285   : > { %v3731_v46 = vadd.f32 %v3730_v9, %v3729_v6  ;;  %v3732_v32 = vpop.f32.mrb[66].mxu1  ;;  %v3705_v16 = vpop.f32.mrb[63].mxu0 }
 0x286   : > { %v3733_v34 = vpop.f32.mrb[67].mxu1  ;;  %v2687_v35 = vadd.f32 %v3703_v29, %v3675_v0  ;;  %v3706_v11 = vadd.f32 %v3705_v16, %v3704_v30 }
 0x287   : > { %v3734_v19 = vadd.f32 %v3733_v34, %v3732_v32 }
 0x288   : > { %v2690_v37 = vadd.f32 %v3706_v11, %v3678_v2  ;;  %v2736_v48 = vadd.f32 %v3731_v46, %v2687_v35 }
 0x28a   : > { %v2739_v38 = vadd.f32 %v3734_v19, %v2690_v37 }
 0x29a   : > { %v3751_v39 = vpop.f32.mrb[64].mxu0 }
 0x29b   : > { %v3851_v52 = vpop.f32.mrb[68].mxu1  ;;  %v3752_v43 = vpop.f32.mrb[65].mxu0 }
 0x29c   : > { %v2825_v45 = vpop.f32.mrb[69].mxu1  ;;  %v3753_v51 = vadd.f32 %v3752_v43, %v3751_v39  ;;  %v3754_v54 = vpop.f32.mrb[66].mxu0 }
 0x29d   : > { %v3852_v55 = vpop.f32.mrb[70].mxu1  ;;  %v3755_v57 = vpop.f32.mrb[67].mxu0 }
 0x29e   : > { %v2828_v36 = vpop.f32.mrb[71].mxu1  ;;  %v3756_v60 = vadd.f32 %v3755_v57, %v3754_v54  ;;  %v2777_v62 = vadd.f32 %v3753_v51, %v2728_v20 }
 0x2a0   : > { %v2826_v63 = vadd.f32 %v2825_v45, %v2777_v62  ;;  %v2780_v0 = vadd.f32 %v3756_v60, %v2731_v24 }
 0x2a2   : > { %v2844_v1 = vmax.f32 %v5324_v47, %v2826_v63  ;;  %v2829_v10 = vadd.f32 %v2828_v36, %v2780_v0  ;;  %v3757_v2 = vpop.f32.mrb[68].mxu0 }
 0x2a3   : > { %v3758_v4 = vpop.f32.mrb[69].mxu0 }
 0x2a4   : > { %v2848_v42 = vmax.f32 %v2840_v5, %v2844_v1  ;;  %v2845_v8 = vmax.f32 %v5328_v59, %v2829_v10  ;;  %v3759_v17 = vadd.f32 %v3758_v4, %v3757_v2  ;;  %v3760_v15 = vpop.f32.mrb[70].mxu0 }
 0x2a5   : > { %v3761_v53 = vpop.f32.mrb[71].mxu0 }
 0x2a6   : > { %v2859_v13 = vadd.f32 %v3261_v3, %v2848_v42  ;;  %v2849_v22 = vmax.f32 %v2841_v27, %v2845_v8  ;;  %v2785_v47 = vadd.f32 %v3759_v17, %v2736_v48  ;;  %v3762_v14 = vadd.f32 %v3761_v53, %v3760_v15 }
 0x2a8   : > { %v2867_v58 = vmul.f32 0.01, %v2859_v13  ;;  %v2860_v44 = vadd.f32 %v3261_v3, %v2849_v22  ;;  %v2834_v18 = vadd.f32 %v3851_v52, %v2785_v47  ;;  %vm2863_vm0 = vcmp.ge.f32.partialorder %v2859_v13, 0.0 }
 0x2a9   : > { %v2788_v40 = vadd.f32 %v3762_v14, %v2739_v38 }
 0x2aa   : > { %vm2864_vm1 = vcmp.ge.f32.partialorder %v2860_v44, 0.0  ;;  %v2868_v23 = vmul.f32 0.01, %v2860_v44  ;;  %v2846_v5 = vmax.f32 %v5322_v41, %v2834_v18  ;;  %v2871_v61 = vsel %vm2863_vm0, %v2859_v13, %v2867_v58 }
 0x2ab   : > { %v2837_v59 = vadd.f32 %v3852_v55, %v2788_v40 }
 0x2ac   : > { %v2872_v20 = vsel %vm2864_vm1, %v2860_v44, %v2868_v23  ;;  %v2850_v25 = vmax.f32 %v2842_v12, %v2846_v5 }
 0x2ad   : > { %v3277_v7 = vpack.c.bf16 %v2872_v20, %v2871_v61  ;;  %v2847_v27 = vmax.f32 %v5326_v56, %v2837_v59 }
 0x2ae   : > { %v2861_v24 = vadd.f32 %v3261_v3, %v2850_v25 }
 0x2af   : > { %3278 = vst [vmem:[%s820_s26] sm:$0xff] %v3277_v7   ;;  %v2851_v26 = vmax.f32 %v2843_v33, %v2847_v27 }
 0x2b0   : > { %v2869_v6 = vmul.f32 0.01, %v2861_v24  ;;  %vm2865_vm2 = vcmp.ge.f32.partialorder %v2861_v24, 0.0 }
 0x2b1   : > { %v2862_v28 = vadd.f32 %v3261_v3, %v2851_v26 }
 0x2b2   : > { %v2873_v9 = vsel %vm2865_vm2, %v2861_v24, %v2869_v6  ;;  %2901 = sbr.rel (!%p4222_p6) target bundleno = 705 (0x2c1), region = 77 }
 0x2b3   : > { %vm2866_vm3 = vcmp.ge.f32.partialorder %v2862_v28, 0.0  ;;  %v2870_v41 = vmul.f32 0.01, %v2862_v28 }
 0x2b5   : > { %v2874_v29 = vsel %vm2866_vm3, %v2862_v28, %v2870_v41 }
 0x2b6   : > { %v3282_v30 = vpack.c.bf16 %v2874_v29, %v2873_v9  ;;  %v2922_v49 = vld [vmem:[%s820_s26] sm:$0xf] (%p4222_p6)  ;;  %v2924_v31 = vld [vmem:[%s820_s26 + $0x4] sm:$0xf] (%p4222_p6) }
 0x2b7   : > { %2923 = vst [vmem:[%s2906_s28] sm:$0xf] (%p4222_p6), %v2922_v49  ;;  %2925 = vst [vmem:[%s2906_s28 + $0x8] sm:$0xf] (%p4222_p6), %v2924_v31 }
 0x2b8   : > { %3284 = vst [vmem:[%s820_s26 + $0x8] sm:$0xff] %v3282_v30  }
 0x2bf   : > { %v2926_v21 = vld [vmem:[%s820_s26 + $0x8] sm:$0xf]  ;;  %v2928_v12 = vld [vmem:[%s820_s26 + $0xc] sm:$0xf] }
 0x2c0   : > { %2927 = vst [vmem:[%s2906_s28 + $0x10] sm:$0xf] %v2926_v21  ;;  %2929 = vst [vmem:[%s2906_s28 + $0x18] sm:$0xf] %v2928_v12 }
 0x2c1 PF: > { %s13_s16 = sadd.s32 1, %s4165_s16   ;;  %s5453_s12 = smov %s4153_s13 }
 0x2c2   : > { %p10_p12 = scmp.ge.s32.totalorder %s13_s16, 4   ;;  %s5454_s13 = smov %s4227_s22 }
 0x2c3   : > { %s5455_s14 = smov %s4161_s15  ;;  %s5456_s15 = smov %s5458_s17 }
 0x2c4   :  { %12 = sbr.rel (!%p10_p12) target bundleno = 3 (0x3), region = 158 }

// kernel: variant2_forward.9
= control target key start
LH: loop header
LB: loop body
LE: loop exit
PB: predicated region body
PF: predicated region fallthrough
CT: control target
= control target key end

     0   :  { %vm6601_vm8 = vmmov 0   ;;  %vm4879_vm11 = vcmask 31744   ;;  %s8570_s1 = inlined_call_operand.vmem [shape: bf16[2304,512], index: 1, kind: input, shape index: {}]   ;;  %s8571_s0 = inlined_call_operand.vmem [shape: bf16[16,2304], index: 0, kind: input, shape index: {}]   ;;  %s8572_s3 = inlined_call_operand.vmem [shape: bf16[512,128], index: 3, kind: input, shape index: {}]   ;;  %s8573_s5 = inlined_call_operand.vmem [shape: bf16[128,4], index: 5, kind: input, shape index: {}]   ;;  %s8574_s2 = inlined_call_operand.vmem [shape: f32[1,512], index: 2, kind: input, shape index: {}]   ;;  %s8575_s4 = inlined_call_operand.vmem [shape: f32[1,128], index: 4, kind: input, shape index: {}]   ;;  %s8576_s6 = inlined_call_operand.vmem [shape: f32[1,4], index: 6, kind: input, shape index: {}]   ;;  %s8577_s7 = inlined_call_operand.vmem [shape: f32[16,4], index: 7, kind: output, shape index: {}]  }
   0x1   :  { %v5669_v0 = vld [vmem:[%s8570_s1 + $0x4] ss:$16 sps:$4 sm:$0xff]   ;;  %v5671_v1 = vld [vmem:[%s8570_s1 + $0xc] ss:$16 sps:$4 sm:$0xff]   ;;  %v5673_v2 = vld [vmem:[%s8570_s1] ss:$16 sps:$4 sm:$0xff]  }
   0x2   :  { %3613 = vmatprep.subr.bf16.mxu0 %v5669_v0  ;;  %v5674_v3 = vld [vmem:[%s8570_s1 + $0x8] ss:$16 sps:$4 sm:$0xff]   ;;  %4000 = vmatprep.subr.bf16.mxu1 %v5671_v1  ;;  %v5675_v4 = vld [vmem:[%s8570_s1 + $0x24] ss:$16 sps:$4 sm:$0xff]   ;;  %v5677_v5 = vld [vmem:[%s8570_s1 + $0x2c] ss:$16 sps:$4 sm:$0xff]  }
   0x3   :  { %3614 = vmatpush1.bf16.msra.mxu0 %v5673_v2  ;;  %4001 = vmatpush1.bf16.msra.mxu1 %v5674_v3  ;;  %v5679_v6 = vld [vmem:[%s8570_s1 + $0x20] ss:$16 sps:$4 sm:$0xff]   ;;  %v5680_v7 = vld [vmem:[%s8570_s1 + $0x28] ss:$16 sps:$4 sm:$0xff]   ;;  %v5681_v8 = vld [vmem:[%s8570_s1 + $0x44] ss:$16 sps:$4 sm:$0xff]  }
   0x4   :  { %3615 = vmatprep.subr.bf16.mxu0 %v5675_v4  ;;  %4002 = vmatprep.subr.bf16.mxu1 %v5677_v5  ;;  %v5683_v9 = vld [vmem:[%s8570_s1 + $0x4c] ss:$16 sps:$4 sm:$0xff]   ;;  %v5685_v10 = vld [vmem:[%s8570_s1 + $0x40] ss:$16 sps:$4 sm:$0xff]   ;;  %v5686_v11 = vld [vmem:[%s8570_s1 + $0x48] ss:$16 sps:$4 sm:$0xff]  }
   0x5   :  { %v5687_v12 = vld [vmem:[%s8570_s1 + $0x64] ss:$16 sps:$4 sm:$0xff]   ;;  %v5689_v13 = vld [vmem:[%s8570_s1 + $0x6c] ss:$16 sps:$4 sm:$0xff]   ;;  %v5691_v14 = vld [vmem:[%s8570_s1 + $0x60] ss:$16 sps:$4 sm:$0xff]  }
   0x6   :  { %v5692_v15 = vld [vmem:[%s8570_s1 + $0x68] ss:$16 sps:$4 sm:$0xff]   ;;  %v5693_v16 = vld [vmem:[%s8570_s1 + $0x84] ss:$16 sps:$4 sm:$0xff]   ;;  %v5695_v17 = vld [vmem:[%s8570_s1 + $0x8c] ss:$16 sps:$4 sm:$0xff]  }
   0x7   :  { %3616 = vmatpush1.bf16.msra.mxu0 %v5679_v6  ;;  %4003 = vmatpush1.bf16.msra.mxu1 %v5680_v7  ;;  %v5697_v18 = vld [vmem:[%s8570_s1 + $0x80] ss:$16 sps:$4 sm:$0xff]   ;;  %v5698_v19 = vld [vmem:[%s8570_s1 + $0x88] ss:$16 sps:$4 sm:$0xff]   ;;  %v5699_v20 = vld [vmem:[%s8570_s1 + $0xa4] ss:$16 sps:$4 sm:$0xff]  }
   0x8   :  { %3617 = vmatprep.subr.bf16.mxu0 %v5681_v8  ;;  %4004 = vmatprep.subr.bf16.mxu1 %v5683_v9  ;;  %v5701_v21 = vld [vmem:[%s8570_s1 + $0xac] ss:$16 sps:$4 sm:$0xff]   ;;  %v5703_v22 = vld [vmem:[%s8570_s1 + $0xa0] ss:$16 sps:$4 sm:$0xff]   ;;  %v5704_v23 = vld [vmem:[%s8570_s1 + $0xa8] ss:$16 sps:$4 sm:$0xff]  }
   0x9   :  { %v5705_v24 = vld [vmem:[%s8570_s1 + $0xc4] ss:$16 sps:$4 sm:$0xff]   ;;  %v5707_v25 = vld [vmem:[%s8570_s1 + $0xcc] ss:$16 sps:$4 sm:$0xff]   ;;  %v5709_v26 = vld [vmem:[%s8570_s1 + $0xc0] ss:$16 sps:$4 sm:$0xff]  }
   0xa   :  { %v5710_v27 = vld [vmem:[%s8570_s1 + $0xc8] ss:$16 sps:$4 sm:$0xff]   ;;  %v5711_v28 = vld [vmem:[%s8570_s1 + $0xe4] ss:$16 sps:$4 sm:$0xff]   ;;  %v5713_v29 = vld [vmem:[%s8570_s1 + $0xec] ss:$16 sps:$4 sm:$0xff]  }
   0xb   :  { %3618 = vmatpush1.bf16.msra.mxu0 %v5685_v10  ;;  %4005 = vmatpush1.bf16.msra.mxu1 %v5686_v11  ;;  %v5715_v30 = vld [vmem:[%s8570_s1 + $0xe0] ss:$16 sps:$4 sm:$0xff]   ;;  %v5716_v31 = vld [vmem:[%s8570_s1 + $0xe8] ss:$16 sps:$4 sm:$0xff]   ;;  %v5717_v32 = vld [vmem:[%s8570_s1 + $0x104] ss:$16 sps:$4 sm:$0xff]  }
   0xc   :  { %3619 = vmatprep.subr.bf16.mxu0 %v5687_v12  ;;  %4006 = vmatprep.subr.bf16.mxu1 %v5689_v13  ;;  %v5719_v33 = vld [vmem:[%s8570_s1 + $0x10c] ss:$16 sps:$4 sm:$0xff]   ;;  %v5721_v34 = vld [vmem:[%s8570_s1 + $0x100] ss:$16 sps:$4 sm:$0xff]   ;;  %v5722_v35 = vld [vmem:[%s8570_s1 + $0x108] ss:$16 sps:$4 sm:$0xff]  }
   0xd   :  { %v5723_v36 = vld [vmem:[%s8570_s1 + $0x124] ss:$16 sps:$4 sm:$0xff]   ;;  %v5725_v37 = vld [vmem:[%s8570_s1 + $0x12c] ss:$16 sps:$4 sm:$0xff]   ;;  %v5727_v38 = vld [vmem:[%s8570_s1 + $0x120] ss:$16 sps:$4 sm:$0xff]  }
   0xe   :  { %v5728_v39 = vld [vmem:[%s8570_s1 + $0x128] ss:$16 sps:$4 sm:$0xff]   ;;  %v5729_v40 = vld [vmem:[%s8570_s1 + $0x144] ss:$16 sps:$4 sm:$0xff]   ;;  %v5731_v41 = vld [vmem:[%s8570_s1 + $0x14c] ss:$16 sps:$4 sm:$0xff]  }
   0xf   :  { %3620 = vmatpush1.bf16.msra.mxu0 %v5691_v14  ;;  %4007 = vmatpush1.bf16.msra.mxu1 %v5692_v15  ;;  %v5733_v42 = vld [vmem:[%s8570_s1 + $0x140] ss:$16 sps:$4 sm:$0xff]   ;;  %v5734_v43 = vld [vmem:[%s8570_s1 + $0x148] ss:$16 sps:$4 sm:$0xff]   ;;  %v5735_v44 = vld [vmem:[%s8570_s1 + $0x164] ss:$16 sps:$4 sm:$0xff]  }
  0x10   :  { %3621 = vmatprep.subr.bf16.mxu0 %v5693_v16  ;;  %4008 = vmatprep.subr.bf16.mxu1 %v5695_v17  ;;  %v5737_v45 = vld [vmem:[%s8570_s1 + $0x16c] ss:$16 sps:$4 sm:$0xff]   ;;  %v5739_v46 = vld [vmem:[%s8570_s1 + $0x160] ss:$16 sps:$4 sm:$0xff]   ;;  %v5740_v47 = vld [vmem:[%s8570_s1 + $0x168] ss:$16 sps:$4 sm:$0xff]  }
  0x11   :  { %v5767_v48 = vld [vmem:[%s8571_s0 + $0x4] ss:$72 sps:$4 sm:$0xff]   ;;  %v5745_v51 = vld [vmem:[%s8570_s1 + $0x180] ss:$16 sps:$4 sm:$0xff]   ;;  %v5746_v52 = vld [vmem:[%s8570_s1 + $0x188] ss:$16 sps:$4 sm:$0xff]  }
  0x12   :  { %v5741_v49 = vld [vmem:[%s8570_s1 + $0x184] ss:$16 sps:$4 sm:$0xff]   ;;  %v5743_v50 = vld [vmem:[%s8570_s1 + $0x18c] ss:$16 sps:$4 sm:$0xff]   ;;  %3645 = vmatprep.mubr.bf16.mxu0 %v5767_v48  ;;  %4032 = vmatprep.mubr.bf16.mxu1 %v5767_v48  ;;  %v5751_v55 = vld [vmem:[%s8570_s1 + $0x1a0] ss:$16 sps:$4 sm:$0xff]  }
  0x13   :  { %3622 = vmatpush1.bf16.msra.mxu0 %v5697_v18  ;;  %4009 = vmatpush1.bf16.msra.mxu1 %v5698_v19  ;;  %v5747_v53 = vld [vmem:[%s8570_s1 + $0x1a4] ss:$16 sps:$4 sm:$0xff]   ;;  %v5749_v54 = vld [vmem:[%s8570_s1 + $0x1ac] ss:$16 sps:$4 sm:$0xff]   ;;  %v5752_v56 = vld [vmem:[%s8570_s1 + $0x1a8] ss:$16 sps:$4 sm:$0xff]  }
  0x14   :  { %3623 = vmatprep.subr.bf16.mxu0 %v5699_v20  ;;  %4010 = vmatprep.subr.bf16.mxu1 %v5701_v21  ;;  %v5753_v57 = vld [vmem:[%s8570_s1 + $0x1c4] ss:$16 sps:$4 sm:$0xff]   ;;  %v5755_v58 = vld [vmem:[%s8570_s1 + $0x1cc] ss:$16 sps:$4 sm:$0xff]   ;;  %v5757_v59 = vld [vmem:[%s8570_s1 + $0x1c0] ss:$16 sps:$4 sm:$0xff]  }
  0x15   :  { %v5758_v60 = vld [vmem:[%s8570_s1 + $0x1c8] ss:$16 sps:$4 sm:$0xff]   ;;  %v5759_v61 = vld [vmem:[%s8570_s1 + $0x1e4] ss:$16 sps:$4 sm:$0xff]   ;;  %v5761_v62 = vld [vmem:[%s8570_s1 + $0x1ec] ss:$16 sps:$4 sm:$0xff]  }
  0x16   :  { %v5763_v63 = vld [vmem:[%s8570_s1 + $0x1e0] ss:$16 sps:$4 sm:$0xff]   ;;  %v5764_v0 = vld [vmem:[%s8570_s1 + $0x1e8] ss:$16 sps:$4 sm:$0xff]   ;;  %v5770_v1 = vld [vmem:[%s8570_s1 + $0x204] ss:$16 sps:$4 sm:$0xff]  }
  0x17   :  { %3624 = vmatpush1.bf16.msra.mxu0 %v5703_v22  ;;  %4011 = vmatpush1.bf16.msra.mxu1 %v5704_v23  ;;  %v5773_v2 = vld [vmem:[%s8570_s1 + $0x20c] ss:$16 sps:$4 sm:$0xff]   ;;  %v5765_v3 = vld [vmem:[%s8571_s0] ss:$72 sps:$4 sm:$0xff]   ;;  %v5776_v6 = vld [vmem:[%s8570_s1 + $0x224] ss:$16 sps:$4 sm:$0xff]  }
  0x18   :  { %3625 = vmatprep.subr.bf16.mxu0 %v5705_v24  ;;  %4012 = vmatprep.subr.bf16.mxu1 %v5707_v25  ;;  %v5768_v4 = vld [vmem:[%s8570_s1 + $0x200] ss:$16 sps:$4 sm:$0xff]   ;;  %v5771_v5 = vld [vmem:[%s8570_s1 + $0x208] ss:$16 sps:$4 sm:$0xff]   ;;  %v5779_v7 = vld [vmem:[%s8570_s1 + $0x22c] ss:$16 sps:$4 sm:$0xff]  }
  0x19   :  { %v5774_v8 = vld [vmem:[%s8570_s1 + $0x220] ss:$16 sps:$4 sm:$0xff]   ;;  %v5777_v9 = vld [vmem:[%s8570_s1 + $0x228] ss:$16 sps:$4 sm:$0xff]   ;;  %v5782_v10 = vld [vmem:[%s8570_s1 + $0x244] ss:$16 sps:$4 sm:$0xff]  }
  0x1a   :  { %v5785_v11 = vld [vmem:[%s8570_s1 + $0x24c] ss:$16 sps:$4 sm:$0xff]   ;;  %v5780_v12 = vld [vmem:[%s8570_s1 + $0x240] ss:$16 sps:$4 sm:$0xff]   ;;  %v5783_v13 = vld [vmem:[%s8570_s1 + $0x248] ss:$16 sps:$4 sm:$0xff]  }
  0x1b   :  { %3626 = vmatpush1.bf16.msra.mxu0 %v5709_v26  ;;  %4013 = vmatpush1.bf16.msra.mxu1 %v5710_v27  ;;  %v5788_v14 = vld [vmem:[%s8570_s1 + $0x264] ss:$16 sps:$4 sm:$0xff]   ;;  %v5791_v15 = vld [vmem:[%s8570_s1 + $0x26c] ss:$16 sps:$4 sm:$0xff]   ;;  %v5786_v16 = vld [vmem:[%s8570_s1 + $0x260] ss:$16 sps:$4 sm:$0xff]  }
  0x1c   :  { %3627 = vmatprep.subr.bf16.mxu0 %v5711_v28  ;;  %4014 = vmatprep.subr.bf16.mxu1 %v5713_v29  ;;  %v5789_v17 = vld [vmem:[%s8570_s1 + $0x268] ss:$16 sps:$4 sm:$0xff]   ;;  %v5794_v18 = vld [vmem:[%s8570_s1 + $0x284] ss:$16 sps:$4 sm:$0xff]   ;;  %v5797_v19 = vld [vmem:[%s8570_s1 + $0x28c] ss:$16 sps:$4 sm:$0xff]  }
  0x1d   :  { %v5792_v20 = vld [vmem:[%s8570_s1 + $0x280] ss:$16 sps:$4 sm:$0xff]   ;;  %v5795_v21 = vld [vmem:[%s8570_s1 + $0x288] ss:$16 sps:$4 sm:$0xff]   ;;  %v5800_v22 = vld [vmem:[%s8570_s1 + $0x2a4] ss:$16 sps:$4 sm:$0xff]  }
  0x1e   :  { %v5803_v23 = vld [vmem:[%s8570_s1 + $0x2ac] ss:$16 sps:$4 sm:$0xff]   ;;  %v5798_v24 = vld [vmem:[%s8570_s1 + $0x2a0] ss:$16 sps:$4 sm:$0xff]   ;;  %v5801_v25 = vld [vmem:[%s8570_s1 + $0x2a8] ss:$16 sps:$4 sm:$0xff]  }
  0x1f   :  { %3628 = vmatpush1.bf16.msra.mxu0 %v5715_v30  ;;  %4015 = vmatpush1.bf16.msra.mxu1 %v5716_v31  ;;  %v5806_v26 = vld [vmem:[%s8570_s1 + $0x2c4] ss:$16 sps:$4 sm:$0xff]   ;;  %v5809_v27 = vld [vmem:[%s8570_s1 + $0x2cc] ss:$16 sps:$4 sm:$0xff]   ;;  %v5804_v28 = vld [vmem:[%s8570_s1 + $0x2c0] ss:$16 sps:$4 sm:$0xff]  }
  0x20   :  { %3629 = vmatprep.subr.bf16.mxu0 %v5717_v32  ;;  %4016 = vmatprep.subr.bf16.mxu1 %v5719_v33  ;;  %v5807_v29 = vld [vmem:[%s8570_s1 + $0x2c8] ss:$16 sps:$4 sm:$0xff]   ;;  %v5866_v30 = vld [vmem:[%s8571_s0 + $0xc] ss:$72 sps:$4 sm:$0xff]   ;;  %v5810_v33 = vld [vmem:[%s8570_s1 + $0x2e0] ss:$16 sps:$4 sm:$0xff]  }
  0x21   :  { %v5812_v31 = vld [vmem:[%s8570_s1 + $0x2e4] ss:$16 sps:$4 sm:$0xff]   ;;  %v5815_v32 = vld [vmem:[%s8570_s1 + $0x2ec] ss:$16 sps:$4 sm:$0xff]  }
  0x22   :  { %v5839_v48 = vld [vmem:[%s8570_s1 + $0x36c] ss:$16 sps:$4 sm:$0xff]  }
  0x23   :  { %3630 = vmatpush1.bf16.msra.mxu0 %v5721_v34  ;;  %4017 = vmatpush1.bf16.msra.mxu1 %v5722_v35  ;;  %v5813_v34 = vld [vmem:[%s8570_s1 + $0x2e8] ss:$16 sps:$4 sm:$0xff]   ;;  %v5818_v35 = vld [vmem:[%s8570_s1 + $0x304] ss:$16 sps:$4 sm:$0xff]  }
  0x24   :  { %3631 = vmatprep.subr.bf16.mxu0 %v5723_v36  ;;  %4018 = vmatprep.subr.bf16.mxu1 %v5725_v37  ;;  %v5821_v36 = vld [vmem:[%s8570_s1 + $0x30c] ss:$16 sps:$4 sm:$0xff]   ;;  %v5816_v37 = vld [vmem:[%s8570_s1 + $0x300] ss:$16 sps:$4 sm:$0xff]  }
  0x27   :  { %3632 = vmatpush1.bf16.msra.mxu0 %v5727_v38  ;;  %4019 = vmatpush1.bf16.msra.mxu1 %v5728_v39  ;;  %v5819_v38 = vld [vmem:[%s8570_s1 + $0x308] ss:$16 sps:$4 sm:$0xff]   ;;  %v5824_v39 = vld [vmem:[%s8570_s1 + $0x324] ss:$16 sps:$4 sm:$0xff]  }
  0x28   :  { %3633 = vmatprep.subr.bf16.mxu0 %v5729_v40  ;;  %4020 = vmatprep.subr.bf16.mxu1 %v5731_v41  ;;  %v5827_v40 = vld [vmem:[%s8570_s1 + $0x32c] ss:$16 sps:$4 sm:$0xff]   ;;  %v5822_v41 = vld [vmem:[%s8570_s1 + $0x320] ss:$16 sps:$4 sm:$0xff]  }
  0x2b   :  { %3634 = vmatpush1.bf16.msra.mxu0 %v5733_v42  ;;  %4021 = vmatpush1.bf16.msra.mxu1 %v5734_v43  ;;  %v5825_v42 = vld [vmem:[%s8570_s1 + $0x328] ss:$16 sps:$4 sm:$0xff]   ;;  %v5830_v43 = vld [vmem:[%s8570_s1 + $0x344] ss:$16 sps:$4 sm:$0xff]  }
  0x2c   :  { %3635 = vmatprep.subr.bf16.mxu0 %v5735_v44  ;;  %4022 = vmatprep.subr.bf16.mxu1 %v5737_v45  ;;  %v5833_v44 = vld [vmem:[%s8570_s1 + $0x34c] ss:$16 sps:$4 sm:$0xff]   ;;  %v5828_v45 = vld [vmem:[%s8570_s1 + $0x340] ss:$16 sps:$4 sm:$0xff]  }
  0x2f   :  { %3636 = vmatpush1.bf16.msra.mxu0 %v5739_v46  ;;  %4023 = vmatpush1.bf16.msra.mxu1 %v5740_v47  ;;  %v5831_v46 = vld [vmem:[%s8570_s1 + $0x348] ss:$16 sps:$4 sm:$0xff]   ;;  %v5836_v47 = vld [vmem:[%s8570_s1 + $0x364] ss:$16 sps:$4 sm:$0xff]  }
  0x30   :  { %3637 = vmatprep.subr.bf16.mxu0 %v5741_v49  ;;  %4024 = vmatprep.subr.bf16.mxu1 %v5743_v50  ;;  %v5834_v49 = vld [vmem:[%s8570_s1 + $0x360] ss:$16 sps:$4 sm:$0xff]   ;;  %v5837_v50 = vld [vmem:[%s8570_s1 + $0x368] ss:$16 sps:$4 sm:$0xff]  }
  0x33   :  { %3638 = vmatpush1.bf16.msra.mxu0 %v5745_v51  ;;  %4025 = vmatpush1.bf16.msra.mxu1 %v5746_v52  ;;  %v5842_v51 = vld [vmem:[%s8570_s1 + $0x384] ss:$16 sps:$4 sm:$0xff]   ;;  %v5845_v52 = vld [vmem:[%s8570_s1 + $0x38c] ss:$16 sps:$4 sm:$0xff]  }
  0x34   :  { %3639 = vmatprep.subr.bf16.mxu0 %v5747_v53  ;;  %4026 = vmatprep.subr.bf16.mxu1 %v5749_v54  ;;  %v5840_v53 = vld [vmem:[%s8570_s1 + $0x380] ss:$16 sps:$4 sm:$0xff]   ;;  %v5843_v54 = vld [vmem:[%s8570_s1 + $0x388] ss:$16 sps:$4 sm:$0xff]  }
  0x37   :  { %3640 = vmatpush1.bf16.msra.mxu0 %v5751_v55  ;;  %4027 = vmatpush1.bf16.msra.mxu1 %v5752_v56  ;;  %v5848_v55 = vld [vmem:[%s8570_s1 + $0x3a4] ss:$16 sps:$4 sm:$0xff]   ;;  %v5851_v56 = vld [vmem:[%s8570_s1 + $0x3ac] ss:$16 sps:$4 sm:$0xff]  }
  0x38   :  { %3641 = vmatprep.subr.bf16.mxu0 %v5753_v57  ;;  %4028 = vmatprep.subr.bf16.mxu1 %v5755_v58  ;;  %v5846_v57 = vld [vmem:[%s8570_s1 + $0x3a0] ss:$16 sps:$4 sm:$0xff]   ;;  %v5849_v58 = vld [vmem:[%s8570_s1 + $0x3a8] ss:$16 sps:$4 sm:$0xff]  }
  0x3b   :  { %3642 = vmatpush1.bf16.msra.mxu0 %v5757_v59  ;;  %4029 = vmatpush1.bf16.msra.mxu1 %v5758_v60  ;;  %v5854_v59 = vld [vmem:[%s8570_s1 + $0x3c4] ss:$16 sps:$4 sm:$0xff]   ;;  %v5857_v60 = vld [vmem:[%s8570_s1 + $0x3cc] ss:$16 sps:$4 sm:$0xff]  }
  0x3c   :  { %3643 = vmatprep.subr.bf16.mxu0 %v5759_v61  ;;  %4030 = vmatprep.subr.bf16.mxu1 %v5761_v62  ;;  %v5852_v61 = vld [vmem:[%s8570_s1 + $0x3c0] ss:$16 sps:$4 sm:$0xff]   ;;  %v5855_v62 = vld [vmem:[%s8570_s1 + $0x3c8] ss:$16 sps:$4 sm:$0xff]  }
  0x3f   :  { %3644 = vmatpush1.bf16.msra.mxu0 %v5763_v63  ;;  %4031 = vmatpush1.bf16.msra.mxu1 %v5764_v0  ;;  %v5860_v63 = vld [vmem:[%s8570_s1 + $0x3e4] ss:$16 sps:$4 sm:$0xff]   ;;  %v5863_v0 = vld [vmem:[%s8570_s1 + $0x3ec] ss:$16 sps:$4 sm:$0xff]  }
  0x40   :  { %3656 = vmatprep.subr.bf16.mxu0 %v5770_v1  ;;  %4043 = vmatprep.subr.bf16.mxu1 %v5773_v2  ;;  %v5858_v1 = vld [vmem:[%s8570_s1 + $0x3e0] ss:$16 sps:$4 sm:$0xff]   ;;  %v5861_v2 = vld [vmem:[%s8570_s1 + $0x3e8] ss:$16 sps:$4 sm:$0xff]  }
  0x42   :  { %3646 = vmatmul.mubr.bf16.vlgmr.msra.gmra.mrb[0].mxu0 %v5765_v3  ;;  %4033 = vmatmul.mubr.bf16.vlgmr.msra.gmra.mrb[0].mxu1 %v5765_v3  ;;  %v5869_v3 = vld [vmem:[%s8570_s1 + $0x404] ss:$16 sps:$4 sm:$0xff]  }
  0x43   :  { %3657 = vmatpush1.bf16.msra.mxu0 %v5768_v4  ;;  %4044 = vmatpush1.bf16.msra.mxu1 %v5771_v5  ;;  %v5872_v4 = vld [vmem:[%s8570_s1 + $0x40c] ss:$16 sps:$4 sm:$0xff]   ;;  %v5864_v5 = vld [vmem:[%s8571_s0 + $0x8] ss:$72 sps:$4 sm:$0xff]  }
  0x44   :  { %3658 = vmatprep.subr.bf16.mxu0 %v5776_v6  ;;  %4045 = vmatprep.subr.bf16.mxu1 %v5779_v7  ;;  %v5867_v6 = vld [vmem:[%s8570_s1 + $0x400] ss:$16 sps:$4 sm:$0xff]   ;;  %v5870_v7 = vld [vmem:[%s8570_s1 + $0x408] ss:$16 sps:$4 sm:$0xff]  }
  0x45   :  { %3688 = vmatprep.mubr.bf16.mxu0 %v5866_v30  ;;  %4075 = vmatprep.mubr.bf16.mxu1 %v5866_v30  ;;  %v5908_v30 = vld [vmem:[%s8570_s1 + $0x4cc] ss:$16 sps:$4 sm:$0xff]  }
  0x47   :  { %3659 = vmatpush1.bf16.msra.mxu0 %v5774_v8  ;;  %4046 = vmatpush1.bf16.msra.mxu1 %v5777_v9  ;;  %v5875_v8 = vld [vmem:[%s8570_s1 + $0x424] ss:$16 sps:$4 sm:$0xff]   ;;  %v5878_v9 = vld [vmem:[%s8570_s1 + $0x42c] ss:$16 sps:$4 sm:$0xff]  }
  0x48   :  { %3660 = vmatprep.subr.bf16.mxu0 %v5782_v10  ;;  %4047 = vmatprep.subr.bf16.mxu1 %v5785_v11  ;;  %v5873_v10 = vld [vmem:[%s8570_s1 + $0x420] ss:$16 sps:$4 sm:$0xff]   ;;  %v5876_v11 = vld [vmem:[%s8570_s1 + $0x428] ss:$16 sps:$4 sm:$0xff]  }
  0x4b   :  { %3661 = vmatpush1.bf16.msra.mxu0 %v5780_v12  ;;  %4048 = vmatpush1.bf16.msra.mxu1 %v5783_v13  ;;  %v5965_v12 = vld [vmem:[%s8571_s0 + $0x14] ss:$72 sps:$4 sm:$0xff]  }
  0x4c   :  { %3662 = vmatprep.subr.bf16.mxu0 %v5788_v14  ;;  %4049 = vmatprep.subr.bf16.mxu1 %v5791_v15  ;;  %v5881_v13 = vld [vmem:[%s8570_s1 + $0x444] ss:$16 sps:$4 sm:$0xff]   ;;  %v5884_v14 = vld [vmem:[%s8570_s1 + $0x44c] ss:$16 sps:$4 sm:$0xff]   ;;  %v5879_v15 = vld [vmem:[%s8570_s1 + $0x440] ss:$16 sps:$4 sm:$0xff]  }
  0x4f   :  { %3663 = vmatpush1.bf16.msra.mxu0 %v5786_v16  ;;  %4050 = vmatpush1.bf16.msra.mxu1 %v5789_v17  ;;  %v5882_v16 = vld [vmem:[%s8570_s1 + $0x448] ss:$16 sps:$4 sm:$0xff]   ;;  %v5887_v17 = vld [vmem:[%s8570_s1 + $0x464] ss:$16 sps:$4 sm:$0xff]  }
  0x50   :  { %3664 = vmatprep.subr.bf16.mxu0 %v5794_v18  ;;  %4051 = vmatprep.subr.bf16.mxu1 %v5797_v19  ;;  %v5890_v18 = vld [vmem:[%s8570_s1 + $0x46c] ss:$16 sps:$4 sm:$0xff]   ;;  %v5885_v19 = vld [vmem:[%s8570_s1 + $0x460] ss:$16 sps:$4 sm:$0xff]  }
  0x53   :  { %3665 = vmatpush1.bf16.msra.mxu0 %v5792_v20  ;;  %4052 = vmatpush1.bf16.msra.mxu1 %v5795_v21  ;;  %v5888_v20 = vld [vmem:[%s8570_s1 + $0x468] ss:$16 sps:$4 sm:$0xff]   ;;  %v5893_v21 = vld [vmem:[%s8570_s1 + $0x484] ss:$16 sps:$4 sm:$0xff]  }
  0x54   :  { %3666 = vmatprep.subr.bf16.mxu0 %v5800_v22  ;;  %4053 = vmatprep.subr.bf16.mxu1 %v5803_v23  ;;  %v5896_v22 = vld [vmem:[%s8570_s1 + $0x48c] ss:$16 sps:$4 sm:$0xff]   ;;  %v5891_v23 = vld [vmem:[%s8570_s1 + $0x480] ss:$16 sps:$4 sm:$0xff]  }
  0x57   :  { %3667 = vmatpush1.bf16.msra.mxu0 %v5798_v24  ;;  %4054 = vmatpush1.bf16.msra.mxu1 %v5801_v25  ;;  %v5894_v24 = vld [vmem:[%s8570_s1 + $0x488] ss:$16 sps:$4 sm:$0xff]   ;;  %v5899_v25 = vld [vmem:[%s8570_s1 + $0x4a4] ss:$16 sps:$4 sm:$0xff]  }
  0x58   :  { %3668 = vmatprep.subr.bf16.mxu0 %v5806_v26  ;;  %4055 = vmatprep.subr.bf16.mxu1 %v5809_v27  ;;  %v5902_v26 = vld [vmem:[%s8570_s1 + $0x4ac] ss:$16 sps:$4 sm:$0xff]   ;;  %v5897_v27 = vld [vmem:[%s8570_s1 + $0x4a0] ss:$16 sps:$4 sm:$0xff]  }
  0x5b   :  { %3669 = vmatpush1.bf16.msra.mxu0 %v5804_v28  ;;  %4056 = vmatpush1.bf16.msra.mxu1 %v5807_v29  ;;  %v5900_v28 = vld [vmem:[%s8570_s1 + $0x4a8] ss:$16 sps:$4 sm:$0xff]   ;;  %v5905_v29 = vld [vmem:[%s8570_s1 + $0x4c4] ss:$16 sps:$4 sm:$0xff]  }
  0x5c   :  { %3670 = vmatprep.subr.bf16.mxu0 %v5812_v31  ;;  %4057 = vmatprep.subr.bf16.mxu1 %v5815_v32  ;;  %v5903_v31 = vld [vmem:[%s8570_s1 + $0x4c0] ss:$16 sps:$4 sm:$0xff]   ;;  %v5906_v32 = vld [vmem:[%s8570_s1 + $0x4c8] ss:$16 sps:$4 sm:$0xff]  }
  0x5f   :  { %3671 = vmatpush1.bf16.msra.mxu0 %v5810_v33  ;;  %4058 = vmatpush1.bf16.msra.mxu1 %v5813_v34  ;;  %v5911_v33 = vld [vmem:[%s8570_s1 + $0x4e4] ss:$16 sps:$4 sm:$0xff]   ;;  %v5914_v34 = vld [vmem:[%s8570_s1 + $0x4ec] ss:$16 sps:$4 sm:$0xff]  }
  0x60   :  { %3672 = vmatprep.subr.bf16.mxu0 %v5818_v35  ;;  %4059 = vmatprep.subr.bf16.mxu1 %v5821_v36  ;;  %v5909_v35 = vld [vmem:[%s8570_s1 + $0x4e0] ss:$16 sps:$4 sm:$0xff]   ;;  %v5912_v36 = vld [vmem:[%s8570_s1 + $0x4e8] ss:$16 sps:$4 sm:$0xff]  }
  0x63   :  { %3673 = vmatpush1.bf16.msra.mxu0 %v5816_v37  ;;  %4060 = vmatpush1.bf16.msra.mxu1 %v5819_v38  ;;  %v5917_v37 = vld [vmem:[%s8570_s1 + $0x504] ss:$16 sps:$4 sm:$0xff]   ;;  %v5920_v38 = vld [vmem:[%s8570_s1 + $0x50c] ss:$16 sps:$4 sm:$0xff]  }
  0x64   :  { %3674 = vmatprep.subr.bf16.mxu0 %v5824_v39  ;;  %4061 = vmatprep.subr.bf16.mxu1 %v5827_v40  ;;  %v5915_v39 = vld [vmem:[%s8570_s1 + $0x500] ss:$16 sps:$4 sm:$0xff]   ;;  %v5918_v40 = vld [vmem:[%s8570_s1 + $0x508] ss:$16 sps:$4 sm:$0xff]  }
  0x67   :  { %3675 = vmatpush1.bf16.msra.mxu0 %v5822_v41  ;;  %4062 = vmatpush1.bf16.msra.mxu1 %v5825_v42  ;;  %v5923_v41 = vld [vmem:[%s8570_s1 + $0x524] ss:$16 sps:$4 sm:$0xff]   ;;  %v5926_v42 = vld [vmem:[%s8570_s1 + $0x52c] ss:$16 sps:$4 sm:$0xff]  }
  0x68   :  { %3676 = vmatprep.subr.bf16.mxu0 %v5830_v43  ;;  %4063 = vmatprep.subr.bf16.mxu1 %v5833_v44  ;;  %v5921_v43 = vld [vmem:[%s8570_s1 + $0x520] ss:$16 sps:$4 sm:$0xff]   ;;  %v5924_v44 = vld [vmem:[%s8570_s1 + $0x528] ss:$16 sps:$4 sm:$0xff]  }
  0x6b   :  { %3677 = vmatpush1.bf16.msra.mxu0 %v5828_v45  ;;  %4064 = vmatpush1.bf16.msra.mxu1 %v5831_v46  ;;  %v5929_v45 = vld [vmem:[%s8570_s1 + $0x544] ss:$16 sps:$4 sm:$0xff]   ;;  %v5932_v46 = vld [vmem:[%s8570_s1 + $0x54c] ss:$16 sps:$4 sm:$0xff]  }
  0x6c   :  { %3678 = vmatprep.subr.bf16.mxu0 %v5836_v47  ;;  %4065 = vmatprep.subr.bf16.mxu1 %v5839_v48  ;;  %v5927_v47 = vld [vmem:[%s8570_s1 + $0x540] ss:$16 sps:$4 sm:$0xff]   ;;  %v5930_v48 = vld [vmem:[%s8570_s1 + $0x548] ss:$16 sps:$4 sm:$0xff]  }
  0x6f   :  { %3679 = vmatpush1.bf16.msra.mxu0 %v5834_v49  ;;  %4066 = vmatpush1.bf16.msra.mxu1 %v5837_v50  ;;  %v5935_v49 = vld [vmem:[%s8570_s1 + $0x564] ss:$16 sps:$4 sm:$0xff]   ;;  %v5938_v50 = vld [vmem:[%s8570_s1 + $0x56c] ss:$16 sps:$4 sm:$0xff]  }
  0x70   :  { %3680 = vmatprep.subr.bf16.mxu0 %v5842_v51  ;;  %4067 = vmatprep.subr.bf16.mxu1 %v5845_v52  ;;  %v5933_v51 = vld [vmem:[%s8570_s1 + $0x560] ss:$16 sps:$4 sm:$0xff]   ;;  %v5936_v52 = vld [vmem:[%s8570_s1 + $0x568] ss:$16 sps:$4 sm:$0xff]  }
  0x73   :  { %3681 = vmatpush1.bf16.msra.mxu0 %v5840_v53  ;;  %4068 = vmatpush1.bf16.msra.mxu1 %v5843_v54  ;;  %v5941_v53 = vld [vmem:[%s8570_s1 + $0x584] ss:$16 sps:$4 sm:$0xff]   ;;  %v5944_v54 = vld [vmem:[%s8570_s1 + $0x58c] ss:$16 sps:$4 sm:$0xff]  }
  0x74   :  { %3682 = vmatprep.subr.bf16.mxu0 %v5848_v55  ;;  %4069 = vmatprep.subr.bf16.mxu1 %v5851_v56  ;;  %v5939_v55 = vld [vmem:[%s8570_s1 + $0x580] ss:$16 sps:$4 sm:$0xff]   ;;  %v5942_v56 = vld [vmem:[%s8570_s1 + $0x588] ss:$16 sps:$4 sm:$0xff]  }
  0x77   :  { %3683 = vmatpush1.bf16.msra.mxu0 %v5846_v57  ;;  %4070 = vmatpush1.bf16.msra.mxu1 %v5849_v58  ;;  %v5947_v57 = vld [vmem:[%s8570_s1 + $0x5a4] ss:$16 sps:$4 sm:$0xff]   ;;  %v5950_v58 = vld [vmem:[%s8570_s1 + $0x5ac] ss:$16 sps:$4 sm:$0xff]  }
  0x78   :  { %3684 = vmatprep.subr.bf16.mxu0 %v5854_v59  ;;  %4071 = vmatprep.subr.bf16.mxu1 %v5857_v60  ;;  %v5945_v59 = vld [vmem:[%s8570_s1 + $0x5a0] ss:$16 sps:$4 sm:$0xff]   ;;  %v5948_v60 = vld [vmem:[%s8570_s1 + $0x5a8] ss:$16 sps:$4 sm:$0xff]  }
  0x7b   :  { %3685 = vmatpush1.bf16.msra.mxu0 %v5852_v61  ;;  %4072 = vmatpush1.bf16.msra.mxu1 %v5855_v62  ;;  %v5953_v61 = vld [vmem:[%s8570_s1 + $0x5c4] ss:$16 sps:$4 sm:$0xff]   ;;  %v5956_v62 = vld [vmem:[%s8570_s1 + $0x5cc] ss:$16 sps:$4 sm:$0xff]  }
  0x7c   :  { %3686 = vmatprep.subr.bf16.mxu0 %v5860_v63  ;;  %4073 = vmatprep.subr.bf16.mxu1 %v5863_v0  ;;  %v5951_v63 = vld [vmem:[%s8570_s1 + $0x5c0] ss:$16 sps:$4 sm:$0xff]   ;;  %v5954_v0 = vld [vmem:[%s8570_s1 + $0x5c8] ss:$16 sps:$4 sm:$0xff]  }
  0x7f   :  { %3687 = vmatpush1.bf16.msra.mxu0 %v5858_v1  ;;  %4074 = vmatpush1.bf16.msra.mxu1 %v5861_v2  ;;  %v5959_v1 = vld [vmem:[%s8570_s1 + $0x5e4] ss:$16 sps:$4 sm:$0xff]   ;;  %v5962_v2 = vld [vmem:[%s8570_s1 + $0x5ec] ss:$16 sps:$4 sm:$0xff]  }
  0x80   :  { %3699 = vmatprep.subr.bf16.mxu0 %v5869_v3  ;;  %4086 = vmatprep.subr.bf16.mxu1 %v5872_v4  ;;  %v5957_v3 = vld [vmem:[%s8570_s1 + $0x5e0] ss:$16 sps:$4 sm:$0xff]   ;;  %v5960_v4 = vld [vmem:[%s8570_s1 + $0x5e8] ss:$16 sps:$4 sm:$0xff]  }
  0x82   :  { %3689 = vmatmul.mubr.bf16.vlgmr.msra.gmra.mrb[0].mxu0 %v5864_v5  ;;  %4076 = vmatmul.mubr.bf16.vlgmr.msra.gmra.mrb[0].mxu1 %v5864_v5  ;;  %v5968_v5 = vld [vmem:[%s8570_s1 + $0x604] ss:$16 sps:$4 sm:$0xff]  }
  0x83   :  { %3700 = vmatpush1.bf16.msra.mxu0 %v5867_v6  ;;  %4087 = vmatpush1.bf16.msra.mxu1 %v5870_v7  ;;  %v5971_v6 = vld [vmem:[%s8570_s1 + $0x60c] ss:$16 sps:$4 sm:$0xff]   ;;  %v5963_v7 = vld [vmem:[%s8571_s0 + $0x10] ss:$72 sps:$4 sm:$0xff]  }
  0x84   :  { %3701 = vmatprep.subr.bf16.mxu0 %v5875_v8  ;;  %4088 = vmatprep.subr.bf16.mxu1 %v5878_v9  ;;  %v5966_v8 = vld [vmem:[%s8570_s1 + $0x600] ss:$16 sps:$4 sm:$0xff]   ;;  %v5969_v9 = vld [vmem:[%s8570_s1 + $0x608] ss:$16 sps:$4 sm:$0xff]  }
  0x85   :  { %3731 = vmatprep.mubr.bf16.mxu0 %v5965_v12  ;;  %4118 = vmatprep.mubr.bf16.mxu1 %v5965_v12  ;;  %v6064_v12 = vld [vmem:[%s8571_s0 + $0x1c] ss:$72 sps:$4 sm:$0xff]  }
  0x87   :  { %3702 = vmatpush1.bf16.msra.mxu0 %v5873_v10  ;;  %4089 = vmatpush1.bf16.msra.mxu1 %v5876_v11  ;;  %v5974_v10 = vld [vmem:[%s8570_s1 + $0x624] ss:$16 sps:$4 sm:$0xff]   ;;  %v5977_v11 = vld [vmem:[%s8570_s1 + $0x62c] ss:$16 sps:$4 sm:$0xff]  }
  0x88   :  { %3703 = vmatprep.subr.bf16.mxu0 %v5881_v13  ;;  %4090 = vmatprep.subr.bf16.mxu1 %v5884_v14  ;;  %v5972_v13 = vld [vmem:[%s8570_s1 + $0x620] ss:$16 sps:$4 sm:$0xff]   ;;  %v5975_v14 = vld [vmem:[%s8570_s1 + $0x628] ss:$16 sps:$4 sm:$0xff]  }
  0x8b   :  { %3704 = vmatpush1.bf16.msra.mxu0 %v5879_v15  ;;  %4091 = vmatpush1.bf16.msra.mxu1 %v5882_v16  ;;  %v5980_v15 = vld [vmem:[%s8570_s1 + $0x644] ss:$16 sps:$4 sm:$0xff]   ;;  %v5983_v16 = vld [vmem:[%s8570_s1 + $0x64c] ss:$16 sps:$4 sm:$0xff]  }
  0x8c   :  { %3705 = vmatprep.subr.bf16.mxu0 %v5887_v17  ;;  %4092 = vmatprep.subr.bf16.mxu1 %v5890_v18  ;;  %v5978_v17 = vld [vmem:[%s8570_s1 + $0x640] ss:$16 sps:$4 sm:$0xff]   ;;  %v5981_v18 = vld [vmem:[%s8570_s1 + $0x648] ss:$16 sps:$4 sm:$0xff]  }
  0x8f   :  { %3706 = vmatpush1.bf16.msra.mxu0 %v5885_v19  ;;  %4093 = vmatpush1.bf16.msra.mxu1 %v5888_v20  ;;  %v5986_v19 = vld [vmem:[%s8570_s1 + $0x664] ss:$16 sps:$4 sm:$0xff]   ;;  %v5989_v20 = vld [vmem:[%s8570_s1 + $0x66c] ss:$16 sps:$4 sm:$0xff]  }
  0x90   :  { %3707 = vmatprep.subr.bf16.mxu0 %v5893_v21  ;;  %4094 = vmatprep.subr.bf16.mxu1 %v5896_v22  ;;  %v5984_v21 = vld [vmem:[%s8570_s1 + $0x660] ss:$16 sps:$4 sm:$0xff]   ;;  %v5987_v22 = vld [vmem:[%s8570_s1 + $0x668] ss:$16 sps:$4 sm:$0xff]  }
  0x93   :  { %3708 = vmatpush1.bf16.msra.mxu0 %v5891_v23  ;;  %4095 = vmatpush1.bf16.msra.mxu1 %v5894_v24  ;;  %v5992_v23 = vld [vmem:[%s8570_s1 + $0x684] ss:$16 sps:$4 sm:$0xff]   ;;  %v5995_v24 = vld [vmem:[%s8570_s1 + $0x68c] ss:$16 sps:$4 sm:$0xff]  }
  0x94   :  { %3709 = vmatprep.subr.bf16.mxu0 %v5899_v25  ;;  %4096 = vmatprep.subr.bf16.mxu1 %v5902_v26  ;;  %v5990_v25 = vld [vmem:[%s8570_s1 + $0x680] ss:$16 sps:$4 sm:$0xff]   ;;  %v5993_v26 = vld [vmem:[%s8570_s1 + $0x688] ss:$16 sps:$4 sm:$0xff]  }
  0x97   :  { %3710 = vmatpush1.bf16.msra.mxu0 %v5897_v27  ;;  %4097 = vmatpush1.bf16.msra.mxu1 %v5900_v28  ;;  %v5998_v27 = vld [vmem:[%s8570_s1 + $0x6a4] ss:$16 sps:$4 sm:$0xff]   ;;  %v6001_v28 = vld [vmem:[%s8570_s1 + $0x6ac] ss:$16 sps:$4 sm:$0xff]  }
  0x98   :  { %3711 = vmatprep.subr.bf16.mxu0 %v5905_v29  ;;  %4098 = vmatprep.subr.bf16.mxu1 %v5908_v30  ;;  %v5996_v29 = vld [vmem:[%s8570_s1 + $0x6a0] ss:$16 sps:$4 sm:$0xff]   ;;  %v5999_v30 = vld [vmem:[%s8570_s1 + $0x6a8] ss:$16 sps:$4 sm:$0xff]  }
  0x9b   :  { %3712 = vmatpush1.bf16.msra.mxu0 %v5903_v31  ;;  %4099 = vmatpush1.bf16.msra.mxu1 %v5906_v32  ;;  %v6004_v31 = vld [vmem:[%s8570_s1 + $0x6c4] ss:$16 sps:$4 sm:$0xff]   ;;  %v6007_v32 = vld [vmem:[%s8570_s1 + $0x6cc] ss:$16 sps:$4 sm:$0xff]  }
  0x9c   :  { %3713 = vmatprep.subr.bf16.mxu0 %v5911_v33  ;;  %4100 = vmatprep.subr.bf16.mxu1 %v5914_v34  ;;  %v6002_v33 = vld [vmem:[%s8570_s1 + $0x6c0] ss:$16 sps:$4 sm:$0xff]   ;;  %v6005_v34 = vld [vmem:[%s8570_s1 + $0x6c8] ss:$16 sps:$4 sm:$0xff]  }
  0x9f   :  { %3714 = vmatpush1.bf16.msra.mxu0 %v5909_v35  ;;  %4101 = vmatpush1.bf16.msra.mxu1 %v5912_v36  ;;  %v6010_v35 = vld [vmem:[%s8570_s1 + $0x6e4] ss:$16 sps:$4 sm:$0xff]   ;;  %v6013_v36 = vld [vmem:[%s8570_s1 + $0x6ec] ss:$16 sps:$4 sm:$0xff]  }
  0xa0   :  { %3715 = vmatprep.subr.bf16.mxu0 %v5917_v37  ;;  %4102 = vmatprep.subr.bf16.mxu1 %v5920_v38  ;;  %v6008_v37 = vld [vmem:[%s8570_s1 + $0x6e0] ss:$16 sps:$4 sm:$0xff]   ;;  %v6011_v38 = vld [vmem:[%s8570_s1 + $0x6e8] ss:$16 sps:$4 sm:$0xff]  }
  0xa3   :  { %3716 = vmatpush1.bf16.msra.mxu0 %v5915_v39  ;;  %4103 = vmatpush1.bf16.msra.mxu1 %v5918_v40  ;;  %v6016_v39 = vld [vmem:[%s8570_s1 + $0x704] ss:$16 sps:$4 sm:$0xff]   ;;  %v6019_v40 = vld [vmem:[%s8570_s1 + $0x70c] ss:$16 sps:$4 sm:$0xff]  }
  0xa4   :  { %3717 = vmatprep.subr.bf16.mxu0 %v5923_v41  ;;  %4104 = vmatprep.subr.bf16.mxu1 %v5926_v42  ;;  %v6014_v41 = vld [vmem:[%s8570_s1 + $0x700] ss:$16 sps:$4 sm:$0xff]   ;;  %v6017_v42 = vld [vmem:[%s8570_s1 + $0x708] ss:$16 sps:$4 sm:$0xff]  }
  0xa7   :  { %3718 = vmatpush1.bf16.msra.mxu0 %v5921_v43  ;;  %4105 = vmatpush1.bf16.msra.mxu1 %v5924_v44  ;;  %v6022_v43 = vld [vmem:[%s8570_s1 + $0x724] ss:$16 sps:$4 sm:$0xff]   ;;  %v6025_v44 = vld [vmem:[%s8570_s1 + $0x72c] ss:$16 sps:$4 sm:$0xff]  }
  0xa8   :  { %3719 = vmatprep.subr.bf16.mxu0 %v5929_v45  ;;  %4106 = vmatprep.subr.bf16.mxu1 %v5932_v46  ;;  %v6020_v45 = vld [vmem:[%s8570_s1 + $0x720] ss:$16 sps:$4 sm:$0xff]   ;;  %v6023_v46 = vld [vmem:[%s8570_s1 + $0x728] ss:$16 sps:$4 sm:$0xff]  }
  0xab   :  { %3720 = vmatpush1.bf16.msra.mxu0 %v5927_v47  ;;  %4107 = vmatpush1.bf16.msra.mxu1 %v5930_v48  ;;  %v6028_v47 = vld [vmem:[%s8570_s1 + $0x744] ss:$16 sps:$4 sm:$0xff]   ;;  %v6031_v48 = vld [vmem:[%s8570_s1 + $0x74c] ss:$16 sps:$4 sm:$0xff]  }
  0xac   :  { %3721 = vmatprep.subr.bf16.mxu0 %v5935_v49  ;;  %4108 = vmatprep.subr.bf16.mxu1 %v5938_v50  ;;  %v6026_v49 = vld [vmem:[%s8570_s1 + $0x740] ss:$16 sps:$4 sm:$0xff]   ;;  %v6029_v50 = vld [vmem:[%s8570_s1 + $0x748] ss:$16 sps:$4 sm:$0xff]  }
  0xaf   :  { %3722 = vmatpush1.bf16.msra.mxu0 %v5933_v51  ;;  %4109 = vmatpush1.bf16.msra.mxu1 %v5936_v52  ;;  %v6034_v51 = vld [vmem:[%s8570_s1 + $0x764] ss:$16 sps:$4 sm:$0xff]   ;;  %v6037_v52 = vld [vmem:[%s8570_s1 + $0x76c] ss:$16 sps:$4 sm:$0xff]  }
  0xb0   :  { %3723 = vmatprep.subr.bf16.mxu0 %v5941_v53  ;;  %4110 = vmatprep.subr.bf16.mxu1 %v5944_v54  ;;  %v6032_v53 = vld [vmem:[%s8570_s1 + $0x760] ss:$16 sps:$4 sm:$0xff]   ;;  %v6035_v54 = vld [vmem:[%s8570_s1 + $0x768] ss:$16 sps:$4 sm:$0xff]  }
  0xb3   :  { %3724 = vmatpush1.bf16.msra.mxu0 %v5939_v55  ;;  %4111 = vmatpush1.bf16.msra.mxu1 %v5942_v56  ;;  %v6040_v55 = vld [vmem:[%s8570_s1 + $0x784] ss:$16 sps:$4 sm:$0xff]   ;;  %v6043_v56 = vld [vmem:[%s8570_s1 + $0x78c] ss:$16 sps:$4 sm:$0xff]  }
  0xb4   :  { %3725 = vmatprep.subr.bf16.mxu0 %v5947_v57  ;;  %4112 = vmatprep.subr.bf16.mxu1 %v5950_v58  ;;  %v6038_v57 = vld [vmem:[%s8570_s1 + $0x780] ss:$16 sps:$4 sm:$0xff]   ;;  %v6041_v58 = vld [vmem:[%s8570_s1 + $0x788] ss:$16 sps:$4 sm:$0xff]  }
  0xb7   :  { %3726 = vmatpush1.bf16.msra.mxu0 %v5945_v59  ;;  %4113 = vmatpush1.bf16.msra.mxu1 %v5948_v60  ;;  %v6046_v59 = vld [vmem:[%s8570_s1 + $0x7a4] ss:$16 sps:$4 sm:$0xff]   ;;  %v6049_v60 = vld [vmem:[%s8570_s1 + $0x7ac] ss:$16 sps:$4 sm:$0xff]  }
  0xb8   :  { %3727 = vmatprep.subr.bf16.mxu0 %v5953_v61  ;;  %4114 = vmatprep.subr.bf16.mxu1 %v5956_v62  ;;  %v6044_v61 = vld [vmem:[%s8570_s1 + $0x7a0] ss:$16 sps:$4 sm:$0xff]   ;;  %v6047_v62 = vld [vmem:[%s8570_s1 + $0x7a8] ss:$16 sps:$4 sm:$0xff]  }
  0xbb   :  { %3728 = vmatpush1.bf16.msra.mxu0 %v5951_v63  ;;  %4115 = vmatpush1.bf16.msra.mxu1 %v5954_v0  ;;  %v6052_v63 = vld [vmem:[%s8570_s1 + $0x7c4] ss:$16 sps:$4 sm:$0xff]   ;;  %v6055_v0 = vld [vmem:[%s8570_s1 + $0x7cc] ss:$16 sps:$4 sm:$0xff]  }
  0xbc   :  { %3729 = vmatprep.subr.bf16.mxu0 %v5959_v1  ;;  %4116 = vmatprep.subr.bf16.mxu1 %v5962_v2  ;;  %v6050_v1 = vld [vmem:[%s8570_s1 + $0x7c0] ss:$16 sps:$4 sm:$0xff]   ;;  %v6053_v2 = vld [vmem:[%s8570_s1 + $0x7c8] ss:$16 sps:$4 sm:$0xff]  }
  0xbf   :  { %3730 = vmatpush1.bf16.msra.mxu0 %v5957_v3  ;;  %4117 = vmatpush1.bf16.msra.mxu1 %v5960_v4  ;;  %v6058_v3 = vld [vmem:[%s8570_s1 + $0x7e4] ss:$16 sps:$4 sm:$0xff]   ;;  %v6061_v4 = vld [vmem:[%s8570_s1 + $0x7ec] ss:$16 sps:$4 sm:$0xff]  }
  0xc0   :  { %3742 = vmatprep.subr.bf16.mxu0 %v5968_v5  ;;  %4129 = vmatprep.subr.bf16.mxu1 %v5971_v6  ;;  %v6056_v5 = vld [vmem:[%s8570_s1 + $0x7e0] ss:$16 sps:$4 sm:$0xff]   ;;  %v6059_v6 = vld [vmem:[%s8570_s1 + $0x7e8] ss:$16 sps:$4 sm:$0xff]  }
  0xc2   :  { %3732 = vmatmul.mubr.bf16.vlgmr.msra.gmra.mrb[0].mxu0 %v5963_v7  ;;  %4119 = vmatmul.mubr.bf16.vlgmr.msra.gmra.mrb[0].mxu1 %v5963_v7  ;;  %v6067_v7 = vld [vmem:[%s8570_s1 + $0x804] ss:$16 sps:$4 sm:$0xff]  }
  0xc3   :  { %3743 = vmatpush1.bf16.msra.mxu0 %v5966_v8  ;;  %4130 = vmatpush1.bf16.msra.mxu1 %v5969_v9  ;;  %v6070_v8 = vld [vmem:[%s8570_s1 + $0x80c] ss:$16 sps:$4 sm:$0xff]   ;;  %v6062_v9 = vld [vmem:[%s8571_s0 + $0x18] ss:$72 sps:$4 sm:$0xff]  }
  0xc4   :  { %3744 = vmatprep.subr.bf16.mxu0 %v5974_v10  ;;  %4131 = vmatprep.subr.bf16.mxu1 %v5977_v11  ;;  %v6065_v10 = vld [vmem:[%s8570_s1 + $0x800] ss:$16 sps:$4 sm:$0xff]   ;;  %v6068_v11 = vld [vmem:[%s8570_s1 + $0x808] ss:$16 sps:$4 sm:$0xff]  }
  0xc5   :  { %3774 = vmatprep.mubr.bf16.mxu0 %v6064_v12  ;;  %4161 = vmatprep.mubr.bf16.mxu1 %v6064_v12  ;;  %v6073_v12 = vld [vmem:[%s8570_s1 + $0x824] ss:$16 sps:$4 sm:$0xff]  }
  0xc7   :  { %3745 = vmatpush1.bf16.msra.mxu0 %v5972_v13  ;;  %4132 = vmatpush1.bf16.msra.mxu1 %v5975_v14  ;;  %v6076_v13 = vld [vmem:[%s8570_s1 + $0x82c] ss:$16 sps:$4 sm:$0xff]  }
  0xc8   :  { %3746 = vmatprep.subr.bf16.mxu0 %v5980_v15  ;;  %4133 = vmatprep.subr.bf16.mxu1 %v5983_v16  ;;  %v6163_v14 = vld [vmem:[%s8571_s0 + $0x24] ss:$72 sps:$4 sm:$0xff]   ;;  %v6071_v15 = vld [vmem:[%s8570_s1 + $0x820] ss:$16 sps:$4 sm:$0xff]   ;;  %v6074_v16 = vld [vmem:[%s8570_s1 + $0x828] ss:$16 sps:$4 sm:$0xff]  }
  0xcb   :  { %3747 = vmatpush1.bf16.msra.mxu0 %v5978_v17  ;;  %4134 = vmatpush1.bf16.msra.mxu1 %v5981_v18  ;;  %v6079_v17 = vld [vmem:[%s8570_s1 + $0x844] ss:$16 sps:$4 sm:$0xff]   ;;  %v6082_v18 = vld [vmem:[%s8570_s1 + $0x84c] ss:$16 sps:$4 sm:$0xff]  }
  0xcc   :  { %3748 = vmatprep.subr.bf16.mxu0 %v5986_v19  ;;  %4135 = vmatprep.subr.bf16.mxu1 %v5989_v20  ;;  %v6077_v19 = vld [vmem:[%s8570_s1 + $0x840] ss:$16 sps:$4 sm:$0xff]   ;;  %v6080_v20 = vld [vmem:[%s8570_s1 + $0x848] ss:$16 sps:$4 sm:$0xff]  }
  0xcf   :  { %3749 = vmatpush1.bf16.msra.mxu0 %v5984_v21  ;;  %4136 = vmatpush1.bf16.msra.mxu1 %v5987_v22  ;;  %v6085_v21 = vld [vmem:[%s8570_s1 + $0x864] ss:$16 sps:$4 sm:$0xff]   ;;  %v6088_v22 = vld [vmem:[%s8570_s1 + $0x86c] ss:$16 sps:$4 sm:$0xff]  }
  0xd0   :  { %3750 = vmatprep.subr.bf16.mxu0 %v5992_v23  ;;  %4137 = vmatprep.subr.bf16.mxu1 %v5995_v24  ;;  %v6083_v23 = vld [vmem:[%s8570_s1 + $0x860] ss:$16 sps:$4 sm:$0xff]   ;;  %v6086_v24 = vld [vmem:[%s8570_s1 + $0x868] ss:$16 sps:$4 sm:$0xff]  }
  0xd3   :  { %3751 = vmatpush1.bf16.msra.mxu0 %v5990_v25  ;;  %4138 = vmatpush1.bf16.msra.mxu1 %v5993_v26  ;;  %v6091_v25 = vld [vmem:[%s8570_s1 + $0x884] ss:$16 sps:$4 sm:$0xff]   ;;  %v6094_v26 = vld [vmem:[%s8570_s1 + $0x88c] ss:$16 sps:$4 sm:$0xff]  }
  0xd4   :  { %3752 = vmatprep.subr.bf16.mxu0 %v5998_v27  ;;  %4139 = vmatprep.subr.bf16.mxu1 %v6001_v28  ;;  %v6089_v27 = vld [vmem:[%s8570_s1 + $0x880] ss:$16 sps:$4 sm:$0xff]   ;;  %v6092_v28 = vld [vmem:[%s8570_s1 + $0x888] ss:$16 sps:$4 sm:$0xff]  }
  0xd7   :  { %3753 = vmatpush1.bf16.msra.mxu0 %v5996_v29  ;;  %4140 = vmatpush1.bf16.msra.mxu1 %v5999_v30  ;;  %v6097_v29 = vld [vmem:[%s8570_s1 + $0x8a4] ss:$16 sps:$4 sm:$0xff]   ;;  %v6100_v30 = vld [vmem:[%s8570_s1 + $0x8ac] ss:$16 sps:$4 sm:$0xff]  }
  0xd8   :  { %3754 = vmatprep.subr.bf16.mxu0 %v6004_v31  ;;  %4141 = vmatprep.subr.bf16.mxu1 %v6007_v32  ;;  %v6095_v31 = vld [vmem:[%s8570_s1 + $0x8a0] ss:$16 sps:$4 sm:$0xff]   ;;  %v6098_v32 = vld [vmem:[%s8570_s1 + $0x8a8] ss:$16 sps:$4 sm:$0xff]  }
  0xdb   :  { %3755 = vmatpush1.bf16.msra.mxu0 %v6002_v33  ;;  %4142 = vmatpush1.bf16.msra.mxu1 %v6005_v34  ;;  %v6103_v33 = vld [vmem:[%s8570_s1 + $0x8c4] ss:$16 sps:$4 sm:$0xff]   ;;  %v6106_v34 = vld [vmem:[%s8570_s1 + $0x8cc] ss:$16 sps:$4 sm:$0xff]  }
  0xdc   :  { %3756 = vmatprep.subr.bf16.mxu0 %v6010_v35  ;;  %4143 = vmatprep.subr.bf16.mxu1 %v6013_v36  ;;  %v6101_v35 = vld [vmem:[%s8570_s1 + $0x8c0] ss:$16 sps:$4 sm:$0xff]   ;;  %v6104_v36 = vld [vmem:[%s8570_s1 + $0x8c8] ss:$16 sps:$4 sm:$0xff]  }
  0xdf   :  { %3757 = vmatpush1.bf16.msra.mxu0 %v6008_v37  ;;  %4144 = vmatpush1.bf16.msra.mxu1 %v6011_v38  ;;  %v6109_v37 = vld [vmem:[%s8570_s1 + $0x8e4] ss:$16 sps:$4 sm:$0xff]   ;;  %v6112_v38 = vld [vmem:[%s8570_s1 + $0x8ec] ss:$16 sps:$4 sm:$0xff]  }
  0xe0   :  { %3758 = vmatprep.subr.bf16.mxu0 %v6016_v39  ;;  %4145 = vmatprep.subr.bf16.mxu1 %v6019_v40  ;;  %v6107_v39 = vld [vmem:[%s8570_s1 + $0x8e0] ss:$16 sps:$4 sm:$0xff]   ;;  %v6110_v40 = vld [vmem:[%s8570_s1 + $0x8e8] ss:$16 sps:$4 sm:$0xff]  }
  0xe3   :  { %3759 = vmatpush1.bf16.msra.mxu0 %v6014_v41  ;;  %4146 = vmatpush1.bf16.msra.mxu1 %v6017_v42  ;;  %v6115_v41 = vld [vmem:[%s8570_s1 + $0x904] ss:$16 sps:$4 sm:$0xff]   ;;  %v6118_v42 = vld [vmem:[%s8570_s1 + $0x90c] ss:$16 sps:$4 sm:$0xff]  }
  0xe4   :  { %3760 = vmatprep.subr.bf16.mxu0 %v6022_v43  ;;  %4147 = vmatprep.subr.bf16.mxu1 %v6025_v44  ;;  %v6113_v43 = vld [vmem:[%s8570_s1 + $0x900] ss:$16 sps:$4 sm:$0xff]   ;;  %v6116_v44 = vld [vmem:[%s8570_s1 + $0x908] ss:$16 sps:$4 sm:$0xff]  }
  0xe7   :  { %3761 = vmatpush1.bf16.msra.mxu0 %v6020_v45  ;;  %4148 = vmatpush1.bf16.msra.mxu1 %v6023_v46  ;;  %v6121_v45 = vld [vmem:[%s8570_s1 + $0x924] ss:$16 sps:$4 sm:$0xff]   ;;  %v6124_v46 = vld [vmem:[%s8570_s1 + $0x92c] ss:$16 sps:$4 sm:$0xff]  }
  0xe8   :  { %3762 = vmatprep.subr.bf16.mxu0 %v6028_v47  ;;  %4149 = vmatprep.subr.bf16.mxu1 %v6031_v48  ;;  %v6119_v47 = vld [vmem:[%s8570_s1 + $0x920] ss:$16 sps:$4 sm:$0xff]   ;;  %v6122_v48 = vld [vmem:[%s8570_s1 + $0x928] ss:$16 sps:$4 sm:$0xff]  }
  0xeb   :  { %3763 = vmatpush1.bf16.msra.mxu0 %v6026_v49  ;;  %4150 = vmatpush1.bf16.msra.mxu1 %v6029_v50  ;;  %v6127_v49 = vld [vmem:[%s8570_s1 + $0x944] ss:$16 sps:$4 sm:$0xff]   ;;  %v6130_v50 = vld [vmem:[%s8570_s1 + $0x94c] ss:$16 sps:$4 sm:$0xff]  }
  0xec   :  { %3764 = vmatprep.subr.bf16.mxu0 %v6034_v51  ;;  %4151 = vmatprep.subr.bf16.mxu1 %v6037_v52  ;;  %v6125_v51 = vld [vmem:[%s8570_s1 + $0x940] ss:$16 sps:$4 sm:$0xff]   ;;  %v6128_v52 = vld [vmem:[%s8570_s1 + $0x948] ss:$16 sps:$4 sm:$0xff]  }
  0xef   :  { %3765 = vmatpush1.bf16.msra.mxu0 %v6032_v53  ;;  %4152 = vmatpush1.bf16.msra.mxu1 %v6035_v54  ;;  %v6133_v53 = vld [vmem:[%s8570_s1 + $0x964] ss:$16 sps:$4 sm:$0xff]   ;;  %v6136_v54 = vld [vmem:[%s8570_s1 + $0x96c] ss:$16 sps:$4 sm:$0xff]  }
  0xf0   :  { %3766 = vmatprep.subr.bf16.mxu0 %v6040_v55  ;;  %4153 = vmatprep.subr.bf16.mxu1 %v6043_v56  ;;  %v6131_v55 = vld [vmem:[%s8570_s1 + $0x960] ss:$16 sps:$4 sm:$0xff]   ;;  %v6134_v56 = vld [vmem:[%s8570_s1 + $0x968] ss:$16 sps:$4 sm:$0xff]  }
  0xf3   :  { %3767 = vmatpush1.bf16.msra.mxu0 %v6038_v57  ;;  %4154 = vmatpush1.bf16.msra.mxu1 %v6041_v58  ;;  %v6139_v57 = vld [vmem:[%s8570_s1 + $0x984] ss:$16 sps:$4 sm:$0xff]   ;;  %v6142_v58 = vld [vmem:[%s8570_s1 + $0x98c] ss:$16 sps:$4 sm:$0xff]  }
  0xf4   :  { %3768 = vmatprep.subr.bf16.mxu0 %v6046_v59  ;;  %4155 = vmatprep.subr.bf16.mxu1 %v6049_v60  ;;  %v6137_v59 = vld [vmem:[%s8570_s1 + $0x980] ss:$16 sps:$4 sm:$0xff]   ;;  %v6140_v60 = vld [vmem:[%s8570_s1 + $0x988] ss:$16 sps:$4 sm:$0xff]  }
  0xf7   :  { %3769 = vmatpush1.bf16.msra.mxu0 %v6044_v61  ;;  %4156 = vmatpush1.bf16.msra.mxu1 %v6047_v62  ;;  %v6145_v61 = vld [vmem:[%s8570_s1 + $0x9a4] ss:$16 sps:$4 sm:$0xff]   ;;  %v6148_v62 = vld [vmem:[%s8570_s1 + $0x9ac] ss:$16 sps:$4 sm:$0xff]  }
  0xf8   :  { %3770 = vmatprep.subr.bf16.mxu0 %v6052_v63  ;;  %4157 = vmatprep.subr.bf16.mxu1 %v6055_v0  ;;  %v6143_v63 = vld [vmem:[%s8570_s1 + $0x9a0] ss:$16 sps:$4 sm:$0xff]   ;;  %v6146_v0 = vld [vmem:[%s8570_s1 + $0x9a8] ss:$16 sps:$4 sm:$0xff]  }
  0xfb   :  { %3771 = vmatpush1.bf16.msra.mxu0 %v6050_v1  ;;  %4158 = vmatpush1.bf16.msra.mxu1 %v6053_v2  ;;  %v6151_v1 = vld [vmem:[%s8570_s1 + $0x9c4] ss:$16 sps:$4 sm:$0xff]   ;;  %v6154_v2 = vld [vmem:[%s8570_s1 + $0x9cc] ss:$16 sps:$4 sm:$0xff]  }
  0xfc   :  { %3772 = vmatprep.subr.bf16.mxu0 %v6058_v3  ;;  %4159 = vmatprep.subr.bf16.mxu1 %v6061_v4  ;;  %v6149_v3 = vld [vmem:[%s8570_s1 + $0x9c0] ss:$16 sps:$4 sm:$0xff]   ;;  %v6152_v4 = vld [vmem:[%s8570_s1 + $0x9c8] ss:$16 sps:$4 sm:$0xff]  }
  0xff   :  { %3773 = vmatpush1.bf16.msra.mxu0 %v6056_v5  ;;  %4160 = vmatpush1.bf16.msra.mxu1 %v6059_v6  ;;  %v6157_v5 = vld [vmem:[%s8570_s1 + $0x9e4] ss:$16 sps:$4 sm:$0xff]   ;;  %v6160_v6 = vld [vmem:[%s8570_s1 + $0x9ec] ss:$16 sps:$4 sm:$0xff]  }
 0x100   :  { %3785 = vmatprep.subr.bf16.mxu0 %v6067_v7  ;;  %4172 = vmatprep.subr.bf16.mxu1 %v6070_v8  ;;  %v6155_v7 = vld [vmem:[%s8570_s1 + $0x9e0] ss:$16 sps:$4 sm:$0xff]   ;;  %v6158_v8 = vld [vmem:[%s8570_s1 + $0x9e8] ss:$16 sps:$4 sm:$0xff]  }
 0x102   :  { %3775 = vmatmul.mubr.bf16.vlgmr.msra.gmra.mrb[0].mxu0 %v6062_v9  ;;  %4162 = vmatmul.mubr.bf16.vlgmr.msra.gmra.mrb[0].mxu1 %v6062_v9  ;;  %v6161_v9 = vld [vmem:[%s8571_s0 + $0x20] ss:$72 sps:$4 sm:$0xff]  }
 0x103   :  { %3786 = vmatpush1.bf16.msra.mxu0 %v6065_v10  ;;  %4173 = vmatpush1.bf16.msra.mxu1 %v6068_v11  ;;  %v6166_v10 = vld [vmem:[%s8570_s1 + $0xa04] ss:$16 sps:$4 sm:$0xff]   ;;  %v6169_v11 = vld [vmem:[%s8570_s1 + $0xa0c] ss:$16 sps:$4 sm:$0xff]  }
 0x104   :  { %3787 = vmatprep.subr.bf16.mxu0 %v6073_v12  ;;  %4174 = vmatprep.subr.bf16.mxu1 %v6076_v13  ;;  %v6164_v12 = vld [vmem:[%s8570_s1 + $0xa00] ss:$16 sps:$4 sm:$0xff]   ;;  %v6167_v13 = vld [vmem:[%s8570_s1 + $0xa08] ss:$16 sps:$4 sm:$0xff]  }
 0x105   :  { %3817 = vmatprep.mubr.bf16.mxu0 %v6163_v14  ;;  %4204 = vmatprep.mubr.bf16.mxu1 %v6163_v14  ;;  %v6172_v14 = vld [vmem:[%s8570_s1 + $0xa24] ss:$16 sps:$4 sm:$0xff]  }
 0x107   :  { %3788 = vmatpush1.bf16.msra.mxu0 %v6071_v15  ;;  %4175 = vmatpush1.bf16.msra.mxu1 %v6074_v16  ;;  %v6175_v15 = vld [vmem:[%s8570_s1 + $0xa2c] ss:$16 sps:$4 sm:$0xff]  }
 0x108   :  { %3789 = vmatprep.subr.bf16.mxu0 %v6079_v17  ;;  %4176 = vmatprep.subr.bf16.mxu1 %v6082_v18  ;;  %v6262_v16 = vld [vmem:[%s8571_s0 + $0x2c] ss:$72 sps:$4 sm:$0xff]   ;;  %v6170_v17 = vld [vmem:[%s8570_s1 + $0xa20] ss:$16 sps:$4 sm:$0xff]   ;;  %v6173_v18 = vld [vmem:[%s8570_s1 + $0xa28] ss:$16 sps:$4 sm:$0xff]  }
 0x10b   :  { %3790 = vmatpush1.bf16.msra.mxu0 %v6077_v19  ;;  %4177 = vmatpush1.bf16.msra.mxu1 %v6080_v20  ;;  %v6178_v19 = vld [vmem:[%s8570_s1 + $0xa44] ss:$16 sps:$4 sm:$0xff]   ;;  %v6181_v20 = vld [vmem:[%s8570_s1 + $0xa4c] ss:$16 sps:$4 sm:$0xff]  }
 0x10c   :  { %3791 = vmatprep.subr.bf16.mxu0 %v6085_v21  ;;  %4178 = vmatprep.subr.bf16.mxu1 %v6088_v22  ;;  %v6176_v21 = vld [vmem:[%s8570_s1 + $0xa40] ss:$16 sps:$4 sm:$0xff]   ;;  %v6179_v22 = vld [vmem:[%s8570_s1 + $0xa48] ss:$16 sps:$4 sm:$0xff]  }
 0x10f   :  { %3792 = vmatpush1.bf16.msra.mxu0 %v6083_v23  ;;  %4179 = vmatpush1.bf16.msra.mxu1 %v6086_v24  ;;  %v6184_v23 = vld [vmem:[%s8570_s1 + $0xa64] ss:$16 sps:$4 sm:$0xff]   ;;  %v6187_v24 = vld [vmem:[%s8570_s1 + $0xa6c] ss:$16 sps:$4 sm:$0xff]  }
 0x110   :  { %3793 = vmatprep.subr.bf16.mxu0 %v6091_v25  ;;  %4180 = vmatprep.subr.bf16.mxu1 %v6094_v26  ;;  %v6182_v25 = vld [vmem:[%s8570_s1 + $0xa60] ss:$16 sps:$4 sm:$0xff]   ;;  %v6185_v26 = vld [vmem:[%s8570_s1 + $0xa68] ss:$16 sps:$4 sm:$0xff]  }
 0x113   :  { %3794 = vmatpush1.bf16.msra.mxu0 %v6089_v27  ;;  %4181 = vmatpush1.bf16.msra.mxu1 %v6092_v28  ;;  %v6190_v27 = vld [vmem:[%s8570_s1 + $0xa84] ss:$16 sps:$4 sm:$0xff]   ;;  %v6193_v28 = vld [vmem:[%s8570_s1 + $0xa8c] ss:$16 sps:$4 sm:$0xff]  }
 0x114   :  { %3795 = vmatprep.subr.bf16.mxu0 %v6097_v29  ;;  %4182 = vmatprep.subr.bf16.mxu1 %v6100_v30  ;;  %v6188_v29 = vld [vmem:[%s8570_s1 + $0xa80] ss:$16 sps:$4 sm:$0xff]   ;;  %v6191_v30 = vld [vmem:[%s8570_s1 + $0xa88] ss:$16 sps:$4 sm:$0xff]  }
 0x117   :  { %3796 = vmatpush1.bf16.msra.mxu0 %v6095_v31  ;;  %4183 = vmatpush1.bf16.msra.mxu1 %v6098_v32  ;;  %v6196_v31 = vld [vmem:[%s8570_s1 + $0xaa4] ss:$16 sps:$4 sm:$0xff]   ;;  %v6199_v32 = vld [vmem:[%s8570_s1 + $0xaac] ss:$16 sps:$4 sm:$0xff]  }
 0x118   :  { %3797 = vmatprep.subr.bf16.mxu0 %v6103_v33  ;;  %4184 = vmatprep.subr.bf16.mxu1 %v6106_v34  ;;  %v6194_v33 = vld [vmem:[%s8570_s1 + $0xaa0] ss:$16 sps:$4 sm:$0xff]   ;;  %v6197_v34 = vld [vmem:[%s8570_s1 + $0xaa8] ss:$16 sps:$4 sm:$0xff]  }
 0x11b   :  { %3798 = vmatpush1.bf16.msra.mxu0 %v6101_v35  ;;  %4185 = vmatpush1.bf16.msra.mxu1 %v6104_v36  ;;  %v6202_v35 = vld [vmem:[%s8570_s1 + $0xac4] ss:$16 sps:$4 sm:$0xff]   ;;  %v6205_v36 = vld [vmem:[%s8570_s1 + $0xacc] ss:$16 sps:$4 sm:$0xff]  }
 0x11c   :  { %3799 = vmatprep.subr.bf16.mxu0 %v6109_v37  ;;  %4186 = vmatprep.subr.bf16.mxu1 %v6112_v38  ;;  %v6200_v37 = vld [vmem:[%s8570_s1 + $0xac0] ss:$16 sps:$4 sm:$0xff]   ;;  %v6203_v38 = vld [vmem:[%s8570_s1 + $0xac8] ss:$16 sps:$4 sm:$0xff]  }
 0x11f   :  { %3800 = vmatpush1.bf16.msra.mxu0 %v6107_v39  ;;  %4187 = vmatpush1.bf16.msra.mxu1 %v6110_v40  ;;  %v6208_v39 = vld [vmem:[%s8570_s1 + $0xae4] ss:$16 sps:$4 sm:$0xff]   ;;  %v6211_v40 = vld [vmem:[%s8570_s1 + $0xaec] ss:$16 sps:$4 sm:$0xff]  }
 0x120   :  { %3801 = vmatprep.subr.bf16.mxu0 %v6115_v41  ;;  %4188 = vmatprep.subr.bf16.mxu1 %v6118_v42  ;;  %v6206_v41 = vld [vmem:[%s8570_s1 + $0xae0] ss:$16 sps:$4 sm:$0xff]   ;;  %v6209_v42 = vld [vmem:[%s8570_s1 + $0xae8] ss:$16 sps:$4 sm:$0xff]  }
 0x123   :  { %3802 = vmatpush1.bf16.msra.mxu0 %v6113_v43  ;;  %4189 = vmatpush1.bf16.msra.mxu1 %v6116_v44  ;;  %v6214_v43 = vld [vmem:[%s8570_s1 + $0xb04] ss:$16 sps:$4 sm:$0xff]   ;;  %v6217_v44 = vld [vmem:[%s8570_s1 + $0xb0c] ss:$16 sps:$4 sm:$0xff]  }
 0x124   :  { %3803 = vmatprep.subr.bf16.mxu0 %v6121_v45  ;;  %4190 = vmatprep.subr.bf16.mxu1 %v6124_v46  ;;  %v6212_v45 = vld [vmem:[%s8570_s1 + $0xb00] ss:$16 sps:$4 sm:$0xff]   ;;  %v6215_v46 = vld [vmem:[%s8570_s1 + $0xb08] ss:$16 sps:$4 sm:$0xff]  }
 0x127   :  { %3804 = vmatpush1.bf16.msra.mxu0 %v6119_v47  ;;  %4191 = vmatpush1.bf16.msra.mxu1 %v6122_v48  ;;  %v6220_v47 = vld [vmem:[%s8570_s1 + $0xb24] ss:$16 sps:$4 sm:$0xff]   ;;  %v6223_v48 = vld [vmem:[%s8570_s1 + $0xb2c] ss:$16 sps:$4 sm:$0xff]  }
 0x128   :  { %3805 = vmatprep.subr.bf16.mxu0 %v6127_v49  ;;  %4192 = vmatprep.subr.bf16.mxu1 %v6130_v50  ;;  %v6218_v49 = vld [vmem:[%s8570_s1 + $0xb20] ss:$16 sps:$4 sm:$0xff]   ;;  %v6221_v50 = vld [vmem:[%s8570_s1 + $0xb28] ss:$16 sps:$4 sm:$0xff]  }
 0x12b   :  { %3806 = vmatpush1.bf16.msra.mxu0 %v6125_v51  ;;  %4193 = vmatpush1.bf16.msra.mxu1 %v6128_v52  ;;  %v6226_v51 = vld [vmem:[%s8570_s1 + $0xb44] ss:$16 sps:$4 sm:$0xff]   ;;  %v6229_v52 = vld [vmem:[%s8570_s1 + $0xb4c] ss:$16 sps:$4 sm:$0xff]  }
 0x12c   :  { %3807 = vmatprep.subr.bf16.mxu0 %v6133_v53  ;;  %4194 = vmatprep.subr.bf16.mxu1 %v6136_v54  ;;  %v6224_v53 = vld [vmem:[%s8570_s1 + $0xb40] ss:$16 sps:$4 sm:$0xff]   ;;  %v6227_v54 = vld [vmem:[%s8570_s1 + $0xb48] ss:$16 sps:$4 sm:$0xff]  }
 0x12f   :  { %3808 = vmatpush1.bf16.msra.mxu0 %v6131_v55  ;;  %4195 = vmatpush1.bf16.msra.mxu1 %v6134_v56  ;;  %v6232_v55 = vld [vmem:[%s8570_s1 + $0xb64] ss:$16 sps:$4 sm:$0xff]   ;;  %v6235_v56 = vld [vmem:[%s8570_s1 + $0xb6c] ss:$16 sps:$4 sm:$0xff]  }
 0x130   :  { %3809 = vmatprep.subr.bf16.mxu0 %v6139_v57  ;;  %4196 = vmatprep.subr.bf16.mxu1 %v6142_v58  ;;  %v6230_v57 = vld [vmem:[%s8570_s1 + $0xb60] ss:$16 sps:$4 sm:$0xff]   ;;  %v6233_v58 = vld [vmem:[%s8570_s1 + $0xb68] ss:$16 sps:$4 sm:$0xff]  }
 0x133   :  { %3810 = vmatpush1.bf16.msra.mxu0 %v6137_v59  ;;  %4197 = vmatpush1.bf16.msra.mxu1 %v6140_v60  ;;  %v6238_v59 = vld [vmem:[%s8570_s1 + $0xb84] ss:$16 sps:$4 sm:$0xff]   ;;  %v6241_v60 = vld [vmem:[%s8570_s1 + $0xb8c] ss:$16 sps:$4 sm:$0xff]  }
 0x134   :  { %3811 = vmatprep.subr.bf16.mxu0 %v6145_v61  ;;  %4198 = vmatprep.subr.bf16.mxu1 %v6148_v62  ;;  %v6236_v61 = vld [vmem:[%s8570_s1 + $0xb80] ss:$16 sps:$4 sm:$0xff]   ;;  %v6239_v62 = vld [vmem:[%s8570_s1 + $0xb88] ss:$16 sps:$4 sm:$0xff]  }
 0x137   :  { %3812 = vmatpush1.bf16.msra.mxu0 %v6143_v63  ;;  %4199 = vmatpush1.bf16.msra.mxu1 %v6146_v0  ;;  %v6244_v63 = vld [vmem:[%s8570_s1 + $0xba4] ss:$16 sps:$4 sm:$0xff]   ;;  %v6247_v0 = vld [vmem:[%s8570_s1 + $0xbac] ss:$16 sps:$4 sm:$0xff]  }
 0x138   :  { %3813 = vmatprep.subr.bf16.mxu0 %v6151_v1  ;;  %4200 = vmatprep.subr.bf16.mxu1 %v6154_v2  ;;  %v6242_v1 = vld [vmem:[%s8570_s1 + $0xba0] ss:$16 sps:$4 sm:$0xff]   ;;  %v6245_v2 = vld [vmem:[%s8570_s1 + $0xba8] ss:$16 sps:$4 sm:$0xff]  }
 0x13b   :  { %3814 = vmatpush1.bf16.msra.mxu0 %v6149_v3  ;;  %4201 = vmatpush1.bf16.msra.mxu1 %v6152_v4  ;;  %v6250_v3 = vld [vmem:[%s8570_s1 + $0xbc4] ss:$16 sps:$4 sm:$0xff]   ;;  %v6253_v4 = vld [vmem:[%s8570_s1 + $0xbcc] ss:$16 sps:$4 sm:$0xff]  }
 0x13c   :  { %3815 = vmatprep.subr.bf16.mxu0 %v6157_v5  ;;  %4202 = vmatprep.subr.bf16.mxu1 %v6160_v6  ;;  %v6248_v5 = vld [vmem:[%s8570_s1 + $0xbc0] ss:$16 sps:$4 sm:$0xff]   ;;  %v6251_v6 = vld [vmem:[%s8570_s1 + $0xbc8] ss:$16 sps:$4 sm:$0xff]  }
 0x13f   :  { %3816 = vmatpush1.bf16.msra.mxu0 %v6155_v7  ;;  %4203 = vmatpush1.bf16.msra.mxu1 %v6158_v8  ;;  %v6256_v7 = vld [vmem:[%s8570_s1 + $0xbe4] ss:$16 sps:$4 sm:$0xff]   ;;  %v6259_v8 = vld [vmem:[%s8570_s1 + $0xbec] ss:$16 sps:$4 sm:$0xff]  }
 0x140   :  { %3828 = vmatprep.subr.bf16.mxu0 %v6166_v10  ;;  %4215 = vmatprep.subr.bf16.mxu1 %v6169_v11  ;;  %v6257_v10 = vld [vmem:[%s8570_s1 + $0xbe8] ss:$16 sps:$4 sm:$0xff]   ;;  %v6265_v11 = vld [vmem:[%s8570_s1 + $0xc04] ss:$16 sps:$4 sm:$0xff]  }
 0x142   :  { %3818 = vmatmul.mubr.bf16.vlgmr.msra.gmra.mrb[0].mxu0 %v6161_v9  ;;  %4205 = vmatmul.mubr.bf16.vlgmr.msra.gmra.mrb[0].mxu1 %v6161_v9  ;;  %v6254_v9 = vld [vmem:[%s8570_s1 + $0xbe0] ss:$16 sps:$4 sm:$0xff]  }
 0x143   :  { %3829 = vmatpush1.bf16.msra.mxu0 %v6164_v12  ;;  %4216 = vmatpush1.bf16.msra.mxu1 %v6167_v13  ;;  %v6268_v12 = vld [vmem:[%s8570_s1 + $0xc0c] ss:$16 sps:$4 sm:$0xff]   ;;  %v6260_v13 = vld [vmem:[%s8571_s0 + $0x28] ss:$72 sps:$4 sm:$0xff]  }
 0x144   :  { %3830 = vmatprep.subr.bf16.mxu0 %v6172_v14  ;;  %4217 = vmatprep.subr.bf16.mxu1 %v6175_v15  ;;  %v6263_v14 = vld [vmem:[%s8570_s1 + $0xc00] ss:$16 sps:$4 sm:$0xff]   ;;  %v6266_v15 = vld [vmem:[%s8570_s1 + $0xc08] ss:$16 sps:$4 sm:$0xff]  }
 0x145   :  { %3860 = vmatprep.mubr.bf16.mxu0 %v6262_v16  ;;  %4247 = vmatprep.mubr.bf16.mxu1 %v6262_v16  ;;  %v6271_v16 = vld [vmem:[%s8570_s1 + $0xc24] ss:$16 sps:$4 sm:$0xff]  }
 0x147   :  { %3831 = vmatpush1.bf16.msra.mxu0 %v6170_v17  ;;  %4218 = vmatpush1.bf16.msra.mxu1 %v6173_v18  ;;  %v6274_v17 = vld [vmem:[%s8570_s1 + $0xc2c] ss:$16 sps:$4 sm:$0xff]  }
 0x148   :  { %3832 = vmatprep.subr.bf16.mxu0 %v6178_v19  ;;  %4219 = vmatprep.subr.bf16.mxu1 %v6181_v20  ;;  %v6361_v18 = vld [vmem:[%s8571_s0 + $0x34] ss:$72 sps:$4 sm:$0xff]   ;;  %v6269_v19 = vld [vmem:[%s8570_s1 + $0xc20] ss:$16 sps:$4 sm:$0xff]   ;;  %v6272_v20 = vld [vmem:[%s8570_s1 + $0xc28] ss:$16 sps:$4 sm:$0xff]  }
 0x14b   :  { %3833 = vmatpush1.bf16.msra.mxu0 %v6176_v21  ;;  %4220 = vmatpush1.bf16.msra.mxu1 %v6179_v22  ;;  %v6277_v21 = vld [vmem:[%s8570_s1 + $0xc44] ss:$16 sps:$4 sm:$0xff]   ;;  %v6280_v22 = vld [vmem:[%s8570_s1 + $0xc4c] ss:$16 sps:$4 sm:$0xff]  }
 0x14c   :  { %3834 = vmatprep.subr.bf16.mxu0 %v6184_v23  ;;  %4221 = vmatprep.subr.bf16.mxu1 %v6187_v24  ;;  %v6275_v23 = vld [vmem:[%s8570_s1 + $0xc40] ss:$16 sps:$4 sm:$0xff]   ;;  %v6278_v24 = vld [vmem:[%s8570_s1 + $0xc48] ss:$16 sps:$4 sm:$0xff]  }
 0x14f   :  { %3835 = vmatpush1.bf16.msra.mxu0 %v6182_v25  ;;  %4222 = vmatpush1.bf16.msra.mxu1 %v6185_v26  ;;  %v6283_v25 = vld [vmem:[%s8570_s1 + $0xc64] ss:$16 sps:$4 sm:$0xff]   ;;  %v6286_v26 = vld [vmem:[%s8570_s1 + $0xc6c] ss:$16 sps:$4 sm:$0xff]  }
 0x150   :  { %3836 = vmatprep.subr.bf16.mxu0 %v6190_v27  ;;  %4223 = vmatprep.subr.bf16.mxu1 %v6193_v28  ;;  %v6281_v27 = vld [vmem:[%s8570_s1 + $0xc60] ss:$16 sps:$4 sm:$0xff]   ;;  %v6284_v28 = vld [vmem:[%s8570_s1 + $0xc68] ss:$16 sps:$4 sm:$0xff]  }
 0x153   :  { %3837 = vmatpush1.bf16.msra.mxu0 %v6188_v29  ;;  %4224 = vmatpush1.bf16.msra.mxu1 %v6191_v30  ;;  %v6289_v29 = vld [vmem:[%s8570_s1 + $0xc84] ss:$16 sps:$4 sm:$0xff]   ;;  %v6292_v30 = vld [vmem:[%s8570_s1 + $0xc8c] ss:$16 sps:$4 sm:$0xff]  }
 0x154   :  { %3838 = vmatprep.subr.bf16.mxu0 %v6196_v31  ;;  %4225 = vmatprep.subr.bf16.mxu1 %v6199_v32  ;;  %v6287_v31 = vld [vmem:[%s8570_s1 + $0xc80] ss:$16 sps:$4 sm:$0xff]   ;;  %v6290_v32 = vld [vmem:[%s8570_s1 + $0xc88] ss:$16 sps:$4 sm:$0xff]  }
 0x157   :  { %3839 = vmatpush1.bf16.msra.mxu0 %v6194_v33  ;;  %4226 = vmatpush1.bf16.msra.mxu1 %v6197_v34  ;;  %v6295_v33 = vld [vmem:[%s8570_s1 + $0xca4] ss:$16 sps:$4 sm:$0xff]   ;;  %v6298_v34 = vld [vmem:[%s8570_s1 + $0xcac] ss:$16 sps:$4 sm:$0xff]  }
 0x158   :  { %3840 = vmatprep.subr.bf16.mxu0 %v6202_v35  ;;  %4227 = vmatprep.subr.bf16.mxu1 %v6205_v36  ;;  %v6293_v35 = vld [vmem:[%s8570_s1 + $0xca0] ss:$16 sps:$4 sm:$0xff]   ;;  %v6296_v36 = vld [vmem:[%s8570_s1 + $0xca8] ss:$16 sps:$4 sm:$0xff]  }
 0x15b   :  { %3841 = vmatpush1.bf16.msra.mxu0 %v6200_v37  ;;  %4228 = vmatpush1.bf16.msra.mxu1 %v6203_v38  ;;  %v6301_v37 = vld [vmem:[%s8570_s1 + $0xcc4] ss:$16 sps:$4 sm:$0xff]   ;;  %v6304_v38 = vld [vmem:[%s8570_s1 + $0xccc] ss:$16 sps:$4 sm:$0xff]  }
 0x15c   :  { %3842 = vmatprep.subr.bf16.mxu0 %v6208_v39  ;;  %4229 = vmatprep.subr.bf16.mxu1 %v6211_v40  ;;  %v6299_v39 = vld [vmem:[%s8570_s1 + $0xcc0] ss:$16 sps:$4 sm:$0xff]   ;;  %v6302_v40 = vld [vmem:[%s8570_s1 + $0xcc8] ss:$16 sps:$4 sm:$0xff]  }
 0x15f   :  { %3843 = vmatpush1.bf16.msra.mxu0 %v6206_v41  ;;  %4230 = vmatpush1.bf16.msra.mxu1 %v6209_v42  ;;  %v6307_v41 = vld [vmem:[%s8570_s1 + $0xce4] ss:$16 sps:$4 sm:$0xff]   ;;  %v6310_v42 = vld [vmem:[%s8570_s1 + $0xcec] ss:$16 sps:$4 sm:$0xff]  }
 0x160   :  { %3844 = vmatprep.subr.bf16.mxu0 %v6214_v43  ;;  %4231 = vmatprep.subr.bf16.mxu1 %v6217_v44  ;;  %v6305_v43 = vld [vmem:[%s8570_s1 + $0xce0] ss:$16 sps:$4 sm:$0xff]   ;;  %v6308_v44 = vld [vmem:[%s8570_s1 + $0xce8] ss:$16 sps:$4 sm:$0xff]  }
 0x163   :  { %3845 = vmatpush1.bf16.msra.mxu0 %v6212_v45  ;;  %4232 = vmatpush1.bf16.msra.mxu1 %v6215_v46  ;;  %v6313_v45 = vld [vmem:[%s8570_s1 + $0xd04] ss:$16 sps:$4 sm:$0xff]   ;;  %v6316_v46 = vld [vmem:[%s8570_s1 + $0xd0c] ss:$16 sps:$4 sm:$0xff]  }
 0x164   :  { %3846 = vmatprep.subr.bf16.mxu0 %v6220_v47  ;;  %4233 = vmatprep.subr.bf16.mxu1 %v6223_v48  ;;  %v6311_v47 = vld [vmem:[%s8570_s1 + $0xd00] ss:$16 sps:$4 sm:$0xff]   ;;  %v6314_v48 = vld [vmem:[%s8570_s1 + $0xd08] ss:$16 sps:$4 sm:$0xff]  }
 0x167   :  { %3847 = vmatpush1.bf16.msra.mxu0 %v6218_v49  ;;  %4234 = vmatpush1.bf16.msra.mxu1 %v6221_v50  ;;  %v6319_v49 = vld [vmem:[%s8570_s1 + $0xd24] ss:$16 sps:$4 sm:$0xff]   ;;  %v6322_v50 = vld [vmem:[%s8570_s1 + $0xd2c] ss:$16 sps:$4 sm:$0xff]  }
 0x168   :  { %3848 = vmatprep.subr.bf16.mxu0 %v6226_v51  ;;  %4235 = vmatprep.subr.bf16.mxu1 %v6229_v52  ;;  %v6317_v51 = vld [vmem:[%s8570_s1 + $0xd20] ss:$16 sps:$4 sm:$0xff]   ;;  %v6320_v52 = vld [vmem:[%s8570_s1 + $0xd28] ss:$16 sps:$4 sm:$0xff]  }
 0x16b   :  { %3849 = vmatpush1.bf16.msra.mxu0 %v6224_v53  ;;  %4236 = vmatpush1.bf16.msra.mxu1 %v6227_v54  ;;  %v6325_v53 = vld [vmem:[%s8570_s1 + $0xd44] ss:$16 sps:$4 sm:$0xff]   ;;  %v6328_v54 = vld [vmem:[%s8570_s1 + $0xd4c] ss:$16 sps:$4 sm:$0xff]  }
 0x16c   :  { %3850 = vmatprep.subr.bf16.mxu0 %v6232_v55  ;;  %4237 = vmatprep.subr.bf16.mxu1 %v6235_v56  ;;  %v6323_v55 = vld [vmem:[%s8570_s1 + $0xd40] ss:$16 sps:$4 sm:$0xff]   ;;  %v6326_v56 = vld [vmem:[%s8570_s1 + $0xd48] ss:$16 sps:$4 sm:$0xff]  }
 0x16f   :  { %3851 = vmatpush1.bf16.msra.mxu0 %v6230_v57  ;;  %4238 = vmatpush1.bf16.msra.mxu1 %v6233_v58  ;;  %v6331_v57 = vld [vmem:[%s8570_s1 + $0xd64] ss:$16 sps:$4 sm:$0xff]   ;;  %v6334_v58 = vld [vmem:[%s8570_s1 + $0xd6c] ss:$16 sps:$4 sm:$0xff]  }
 0x170   :  { %3852 = vmatprep.subr.bf16.mxu0 %v6238_v59  ;;  %4239 = vmatprep.subr.bf16.mxu1 %v6241_v60  ;;  %v6329_v59 = vld [vmem:[%s8570_s1 + $0xd60] ss:$16 sps:$4 sm:$0xff]   ;;  %v6332_v60 = vld [vmem:[%s8570_s1 + $0xd68] ss:$16 sps:$4 sm:$0xff]  }
 0x173   :  { %3853 = vmatpush1.bf16.msra.mxu0 %v6236_v61  ;;  %4240 = vmatpush1.bf16.msra.mxu1 %v6239_v62  ;;  %v6337_v61 = vld [vmem:[%s8570_s1 + $0xd84] ss:$16 sps:$4 sm:$0xff]   ;;  %v6340_v62 = vld [vmem:[%s8570_s1 + $0xd8c] ss:$16 sps:$4 sm:$0xff]  }
 0x174   :  { %3854 = vmatprep.subr.bf16.mxu0 %v6244_v63  ;;  %4241 = vmatprep.subr.bf16.mxu1 %v6247_v0  ;;  %v6335_v63 = vld [vmem:[%s8570_s1 + $0xd80] ss:$16 sps:$4 sm:$0xff]   ;;  %v6338_v0 = vld [vmem:[%s8570_s1 + $0xd88] ss:$16 sps:$4 sm:$0xff]  }
 0x177   :  { %3855 = vmatpush1.bf16.msra.mxu0 %v6242_v1  ;;  %4242 = vmatpush1.bf16.msra.mxu1 %v6245_v2  ;;  %v6343_v1 = vld [vmem:[%s8570_s1 + $0xda4] ss:$16 sps:$4 sm:$0xff]   ;;  %v6346_v2 = vld [vmem:[%s8570_s1 + $0xdac] ss:$16 sps:$4 sm:$0xff]  }
 0x178   :  { %3856 = vmatprep.subr.bf16.mxu0 %v6250_v3  ;;  %4243 = vmatprep.subr.bf16.mxu1 %v6253_v4  ;;  %v6341_v3 = vld [vmem:[%s8570_s1 + $0xda0] ss:$16 sps:$4 sm:$0xff]   ;;  %v6344_v4 = vld [vmem:[%s8570_s1 + $0xda8] ss:$16 sps:$4 sm:$0xff]  }
 0x17b   :  { %3857 = vmatpush1.bf16.msra.mxu0 %v6248_v5  ;;  %4244 = vmatpush1.bf16.msra.mxu1 %v6251_v6  ;;  %v6349_v5 = vld [vmem:[%s8570_s1 + $0xdc4] ss:$16 sps:$4 sm:$0xff]   ;;  %v6352_v6 = vld [vmem:[%s8570_s1 + $0xdcc] ss:$16 sps:$4 sm:$0xff]  }
 0x17c   :  { %3858 = vmatprep.subr.bf16.mxu0 %v6256_v7  ;;  %4245 = vmatprep.subr.bf16.mxu1 %v6259_v8  ;;  %v6347_v7 = vld [vmem:[%s8570_s1 + $0xdc0] ss:$16 sps:$4 sm:$0xff]   ;;  %v6350_v8 = vld [vmem:[%s8570_s1 + $0xdc8] ss:$16 sps:$4 sm:$0xff]  }
 0x17f   :  { %3859 = vmatpush1.bf16.msra.mxu0 %v6254_v9  ;;  %4246 = vmatpush1.bf16.msra.mxu1 %v6257_v10  ;;  %v6355_v9 = vld [vmem:[%s8570_s1 + $0xde4] ss:$16 sps:$4 sm:$0xff]   ;;  %v6358_v10 = vld [vmem:[%s8570_s1 + $0xdec] ss:$16 sps:$4 sm:$0xff]  }
 0x180   :  { %3871 = vmatprep.subr.bf16.mxu0 %v6265_v11  ;;  %4258 = vmatprep.subr.bf16.mxu1 %v6268_v12  ;;  %v6353_v11 = vld [vmem:[%s8570_s1 + $0xde0] ss:$16 sps:$4 sm:$0xff]   ;;  %v6356_v12 = vld [vmem:[%s8570_s1 + $0xde8] ss:$16 sps:$4 sm:$0xff]  }
 0x182   :  { %3861 = vmatmul.mubr.bf16.vlgmr.msra.gmra.mrb[0].mxu0 %v6260_v13  ;;  %4248 = vmatmul.mubr.bf16.vlgmr.msra.gmra.mrb[0].mxu1 %v6260_v13  ;;  %v6364_v13 = vld [vmem:[%s8570_s1 + $0xe04] ss:$16 sps:$4 sm:$0xff]  }
 0x183   :  { %3872 = vmatpush1.bf16.msra.mxu0 %v6263_v14  ;;  %4259 = vmatpush1.bf16.msra.mxu1 %v6266_v15  ;;  %v6367_v14 = vld [vmem:[%s8570_s1 + $0xe0c] ss:$16 sps:$4 sm:$0xff]   ;;  %v6359_v15 = vld [vmem:[%s8571_s0 + $0x30] ss:$72 sps:$4 sm:$0xff]  }
 0x184   :  { %3873 = vmatprep.subr.bf16.mxu0 %v6271_v16  ;;  %4260 = vmatprep.subr.bf16.mxu1 %v6274_v17  ;;  %v6362_v16 = vld [vmem:[%s8570_s1 + $0xe00] ss:$16 sps:$4 sm:$0xff]   ;;  %v6365_v17 = vld [vmem:[%s8570_s1 + $0xe08] ss:$16 sps:$4 sm:$0xff]  }
 0x185   :  { %3903 = vmatprep.mubr.bf16.mxu0 %v6361_v18  ;;  %4290 = vmatprep.mubr.bf16.mxu1 %v6361_v18  ;;  %v6370_v18 = vld [vmem:[%s8570_s1 + $0xe24] ss:$16 sps:$4 sm:$0xff]  }
 0x187   :  { %3874 = vmatpush1.bf16.msra.mxu0 %v6269_v19  ;;  %4261 = vmatpush1.bf16.msra.mxu1 %v6272_v20  ;;  %v6373_v19 = vld [vmem:[%s8570_s1 + $0xe2c] ss:$16 sps:$4 sm:$0xff]  }
 0x188   :  { %3875 = vmatprep.subr.bf16.mxu0 %v6277_v21  ;;  %4262 = vmatprep.subr.bf16.mxu1 %v6280_v22  ;;  %v6460_v20 = vld [vmem:[%s8571_s0 + $0x3c] ss:$72 sps:$4 sm:$0xff]   ;;  %v6368_v21 = vld [vmem:[%s8570_s1 + $0xe20] ss:$16 sps:$4 sm:$0xff]   ;;  %v6371_v22 = vld [vmem:[%s8570_s1 + $0xe28] ss:$16 sps:$4 sm:$0xff]  }
 0x18b   :  { %3876 = vmatpush1.bf16.msra.mxu0 %v6275_v23  ;;  %4263 = vmatpush1.bf16.msra.mxu1 %v6278_v24  ;;  %v6376_v23 = vld [vmem:[%s8570_s1 + $0xe44] ss:$16 sps:$4 sm:$0xff]   ;;  %v6379_v24 = vld [vmem:[%s8570_s1 + $0xe4c] ss:$16 sps:$4 sm:$0xff]  }
 0x18c   :  { %3877 = vmatprep.subr.bf16.mxu0 %v6283_v25  ;;  %4264 = vmatprep.subr.bf16.mxu1 %v6286_v26  ;;  %v6374_v25 = vld [vmem:[%s8570_s1 + $0xe40] ss:$16 sps:$4 sm:$0xff]   ;;  %v6377_v26 = vld [vmem:[%s8570_s1 + $0xe48] ss:$16 sps:$4 sm:$0xff]  }
 0x18f   :  { %3878 = vmatpush1.bf16.msra.mxu0 %v6281_v27  ;;  %4265 = vmatpush1.bf16.msra.mxu1 %v6284_v28  ;;  %v6382_v27 = vld [vmem:[%s8570_s1 + $0xe64] ss:$16 sps:$4 sm:$0xff]   ;;  %v6385_v28 = vld [vmem:[%s8570_s1 + $0xe6c] ss:$16 sps:$4 sm:$0xff]  }
 0x190   :  { %3879 = vmatprep.subr.bf16.mxu0 %v6289_v29  ;;  %4266 = vmatprep.subr.bf16.mxu1 %v6292_v30  ;;  %v6380_v29 = vld [vmem:[%s8570_s1 + $0xe60] ss:$16 sps:$4 sm:$0xff]   ;;  %v6383_v30 = vld [vmem:[%s8570_s1 + $0xe68] ss:$16 sps:$4 sm:$0xff]  }
 0x193   :  { %3880 = vmatpush1.bf16.msra.mxu0 %v6287_v31  ;;  %4267 = vmatpush1.bf16.msra.mxu1 %v6290_v32  ;;  %v6388_v31 = vld [vmem:[%s8570_s1 + $0xe84] ss:$16 sps:$4 sm:$0xff]   ;;  %v6391_v32 = vld [vmem:[%s8570_s1 + $0xe8c] ss:$16 sps:$4 sm:$0xff]  }
 0x194   :  { %3881 = vmatprep.subr.bf16.mxu0 %v6295_v33  ;;  %4268 = vmatprep.subr.bf16.mxu1 %v6298_v34  ;;  %v6386_v33 = vld [vmem:[%s8570_s1 + $0xe80] ss:$16 sps:$4 sm:$0xff]   ;;  %v6389_v34 = vld [vmem:[%s8570_s1 + $0xe88] ss:$16 sps:$4 sm:$0xff]  }
 0x197   :  { %3882 = vmatpush1.bf16.msra.mxu0 %v6293_v35  ;;  %4269 = vmatpush1.bf16.msra.mxu1 %v6296_v36  ;;  %v6394_v35 = vld [vmem:[%s8570_s1 + $0xea4] ss:$16 sps:$4 sm:$0xff]   ;;  %v6397_v36 = vld [vmem:[%s8570_s1 + $0xeac] ss:$16 sps:$4 sm:$0xff]  }
 0x198   :  { %3883 = vmatprep.subr.bf16.mxu0 %v6301_v37  ;;  %4270 = vmatprep.subr.bf16.mxu1 %v6304_v38  ;;  %v6392_v37 = vld [vmem:[%s8570_s1 + $0xea0] ss:$16 sps:$4 sm:$0xff]   ;;  %v6395_v38 = vld [vmem:[%s8570_s1 + $0xea8] ss:$16 sps:$4 sm:$0xff]  }
 0x19b   :  { %3884 = vmatpush1.bf16.msra.mxu0 %v6299_v39  ;;  %4271 = vmatpush1.bf16.msra.mxu1 %v6302_v40  ;;  %v6400_v39 = vld [vmem:[%s8570_s1 + $0xec4] ss:$16 sps:$4 sm:$0xff]   ;;  %v6403_v40 = vld [vmem:[%s8570_s1 + $0xecc] ss:$16 sps:$4 sm:$0xff]  }
 0x19c   :  { %3885 = vmatprep.subr.bf16.mxu0 %v6307_v41  ;;  %4272 = vmatprep.subr.bf16.mxu1 %v6310_v42  ;;  %v6398_v41 = vld [vmem:[%s8570_s1 + $0xec0] ss:$16 sps:$4 sm:$0xff]   ;;  %v6401_v42 = vld [vmem:[%s8570_s1 + $0xec8] ss:$16 sps:$4 sm:$0xff]  }
 0x19f   :  { %3886 = vmatpush1.bf16.msra.mxu0 %v6305_v43  ;;  %4273 = vmatpush1.bf16.msra.mxu1 %v6308_v44  ;;  %v6406_v43 = vld [vmem:[%s8570_s1 + $0xee4] ss:$16 sps:$4 sm:$0xff]   ;;  %v6409_v44 = vld [vmem:[%s8570_s1 + $0xeec] ss:$16 sps:$4 sm:$0xff]  }
 0x1a0   :  { %3887 = vmatprep.subr.bf16.mxu0 %v6313_v45  ;;  %4274 = vmatprep.subr.bf16.mxu1 %v6316_v46  ;;  %v6404_v45 = vld [vmem:[%s8570_s1 + $0xee0] ss:$16 sps:$4 sm:$0xff]   ;;  %v6407_v46 = vld [vmem:[%s8570_s1 + $0xee8] ss:$16 sps:$4 sm:$0xff]  }
 0x1a3   :  { %3888 = vmatpush1.bf16.msra.mxu0 %v6311_v47  ;;  %4275 = vmatpush1.bf16.msra.mxu1 %v6314_v48  ;;  %v6412_v47 = vld [vmem:[%s8570_s1 + $0xf04] ss:$16 sps:$4 sm:$0xff]   ;;  %v6415_v48 = vld [vmem:[%s8570_s1 + $0xf0c] ss:$16 sps:$4 sm:$0xff]  }
 0x1a4   :  { %3889 = vmatprep.subr.bf16.mxu0 %v6319_v49  ;;  %4276 = vmatprep.subr.bf16.mxu1 %v6322_v50  ;;  %v6410_v49 = vld [vmem:[%s8570_s1 + $0xf00] ss:$16 sps:$4 sm:$0xff]   ;;  %v6413_v50 = vld [vmem:[%s8570_s1 + $0xf08] ss:$16 sps:$4 sm:$0xff]  }
 0x1a7   :  { %3890 = vmatpush1.bf16.msra.mxu0 %v6317_v51  ;;  %4277 = vmatpush1.bf16.msra.mxu1 %v6320_v52  ;;  %v6418_v51 = vld [vmem:[%s8570_s1 + $0xf24] ss:$16 sps:$4 sm:$0xff]   ;;  %v6421_v52 = vld [vmem:[%s8570_s1 + $0xf2c] ss:$16 sps:$4 sm:$0xff]  }
 0x1a8   :  { %3891 = vmatprep.subr.bf16.mxu0 %v6325_v53  ;;  %4278 = vmatprep.subr.bf16.mxu1 %v6328_v54  ;;  %v6416_v53 = vld [vmem:[%s8570_s1 + $0xf20] ss:$16 sps:$4 sm:$0xff]   ;;  %v6419_v54 = vld [vmem:[%s8570_s1 + $0xf28] ss:$16 sps:$4 sm:$0xff]  }
 0x1ab   :  { %3892 = vmatpush1.bf16.msra.mxu0 %v6323_v55  ;;  %4279 = vmatpush1.bf16.msra.mxu1 %v6326_v56  ;;  %v6424_v55 = vld [vmem:[%s8570_s1 + $0xf44] ss:$16 sps:$4 sm:$0xff]   ;;  %v6427_v56 = vld [vmem:[%s8570_s1 + $0xf4c] ss:$16 sps:$4 sm:$0xff]  }
 0x1ac   :  { %3893 = vmatprep.subr.bf16.mxu0 %v6331_v57  ;;  %4280 = vmatprep.subr.bf16.mxu1 %v6334_v58  ;;  %v6422_v57 = vld [vmem:[%s8570_s1 + $0xf40] ss:$16 sps:$4 sm:$0xff]   ;;  %v6425_v58 = vld [vmem:[%s8570_s1 + $0xf48] ss:$16 sps:$4 sm:$0xff]  }
 0x1af   :  { %3894 = vmatpush1.bf16.msra.mxu0 %v6329_v59  ;;  %4281 = vmatpush1.bf16.msra.mxu1 %v6332_v60  ;;  %v6430_v59 = vld [vmem:[%s8570_s1 + $0xf64] ss:$16 sps:$4 sm:$0xff]   ;;  %v6433_v60 = vld [vmem:[%s8570_s1 + $0xf6c] ss:$16 sps:$4 sm:$0xff]  }
 0x1b0   :  { %3895 = vmatprep.subr.bf16.mxu0 %v6337_v61  ;;  %4282 = vmatprep.subr.bf16.mxu1 %v6340_v62  ;;  %v6428_v61 = vld [vmem:[%s8570_s1 + $0xf60] ss:$16 sps:$4 sm:$0xff]   ;;  %v6431_v62 = vld [vmem:[%s8570_s1 + $0xf68] ss:$16 sps:$4 sm:$0xff]  }
 0x1b3   :  { %3896 = vmatpush1.bf16.msra.mxu0 %v6335_v63  ;;  %4283 = vmatpush1.bf16.msra.mxu1 %v6338_v0  ;;  %v6436_v63 = vld [vmem:[%s8570_s1 + $0xf84] ss:$16 sps:$4 sm:$0xff]   ;;  %v6439_v0 = vld [vmem:[%s8570_s1 + $0xf8c] ss:$16 sps:$4 sm:$0xff]  }
 0x1b4   :  { %3897 = vmatprep.subr.bf16.mxu0 %v6343_v1  ;;  %4284 = vmatprep.subr.bf16.mxu1 %v6346_v2  ;;  %v6434_v1 = vld [vmem:[%s8570_s1 + $0xf80] ss:$16 sps:$4 sm:$0xff]   ;;  %v6437_v2 = vld [vmem:[%s8570_s1 + $0xf88] ss:$16 sps:$4 sm:$0xff]  }
 0x1b7   :  { %3898 = vmatpush1.bf16.msra.mxu0 %v6341_v3  ;;  %4285 = vmatpush1.bf16.msra.mxu1 %v6344_v4  ;;  %v6442_v3 = vld [vmem:[%s8570_s1 + $0xfa4] ss:$16 sps:$4 sm:$0xff]   ;;  %v6445_v4 = vld [vmem:[%s8570_s1 + $0xfac] ss:$16 sps:$4 sm:$0xff]  }
 0x1b8   :  { %3899 = vmatprep.subr.bf16.mxu0 %v6349_v5  ;;  %4286 = vmatprep.subr.bf16.mxu1 %v6352_v6  ;;  %v6440_v5 = vld [vmem:[%s8570_s1 + $0xfa0] ss:$16 sps:$4 sm:$0xff]   ;;  %v6443_v6 = vld [vmem:[%s8570_s1 + $0xfa8] ss:$16 sps:$4 sm:$0xff]  }
 0x1bb   :  { %3900 = vmatpush1.bf16.msra.mxu0 %v6347_v7  ;;  %4287 = vmatpush1.bf16.msra.mxu1 %v6350_v8  ;;  %v6448_v7 = vld [vmem:[%s8570_s1 + $0xfc4] ss:$16 sps:$4 sm:$0xff]   ;;  %v6451_v8 = vld [vmem:[%s8570_s1 + $0xfcc] ss:$16 sps:$4 sm:$0xff]  }
 0x1bc   :  { %3901 = vmatprep.subr.bf16.mxu0 %v6355_v9  ;;  %4288 = vmatprep.subr.bf16.mxu1 %v6358_v10  ;;  %v6446_v9 = vld [vmem:[%s8570_s1 + $0xfc0] ss:$16 sps:$4 sm:$0xff]   ;;  %v6449_v10 = vld [vmem:[%s8570_s1 + $0xfc8] ss:$16 sps:$4 sm:$0xff]  }
 0x1bf   :  { %3902 = vmatpush1.bf16.msra.mxu0 %v6353_v11  ;;  %4289 = vmatpush1.bf16.msra.mxu1 %v6356_v12  ;;  %v6454_v11 = vld [vmem:[%s8570_s1 + $0xfe4] ss:$16 sps:$4 sm:$0xff]   ;;  %v6457_v12 = vld [vmem:[%s8570_s1 + $0xfec] ss:$16 sps:$4 sm:$0xff]  }
 0x1c0   :  { %3914 = vmatprep.subr.bf16.mxu0 %v6364_v13  ;;  %4301 = vmatprep.subr.bf16.mxu1 %v6367_v14  ;;  %v6452_v13 = vld [vmem:[%s8570_s1 + $0xfe0] ss:$16 sps:$4 sm:$0xff]   ;;  %v6455_v14 = vld [vmem:[%s8570_s1 + $0xfe8] ss:$16 sps:$4 sm:$0xff]  }
 0x1c2   :  { %3904 = vmatmul.mubr.bf16.vlgmr.msra.gmra.mrb[0].mxu0 %v6359_v15  ;;  %4291 = vmatmul.mubr.bf16.vlgmr.msra.gmra.mrb[0].mxu1 %v6359_v15  ;;  %v6463_v15 = vld [vmem:[%s8570_s1 + $0x1004] ss:$16 sps:$4 sm:$0xff]  }
 0x1c3   :  { %3915 = vmatpush1.bf16.msra.mxu0 %v6362_v16  ;;  %4302 = vmatpush1.bf16.msra.mxu1 %v6365_v17  ;;  %v6466_v16 = vld [vmem:[%s8570_s1 + $0x100c] ss:$16 sps:$4 sm:$0xff]   ;;  %v6458_v17 = vld [vmem:[%s8571_s0 + $0x38] ss:$72 sps:$4 sm:$0xff]  }
 0x1c4   :  { %3916 = vmatprep.subr.bf16.mxu0 %v6370_v18  ;;  %4303 = vmatprep.subr.bf16.mxu1 %v6373_v19  ;;  %v6461_v18 = vld [vmem:[%s8570_s1 + $0x1000] ss:$16 sps:$4 sm:$0xff]   ;;  %v6464_v19 = vld [vmem:[%s8570_s1 + $0x1008] ss:$16 sps:$4 sm:$0xff]  }
 0x1c5   :  { %3946 = vmatprep.mubr.bf16.mxu0 %v6460_v20  ;;  %4333 = vmatprep.mubr.bf16.mxu1 %v6460_v20  ;;  %v6469_v20 = vld [vmem:[%s8570_s1 + $0x1024] ss:$16 sps:$4 sm:$0xff]  }
 0x1c7   :  { %3917 = vmatpush1.bf16.msra.mxu0 %v6368_v21  ;;  %4304 = vmatpush1.bf16.msra.mxu1 %v6371_v22  ;;  %v6472_v21 = vld [vmem:[%s8570_s1 + $0x102c] ss:$16 sps:$4 sm:$0xff]  }
 0x1c8   :  { %3918 = vmatprep.subr.bf16.mxu0 %v6376_v23  ;;  %4305 = vmatprep.subr.bf16.mxu1 %v6379_v24  ;;  %v6559_v22 = vld [vmem:[%s8571_s0 + $0x44] ss:$72 sps:$4 sm:$0xff]   ;;  %v6467_v23 = vld [vmem:[%s8570_s1 + $0x1020] ss:$16 sps:$4 sm:$0xff]   ;;  %v6470_v24 = vld [vmem:[%s8570_s1 + $0x1028] ss:$16 sps:$4 sm:$0xff]  }
 0x1cb   :  { %3919 = vmatpush1.bf16.msra.mxu0 %v6374_v25  ;;  %4306 = vmatpush1.bf16.msra.mxu1 %v6377_v26  ;;  %v6475_v25 = vld [vmem:[%s8570_s1 + $0x1044] ss:$16 sps:$4 sm:$0xff]   ;;  %v6478_v26 = vld [vmem:[%s8570_s1 + $0x104c] ss:$16 sps:$4 sm:$0xff]  }
 0x1cc   :  { %3920 = vmatprep.subr.bf16.mxu0 %v6382_v27  ;;  %4307 = vmatprep.subr.bf16.mxu1 %v6385_v28  ;;  %v6473_v27 = vld [vmem:[%s8570_s1 + $0x1040] ss:$16 sps:$4 sm:$0xff]   ;;  %v6476_v28 = vld [vmem:[%s8570_s1 + $0x1048] ss:$16 sps:$4 sm:$0xff]  }
 0x1cf   :  { %3921 = vmatpush1.bf16.msra.mxu0 %v6380_v29  ;;  %4308 = vmatpush1.bf16.msra.mxu1 %v6383_v30  ;;  %v6481_v29 = vld [vmem:[%s8570_s1 + $0x1064] ss:$16 sps:$4 sm:$0xff]   ;;  %v6484_v30 = vld [vmem:[%s8570_s1 + $0x106c] ss:$16 sps:$4 sm:$0xff]  }
 0x1d0   :  { %3922 = vmatprep.subr.bf16.mxu0 %v6388_v31  ;;  %4309 = vmatprep.subr.bf16.mxu1 %v6391_v32  ;;  %v6479_v31 = vld [vmem:[%s8570_s1 + $0x1060] ss:$16 sps:$4 sm:$0xff]   ;;  %v6482_v32 = vld [vmem:[%s8570_s1 + $0x1068] ss:$16 sps:$4 sm:$0xff]  }
 0x1d3   :  { %3923 = vmatpush1.bf16.msra.mxu0 %v6386_v33  ;;  %4310 = vmatpush1.bf16.msra.mxu1 %v6389_v34  ;;  %v6487_v33 = vld [vmem:[%s8570_s1 + $0x1084] ss:$16 sps:$4 sm:$0xff]   ;;  %v6490_v34 = vld [vmem:[%s8570_s1 + $0x108c] ss:$16 sps:$4 sm:$0xff]  }
 0x1d4   :  { %3924 = vmatprep.subr.bf16.mxu0 %v6394_v35  ;;  %4311 = vmatprep.subr.bf16.mxu1 %v6397_v36  ;;  %v6485_v35 = vld [vmem:[%s8570_s1 + $0x1080] ss:$16 sps:$4 sm:$0xff]   ;;  %v6488_v36 = vld [vmem:[%s8570_s1 + $0x1088] ss:$16 sps:$4 sm:$0xff]  }
 0x1d7   :  { %3925 = vmatpush1.bf16.msra.mxu0 %v6392_v37  ;;  %4312 = vmatpush1.bf16.msra.mxu1 %v6395_v38  ;;  %v6493_v37 = vld [vmem:[%s8570_s1 + $0x10a4] ss:$16 sps:$4 sm:$0xff]   ;;  %v6496_v38 = vld [vmem:[%s8570_s1 + $0x10ac] ss:$16 sps:$4 sm:$0xff]  }
 0x1d8   :  { %3926 = vmatprep.subr.bf16.mxu0 %v6400_v39  ;;  %4313 = vmatprep.subr.bf16.mxu1 %v6403_v40  ;;  %v6491_v39 = vld [vmem:[%s8570_s1 + $0x10a0] ss:$16 sps:$4 sm:$0xff]   ;;  %v6494_v40 = vld [vmem:[%s8570_s1 + $0x10a8] ss:$16 sps:$4 sm:$0xff]  }
 0x1db   :  { %3927 = vmatpush1.bf16.msra.mxu0 %v6398_v41  ;;  %4314 = vmatpush1.bf16.msra.mxu1 %v6401_v42  ;;  %v6499_v41 = vld [vmem:[%s8570_s1 + $0x10c4] ss:$16 sps:$4 sm:$0xff]   ;;  %v6502_v42 = vld [vmem:[%s8570_s1 + $0x10cc] ss:$16 sps:$4 sm:$0xff]  }
 0x1dc   :  { %3928 = vmatprep.subr.bf16.mxu0 %v6406_v43  ;;  %4315 = vmatprep.subr.bf16.mxu1 %v6409_v44  ;;  %v6497_v43 = vld [vmem:[%s8570_s1 + $0x10c0] ss:$16 sps:$4 sm:$0xff]   ;;  %v6500_v44 = vld [vmem:[%s8570_s1 + $0x10c8] ss:$16 sps:$4 sm:$0xff]  }
 0x1df   :  { %3929 = vmatpush1.bf16.msra.mxu0 %v6404_v45  ;;  %4316 = vmatpush1.bf16.msra.mxu1 %v6407_v46  ;;  %v6505_v45 = vld [vmem:[%s8570_s1 + $0x10e4] ss:$16 sps:$4 sm:$0xff]   ;;  %v6508_v46 = vld [vmem:[%s8570_s1 + $0x10ec] ss:$16 sps:$4 sm:$0xff]  }
 0x1e0   :  { %3930 = vmatprep.subr.bf16.mxu0 %v6412_v47  ;;  %4317 = vmatprep.subr.bf16.mxu1 %v6415_v48  ;;  %v6503_v47 = vld [vmem:[%s8570_s1 + $0x10e0] ss:$16 sps:$4 sm:$0xff]   ;;  %v6506_v48 = vld [vmem:[%s8570_s1 + $0x10e8] ss:$16 sps:$4 sm:$0xff]  }
 0x1e3   :  { %3931 = vmatpush1.bf16.msra.mxu0 %v6410_v49  ;;  %4318 = vmatpush1.bf16.msra.mxu1 %v6413_v50  ;;  %v6511_v49 = vld [vmem:[%s8570_s1 + $0x1104] ss:$16 sps:$4 sm:$0xff]   ;;  %v6514_v50 = vld [vmem:[%s8570_s1 + $0x110c] ss:$16 sps:$4 sm:$0xff]  }
 0x1e4   :  { %3932 = vmatprep.subr.bf16.mxu0 %v6418_v51  ;;  %4319 = vmatprep.subr.bf16.mxu1 %v6421_v52  ;;  %v6509_v51 = vld [vmem:[%s8570_s1 + $0x1100] ss:$16 sps:$4 sm:$0xff]   ;;  %v6512_v52 = vld [vmem:[%s8570_s1 + $0x1108] ss:$16 sps:$4 sm:$0xff]  }
 0x1e7   :  { %3933 = vmatpush1.bf16.msra.mxu0 %v6416_v53  ;;  %4320 = vmatpush1.bf16.msra.mxu1 %v6419_v54  ;;  %v6517_v53 = vld [vmem:[%s8570_s1 + $0x1124] ss:$16 sps:$4 sm:$0xff]   ;;  %v6520_v54 = vld [vmem:[%s8570_s1 + $0x112c] ss:$16 sps:$4 sm:$0xff]  }
 0x1e8   :  { %3934 = vmatprep.subr.bf16.mxu0 %v6424_v55  ;;  %4321 = vmatprep.subr.bf16.mxu1 %v6427_v56  ;;  %v6515_v55 = vld [vmem:[%s8570_s1 + $0x1120] ss:$16 sps:$4 sm:$0xff]   ;;  %v6518_v56 = vld [vmem:[%s8570_s1 + $0x1128] ss:$16 sps:$4 sm:$0xff]  }
 0x1eb   :  { %3935 = vmatpush1.bf16.msra.mxu0 %v6422_v57  ;;  %4322 = vmatpush1.bf16.msra.mxu1 %v6425_v58  ;;  %v6523_v57 = vld [vmem:[%s8570_s1 + $0x1144] ss:$16 sps:$4 sm:$0xff]   ;;  %v6526_v58 = vld [vmem:[%s8570_s1 + $0x114c] ss:$16 sps:$4 sm:$0xff]  }
 0x1ec   :  { %3936 = vmatprep.subr.bf16.mxu0 %v6430_v59  ;;  %4323 = vmatprep.subr.bf16.mxu1 %v6433_v60  ;;  %v6521_v59 = vld [vmem:[%s8570_s1 + $0x1140] ss:$16 sps:$4 sm:$0xff]   ;;  %v6524_v60 = vld [vmem:[%s8570_s1 + $0x1148] ss:$16 sps:$4 sm:$0xff]  }
 0x1ef   :  { %3937 = vmatpush1.bf16.msra.mxu0 %v6428_v61  ;;  %4324 = vmatpush1.bf16.msra.mxu1 %v6431_v62  ;;  %v6529_v61 = vld [vmem:[%s8570_s1 + $0x1164] ss:$16 sps:$4 sm:$0xff]   ;;  %v6532_v62 = vld [vmem:[%s8570_s1 + $0x116c] ss:$16 sps:$4 sm:$0xff]  }
 0x1f0   :  { %3938 = vmatprep.subr.bf16.mxu0 %v6436_v63  ;;  %4325 = vmatprep.subr.bf16.mxu1 %v6439_v0  ;;  %v6527_v63 = vld [vmem:[%s8570_s1 + $0x1160] ss:$16 sps:$4 sm:$0xff]   ;;  %v6530_v0 = vld [vmem:[%s8570_s1 + $0x1168] ss:$16 sps:$4 sm:$0xff]  }
 0x1f3   :  { %3939 = vmatpush1.bf16.msra.mxu0 %v6434_v1  ;;  %4326 = vmatpush1.bf16.msra.mxu1 %v6437_v2  ;;  %v6535_v1 = vld [vmem:[%s8570_s1 + $0x1184] ss:$16 sps:$4 sm:$0xff]   ;;  %v6538_v2 = vld [vmem:[%s8570_s1 + $0x118c] ss:$16 sps:$4 sm:$0xff]  }
 0x1f4   :  { %3940 = vmatprep.subr.bf16.mxu0 %v6442_v3  ;;  %4327 = vmatprep.subr.bf16.mxu1 %v6445_v4  ;;  %v6533_v3 = vld [vmem:[%s8570_s1 + $0x1180] ss:$16 sps:$4 sm:$0xff]   ;;  %v6536_v4 = vld [vmem:[%s8570_s1 + $0x1188] ss:$16 sps:$4 sm:$0xff]  }
 0x1f7   :  { %3941 = vmatpush1.bf16.msra.mxu0 %v6440_v5  ;;  %4328 = vmatpush1.bf16.msra.mxu1 %v6443_v6  ;;  %v6541_v5 = vld [vmem:[%s8570_s1 + $0x11a4] ss:$16 sps:$4 sm:$0xff]   ;;  %v6544_v6 = vld [vmem:[%s8570_s1 + $0x11ac] ss:$16 sps:$4 sm:$0xff]  }
 0x1f8   :  { %3942 = vmatprep.subr.bf16.mxu0 %v6448_v7  ;;  %4329 = vmatprep.subr.bf16.mxu1 %v6451_v8  ;;  %v6539_v7 = vld [vmem:[%s8570_s1 + $0x11a0] ss:$16 sps:$4 sm:$0xff]   ;;  %v6542_v8 = vld [vmem:[%s8570_s1 + $0x11a8] ss:$16 sps:$4 sm:$0xff]  }
 0x1fb   :  { %3943 = vmatpush1.bf16.msra.mxu0 %v6446_v9  ;;  %4330 = vmatpush1.bf16.msra.mxu1 %v6449_v10  ;;  %v6547_v9 = vld [vmem:[%s8570_s1 + $0x11c4] ss:$16 sps:$4 sm:$0xff]   ;;  %v6550_v10 = vld [vmem:[%s8570_s1 + $0x11cc] ss:$16 sps:$4 sm:$0xff]  }
 0x1fc   :  { %3944 = vmatprep.subr.bf16.mxu0 %v6454_v11  ;;  %4331 = vmatprep.subr.bf16.mxu1 %v6457_v12  ;;  %v6545_v11 = vld [vmem:[%s8570_s1 + $0x11c0] ss:$16 sps:$4 sm:$0xff]   ;;  %v6548_v12 = vld [vmem:[%s8570_s1 + $0x11c8] ss:$16 sps:$4 sm:$0xff]  }
 0x1ff   :  { %3945 = vmatpush1.bf16.msra.mxu0 %v6452_v13  ;;  %4332 = vmatpush1.bf16.msra.mxu1 %v6455_v14  ;;  %v6553_v13 = vld [vmem:[%s8570_s1 + $0x11e4] ss:$16 sps:$4 sm:$0xff]   ;;  %v6556_v14 = vld [vmem:[%s8570_s1 + $0x11ec] ss:$16 sps:$4 sm:$0xff]  }
 0x200   :  { %3957 = vmatprep.subr.bf16.mxu0 %v6463_v15  ;;  %4344 = vmatprep.subr.bf16.mxu1 %v6466_v16  ;;  %v6551_v15 = vld [vmem:[%s8570_s1 + $0x11e0] ss:$16 sps:$4 sm:$0xff]   ;;  %v6554_v16 = vld [vmem:[%s8570_s1 + $0x11e8] ss:$16 sps:$4 sm:$0xff]  }
 0x202   :  { %3947 = vmatmul.mubr.bf16.vlgmr.msra.gmra.mrb[0].mxu0 %v6458_v17  ;;  %4334 = vmatmul.mubr.bf16.vlgmr.msra.gmra.mrb[0].mxu1 %v6458_v17  ;;  %v6560_v17 = vld [vmem:[%s8572_s3 + $0x40] sm:$0xff]  }
 0x203   :  { %3958 = vmatpush1.bf16.msra.mxu0 %v6461_v18  ;;  %4345 = vmatpush1.bf16.msra.mxu1 %v6464_v19  ;;  %v6561_v18 = vld [vmem:[%s8572_s3 + $0xc0] sm:$0xff]  }
 0x204   :  { %3959 = vmatprep.subr.bf16.mxu0 %v6469_v20  ;;  %4346 = vmatprep.subr.bf16.mxu1 %v6472_v21  ;;  %v6557_v19 = vld [vmem:[%s8571_s0 + $0x40] ss:$72 sps:$4 sm:$0xff]  }
 0x205   :  { %3989 = vmatprep.mubr.bf16.mxu0 %v6559_v22  ;;  %4376 = vmatprep.mubr.bf16.mxu1 %v6559_v22  ;;  %v6562_v20 = vld [vmem:[%s8572_s3] sm:$0xff]   ;;  %v6564_v22 = vld [vmem:[%s8572_s3 + $0x48] sm:$0xff]  }
 0x206   :  { %v6563_v21 = vld [vmem:[%s8572_s3 + $0x80] sm:$0xff]  }
 0x207   :  { %3960 = vmatpush1.bf16.msra.mxu0 %v6467_v23  ;;  %4347 = vmatpush1.bf16.msra.mxu1 %v6470_v24  ;;  %v6565_v23 = vld [vmem:[%s8572_s3 + $0xc8] sm:$0xff]  }
 0x208   :  { %3961 = vmatprep.subr.bf16.mxu0 %v6475_v25  ;;  %4348 = vmatprep.subr.bf16.mxu1 %v6478_v26  ;;  %v6566_v24 = vld [vmem:[%s8572_s3 + $0x8] sm:$0xff]   ;;  %v6568_v26 = vld [vmem:[%s8572_s3 + $0x50] sm:$0xff]  }
 0x209   :  { %v6567_v25 = vld [vmem:[%s8572_s3 + $0x88] sm:$0xff]  }
 0x20b   :  { %3962 = vmatpush1.bf16.msra.mxu0 %v6473_v27  ;;  %4349 = vmatpush1.bf16.msra.mxu1 %v6476_v28  ;;  %v6569_v27 = vld [vmem:[%s8572_s3 + $0xd0] sm:$0xff]  }
 0x20c   :  { %3963 = vmatprep.subr.bf16.mxu0 %v6481_v29  ;;  %4350 = vmatprep.subr.bf16.mxu1 %v6484_v30  ;;  %v6570_v28 = vld [vmem:[%s8572_s3 + $0x10] sm:$0xff]   ;;  %v6572_v30 = vld [vmem:[%s8572_s3 + $0x58] sm:$0xff]  }
 0x20d   :  { %v6571_v29 = vld [vmem:[%s8572_s3 + $0x90] sm:$0xff]  }
 0x20f   :  { %3964 = vmatpush1.bf16.msra.mxu0 %v6479_v31  ;;  %4351 = vmatpush1.bf16.msra.mxu1 %v6482_v32  ;;  %v6573_v31 = vld [vmem:[%s8572_s3 + $0xd8] sm:$0xff]  }
 0x210   :  { %3965 = vmatprep.subr.bf16.mxu0 %v6487_v33  ;;  %4352 = vmatprep.subr.bf16.mxu1 %v6490_v34  ;;  %v6574_v32 = vld [vmem:[%s8572_s3 + $0x18] sm:$0xff]   ;;  %v6576_v34 = vld [vmem:[%s8572_s3 + $0x60] sm:$0xff]  }
 0x211   :  { %v6575_v33 = vld [vmem:[%s8572_s3 + $0x98] sm:$0xff]  }
 0x213   :  { %3966 = vmatpush1.bf16.msra.mxu0 %v6485_v35  ;;  %4353 = vmatpush1.bf16.msra.mxu1 %v6488_v36  ;;  %v6577_v35 = vld [vmem:[%s8572_s3 + $0xe0] sm:$0xff]  }
 0x214   :  { %3967 = vmatprep.subr.bf16.mxu0 %v6493_v37  ;;  %4354 = vmatprep.subr.bf16.mxu1 %v6496_v38  ;;  %v6578_v36 = vld [vmem:[%s8572_s3 + $0x20] sm:$0xff]   ;;  %v6580_v38 = vld [vmem:[%s8572_s3 + $0x68] sm:$0xff]  }
 0x215   :  { %v6579_v37 = vld [vmem:[%s8572_s3 + $0xa0] sm:$0xff]  }
 0x217   :  { %3968 = vmatpush1.bf16.msra.mxu0 %v6491_v39  ;;  %4355 = vmatpush1.bf16.msra.mxu1 %v6494_v40  ;;  %v6581_v39 = vld [vmem:[%s8572_s3 + $0xe8] sm:$0xff]  }
 0x218   :  { %3969 = vmatprep.subr.bf16.mxu0 %v6499_v41  ;;  %4356 = vmatprep.subr.bf16.mxu1 %v6502_v42  ;;  %v6582_v40 = vld [vmem:[%s8572_s3 + $0x28] sm:$0xff]   ;;  %v6584_v42 = vld [vmem:[%s8572_s3 + $0x70] sm:$0xff]  }
 0x219   :  { %v6583_v41 = vld [vmem:[%s8572_s3 + $0xa8] sm:$0xff]  }
 0x21b   :  { %3970 = vmatpush1.bf16.msra.mxu0 %v6497_v43  ;;  %4357 = vmatpush1.bf16.msra.mxu1 %v6500_v44  ;;  %v6585_v43 = vld [vmem:[%s8572_s3 + $0xf0] sm:$0xff]  }
 0x21c   :  { %3971 = vmatprep.subr.bf16.mxu0 %v6505_v45  ;;  %4358 = vmatprep.subr.bf16.mxu1 %v6508_v46  ;;  %v6586_v44 = vld [vmem:[%s8572_s3 + $0x30] sm:$0xff]   ;;  %v6588_v46 = vld [vmem:[%s8572_s3 + $0x78] sm:$0xff]  }
 0x21d   :  { %v6587_v45 = vld [vmem:[%s8572_s3 + $0xb0] sm:$0xff]  }
 0x21f   :  { %3972 = vmatpush1.bf16.msra.mxu0 %v6503_v47  ;;  %4359 = vmatpush1.bf16.msra.mxu1 %v6506_v48  ;;  %v6589_v47 = vld [vmem:[%s8572_s3 + $0xf8] sm:$0xff]  }
 0x220   :  { %3973 = vmatprep.subr.bf16.mxu0 %v6511_v49  ;;  %4360 = vmatprep.subr.bf16.mxu1 %v6514_v50  ;;  %v6590_v48 = vld [vmem:[%s8572_s3 + $0x38] sm:$0xff]   ;;  %v6600_v50 = vmov 0.0  }
 0x221   :  { %v6591_v49 = vld [vmem:[%s8572_s3 + $0xb8] sm:$0xff]  }
 0x223   :  { %3974 = vmatpush1.bf16.msra.mxu0 %v6509_v51  ;;  %4361 = vmatpush1.bf16.msra.mxu1 %v6512_v52  ;;  %v623_v51 = vlaneseq }
 0x224   :  { %3975 = vmatprep.subr.bf16.mxu0 %v6517_v53  ;;  %4362 = vmatprep.subr.bf16.mxu1 %v6520_v54 }
 0x225   :  { %v624_v52 = vshrl.u32 %v623_v51, 7 }
 0x227   :  { %3976 = vmatpush1.bf16.msra.mxu0 %v6515_v55  ;;  %4363 = vmatpush1.bf16.msra.mxu1 %v6518_v56  ;;  %v625_v53 = vsub.s32 0, %v624_v52  ;;  %v633_v54 = vsub.s32 2, %v624_v52  ;;  %v621_v55 = vld [vmem:[%s8574_s2] sm:$0xf]  ;;  %v629_v56 = vsub.s32 1, %v624_v52 }
 0x228   :  { %3977 = vmatprep.subr.bf16.mxu0 %v6523_v57  ;;  %4364 = vmatprep.subr.bf16.mxu1 %v6526_v58  ;;  %v637_v57 = vsub.s32 3, %v624_v52 }
 0x229   :  { %v626_v58 = vrot.slane %v621_v55, %v625_v53 }
 0x22b   :  { %3978 = vmatpush1.bf16.msra.mxu0 %v6521_v59  ;;  %4365 = vmatpush1.bf16.msra.mxu1 %v6524_v60  ;;  %v634_v59 = vrot.slane %v621_v55, %v633_v54  ;;  %v630_v60 = vrot.slane %v621_v55, %v629_v56 }
 0x22c   :  { %3979 = vmatprep.subr.bf16.mxu0 %v6529_v61  ;;  %4366 = vmatprep.subr.bf16.mxu1 %v6532_v62  ;;  %v638_v61 = vrot.slane %v621_v55, %v637_v57 }
 0x22f   :  { %3980 = vmatpush1.bf16.msra.mxu0 %v6527_v63  ;;  %4367 = vmatpush1.bf16.msra.mxu1 %v6530_v0 }
 0x230   :  { %3981 = vmatprep.subr.bf16.mxu0 %v6535_v1  ;;  %4368 = vmatprep.subr.bf16.mxu1 %v6538_v2 }
 0x233   :  { %3982 = vmatpush1.bf16.msra.mxu0 %v6533_v3  ;;  %4369 = vmatpush1.bf16.msra.mxu1 %v6536_v4 }
 0x234   :  { %3983 = vmatprep.subr.bf16.mxu0 %v6541_v5  ;;  %4370 = vmatprep.subr.bf16.mxu1 %v6544_v6 }
 0x237   :  { %3984 = vmatpush1.bf16.msra.mxu0 %v6539_v7  ;;  %4371 = vmatpush1.bf16.msra.mxu1 %v6542_v8 }
 0x238   :  { %3985 = vmatprep.subr.bf16.mxu0 %v6547_v9  ;;  %4372 = vmatprep.subr.bf16.mxu1 %v6550_v10 }
 0x23b   :  { %3986 = vmatpush1.bf16.msra.mxu0 %v6545_v11  ;;  %4373 = vmatpush1.bf16.msra.mxu1 %v6548_v12 }
 0x23c   :  { %3987 = vmatprep.subr.bf16.mxu0 %v6553_v13  ;;  %4374 = vmatprep.subr.bf16.mxu1 %v6556_v14 }
 0x23f   :  { %3988 = vmatpush1.bf16.msra.mxu0 %v6551_v15  ;;  %4375 = vmatpush1.bf16.msra.mxu1 %v6554_v16 }
 0x240   :  { %5522 = vmatprep.subr.bf16.mxu0 %v6560_v17  ;;  %5544 = vmatprep.subr.bf16.mxu1 %v6561_v18 }
 0x242   :  { %3990 = vmatmul.mubr.bf16.vlgmr.msra.gmra.mrb[0].mxu0 %v6557_v19  ;;  %4377 = vmatmul.mubr.bf16.vlgmr.msra.gmra.mrb[0].mxu1 %v6557_v19 }
 0x243   :  { %5523 = vmatpush3.bf16.msra.mxu0 %v6562_v20  ;;  %5545 = vmatpush3.bf16.msra.mxu1 %v6563_v21 }
 0x244   :  { %5524 = vmatprep.subr.bf16.mxu0 %v6564_v22  ;;  %5546 = vmatprep.subr.bf16.mxu1 %v6565_v23 }
 0x247   :  { %5525 = vmatpush3.bf16.msra.mxu0 %v6566_v24  ;;  %5547 = vmatpush3.bf16.msra.mxu1 %v6567_v25 }
 0x248   :  { %5526 = vmatprep.subr.bf16.mxu0 %v6568_v26  ;;  %5548 = vmatprep.subr.bf16.mxu1 %v6569_v27 }
 0x24b   :  { %5527 = vmatpush3.bf16.msra.mxu0 %v6570_v28  ;;  %5549 = vmatpush3.bf16.msra.mxu1 %v6571_v29 }
 0x24c   :  { %5528 = vmatprep.subr.bf16.mxu0 %v6572_v30  ;;  %5550 = vmatprep.subr.bf16.mxu1 %v6573_v31 }
 0x24f   :  { %5529 = vmatpush3.bf16.msra.mxu0 %v6574_v32  ;;  %5551 = vmatpush3.bf16.msra.mxu1 %v6575_v33 }
 0x250   :  { %5530 = vmatprep.subr.bf16.mxu0 %v6576_v34  ;;  %5552 = vmatprep.subr.bf16.mxu1 %v6577_v35  ;;  %v6592_v34 = vld [vmem:[%s8573_s5] sm:$0xff]   ;;  %v6593_v35 = vld [vmem:[%s8573_s5 + $0x8] sm:$0xff]  }
 0x253   :  { %5531 = vmatpush3.bf16.msra.mxu0 %v6578_v36  ;;  %5553 = vmatpush3.bf16.msra.mxu1 %v6579_v37  ;;  %v6594_v36 = vld [vmem:[%s8573_s5 + $0x10] sm:$0xff]   ;;  %v6595_v37 = vld [vmem:[%s8573_s5 + $0x18] sm:$0xff]  }
 0x254   :  { %5532 = vmatprep.subr.bf16.mxu0 %v6580_v38  ;;  %5554 = vmatprep.subr.bf16.mxu1 %v6581_v39  ;;  %v6596_v38 = vld [vmem:[%s8573_s5 + $0x20] sm:$0xff]   ;;  %v6597_v39 = vld [vmem:[%s8573_s5 + $0x28] sm:$0xff]  }
 0x257   :  { %5533 = vmatpush3.bf16.msra.mxu0 %v6582_v40  ;;  %5555 = vmatpush3.bf16.msra.mxu1 %v6583_v41  ;;  %v6598_v40 = vld [vmem:[%s8573_s5 + $0x30] sm:$0xff]   ;;  %v6599_v41 = vld [vmem:[%s8573_s5 + $0x38] sm:$0xff]  }
 0x258   :  { %5534 = vmatprep.subr.bf16.mxu0 %v6584_v42  ;;  %5556 = vmatprep.subr.bf16.mxu1 %v6585_v43 }
 0x25b   :  { %5535 = vmatpush3.bf16.msra.mxu0 %v6586_v44  ;;  %5557 = vmatpush3.bf16.msra.mxu1 %v6587_v45  ;;  %v5480_v44 = vld [vmem:[%s8575_s4] ss:$0 sm:$0xff] }
 0x25c   :  { %5536 = vmatprep.subr.bf16.mxu0 %v6588_v46  ;;  %5558 = vmatprep.subr.bf16.mxu1 %v6589_v47 }
 0x25f   :  { %5537 = vmatpush3.bf16.msra.mxu0 %v6590_v48  ;;  %5559 = vmatpush3.bf16.msra.mxu1 %v6591_v49 }
 0x260   :  { %5575 = vmatprep.subr.bf16.mxu0 %v6600_v50 }
 0x315   :  { %v3991_v62 = vpop.f32.mrb[0].mxu0  ;;  %v4378_v63 = vpop.f32.mrb[0].mxu1 }
 0x316   :  { %v5595_v0 = vadd.f32 %v3991_v62, %v626_v58  ;;  %v5599_v1 = vadd.f32 %v4378_v63, %v634_v59  ;;  %v3993_v2 = vpop.f32.mrb[1].mxu0  ;;  %v4380_v3 = vpop.f32.mrb[1].mxu1 }
 0x317   :  { %v5596_v4 = vadd.f32 %v3993_v2, %v630_v60  ;;  %v5600_v5 = vadd.f32 %v4380_v3, %v638_v61  ;;  %v3995_v6 = vpop.f32.mrb[2].mxu0  ;;  %v4382_v7 = vpop.f32.mrb[2].mxu1 }
 0x318   :  { %vm4387_vm0 = vcmp.ge.f32.partialorder %v5595_v0, 0.0  ;;  %v4395_v8 = vmul.f32 0.01, %v5595_v0  ;;  %vm4389_vm1 = vcmp.ge.f32.partialorder %v5599_v1, 0.0  ;;  %v4397_v9 = vmul.f32 0.01, %v5599_v1 }
 0x319   :  { %vm4388_vm2 = vcmp.ge.f32.partialorder %v5596_v4, 0.0  ;;  %v4396_v10 = vmul.f32 0.01, %v5596_v4  ;;  %vm4390_vm3 = vcmp.ge.f32.partialorder %v5600_v5, 0.0  ;;  %v4398_v11 = vmul.f32 0.01, %v5600_v5 }
 0x31a   :  { %v5597_v12 = vadd.f32 %v3995_v6, %v626_v58  ;;  %v5601_v13 = vadd.f32 %v4382_v7, %v634_v59  ;;  %v3997_v14 = vpop.f32.mrb[3].mxu0  ;;  %v4384_v15 = vpop.f32.mrb[3].mxu1  ;;  %v4403_v16 = vsel %vm4387_vm0, %v5595_v0, %v4395_v8  ;;  %v4405_v17 = vsel %vm4389_vm1, %v5599_v1, %v4397_v9  ;;  %v5513_v0 = vld [vmem:[%s8576_s6] ss:$0 sm:$0xff] }
 0x31b   :  { %v5598_v18 = vadd.f32 %v3997_v14, %v630_v60  ;;  %v5602_v19 = vadd.f32 %v4384_v15, %v638_v61  ;;  %v4404_v26 = vsel %vm4388_vm2, %v5596_v4, %v4396_v10  ;;  %v4406_v27 = vsel %vm4390_vm3, %v5600_v5, %v4398_v11 }
 0x31c   :  { %vm4391_vm4 = vcmp.ge.f32.partialorder %v5597_v12, 0.0  ;;  %v4399_v20 = vmul.f32 0.01, %v5597_v12  ;;  %vm4393_vm5 = vcmp.ge.f32.partialorder %v5601_v13, 0.0  ;;  %v4401_v21 = vmul.f32 0.01, %v5601_v13 }
 0x31d   :  { %vm4392_vm6 = vcmp.ge.f32.partialorder %v5598_v18, 0.0  ;;  %v4400_v22 = vmul.f32 0.01, %v5598_v18  ;;  %vm4394_vm7 = vcmp.ge.f32.partialorder %v5602_v19, 0.0  ;;  %v4402_v23 = vmul.f32 0.01, %v5602_v19 }
 0x31e   :  { %v4407_v24 = vsel %vm4391_vm4, %v5597_v12, %v4399_v20  ;;  %v4409_v25 = vsel %vm4393_vm5, %v5601_v13, %v4401_v21 }
 0x31f   :  { %v4411_v28 = vpack.c.bf16 %v4407_v24, %v4403_v16  ;;  %v4413_v29 = vpack.c.bf16 %v4409_v25, %v4405_v17  ;;  %v4408_v30 = vsel %vm4392_vm6, %v5598_v18, %v4400_v22  ;;  %v4410_v31 = vsel %vm4394_vm7, %v5602_v19, %v4402_v23 }
 0x320   :  { %v4412_v32 = vpack.c.bf16 %v4408_v30, %v4404_v26  ;;  %v4414_v33 = vpack.c.bf16 %v4410_v31, %v4406_v27 }
 0x322   :  { %4710 = vmatprep.mubr.bf16.mxu0 %v4412_v32  ;;  %4751 = vmatprep.mubr.bf16.mxu1 %v4414_v33 }
 0x323   :  { %4711 = vmatmul.mubr.bf16.vlgmr.msra.gmra.mrb[4].mxu0 %v4411_v28  ;;  %4752 = vmatmul.mubr.bf16.vlgmr.msra.gmra.mrb[4].mxu1 %v4413_v29 }
 0x324   :  { %5576 = vmatpush3.bf16.msra.mxu0 %v6592_v34  ;;  %5591 = vmatprep.mubr.msk.bf16.mxu0 %vm6601_vm8, %v6600_v50 }
 0x325   :  { %5577 = vmatprep.subr.bf16.mxu0 %v6600_v50 }
 0x328   :  { %5578 = vmatpush3.bf16.msra.mxu0 %v6593_v35 }
 0x329   :  { %5579 = vmatprep.subr.bf16.mxu0 %v6600_v50 }
 0x32c   :  { %5580 = vmatpush3.bf16.msra.mxu0 %v6594_v36 }
 0x32d   :  { %5581 = vmatprep.subr.bf16.mxu0 %v6600_v50 }
 0x330   :  { %5582 = vmatpush3.bf16.msra.mxu0 %v6595_v37 }
 0x331   :  { %5583 = vmatprep.subr.bf16.mxu0 %v6600_v50 }
 0x334   :  { %5584 = vmatpush3.bf16.msra.mxu0 %v6596_v38 }
 0x335   :  { %5585 = vmatprep.subr.bf16.mxu0 %v6600_v50 }
 0x338   :  { %5586 = vmatpush3.bf16.msra.mxu0 %v6597_v39 }
 0x339   :  { %5587 = vmatprep.subr.bf16.mxu0 %v6600_v50 }
 0x33c   :  { %5588 = vmatpush3.bf16.msra.mxu0 %v6598_v40 }
 0x33d   :  { %5589 = vmatprep.subr.bf16.mxu0 %v6600_v50 }
 0x340   :  { %5590 = vmatpush3.bf16.msra.mxu0 %v6599_v41 }
 0x3f6   :  { %v5538_v42 = vpop.f32.mrb[4].mxu0  ;;  %v5560_v43 = vpop.f32.mrb[4].mxu1 }
 0x3f7   :  { %v5539_v45 = vpop.f32.mrb[5].mxu0  ;;  %v5561_v46 = vpop.f32.mrb[5].mxu1 }
 0x3f8   :  { %v5540_v47 = vadd.f32 %v5539_v45, %v5538_v42  ;;  %v5562_v48 = vadd.f32 %v5561_v46, %v5560_v43  ;;  %v5541_v49 = vpop.f32.mrb[6].mxu0  ;;  %v5563_v51 = vpop.f32.mrb[6].mxu1 }
 0x3f9   :  { %v5542_v52 = vpop.f32.mrb[7].mxu0  ;;  %v5564_v53 = vpop.f32.mrb[7].mxu1 }
 0x3fa   :  { %v4713_v54 = vadd.f32 %v5540_v47, %v5480_v44  ;;  %v5543_v55 = vadd.f32 %v5542_v52, %v5541_v49  ;;  %v5565_v56 = vadd.f32 %v5564_v53, %v5563_v51 }
 0x3fc   :  { %v4754_v57 = vadd.f32 %v5562_v48, %v4713_v54  ;;  %v4716_v58 = vadd.f32 %v5543_v55, %v5480_v44 }
 0x3fe   :  { %v4762_v50 = vmul.f32 0.01, %v4754_v57  ;;  %v4757_v59 = vadd.f32 %v5565_v56, %v4716_v58  ;;  %vm4760_vm9 = vcmp.ge.f32.partialorder %v4754_v57, 0.0 }
 0x400   :  { %vm4761_vm10 = vcmp.ge.f32.partialorder %v4757_v59, 0.0  ;;  %v4763_v60 = vmul.f32 0.01, %v4757_v59  ;;  %v4764_v61 = vsel %vm4760_vm9, %v4754_v57, %v4762_v50 }
 0x402   :  { %v4765_v62 = vsel %vm4761_vm10, %v4757_v59, %v4763_v60 }
 0x403   :  { %v4766_v63 = vpack.c.bf16 %v4765_v62, %v4764_v61 }
 0x405   :  { %5592 = vmatmul.mubr.bf16.vlgmr.msra.gmra.mrb[8].mxu0 %v4766_v63 }
 0x4d8   :  { %v4872_v1 = vpop.f32.mrb[8].mxu0 }
 0x4d9   :  { %v4873_v2 = vadd.f32 %v5513_v0, %v4872_v1  ;;  %v5593_v3 = vpop.f32.mrb[9].mxu0 }
 0x4da   :  { %v4875_v4 = vpop.f32.mrb[10].mxu0 }
 0x4db   :  { %4880 = vst.msk [vmem:[%s8577_s7] sm:$0xff] %vm4879_vm11, %v4873_v2  ;;  %v4876_v5 = vadd.f32 %v5513_v0, %v4875_v4  ;;  %v5594_v6 = vpop.f32.mrb[11].mxu0 }
 0x4dd   :  { %4881 = vst.msk [vmem:[%s8577_s7 + $0x8] sm:$0xff] %vm4879_vm11, %v4876_v5 }

</bundles_post_ra>
